<compile_context>
chip_gen: v7x
topology: tpu7x:2x2x1
jax: 0.10.0
libtpu: 0.0.40
codegen_flags: <defaults>
</compile_context>

<pallas_src>
import functools

import jax
import jax.numpy as jnp
from jax.experimental import pallas as pl
from jax.experimental.pallas import tpu as pltpu

P = 128  # lane padding for every feature / class dimension

# rows of the packed weight stack
W_EMB, W_G1, W_G2, W_FF, W_FF1, W_FF2 = range(6)
# rows of the packed bias stack (rows 6,7 are zero padding for sublane alignment)
B_EMB, B_G1, B_G2, B_FF, B_FF1, B_FF2 = range(6)


# ----------------------------- Pallas kernel ------------------------------ #
def graph_encoder_kernel(x_ref, adj_ref, srcm_ref, dstm_ref, w_ref, b_ref,
                         out_ref, *, n, hidden):
    f32 = jnp.float32
    tile_rows, lanes = x_ref.shape
    g_per_tile = tile_rows // n

    A = adj_ref[0]            # (T, T) block-diagonal normalized adjacency (this tile)
    x = x_ref[...]            # (T, P) lane-padded node features of the tile's graphs
    bias = b_ref[...]         # (8, P) packed, padded biases

    # self.embedding : Linear(node_features, embedding_dim)
    h = jnp.dot(x, w_ref[W_EMB], preferred_element_type=f32) + bias[B_EMB:B_EMB + 1, :]

    # GNN1 = GCNConv:  A_hat @ (h W1) + b1, ReLU; dropout -> identity (inference)
    h = jnp.dot(A, jnp.dot(h, w_ref[W_G1], preferred_element_type=f32),
                preferred_element_type=f32) + bias[B_G1:B_G1 + 1, :]
    h = jnp.maximum(h, 0.0)

    # GNN2 = GCNConv
    h2 = jnp.dot(A, jnp.dot(h, w_ref[W_G2], preferred_element_type=f32),
                 preferred_element_type=f32) + bias[B_G2:B_G2 + 1, :]

    # Per-graph src/dst gather + broadcast, entirely in vregs (VPU + XLU):
    # one-hot column mask keeps only the selected row of each graph, the
    # per-graph sublane reduce extracts it, and the sublane broadcast copies it
    # to all n rows of that graph.  No VMEM scratch, no tiny MXU pushes.
    def gather_broadcast(mask_col):                          # mask_col: (T, 1)
        sel = h2 * mask_col                                   # (T, P)
        rows = jnp.sum(sel.reshape(g_per_tile, n, lanes), axis=1, keepdims=True)
        return jnp.broadcast_to(rows, (g_per_tile, n, lanes)).reshape(tile_rows, lanes)

    src_b = gather_broadcast(srcm_ref[0])
    dst_b = gather_broadcast(dstm_ref[0])

    # In-lane concat([h2, src, dst]): h2 lives in lanes [0,H); rotate src by H and
    # dst by 2H so the fused FFConn weight contracts all three in ONE matmul.
    # (W_FFB is packed at both row bands [H,2H) and [3H,4H), so the result does
    # not depend on the rotate-direction convention of pltpu.roll.)
    z_in = (h2
            + pltpu.roll(src_b, shift=hidden, axis=1)
            + pltpu.roll(dst_b, shift=2 * hidden, axis=1))

    # FFConn (+ folded eval-mode BatchNorm3) + ReLU  -- single fused matmul
    z = jnp.maximum(
        jnp.dot(z_in, w_ref[W_FF], preferred_element_type=f32) + bias[B_FF:B_FF + 1, :],
        0.0)

    # FFConn1 + dropout + ReLU
    # TODO(synk): second F.dropout(x) defaults to training=True in the original
    # code; treated as inference identity here.
    z = jnp.maximum(
        jnp.dot(z, w_ref[W_FF1], preferred_element_type=f32) + bias[B_FF1:B_FF1 + 1, :],
        0.0)

    # FFConn2 (padded class lanes carry a -1e9 bias -> vanish in softmax)
    logits = jnp.dot(z, w_ref[W_FF2], preferred_element_type=f32) + bias[B_FF2:B_FF2 + 1, :]

    # log_softmax over classes (lane-dense padded output; sliced in wrapper)
    m = jnp.max(logits, axis=1, keepdims=True)
    s = logits - m
    out_ref[...] = s - jnp.log(jnp.sum(jnp.exp(s), axis=1, keepdims=True))


# ------------------------------ wrapper ------------------------------------ #
@functools.partial(jax.jit, static_argnames=("n_per_graph", "graphs_per_tile",
                                             "hidden", "num_classes"))
def graph_encoder_forward(x_pad, adj_bd, src_mask, dst_mask, W, B, *,
                          n_per_graph, graphs_per_tile, hidden, num_classes):
    N, lanes = x_pad.shape
    tile_rows = graphs_per_tile * n_per_graph   # 128-row super-tile
    num_tiles = N // tile_rows
    assert num_tiles * tile_rows == N

    kernel = functools.partial(graph_encoder_kernel, n=n_per_graph, hidden=hidden)

    out_padded = pl.pallas_call(
        kernel,
        out_shape=jax.ShapeDtypeStruct((N, lanes), jnp.float32),
        grid_spec=pltpu.PrefetchScalarGridSpec(
            num_scalar_prefetch=0,
            grid=(num_tiles,),
            in_specs=[
                pl.BlockSpec((tile_rows, lanes), lambda t: (t, 0)),          # node feats
                pl.BlockSpec((1, tile_rows, tile_rows), lambda t: (t, 0, 0)),  # block-diag A
                pl.BlockSpec((1, tile_rows, 1), lambda t: (t, 0, 0)),        # src one-hot
                pl.BlockSpec((1, tile_rows, 1), lambda t: (t, 0, 0)),        # dst one-hot
                pl.BlockSpec(W.shape, lambda t: (0, 0, 0)),                  # packed weights
                pl.BlockSpec(B.shape, lambda t: (0, 0)),                     # packed biases
            ],
            out_specs=pl.BlockSpec((tile_rows, lanes), lambda t: (t, 0)),
        ),
        compiler_params=pltpu.CompilerParams(
            dimension_semantics=("parallel",),   # super-tiles are independent
        ),
    )(x_pad, adj_bd, src_mask, dst_mask, W, B)
    return out_padded[:, :num_classes]


# --------------------------- parameter packing ----------------------------- #
def init_params(key, node_features, embedding_dim, hidden, num_classes):
    ks = jax.random.split(key, 10)

    def lin(k, fan_in, fan_out):
        bound = 1.0 / jnp.sqrt(fan_in)
        kw, kb = jax.random.split(k)
        w = jax.random.uniform(kw, (fan_in, fan_out), jnp.float32, -bound, bound)
        b = jax.random.uniform(kb, (fan_out,), jnp.float32, -bound, bound)
        return w, b

    w_emb, b_emb = lin(ks[0], node_features, embedding_dim)
    w_g1, b_g1 = lin(ks[1], embedding_dim, hidden)
    w_g2, b_g2 = lin(ks[2], hidden, hidden)
    w_ff, b_ff = lin(ks[3], 3 * hidden, hidden)
    bn_g = 1.0 + 0.1 * jax.random.normal(ks[4], (hidden,), jnp.float32)
    bn_b = 0.1 * jax.random.normal(ks[5], (hidden,), jnp.float32)
    bn_m = 0.1 * jax.random.normal(ks[6], (hidden,), jnp.float32)
    bn_v = jax.random.uniform(ks[7], (hidden,), jnp.float32, 0.5, 1.5)
    w_ff1, b_ff1 = lin(ks[8], hidden, hidden)
    w_ff2, b_ff2 = lin(ks[9], hidden, num_classes)
    return (w_emb, b_emb, w_g1, b_g1, w_g2, b_g2, w_ff, b_ff,
            bn_g, bn_b, bn_m, bn_v, w_ff1, b_ff1, w_ff2, b_ff2)


def pack_params(params, hidden):
    """BN-fold + lane-pad + stack into one weight slab and one bias slab."""
    (w_emb, b_emb, w_g1, b_g1, w_g2, b_g2, w_ff, b_ff,
     bn_g, bn_b, bn_m, bn_v, w_ff1, b_ff1, w_ff2, b_ff2) = params
    H = hidden
    assert 4 * H == P, "fused in-lane FFConn concat assumes hidden == 128 // 4"

    # Fold eval-mode BatchNorm3 into the FFConn weights and bias.
    scale = bn_g * jax.lax.rsqrt(bn_v + 1e-5)
    w_ffa = w_ff[:H] * scale
    w_ffb = w_ff[H:2 * H] * scale
    w_ffc = w_ff[2 * H:] * scale
    b_ff_f = b_ff * scale + bn_b - bn_m * scale

    def padw(w):
        return jnp.zeros((P, P), jnp.float32).at[:w.shape[0], :w.shape[1]].set(w)

    def padb(b, fill=0.0):
        return jnp.full((P,), fill, jnp.float32).at[:b.shape[0]].set(b)

    # Fused FFConn weight: cat([h2, src, dst]) sits in lane bands [0,H)/[H,2H)/[2H,3H).
    # W_FFB is duplicated into rows [3H,4H) so the kernel result is invariant to the
    # rotate-direction convention of pltpu.roll (the unused band always sees zeros).
    w_ff_fused = (jnp.zeros((P, P), jnp.float32)
                  .at[0:H, :H].set(w_ffa)
                  .at[H:2 * H, :H].set(w_ffb)
                  .at[2 * H:3 * H, :H].set(w_ffc)
                  .at[3 * H:4 * H, :H].set(w_ffb))

    W = jnp.stack([padw(w_emb), padw(w_g1), padw(w_g2),
                   w_ff_fused, padw(w_ff1), padw(w_ff2)])
    zeros = jnp.zeros((P,), jnp.float32)
    B = jnp.stack([padb(b_emb), padb(b_g1), padb(b_g2),
                   padb(b_ff_f), padb(b_ff1),
                   padb(b_ff2, fill=-1e9),          # padded classes -> -inf-ish
                   zeros, zeros])
    return W, B


# ------------------------- inputs & pure-JAX reference --------------------- #
def build_ring_adj_block(n):
    """GCN-normalized D^-1/2 (A + I) D^-1/2 for one ring graph of n nodes."""
    rows = []
    for k in range(n):
        row = [0.0] * n
        row[k] = 1.0
        row[(k + 1) % n] = 1.0
        row[(k - 1) % n] = 1.0
        rows.append(row)
    A = jnp.asarray(rows, jnp.float32)
    deg = jnp.sum(A, axis=1)
    dinv = jax.lax.rsqrt(deg)
    return A * dinv[:, None] * dinv[None, :]


def blockdiag_supertiles(adj_blocks, graphs_per_tile):
    """Pack per-graph (n,n) blocks into per-super-tile block-diagonal matrices."""
    batch, n, _ = adj_blocks.shape
    num_tiles = batch // graphs_per_tile
    T = graphs_per_tile * n
    A = jnp.zeros((num_tiles, T, T), jnp.float32)
    for t in range(num_tiles):
        for g in range(graphs_per_tile):
            A = A.at[t, g * n:(g + 1) * n, g * n:(g + 1) * n].set(
                adj_blocks[t * graphs_per_tile + g])
    return A


def make_select_masks(idx, n, graphs_per_tile):
    """One-hot column mask (num_tiles, tile_rows, 1) selecting row idx[g] of each graph."""
    batch = idx.shape[0]
    num_tiles = batch // graphs_per_tile
    T = graphs_per_tile * n
    local = jnp.arange(T, dtype=jnp.int32) % n                         # (T,)
    wanted = jnp.repeat(idx.reshape(num_tiles, graphs_per_tile), n, axis=1)  # (nt, T)
    mask = (local[None, :] == wanted).astype(jnp.float32)
    return mask[:, :, None]                                            # (nt, T, 1)


def dense_block_diag(blocks):
    batch, n, _ = blocks.shape
    N = batch * n
    A = jnp.zeros((N, N), jnp.float32)
    for g in range(batch):
        A = A.at[g * n:(g + 1) * n, g * n:(g + 1) * n].set(blocks[g])
    return A


def reference_forward(x, adj_blocks, src_idx, dst_idx, params, n):
    (w_emb, b_emb, w_g1, b_g1, w_g2, b_g2, w_ff, b_ff,
     bn_g, bn_b, bn_m, bn_v, w_ff1, b_ff1, w_ff2, b_ff2) = params
    batch = adj_blocks.shape[0]
    A = dense_block_diag(adj_blocks)
    h = x @ w_emb + b_emb
    h = jax.nn.relu(A @ (h @ w_g1) + b_g1)
    h2 = A @ (h @ w_g2) + b_g2
    gsrc = src_idx + jnp.arange(batch) * n
    gdst = dst_idx + jnp.arange(batch) * n
    src = jnp.repeat(h2[gsrc], n, axis=0)
    dst = jnp.repeat(h2[gdst], n, axis=0)
    z = jnp.concatenate([h2, src, dst], axis=1) @ w_ff + b_ff
    z = jax.nn.relu((z - bn_m) * jax.lax.rsqrt(bn_v + 1e-5) * bn_g + bn_b)
    z = jax.nn.relu(z @ w_ff1 + b_ff1)
    logits = z @ w_ff2 + b_ff2
    return jax.nn.log_softmax(logits, axis=1)


if __name__ == "__main__":
    jax.config.update("jax_default_matmul_precision", "highest")

    # Small shapes consistent with the module (batch=32 graphs is the module default).
    batch = 32            # graphs per batch (self.batchsize)
    n_per_graph = 8       # nodes per graph  (n = x.shape[0] / batchsize)
    graphs_per_tile = 16  # 16 graphs * 8 nodes = 128-row super-tile -> grid=(2,)
    N = batch * n_per_graph
    node_features = 8
    embedding_dim = 16
    hidden_features = 32
    num_classes = 4

    key = jax.random.PRNGKey(0)
    k_x, k_src, k_dst, k_p = jax.random.split(key, 4)

    x = jax.random.normal(k_x, (N, node_features), jnp.float32)
    x_pad = jnp.zeros((N, P), jnp.float32).at[:, :node_features].set(x)

    adj_block = build_ring_adj_block(n_per_graph)
    adj_blocks = jnp.tile(adj_block[None], (batch, 1, 1))
    adj_bd = blockdiag_supertiles(adj_blocks, graphs_per_tile)   # (2, 128, 128)

    src_idx = jax.random.randint(k_src, (batch,), 0, n_per_graph).astype(jnp.int32)
    dst_idx = jax.random.randint(k_dst, (batch,), 0, n_per_graph).astype(jnp.int32)
    src_mask = make_select_masks(src_idx, n_per_graph, graphs_per_tile)
    dst_mask = make_select_masks(dst_idx, n_per_graph, graphs_per_tile)

    params = init_params(k_p, node_features, embedding_dim,
                         hidden_features, num_classes)
    W, B = pack_params(params, hidden_features)

    out = graph_encoder_forward(x_pad, adj_bd, src_mask, dst_mask, W, B,
                                n_per_graph=n_per_graph,
                                graphs_per_tile=graphs_per_tile,
                                hidden=hidden_features,
                                num_classes=num_classes)
    out = jax.block_until_ready(out)

    ref = reference_forward(x, adj_blocks, src_idx, dst_idx, params, n_per_graph)
    assert out.shape == (N, num_classes)
    assert jnp.allclose(out, ref, atol=1e-4, rtol=1e-4), "mismatch vs reference"
    print("KERNEL_OK")
</pallas_src>

<mosaic_0001>
module attributes {stable_mosaic.version = 11 : i64} {
  func.func @graph_encoder_kernel(%arg0: i32, %arg1: memref<128x128xf32, #tpu.memory_space<vmem>>, %arg2: memref<1x128x128xf32, #tpu.memory_space<vmem>>, %arg3: memref<1x128x1xf32, #tpu.memory_space<vmem>>, %arg4: memref<1x128x1xf32, #tpu.memory_space<vmem>>, %arg5: memref<6x128x128xf32, #tpu.memory_space<vmem>>, %arg6: memref<8x128xf32, #tpu.memory_space<vmem>>, %arg7: memref<128x128xf32, #tpu.memory_space<vmem>>) attributes {dimension_semantics = [#tpu.dimension_semantics<parallel>], iteration_bounds = array<i64: 2>, scalar_prefetch = 0 : i64, scratch_operands = 0 : i64, tpu.core_type = #tpu.core_type<tc>, window_params = [{transform_indices = @transform_0, window_bounds = array<i64: 128, 128>}, {transform_indices = @transform_1, window_bounds = array<i64: 1, 128, 128>}, {transform_indices = @transform_2, window_bounds = array<i64: 1, 128, 1>}, {transform_indices = @transform_3, window_bounds = array<i64: 1, 128, 1>}, {pipeline_mode = #tpu.pipeline_mode<synchronous>, transform_indices = @transform_4, window_bounds = array<i64: 6, 128, 128>}, {pipeline_mode = #tpu.pipeline_mode<synchronous>, transform_indices = @transform_5, window_bounds = array<i64: 8, 128>}, {transform_indices = @transform_6, window_bounds = array<i64: 128, 128>}]} {
    %c0 = arith.constant 0 : index
    %c0_0 = arith.constant 0 : index
    %c0_1 = arith.constant 0 : index
    %0 = vector.load %arg2[%c0, %c0_0, %c0_1] : memref<1x128x128xf32, #tpu.memory_space<vmem>>, vector<1x128x128xf32>
    %1 = vector.shape_cast %0 : vector<1x128x128xf32> to vector<128x128xf32>
    %c0_2 = arith.constant 0 : index
    %c0_3 = arith.constant 0 : index
    %2 = vector.load %arg1[%c0_2, %c0_3] : memref<128x128xf32, #tpu.memory_space<vmem>>, vector<128x128xf32>
    %c0_4 = arith.constant 0 : index
    %c0_5 = arith.constant 0 : index
    %3 = vector.load %arg6[%c0_4, %c0_5] : memref<8x128xf32, #tpu.memory_space<vmem>>, vector<8x128xf32>
    %c0_6 = arith.constant 0 : index
    %c0_7 = arith.constant 0 : index
    %c0_8 = arith.constant 0 : index
    %4 = vector.load %arg5[%c0_6, %c0_7, %c0_8] : memref<6x128x128xf32, #tpu.memory_space<vmem>>, vector<1x128x128xf32>
    %5 = vector.shape_cast %4 : vector<1x128x128xf32> to vector<128x128xf32>
    %cst = arith.constant dense<0.000000e+00> : vector<128x128xf32>
    %6 = tpu.matmul %2, %5, %cst {dimension_numbers = #tpu.dot_dimension_numbers<[1], [0], [0], [1], [0, 0, 1, 1], [], []>, precision = #tpu.contract_precision<fp32>} : vector<128x128xf32>, vector<128x128xf32>, vector<128x128xf32> -> vector<128x128xf32>
    %7 = vector.extract_strided_slice %3 {offsets = [0, 0], sizes = [1, 128], strides = [1, 1]} : vector<8x128xf32> to vector<1x128xf32>
    %8 = vector.broadcast %7 : vector<1x128xf32> to vector<128x128xf32>
    %9 = arith.addf %6, %8 : vector<128x128xf32>
    %c1 = arith.constant 1 : index
    %c0_9 = arith.constant 0 : index
    %c0_10 = arith.constant 0 : index
    %10 = vector.load %arg5[%c1, %c0_9, %c0_10] : memref<6x128x128xf32, #tpu.memory_space<vmem>>, vector<1x128x128xf32>
    %11 = vector.shape_cast %10 : vector<1x128x128xf32> to vector<128x128xf32>
    %cst_11 = arith.constant dense<0.000000e+00> : vector<128x128xf32>
    %12 = tpu.matmul %9, %11, %cst_11 {dimension_numbers = #tpu.dot_dimension_numbers<[1], [0], [0], [1], [0, 0, 1, 1], [], []>, precision = #tpu.contract_precision<fp32>} : vector<128x128xf32>, vector<128x128xf32>, vector<128x128xf32> -> vector<128x128xf32>
    %cst_12 = arith.constant dense<0.000000e+00> : vector<128x128xf32>
    %13 = tpu.matmul %1, %12, %cst_12 {dimension_numbers = #tpu.dot_dimension_numbers<[1], [0], [0], [1], [0, 0, 1, 1], [], []>, precision = #tpu.contract_precision<fp32>} : vector<128x128xf32>, vector<128x128xf32>, vector<128x128xf32> -> vector<128x128xf32>
    %14 = vector.extract_strided_slice %3 {offsets = [1, 0], sizes = [1, 128], strides = [1, 1]} : vector<8x128xf32> to vector<1x128xf32>
    %15 = vector.broadcast %14 : vector<1x128xf32> to vector<128x128xf32>
    %16 = arith.addf %13, %15 : vector<128x128xf32>
    %cst_13 = arith.constant 0.000000e+00 : f32
    %17 = vector.broadcast %cst_13 : f32 to vector<128x128xf32>
    %18 = arith.maximumf %16, %17 : vector<128x128xf32>
    %c2 = arith.constant 2 : index
    %c0_14 = arith.constant 0 : index
    %c0_15 = arith.constant 0 : index
    %19 = vector.load %arg5[%c2, %c0_14, %c0_15] : memref<6x128x128xf32, #tpu.memory_space<vmem>>, vector<1x128x128xf32>
    %20 = vector.shape_cast %19 : vector<1x128x128xf32> to vector<128x128xf32>
    %cst_16 = arith.constant dense<0.000000e+00> : vector<128x128xf32>
    %21 = tpu.matmul %18, %20, %cst_16 {dimension_numbers = #tpu.dot_dimension_numbers<[1], [0], [0], [1], [0, 0, 1, 1], [], []>, precision = #tpu.contract_precision<fp32>} : vector<128x128xf32>, vector<128x128xf32>, vector<128x128xf32> -> vector<128x128xf32>
    %cst_17 = arith.constant dense<0.000000e+00> : vector<128x128xf32>
    %22 = tpu.matmul %1, %21, %cst_17 {dimension_numbers = #tpu.dot_dimension_numbers<[1], [0], [0], [1], [0, 0, 1, 1], [], []>, precision = #tpu.contract_precision<fp32>} : vector<128x128xf32>, vector<128x128xf32>, vector<128x128xf32> -> vector<128x128xf32>
    %23 = vector.extract_strided_slice %3 {offsets = [2, 0], sizes = [1, 128], strides = [1, 1]} : vector<8x128xf32> to vector<1x128xf32>
    %24 = vector.broadcast %23 : vector<1x128xf32> to vector<128x128xf32>
    %25 = arith.addf %22, %24 : vector<128x128xf32>
    %c0_18 = arith.constant 0 : index
    %c0_19 = arith.constant 0 : index
    %c0_20 = arith.constant 0 : index
    %26 = vector.load %arg3[%c0_18, %c0_19, %c0_20] : memref<1x128x1xf32, #tpu.memory_space<vmem>>, vector<1x128x1xf32>
    %27 = vector.shape_cast %26 : vector<1x128x1xf32> to vector<128x1xf32>
    %28 = vector.broadcast %27 : vector<128x1xf32> to vector<128x128xf32>
    %29 = arith.mulf %25, %28 : vector<128x128xf32>
    %30 = vector.shape_cast %29 : vector<128x128xf32> to vector<16x8x128xf32>
    %cst_21 = arith.constant dense<0.000000e+00> : vector<16x128xf32>
    %31 = vector.multi_reduction <add>, %30, %cst_21 [1] : vector<16x8x128xf32> to vector<16x128xf32>
    %32 = vector.shape_cast %31 : vector<16x128xf32> to vector<16x1x128xf32>
    %33 = vector.shape_cast %32 : vector<16x1x128xf32> to vector<16x1x128xf32>
    %34 = vector.broadcast %33 : vector<16x1x128xf32> to vector<16x8x128xf32>
    %35 = vector.shape_cast %34 : vector<16x8x128xf32> to vector<128x128xf32>
    %c0_22 = arith.constant 0 : index
    %c0_23 = arith.constant 0 : index
    %c0_24 = arith.constant 0 : index
    %36 = vector.load %arg4[%c0_22, %c0_23, %c0_24] : memref<1x128x1xf32, #tpu.memory_space<vmem>>, vector<1x128x1xf32>
    %37 = vector.shape_cast %36 : vector<1x128x1xf32> to vector<128x1xf32>
    %38 = vector.broadcast %37 : vector<128x1xf32> to vector<128x128xf32>
    %39 = arith.mulf %25, %38 : vector<128x128xf32>
    %40 = vector.shape_cast %39 : vector<128x128xf32> to vector<16x8x128xf32>
    %cst_25 = arith.constant dense<0.000000e+00> : vector<16x128xf32>
    %41 = vector.multi_reduction <add>, %40, %cst_25 [1] : vector<16x8x128xf32> to vector<16x128xf32>
    %42 = vector.shape_cast %41 : vector<16x128xf32> to vector<16x1x128xf32>
    %43 = vector.shape_cast %42 : vector<16x1x128xf32> to vector<16x1x128xf32>
    %44 = vector.broadcast %43 : vector<16x1x128xf32> to vector<16x8x128xf32>
    %45 = vector.shape_cast %44 : vector<16x8x128xf32> to vector<128x128xf32>
    %c32_i32 = arith.constant 32 : i32
    %46 = tpu.dynamic_rotate %35 by %c32_i32 dim 1 : vector<128x128xf32>, i32 -> vector<128x128xf32>
    %47 = arith.addf %25, %46 : vector<128x128xf32>
    %c64_i32 = arith.constant 64 : i32
    %48 = tpu.dynamic_rotate %45 by %c64_i32 dim 1 : vector<128x128xf32>, i32 -> vector<128x128xf32>
    %49 = arith.addf %47, %48 : vector<128x128xf32>
    %c3 = arith.constant 3 : index
    %c0_26 = arith.constant 0 : index
    %c0_27 = arith.constant 0 : index
    %50 = vector.load %arg5[%c3, %c0_26, %c0_27] : memref<6x128x128xf32, #tpu.memory_space<vmem>>, vector<1x128x128xf32>
    %51 = vector.shape_cast %50 : vector<1x128x128xf32> to vector<128x128xf32>
    %cst_28 = arith.constant dense<0.000000e+00> : vector<128x128xf32>
    %52 = tpu.matmul %49, %51, %cst_28 {dimension_numbers = #tpu.dot_dimension_numbers<[1], [0], [0], [1], [0, 0, 1, 1], [], []>, precision = #tpu.contract_precision<fp32>} : vector<128x128xf32>, vector<128x128xf32>, vector<128x128xf32> -> vector<128x128xf32>
    %53 = vector.extract_strided_slice %3 {offsets = [3, 0], sizes = [1, 128], strides = [1, 1]} : vector<8x128xf32> to vector<1x128xf32>
    %54 = vector.broadcast %53 : vector<1x128xf32> to vector<128x128xf32>
    %55 = arith.addf %52, %54 : vector<128x128xf32>
    %cst_29 = arith.constant 0.000000e+00 : f32
    %56 = vector.broadcast %cst_29 : f32 to vector<128x128xf32>
    %57 = arith.maximumf %55, %56 : vector<128x128xf32>
    %c4 = arith.constant 4 : index
    %c0_30 = arith.constant 0 : index
    %c0_31 = arith.constant 0 : index
    %58 = vector.load %arg5[%c4, %c0_30, %c0_31] : memref<6x128x128xf32, #tpu.memory_space<vmem>>, vector<1x128x128xf32>
    %59 = vector.shape_cast %58 : vector<1x128x128xf32> to vector<128x128xf32>
    %cst_32 = arith.constant dense<0.000000e+00> : vector<128x128xf32>
    %60 = tpu.matmul %57, %59, %cst_32 {dimension_numbers = #tpu.dot_dimension_numbers<[1], [0], [0], [1], [0, 0, 1, 1], [], []>, precision = #tpu.contract_precision<fp32>} : vector<128x128xf32>, vector<128x128xf32>, vector<128x128xf32> -> vector<128x128xf32>
    %61 = vector.extract_strided_slice %3 {offsets = [4, 0], sizes = [1, 128], strides = [1, 1]} : vector<8x128xf32> to vector<1x128xf32>
    %62 = vector.broadcast %61 : vector<1x128xf32> to vector<128x128xf32>
    %63 = arith.addf %60, %62 : vector<128x128xf32>
    %cst_33 = arith.constant 0.000000e+00 : f32
    %64 = vector.broadcast %cst_33 : f32 to vector<128x128xf32>
    %65 = arith.maximumf %63, %64 : vector<128x128xf32>
    %c5 = arith.constant 5 : index
    %c0_34 = arith.constant 0 : index
    %c0_35 = arith.constant 0 : index
    %66 = vector.load %arg5[%c5, %c0_34, %c0_35] : memref<6x128x128xf32, #tpu.memory_space<vmem>>, vector<1x128x128xf32>
    %67 = vector.shape_cast %66 : vector<1x128x128xf32> to vector<128x128xf32>
    %cst_36 = arith.constant dense<0.000000e+00> : vector<128x128xf32>
    %68 = tpu.matmul %65, %67, %cst_36 {dimension_numbers = #tpu.dot_dimension_numbers<[1], [0], [0], [1], [0, 0, 1, 1], [], []>, precision = #tpu.contract_precision<fp32>} : vector<128x128xf32>, vector<128x128xf32>, vector<128x128xf32> -> vector<128x128xf32>
    %69 = vector.extract_strided_slice %3 {offsets = [5, 0], sizes = [1, 128], strides = [1, 1]} : vector<8x128xf32> to vector<1x128xf32>
    %70 = vector.broadcast %69 : vector<1x128xf32> to vector<128x128xf32>
    %71 = arith.addf %68, %70 : vector<128x128xf32>
    %cst_37 = arith.constant dense<0xFF800000> : vector<128xf32>
    %72 = vector.multi_reduction <maximumf>, %71, %cst_37 [1] : vector<128x128xf32> to vector<128xf32>
    %73 = vector.shape_cast %72 : vector<128xf32> to vector<128x1xf32>
    %74 = vector.broadcast %73 : vector<128x1xf32> to vector<128x128xf32>
    %75 = arith.subf %71, %74 : vector<128x128xf32>
    %76 = math.exp %75 : vector<128x128xf32>
    %cst_38 = arith.constant dense<0.000000e+00> : vector<128xf32>
    %77 = vector.multi_reduction <add>, %76, %cst_38 [1] : vector<128x128xf32> to vector<128xf32>
    %78 = vector.shape_cast %77 : vector<128xf32> to vector<128x1xf32>
    %79 = math.log %78 : vector<128x1xf32>
    %80 = vector.broadcast %79 : vector<128x1xf32> to vector<128x128xf32>
    %81 = arith.subf %75, %80 : vector<128x128xf32>
    %c0_39 = arith.constant 0 : index
    %c0_40 = arith.constant 0 : index
    %82 = vector.load %arg7[%c0_39, %c0_40] : memref<128x128xf32, #tpu.memory_space<vmem>>, vector<128x128xf32>
    tpu.vector_store %arg7[%c0_39, %c0_40], %81 {strides = array<i32>} : memref<128x128xf32, #tpu.memory_space<vmem>>, vector<128x128xf32>,
    return
  }
  func.func @transform_0(%arg0: i32) -> (i32, i32) {
    %c0_i32 = arith.constant 0 : i32
    %c0_i32_0 = arith.constant 0 : i32
    return %arg0, %c0_i32 : i32, i32
  }
  func.func @transform_1(%arg0: i32) -> (i32, i32, i32) {
    %c0_i32 = arith.constant 0 : i32
    %c0_i32_0 = arith.constant 0 : i32
    %c0_i32_1 = arith.constant 0 : i32
    return %arg0, %c0_i32, %c0_i32_0 : i32, i32, i32
  }
  func.func @transform_2(%arg0: i32) -> (i32, i32, i32) {
    %c0_i32 = arith.constant 0 : i32
    %c0_i32_0 = arith.constant 0 : i32
    %c0_i32_1 = arith.constant 0 : i32
    return %arg0, %c0_i32, %c0_i32_0 : i32, i32, i32
  }
  func.func @transform_3(%arg0: i32) -> (i32, i32, i32) {
    %c0_i32 = arith.constant 0 : i32
    %c0_i32_0 = arith.constant 0 : i32
    %c0_i32_1 = arith.constant 0 : i32
    return %arg0, %c0_i32, %c0_i32_0 : i32, i32, i32
  }
  func.func @transform_4(%arg0: i32) -> (i32, i32, i32) {
    %c0_i32 = arith.constant 0 : i32
    %c0_i32_0 = arith.constant 0 : i32
    %c0_i32_1 = arith.constant 0 : i32
    %c0_i32_2 = arith.constant 0 : i32
    return %c0_i32, %c0_i32_0, %c0_i32_1 : i32, i32, i32
  }
  func.func @transform_5(%arg0: i32) -> (i32, i32) {
    %c0_i32 = arith.constant 0 : i32
    %c0_i32_0 = arith.constant 0 : i32
    %c0_i32_1 = arith.constant 0 : i32
    return %c0_i32, %c0_i32_0 : i32, i32
  }
  func.func @transform_6(%arg0: i32) -> (i32, i32) {
    %c0_i32 = arith.constant 0 : i32
    %c0_i32_0 = arith.constant 0 : i32
    return %arg0, %c0_i32 : i32, i32
  }
}

</mosaic_0001>

<bundles_post_ra>
// kernel: graph_encoder_forward.1
= control target key start
LH: loop header
LB: loop body
LE: loop exit
PB: predicated region body
PF: predicated region fallthrough
CT: control target
= control target key end

     0   :  { %11 = vsyncpa [#allocation3], 0  ;;  %s18309_s21 = smov 0   ;;  %s23004_s0 = inlined_call_operand.vmem [shape: f32[256,128], index: 0, kind: input, shape index: {}]   ;;  %s23005_s1 = inlined_call_operand.vmem [shape: f32[2,128,128], index: 1, kind: input, shape index: {}]   ;;  %s23006_s2 = inlined_call_operand.vmem [shape: f32[2,128,1], index: 2, kind: input, shape index: {}]   ;;  %s23007_s3 = inlined_call_operand.vmem [shape: f32[2,128,1], index: 3, kind: input, shape index: {}]   ;;  %s23008_s4 = inlined_call_operand.hbm [shape: f32[6,128,128], index: 4, kind: input, shape index: {}]   ;;  %s23009_s5 = inlined_call_operand.vmem [shape: f32[8,128], index: 5, kind: input, shape index: {}]   ;;  %s23010_s6 = inlined_call_operand.vmem [shape: f32[256,128], index: 6, kind: output, shape index: {}]  }
   0x1 LB: > { %s18315_s22 = sadd.s32 4294967295, %s18266_s21   ;;  %p11618_p0 = scmp.ge.s32.totalorder %s18266_s21, 1  ;;  %s18266_s21 = sphi %s18309_s21, %s17_s21  }
   0x2   : > { %p194_p1 = scmp.lt.s32.totalorder %s18266_s21, 3  ;;  %s18268_s23 = smov [#allocation2]  }
   0x3   : > { %s206_s24 = sshll.u32 %s18268_s23, 4  ;;  %p23011_p3 = scmp.eq.s32.totalorder %s18315_s22, 0  ;;  %s207_s24 = int_to_ptr.vmem [resolvable:$true] %s206_s24 }
   0x4   : > { %p18319_p2 = pnand %p11618_p0, %p194_p1  ;;  %s18228_s29 = scalar_lea.hbm %s23008_s4, 12288 }
   0x5   : > { %p18229_p6 = scmp.ne.s32.totalorder %s23008_s4, %s18228_s29  ;;  %p18235_p10 = scmp.lt.u32.totalorder %s18228_s29, %s23008_s4 }
   0x6   : > { %s23451_s25 = scalar_select %p18319_p2, 1, 0 }
   0x7   : > { %p18138_p4 = pneg %p18319_p2 }
   0x9   : > { %p18328_p5 = pnand %p23011_p3, %p18138_p4 }
   0xb   : > { %p18230_p7 = pneg %p18328_p5 }
   0xd   : > { %p18231_p8 = pnand %p18230_p7, %p18229_p6 }
   0xf   : > { %p18232_p9 = pneg %p18231_p8 }
  0x11   : > { %p18237_p11 = pnand %p18235_p10, %p18232_p9 }
  0x13   : > { %18240 = shalt.err (!%p18237_p11)
}
  0x14   : > { %s18241_s10 = scalar_lea.vmem %s207_s24, 12288  ;;  %p18249_p1 = scmp.lt.s32.totalorder %s207_s24, %s207_s24 }
  0x15   : > { %p18242_p12 = scmp.ne.s32.totalorder %s207_s24, %s18241_s10  ;;  %p18250_p4 = scmp.lt.s32.totalorder %s18241_s10, %s18241_s10 }
  0x17   : > { %p18244_p13 = pnand %p18242_p12, %p18230_p7  ;;  %p18251_p3 = por %p18250_p4, %p18249_p1 }
  0x19   : > { %p18245_p0 = pneg %p18244_p13 }
  0x1b   : > { %p18252_p2 = pnand %p18251_p3, %p18245_p0 }
  0x1d   : > { %18255 = shalt.err (!%p18252_p2)
}
  0x1e   : > { %s18269_s11 = smov 128   ;;  %s18270_s12 = smov 8  }
  0x1f   : > { %18141 = dma.hbm_to_vmem [thread:$0]  (!%p18328_p5), %s23008_s4, 12288, %s207_s24, [#allocation3], %s18269_s11, %s18269_s11, %s18270_s12  }
  0x20   : > { %p23453_p6 = scmp.ne.s32.totalorder %s23451_s25, 0 }
  0x22   : > { %258 = sbr.rel (%p23453_p6) target bundleno = 3729 (0xe91), region = 44 }
  0x29   : > { %p23454_p8 = scmp.eq.s32.totalorder %s18315_s22, 0 }
  0x2b   : > { %18261 = dma.done.wait (%p23454_p8), [#allocation3], 12288   ;;  %p23455_p7 = pmov %p23454_p8 }
  0x2c   : > { %s11623_s15 = sshll.u32 %s18315_s22, 4  ;;  %v363_v0 = vld [vmem:[#allocation2] sm:$0xff]  ;;  %v364_v1 = vld [vmem:[#allocation2 + $0x8] sm:$0xff]  ;;  %v365_v2 = vld [vmem:[#allocation2 + $0x10] sm:$0xff]  ;;  %p309_p3 = scmp.lt.s32.totalorder %s18315_s22, 1 }
  0x2d   : > { %18263 = vsyncadd (%p23455_p7), [#allocation3], 4294955008  ;;  %p304_p2 = scmp.lt.s32.totalorder %s11623_s15, 31  ;;  %v384_v3 = vand.u32 4294901760, %v363_v0  ;;  %v387_v4 = vand.u32 4294901760, %v364_v1  ;;  %v366_v5 = vld [vmem:[#allocation2 + $0x18] sm:$0xff] }
  0x2e   : > { %v390_v6 = vand.u32 4294901760, %v365_v2  ;;  %v18358_v7 = vld [vmem:[#allocation2 + $0x20] sm:$0xff]  ;;  %v18360_v8 = vld [vmem:[#allocation2 + $0x28] sm:$0xff]  ;;  %v393_v9 = vand.u32 4294901760, %v366_v5  ;;  %v18375_v14 = vld [vmem:[#allocation2 + $0x30] sm:$0xff]  ;;  %s24044_s22 = smov (!%p309_p3, %s18315_s22), 1 }
  0x2f   : > { %s24042_s15 = smov (!%p304_p2, %s11623_s15), 31  ;;  %v18369_v10 = vpack.c.bf16 %v387_v4, %v384_v3  ;;  %v396_v11 = vand.u32 4294901760, %v18358_v7  ;;  %v399_v12 = vand.u32 4294901760, %v18360_v8  ;;  %v18377_v15 = vld [vmem:[#allocation2 + $0x38] sm:$0xff]  ;;  %v402_v20 = vand.u32 4294901760, %v18375_v14  ;;  %v18394_v22 = vld [vmem:[#allocation2 + $0x40] sm:$0xff] }
  0x30   : > { %s11624_s16 = sshll.u32 %s24042_s15, 3  ;;  %v18373_v13 = vpack.c.bf16 %v393_v9, %v390_v6  ;;  %v405_v21 = vand.u32 4294901760, %v18377_v15  ;;  %v18396_v23 = vld [vmem:[#allocation2 + $0x48] sm:$0xff]  ;;  %v408_v28 = vand.u32 4294901760, %v18394_v22  ;;  %v18416_v32 = vld [vmem:[#allocation2 + $0x50] sm:$0xff]  ;;  %v18418_v33 = vsub.f32 %v363_v0, %v384_v3  ;;  %v18422_v35 = vld [vmem:[#allocation2 + $0x58] sm:$0xff] }
  0x31   : > { %s18367_s19 = scalar_lea.vmem %s23004_s0, %s11624_s16  ;;  %23456 = vst [vmem:[#allocation5_spill] sm:$0xff] %v18369_v10  ;;  %15863 = vmatprep.subr.bf16.mxu0 %v18369_v10  ;;  %v18390_v19 = vpack.c.bf16 %v399_v12, %v396_v11  ;;  %v411_v31 = vand.u32 4294901760, %v18396_v23  ;;  %v18420_v34 = vsub.f32 %v364_v1, %v387_v4  ;;  %v18434_v40 = vsub.f32 %v365_v2, %v390_v6  ;;  %v18438_v42 = vld [vmem:[#allocation2 + $0x60] sm:$0xff]  ;;  %v18440_v43 = vld [vmem:[#allocation2 + $0x68] sm:$0xff]  ;;  %v18450_v47 = vld [vmem:[#allocation2 + $0x70] sm:$0xff]  ;;  %s19542_s24 = sshll.u32 %s24044_s22, 7 }
  0x32   : > { %23457 = vst [vmem:[#allocation6_spill] sm:$0xff] %v18373_v13  ;;  %v346_v16 = vld [vmem:[%s18367_s19] sm:$0xff]  ;;  %v347_v17 = vld [vmem:[%s18367_s19 + $0x8] sm:$0xff]  ;;  %15865 = vmatpush3.bf16.msra.mxu0 %v18369_v10  ;;  %v348_v26 = vld [vmem:[%s18367_s19 + $0x10] sm:$0xff]  ;;  %v18413_v30 = vpack.c.bf16 %v405_v21, %v402_v20  ;;  %v23026_v41 = vand.u32 4294901760, %v18416_v32  ;;  %v23025_v46 = vand.u32 4294901760, %v18422_v35  ;;  %v18453_v49 = vsub.f32 %v366_v5, %v393_v9  ;;  %s19548_s27 = scalar_lea.vmem %s23005_s1, %s19542_s24  ;;  %s20717_s7 = scalar_lea.vmem %s23006_s2, %s19542_s24 }
  0x33   : > { %v18383_v18 = vand.u32 4294901760, %v346_v16  ;;  %15867 = vmatprep.subr.bf16.mxu0 %v18373_v13  ;;  %23458 = vst [vmem:[#allocation7_spill] sm:$0xff] %v18390_v19  ;;  %v18401_v25 = vand.u32 4294901760, %v347_v17  ;;  %v349_v27 = vld [vmem:[%s18367_s19 + $0x18] sm:$0xff]  ;;  %v18430_v38 = vand.u32 4294901760, %v348_v26  ;;  %v18447_v45 = vpack.c.bf16 %v411_v31, %v408_v28  ;;  %v350_v50 = vld [vmem:[%s18367_s19 + $0x20] sm:$0xff]  ;;  %s20728_s10 = scalar_lea.vmem %s23007_s3, %s19542_s24  ;;  %s22967_s25 = scalar_lea.vmem %s23010_s6, %s11624_s16 }
  0x34   : > { %23460 = vst [vmem:[#allocation9_spill] sm:$0xff] %v18413_v30  ;;  %v18432_v39 = vand.u32 4294901760, %v349_v27  ;;  %v23017_v48 = vand.u32 4294901760, %v18418_v33  ;;  %v351_v51 = vld [vmem:[%s18367_s19 + $0x28] sm:$0xff]  ;;  %v18457_v52 = vld [vmem:[#allocation2 + $0x78] sm:$0xff]  ;;  %v23016_v54 = vand.u32 4294901760, %v18420_v34  ;;  %v18481_v63 = vpack.c.bf16 %v23025_v46, %v23026_v41 }
  0x35   : > { %v18399_v24 = vsub.f32 %v346_v16, %v18383_v18  ;;  %v18428_v37 = vsub.f32 %v347_v17, %v18401_v25  ;;  %23462 = vst [vmem:[#allocation11_spill] sm:$0xff] %v18447_v45  ;;  %v18462_v55 = vsub.f32 %v348_v26, %v18430_v38  ;;  %v23024_v57 = vand.u32 4294901760, %v18438_v42  ;;  %v352_v3 = vld [vmem:[%s18367_s19 + $0x30] sm:$0xff]  ;;  %s18272_s13 = smov 32   ;;  %s18273_s14 = smov 64  }
  0x36   : > { %15869 = vmatpush3.bf16.msra.mxu0 %v18373_v13  ;;  %v18465_v56 = vsub.f32 %v349_v27, %v18432_v39  ;;  %v23015_v58 = vand.u32 4294901760, %v18434_v40  ;;  %v23023_v59 = vand.u32 4294901760, %v18440_v43  ;;  %v23020_v60 = vand.u32 4294901760, %v18450_v47  ;;  %23465 = vst [vmem:[#allocation14_spill] sm:$0xff] %v18481_v63 }
  0x37   : > { %23459 = vst [vmem:[#allocation8_spill] sm:$0xff] %v18399_v24  ;;  %v23014_v29 = vand.u32 4294901760, %v18399_v24  ;;  %15871 = vmatprep.subr.bf16.mxu0 %v18390_v19  ;;  %23461 = vst [vmem:[#allocation10_spill] sm:$0xff] %v18428_v37  ;;  %v23013_v53 = vand.u32 4294901760, %v18428_v37  ;;  %v18472_v61 = vand.u32 4294901760, %v350_v50  ;;  %v18474_v62 = vand.u32 4294901760, %v351_v51 }
  0x38   : > { %23463 = vst [vmem:[#allocation12_spill] sm:$0xff] %v18462_v55  ;;  %23464 = vst [vmem:[#allocation13_spill] sm:$0xff] %v18465_v56  ;;  %v23018_v0 = vand.u32 4294901760, %v18457_v52  ;;  %v628_v1 = vsub.f32 %v18418_v33, %v23017_v48  ;;  %v23019_v2 = vand.u32 4294901760, %v18453_v49  ;;  %v635_v5 = vsub.f32 %v18420_v34, %v23016_v54  ;;  %v354_v54 = vld [vmem:[%s18367_s19 + $0x40] sm:$0xff]  ;;  %v355_v48 = vld [vmem:[%s18367_s19 + $0x48] sm:$0xff] }
  0x39   : > { %v467_v36 = vsub.f32 %v18399_v24, %v23014_v29  ;;  %v18492_v4 = vsub.f32 %v18428_v37, %v23013_v53  ;;  %v23021_v6 = vand.u32 4294901760, %v18462_v55  ;;  %v23022_v9 = vand.u32 4294901760, %v18465_v56  ;;  %v353_v53 = vld [vmem:[%s18367_s19 + $0x38] sm:$0xff] }
  0x3a   : > { %15873 = vmatpush3.bf16.msra.mxu0 %v18390_v19  ;;  %v642_v16 = vsub.f32 %v18434_v40, %v23015_v58  ;;  %v18505_v17 = vsub.f32 %v18358_v7, %v396_v11  ;;  %v18510_v26 = vsub.f32 %v18360_v8, %v399_v12  ;;  %v18514_v27 = vsub.f32 %v350_v50, %v18472_v61 }
  0x3b   : > { %v468_v44 = vand.u32 4294901760, %v467_v36  ;;  %15875 = vmatprep.subr.bf16.mxu0 %v18413_v30  ;;  %v18517_v36 = vsub.f32 %v351_v51, %v18474_v62  ;;  %v18527_v7 = vpack.c.bf16 %v23023_v59, %v23024_v57  ;;  %v18533_v8 = vpack.c.bf16 %v23018_v0, %v23020_v60 }
  0x3c   : > { %23466 = vst [vmem:[#allocation15_spill] sm:$0xff] %v18514_v27  ;;  %v629_v11 = vand.u32 4294901760, %v628_v1  ;;  %v649_v12 = vsub.f32 %v18453_v49, %v23019_v2  ;;  %v478_v50 = vand.u32 4294901760, %v18492_v4  ;;  %v636_v51 = vand.u32 4294901760, %v635_v5 }
  0x3d   : > { %13206 = vmatprep.mubr.f32.mxu0 %v468_v44  ;;  %23467 = vst [vmem:[#allocation16_spill] sm:$0xff] %v18517_v36  ;;  %v18519_v44 = vand.u32 4294901760, %v352_v3  ;;  %23468 = vst [vmem:[#allocation17_spill] sm:$0xff] %v18527_v7  ;;  %v18542_v29 = vsub.f32 %v18462_v55, %v23021_v6  ;;  %v18547_v58 = vsub.f32 %v18465_v56, %v23022_v9  ;;  %v643_v1 = vand.u32 4294901760, %v642_v16 }
  0x3e   : > { %15877 = vmatpush3.bf16.msra.mxu0 %v18413_v30  ;;  %23469 = vst [vmem:[#allocation18_spill] sm:$0xff] %v18533_v8  ;;  %v23030_v0 = vand.u32 4294901760, %v18505_v17  ;;  %v23028_v2 = vand.u32 4294901760, %v18510_v26  ;;  %v18553_v60 = vand.u32 4294901760, %v353_v53  ;;  %v23027_v4 = vand.u32 4294901760, %v18514_v27 }
  0x3f   : > { %15879 = vmatprep.subr.bf16.mxu0 %v18447_v45  ;;  %v23029_v5 = vand.u32 4294901760, %v18517_v36  ;;  %v18559_v6 = vsub.f32 %v352_v3, %v18519_v44  ;;  %v18564_v16 = vsub.f32 %v18375_v14, %v402_v20  ;;  %v650_v9 = vand.u32 4294901760, %v649_v12 }
  0x40   : > { %v18570_v59 = vsub.f32 %v18377_v15, %v405_v21  ;;  %v18572_v57 = vand.u32 4294901760, %v354_v54  ;;  %v18574_v46 = vand.u32 4294901760, %v355_v48  ;;  %v15894_v41 = vpack.c.bf16 %v636_v51, %v629_v11 }
  0x41   : > { %23470 = vst [vmem:[#allocation19_spill] sm:$0xff] %v18559_v6  ;;  %v488_v3 = vand.u32 4294901760, %v18542_v29  ;;  %v18580_v14 = vsub.f32 %v18394_v22, %v408_v28  ;;  %v18585_v20 = vsub.f32 %v18396_v23, %v411_v31  ;;  %v498_v15 = vand.u32 4294901760, %v18547_v58  ;;  %v356_v22 = vld [vmem:[%s18367_s19 + $0x50] sm:$0xff]  ;;  %v357_v31 = vld [vmem:[%s18367_s19 + $0x58] sm:$0xff] }
  0x42   : > { %15881 = vmatpush3.bf16.msra.mxu0 %v18447_v45  ;;  %v656_v21 = vsub.f32 %v18505_v17, %v23030_v0  ;;  %v663_v29 = vsub.f32 %v18510_v26, %v23028_v2  ;;  %v18595_v11 = vsub.f32 %v353_v53, %v18553_v60  ;;  %v507_v23 = vsub.f32 %v18514_v27, %v23027_v4  ;;  %v359_v27 = vld [vmem:[%s18367_s19 + $0x68] sm:$0xff] }
  0x43   : > { %15883 = vmatprep.subr.bf16.mxu0 %v18481_v63  ;;  %v18605_v28 = vsub.f32 %v18517_v36, %v23029_v5  ;;  %v15898_v53 = vpack.c.bf16 %v650_v9, %v643_v1  ;;  %v18612_v51 = vsub.f32 %v354_v54, %v18572_v57  ;;  %v18615_v4 = vsub.f32 %v355_v48, %v18574_v46 }
  0x44   : > { %23471 = vst [vmem:[#allocation20_spill] sm:$0xff] %v18595_v11  ;;  %v18619_v0 = vand.u32 4294901760, %v356_v22  ;;  %v23474_v58 = vand.u32 4294901760, %v18416_v32  ;;  %v657_v1 = vand.u32 4294901760, %v656_v21  ;;  %v664_v12 = vand.u32 4294901760, %v663_v29  ;;  %v358_v29 = vld [vmem:[%s18367_s19 + $0x60] sm:$0xff] }
  0x45   : > { %23472 = vst [vmem:[#allocation21_spill] sm:$0xff] %v18612_v51  ;;  %23473 = vst [vmem:[#allocation22_spill] sm:$0xff] %v18615_v4  ;;  %v508_v5 = vand.u32 4294901760, %v507_v23  ;;  %v518_v2 = vand.u32 4294901760, %v18605_v28  ;;  %v18647_v28 = vand.u32 4294901760, %v357_v31  ;;  %v23479_v54 = vand.u32 4294901760, %v18580_v14 }
  0x46   : > { %15885 = vmatpush3.bf16.msra.mxu0 %v18481_v63  ;;  %v18625_v9 = vsub.f32 %v18416_v32, %v23474_v58  ;;  %v23476_v63 = vand.u32 4294901760, %v18559_v6  ;;  %v23477_v32 = vand.u32 4294901760, %v18564_v16  ;;  %v23478_v58 = vand.u32 4294901760, %v18570_v59 }
  0x47   : > { %15887 = vmatprep.subr.bf16.mxu0 %v18527_v7  ;;  %v18656_v30 = vsub.f32 %v356_v22, %v18619_v0  ;;  %v18663_v19 = vand.u32 4294901760, %v358_v29  ;;  %v23483_v22 = vand.u32 4294901760, %v18438_v42 }
  0x48   : > { %v527_v45 = vsub.f32 %v18559_v6, %v23476_v63  ;;  %v670_v21 = vsub.f32 %v18564_v16, %v23477_v32  ;;  %v684_v63 = vsub.f32 %v18580_v14, %v23479_v54  ;;  %v23482_v6 = vand.u32 4294901760, %v18595_v11 }
  0x49   : > { %23481 = vst [vmem:[#allocation23_spill] sm:$0xff] %v18656_v30  ;;  %v23490_v37 = vand.u32 4294901760, %v18656_v30 }
  0x4a   : > { %15889 = vmatpush3.bf16.msra.mxu0 %v18527_v7  ;;  %v23475_v7 = vand.u32 4294901760, %v18422_v35  ;;  %v537_v23 = vsub.f32 %v18595_v11, %v23482_v6  ;;  %v528_v54 = vand.u32 4294901760, %v527_v45  ;;  %v23486_v45 = vand.u32 4294901760, %v18615_v4 }
  0x4b   : > { %15891 = vmatprep.subr.bf16.mxu0 %v18533_v8  ;;  %v567_v10 = vsub.f32 %v18656_v30, %v23490_v37  ;;  %v23500_v30 = vand.u32 4294901760, %v18564_v16 }
  0x4c   : > { %v18631_v48 = vsub.f32 %v18422_v35, %v23475_v7  ;;  %v677_v35 = vsub.f32 %v18570_v59, %v23478_v58  ;;  %v15902_v7 = vpack.c.bf16 %v664_v12, %v657_v1  ;;  %v18669_v58 = vsub.f32 %v18438_v42, %v23483_v22  ;;  %v360_v42 = vld [vmem:[%s18367_s19 + $0x70] sm:$0xff] }
  0x4d   : > { %v23485_v1 = vand.u32 4294901760, %v18612_v51  ;;  %v685_v22 = vand.u32 4294901760, %v684_v63 }
  0x4e   : > { %15893 = vmatpush3.bf16.msra.mxu0 %v18533_v8  ;;  %v23480_v8 = vand.u32 4294901760, %v18585_v20  ;;  %v704_v36 = vand.u32 4294901760, %v18631_v48  ;;  %v678_v6 = vand.u32 4294901760, %v677_v35  ;;  %v23487_v35 = vand.u32 4294901760, %v18625_v9 }
  0x4f   : > { %15895 = vmatprep.subr.bf16.mxu0 %v15894_v41 }
  0x50   : > { %v691_v32 = vsub.f32 %v18585_v20, %v23480_v8  ;;  %v671_v8 = vand.u32 4294901760, %v670_v21  ;;  %v18685_v21 = vsub.f32 %v357_v31, %v18647_v28  ;;  %v711_v31 = vand.u32 4294901760, %v18669_v58 }
  0x51   : > { %13207 = vmatmul.mubr.f32.vlgmr.msra.gmra.mrb[0].mxu0 %v478_v50  ;;  %v23484_v50 = vand.u32 4294901760, %v18440_v43 }
  0x52   : > { %15897 = vmatpush3.bf16.msra.mxu0 %v15894_v41  ;;  %13209 = vmatprep.mubr.f32.mxu0 %v488_v3  ;;  %v547_v41 = vsub.f32 %v18612_v51, %v23485_v1  ;;  %v18682_v3 = vsub.f32 %v18615_v4, %v23486_v45  ;;  %v692_v11 = vand.u32 4294901760, %v691_v32  ;;  %v538_v1 = vand.u32 4294901760, %v537_v23 }
  0x53   : > { %v18674_v12 = vsub.f32 %v18440_v43, %v23484_v50  ;;  %15899 = vmatprep.subr.bf16.mxu0 %v15898_v53  ;;  %v698_v50 = vsub.f32 %v18625_v9, %v23487_v35  ;;  %v705_v51 = vsub.f32 %v18631_v48, %v704_v36  ;;  %v18694_v45 = vsub.f32 %v358_v29, %v18663_v19  ;;  %v361_v43 = vld [vmem:[%s18367_s19 + $0x78] sm:$0xff] }
  0x54   : > { %v18696_v4 = vand.u32 4294901760, %v359_v27  ;;  %v18700_v32 = vand.u32 4294901760, %v360_v42  ;;  %v23488_v35 = vand.u32 4294901760, %v18450_v47  ;;  %v15906_v23 = vpack.c.bf16 %v678_v6, %v671_v8 }
  0x55   : > { %13210 = vmatmul.mubr.f32.gmra.mrb[2].mxu0 %v498_v15  ;;  %v718_v63 = vand.u32 4294901760, %v18674_v12  ;;  %v548_v29 = vand.u32 4294901760, %v547_v41  ;;  %v23071_v56 = vand.u32 4294901760, %v18685_v21  ;;  %v558_v13 = vand.u32 4294901760, %v18682_v3 }
  0x56   : > { %15901 = vmatpush3.bf16.msra.mxu0 %v15898_v53  ;;  %13212 = vmatprep.mubr.f32.mxu0 %v508_v5  ;;  %v18706_v15 = vsub.f32 %v18450_v47, %v23488_v35  ;;  %v23489_v53 = vand.u32 4294901760, %v18457_v52  ;;  %v15910_v55 = vpack.c.bf16 %v692_v11, %v685_v22  ;;  %v699_v24 = vand.u32 4294901760, %v698_v50 }
  0x57   : > { %15903 = vmatprep.subr.bf16.mxu0 %v15902_v7  ;;  %v706_v47 = vand.u32 4294901760, %v705_v51  ;;  %v18720_v6 = vsub.f32 %v359_v27, %v18696_v4  ;;  %v18722_v41 = vand.u32 4294901760, %v361_v43  ;;  %v719_v11 = vsub.f32 %v18674_v12, %v718_v63 }
  0x58   : > { %v18712_v5 = vsub.f32 %v18457_v52, %v23489_v53  ;;  %v712_v52 = vsub.f32 %v18669_v58, %v711_v31  ;;  %v18727_v3 = vsub.f32 %v360_v42, %v18700_v32  ;;  %v725_v37 = vand.u32 4294901760, %v18706_v15 }
  0x59   : > { %13213 = vmatmul.mubr.f32.gmra.mrb[4].mxu0 %v518_v2  ;;  %v23491_v51 = vand.u32 4294901760, %v18418_v33  ;;  %v23492_v27 = vand.u32 4294901760, %v18420_v34  ;;  %v23497_v42 = vand.u32 4294901760, %v18505_v17  ;;  %v23498_v35 = vand.u32 4294901760, %v18510_v26 }
  0x5a   : > { %15905 = vmatpush3.bf16.msra.mxu0 %v15902_v7  ;;  %13215 = vmatprep.mubr.f32.mxu0 %v528_v54  ;;  %v732_v2 = vand.u32 4294901760, %v18712_v5  ;;  %v23494_v7 = vand.u32 4294901760, %v18434_v40  ;;  %v23495_v54 = vand.u32 4294901760, %v18453_v49  ;;  %v577_v8 = vsub.f32 %v18685_v21, %v23071_v56 }
  0x5b   : > { %15907 = vmatprep.subr.bf16.mxu0 %v15906_v23  ;;  %v18735_v22 = vpack.c.bf16 %v23492_v27, %v23491_v51  ;;  %v18747_v53 = vpack.c.bf16 %v23498_v35, %v23497_v42  ;;  %v23501_v51 = vand.u32 4294901760, %v18570_v59  ;;  %v23086_v35 = vand.u32 4294901760, %v18720_v6 }
  0x5c   : > { %v18741_v50 = vpack.c.bf16 %v23495_v54, %v23494_v7  ;;  %v23504_v7 = vand.u32 4294901760, %v18585_v20  ;;  %v18770_v56 = vsub.f32 %v361_v43, %v18722_v41  ;;  %v726_v43 = vsub.f32 %v18706_v15, %v725_v37 }
  0x5d   : > { %23493 = vst [vmem:[#allocation24_spill] sm:$0xff] %v18735_v22  ;;  %23499 = vst [vmem:[#allocation26_spill] sm:$0xff] %v18747_v53  ;;  %v18756_v27 = vpack.c.bf16 %v23501_v51, %v23500_v30  ;;  %v23503_v22 = vand.u32 4294901760, %v18580_v14  ;;  %13216 = vmatmul.mubr.f32.gmra.mrb[6].mxu0 %v538_v1  ;;  %v18772_v53 = vpack.c.bf16 %v718_v63, %v711_v31  ;;  %v568_v51 = vand.u32 4294901760, %v567_v10 }
  0x5e   : > { %23496 = vst [vmem:[#allocation25_spill] sm:$0xff] %v18741_v50  ;;  %v23505_v50 = vand.u32 4294901760, %v18625_v9  ;;  %v18774_v30 = vpack.c.bf16 %v732_v2, %v725_v37  ;;  %15909 = vmatpush3.bf16.msra.mxu0 %v15906_v23  ;;  %13218 = vmatprep.mubr.f32.mxu0 %v548_v29  ;;  %v713_v1 = vand.u32 4294901760, %v712_v52  ;;  %v733_v31 = vsub.f32 %v18712_v5, %v732_v2 }
  0x5f   : > { %23502 = vst [vmem:[#allocation27_spill] sm:$0xff] %v18756_v27  ;;  %v18762_v54 = vpack.c.bf16 %v23504_v7, %v23503_v22  ;;  %v15914_v27 = vpack.c.bf16 %v706_v47, %v699_v24  ;;  %v23506_v22 = vand.u32 4294901760, %v18694_v45  ;;  %15911 = vmatprep.subr.bf16.mxu0 %v15910_v55  ;;  %v578_v63 = vand.u32 4294901760, %v577_v8 }
  0x60   : > { %v18766_v42 = vpack.c.bf16 %v704_v36, %v23505_v50  ;;  %v23085_v36 = vand.u32 4294901760, %v18727_v3  ;;  %v720_v50 = vand.u32 4294901760, %v719_v11  ;;  %v597_v10 = vsub.f32 %v18720_v6, %v23086_v35 }
  0x61   : > { %v587_v7 = vsub.f32 %v18694_v45, %v23506_v22  ;;  %13219 = vmatmul.mubr.f32.gmra.mrb[8].mxu0 %v558_v13  ;;  %v23084_v24 = vand.u32 4294901760, %v18770_v56  ;;  %v727_v52 = vand.u32 4294901760, %v726_v43  ;;  %v734_v11 = vand.u32 4294901760, %v733_v31 }
  0x62   : > { %15913 = vmatpush3.bf16.msra.mxu0 %v15910_v55  ;;  %13221 = vmatprep.mubr.f32.mxu0 %v568_v51  ;;  %v607_v29 = vsub.f32 %v18727_v3, %v23085_v36  ;;  %v15918_v47 = vpack.c.bf16 %v720_v50, %v713_v1  ;;  %v598_v13 = vand.u32 4294901760, %v597_v10  ;;  %v15926_v51 = vpack.c.bf16 %v18420_v34, %v18418_v33  ;;  %v23509_v50 = vld [vmem:[#allocation10_spill] sm:$0xff]  ;;  %v23510_v10 = vld [vmem:[#allocation12_spill] sm:$0xff] }
  0x63   : > { %v588_v23 = vand.u32 4294901760, %v587_v7  ;;  %15915 = vmatprep.subr.bf16.mxu0 %v15914_v27  ;;  %v617_v8 = vsub.f32 %v18770_v56, %v23084_v24  ;;  %v15922_v55 = vpack.c.bf16 %v734_v11, %v727_v52  ;;  %v15934_v22 = vpack.c.bf16 %v18510_v26, %v18505_v17  ;;  %v18824_v17 = vld [vmem:[#allocation2 + $0x80] sm:$0xff]  ;;  %v18826_v26 = vld [vmem:[#allocation2 + $0x88] sm:$0xff] }
  0x64   : > { %v608_v37 = vand.u32 4294901760, %v607_v29  ;;  %v15938_v33 = vpack.c.bf16 %v18570_v59, %v18564_v16  ;;  %v15942_v34 = vpack.c.bf16 %v18585_v20, %v18580_v14  ;;  %v15954_v59 = vpack.c.bf16 %v18712_v5, %v18706_v15  ;;  %v18828_v16 = vld [vmem:[#allocation2 + $0x90] sm:$0xff]  ;;  %v23507_v14 = vld [vmem:[#allocation8_spill] sm:$0xff]  ;;  %v18838_v15 = vld [vmem:[#allocation2 + $0xa8] sm:$0xff] }
  0x65   : > { %13222 = vmatmul.mubr.f32.gmra.mrb[10].mxu0 %v578_v63  ;;  %v618_v2 = vand.u32 4294901760, %v617_v8  ;;  %v23083_v20 = vand.u32 4294901760, %v18824_v17  ;;  %v23508_v5 = vld [vmem:[#allocation5_spill] sm:$0xff]  ;;  %v23076_v63 = vand.u32 4294901760, %v18838_v15  ;;  %v18861_v29 = vld [vmem:[#allocation2 + $0xb8] sm:$0xff]  ;;  %v23529_v24 = vand.u32 4294901760, %v23509_v50 }
  0x66   : > { %15917 = vmatpush3.bf16.msra.mxu0 %v15914_v27  ;;  %13224 = vmatprep.mubr.f32.mxu0 %v588_v23  ;;  %v15930_v27 = vpack.c.bf16 %v18453_v49, %v18434_v40  ;;  %v15946_v40 = vpack.c.bf16 %v18631_v48, %v18625_v9  ;;  %v15950_v49 = vpack.c.bf16 %v18674_v12, %v18669_v58  ;;  %v23082_v9 = vand.u32 4294901760, %v18826_v26  ;;  %v18833_v48 = vld [vmem:[#allocation2 + $0x98] sm:$0xff]  ;;  %v18836_v12 = vld [vmem:[#allocation2 + $0xa0] sm:$0xff]  ;;  %v18859_v23 = vld [vmem:[#allocation2 + $0xb0] sm:$0xff] }
  0x67   : > { %15919 = vmatprep.subr.bf16.mxu0 %v15918_v47  ;;  %v23079_v58 = vand.u32 4294901760, %v18828_v16  ;;  %v23078_v7 = vand.u32 4294901760, %v18833_v48  ;;  %v23077_v31 = vand.u32 4294901760, %v18836_v12  ;;  %v23512_v52 = vld [vmem:[#allocation13_spill] sm:$0xff]  ;;  %v23074_v8 = vand.u32 4294901760, %v18861_v29 }
  0x68   : > { %v18846_v1 = vpack.c.bf16 %v23082_v9, %v23083_v20  ;;  %v23527_v9 = vand.u32 4294901760, %v23507_v14  ;;  %v23528_v20 = vld [vmem:[#allocation24_spill] sm:$0xff]  ;;  %v23530_v36 = vand.u32 4294901760, %v23510_v10  ;;  %v23531_v35 = vld [vmem:[#allocation25_spill] sm:$0xff] }
  0x69   : > { %13225 = vmatmul.mubr.f32.gmra.mrb[12].mxu0 %v598_v13  ;;  %v18853_v43 = vpack.c.bf16 %v23078_v7, %v23079_v58  ;;  %v18872_v11 = vpack.c.bf16 %v23076_v63, %v23077_v31  ;;  %v23075_v13 = vand.u32 4294901760, %v18859_v23  ;;  %v23521_v63 = vld [vmem:[#allocation11_spill] sm:$0xff]  ;;  %v23522_v31 = vld [vmem:[#allocation22_spill] sm:$0xff] }
  0x6a   : > { %15921 = vmatpush3.bf16.msra.mxu0 %v15918_v47  ;;  %13227 = vmatprep.mubr.f32.mxu0 %v608_v37  ;;  %v23511_v47 = vld [vmem:[#allocation6_spill] sm:$0xff]  ;;  %v23513_v37 = vld [vmem:[#allocation15_spill] sm:$0xff] }
  0x6b   : > { %15923 = vmatprep.subr.bf16.mxu0 %v15922_v55  ;;  %16055 = vmatprep.subr.bf16.mxu1 %v18846_v1  ;;  %v23523_v7 = vld [vmem:[#allocation23_spill] sm:$0xff]  ;;  %v23524_v58 = vld [vmem:[#allocation14_spill] sm:$0xff] }
  0x6c   : > { %16057 = vmatpush3.bf16.msra.mxu1 %v18846_v1 }
  0x6d   : > { %13228 = vmatmul.mubr.f32.gmra.mrb[14].mxu0 %v618_v2  ;;  %16059 = vmatprep.subr.bf16.mxu1 %v18853_v43  ;;  %v18880_v2 = vld [vmem:[#allocation2 + $0xc8] sm:$0xff] }
  0x6e   : > { %15925 = vmatpush3.bf16.msra.mxu0 %v15922_v55  ;;  %13262 = vmatprep.mubr.f32.mxu0 %v18383_v18  ;;  %v18878_v55 = vld [vmem:[#allocation2 + $0xc0] sm:$0xff] }
  0x6f   : > { %15927 = vmatprep.subr.bf16.mxu0 %v15926_v51 }
  0x70   : > { %16061 = vmatpush3.bf16.msra.mxu1 %v18853_v43 }
  0x71   : > { %13263 = vmatmul.mubr.f32.vlgmr.msra.gmra.mrb[0].mxu0 %v18401_v25  ;;  %16063 = vmatprep.subr.bf16.mxu1 %v18872_v11 }
  0x72   : > { %15929 = vmatpush3.bf16.msra.mxu0 %v15926_v51  ;;  %13265 = vmatprep.mubr.f32.mxu0 %v18430_v38  ;;  %v23514_v51 = vld [vmem:[#allocation7_spill] sm:$0xff] }
  0x73   : > { %15931 = vmatprep.subr.bf16.mxu0 %v15930_v27 }
  0x74   : > { %16065 = vmatpush3.bf16.msra.mxu1 %v18872_v11 }
  0x75   : > { %13266 = vmatmul.mubr.f32.gmra.mrb[2].mxu0 %v18432_v39 }
  0x76   : > { %15933 = vmatpush3.bf16.msra.mxu0 %v15930_v27  ;;  %13268 = vmatprep.mubr.f32.mxu0 %v18472_v61  ;;  %v23515_v27 = vld [vmem:[#allocation16_spill] sm:$0xff] }
  0x77   : > { %15935 = vmatprep.subr.bf16.mxu0 %v15934_v22 }
  0x79   : > { %13269 = vmatmul.mubr.f32.gmra.mrb[4].mxu0 %v18474_v62 }
  0x7a   : > { %15937 = vmatpush3.bf16.msra.mxu0 %v15934_v22  ;;  %13271 = vmatprep.mubr.f32.mxu0 %v18519_v44  ;;  %v18890_v22 = vpack.c.bf16 %v23074_v8, %v23075_v13  ;;  %v23520_v13 = vld [vmem:[#allocation21_spill] sm:$0xff] }
  0x7b   : > { %15939 = vmatprep.subr.bf16.mxu0 %v15938_v33 }
  0x7c   : > { %16067 = vmatprep.subr.bf16.mxu1 %v18890_v22 }
  0x7d   : > { %13272 = vmatmul.mubr.f32.gmra.mrb[6].mxu0 %v18553_v60  ;;  %16069 = vmatpush3.bf16.msra.mxu1 %v18890_v22 }
  0x7e   : > { %15941 = vmatpush3.bf16.msra.mxu0 %v15938_v33  ;;  %13274 = vmatprep.mubr.f32.mxu0 %v18572_v57  ;;  %v23081_v33 = vand.u32 4294901760, %v18878_v55 }
  0x7f   : > { %15943 = vmatprep.subr.bf16.mxu0 %v15942_v34 }
  0x81   : > { %13275 = vmatmul.mubr.f32.gmra.mrb[8].mxu0 %v18574_v46 }
  0x82   : > { %15945 = vmatpush3.bf16.msra.mxu0 %v15942_v34  ;;  %13277 = vmatprep.mubr.f32.mxu0 %v18619_v0  ;;  %v23080_v34 = vand.u32 4294901760, %v18880_v2 }
  0x83   : > { %15947 = vmatprep.subr.bf16.mxu0 %v15946_v40 }
  0x84   : > { %v18904_v8 = vpack.c.bf16 %v23080_v34, %v23081_v33  ;;  %v23525_v34 = vld [vmem:[#allocation17_spill] sm:$0xff]  ;;  %v23526_v33 = vld [vmem:[#allocation18_spill] sm:$0xff] }
  0x85   : > { %13278 = vmatmul.mubr.f32.gmra.mrb[10].mxu0 %v18647_v28 }
  0x86   : > { %15949 = vmatpush3.bf16.msra.mxu0 %v15946_v40  ;;  %13280 = vmatprep.mubr.f32.mxu0 %v18663_v19  ;;  %v23516_v40 = vld [vmem:[#allocation19_spill] sm:$0xff]  ;;  %23519 = vst [vmem:[#allocation8_spill] sm:$0xff] %v18904_v8 }
  0x87   : > { %15951 = vmatprep.subr.bf16.mxu0 %v15950_v49  ;;  %16071 = vmatprep.subr.bf16.mxu1 %v18904_v8 }
  0x88   : > { %16073 = vmatpush3.bf16.msra.mxu1 %v18904_v8  ;;  %v23532_v8 = vand.u32 4294901760, %v23512_v52 }
  0x89   : > { %13281 = vmatmul.mubr.f32.gmra.mrb[12].mxu0 %v18696_v4 }
  0x8a   : > { %15953 = vmatpush3.bf16.msra.mxu0 %v15950_v49  ;;  %13283 = vmatprep.mubr.f32.mxu0 %v18700_v32  ;;  %v23517_v49 = vld [vmem:[#allocation9_spill] sm:$0xff] }
  0x8b   : > { %15955 = vmatprep.subr.bf16.mxu0 %v15954_v59 }
  0x8d   : > { %13284 = vmatmul.mubr.f32.gmra.mrb[14].mxu0 %v18722_v41 }
  0x8e   : > { %15957 = vmatpush3.bf16.msra.mxu0 %v15954_v59  ;;  %13318 = vmatprep.mubr.f32.mxu0 %v23507_v14  ;;  %v23518_v59 = vld [vmem:[#allocation20_spill] sm:$0xff]  ;;  %v23533_v14 = vand.u32 4294901760, %v23513_v37 }
  0x8f   : > { %15959 = vmatprep.subr.bf16.mxu0 %v23508_v5 }
  0x91   : > { %13319 = vmatmul.mubr.f32.vlgmr.msra.gmra.mrb[0].mxu0 %v23509_v50  ;;  %v23535_v50 = vand.u32 4294901760, %v23515_v27 }
  0x92   : > { %15961 = vmatpush3.bf16.msra.mxu0 %v23508_v5  ;;  %13321 = vmatprep.mubr.f32.mxu0 %v23510_v10  ;;  %v23540_v10 = vand.u32 4294901760, %v23522_v31 }
  0x93   : > { %15963 = vmatprep.subr.bf16.mxu0 %v23511_v47 }
  0x95   : > { %13322 = vmatmul.mubr.f32.gmra.mrb[2].mxu0 %v23512_v52  ;;  %v23541_v52 = vand.u32 4294901760, %v23523_v7 }
  0x96   : > { %15965 = vmatpush3.bf16.msra.mxu0 %v23511_v47  ;;  %13324 = vmatprep.mubr.f32.mxu0 %v23513_v37 }
  0x97   : > { %15967 = vmatprep.subr.bf16.mxu0 %v23514_v51 }
  0x99   : > { %13325 = vmatmul.mubr.f32.gmra.mrb[4].mxu0 %v23515_v27 }
  0x9a   : > { %15969 = vmatpush3.bf16.msra.mxu0 %v23514_v51  ;;  %13327 = vmatprep.mubr.f32.mxu0 %v23516_v40 }
  0x9b   : > { %15971 = vmatprep.subr.bf16.mxu0 %v23517_v49 }
  0x9d   : > { %13328 = vmatmul.mubr.f32.gmra.mrb[6].mxu0 %v23518_v59 }
  0x9e   : > { %15973 = vmatpush3.bf16.msra.mxu0 %v23517_v49  ;;  %13330 = vmatprep.mubr.f32.mxu0 %v23520_v13 }
  0x9f   : > { %15975 = vmatprep.subr.bf16.mxu0 %v23521_v63 }
  0xa1   : > { %13331 = vmatmul.mubr.f32.gmra.mrb[8].mxu0 %v23522_v31  ;;  %v23544_v31 = vand.u32 4294901760, %v18720_v6 }
  0xa2   : > { %15977 = vmatpush3.bf16.msra.mxu0 %v23521_v63  ;;  %13333 = vmatprep.mubr.f32.mxu0 %v23523_v7 }
  0xa3   : > { %15979 = vmatprep.subr.bf16.mxu0 %v23524_v58 }
  0xa5   : > { %13334 = vmatmul.mubr.f32.gmra.mrb[10].mxu0 %v18685_v21 }
  0xa6   : > { %15981 = vmatpush3.bf16.msra.mxu0 %v23524_v58  ;;  %13336 = vmatprep.mubr.f32.mxu0 %v18694_v45 }
  0xa7   : > { %15983 = vmatprep.subr.bf16.mxu0 %v23525_v34 }
  0xa9   : > { %13337 = vmatmul.mubr.f32.gmra.mrb[12].mxu0 %v18720_v6 }
  0xaa   : > { %15985 = vmatpush3.bf16.msra.mxu0 %v23525_v34  ;;  %13339 = vmatprep.mubr.f32.mxu0 %v18727_v3 }
  0xab   : > { %15987 = vmatprep.subr.bf16.mxu0 %v23526_v33 }
  0xad   : > { %13340 = vmatmul.mubr.f32.gmra.mrb[14].mxu0 %v18770_v56 }
  0xae   : > { %15989 = vmatpush3.bf16.msra.mxu0 %v23526_v33  ;;  %13374 = vmatprep.mubr.f32.mxu0 %v23527_v9  ;;  %v23534_v9 = vld [vmem:[#allocation26_spill] sm:$0xff] }
  0xaf   : > { %15991 = vmatprep.subr.bf16.mxu0 %v23528_v20 }
  0xb1   : > { %13375 = vmatmul.mubr.f32.vlgmr.msra.gmra.mrb[0].mxu0 %v23529_v24  ;;  %v23536_v24 = vand.u32 4294901760, %v23516_v40 }
  0xb2   : > { %15993 = vmatpush3.bf16.msra.mxu0 %v23528_v20  ;;  %13377 = vmatprep.mubr.f32.mxu0 %v23530_v36  ;;  %v23537_v36 = vld [vmem:[#allocation27_spill] sm:$0xff]  ;;  %v23538_v20 = vand.u32 4294901760, %v23518_v59 }
  0xb3   : > { %15995 = vmatprep.subr.bf16.mxu0 %v23531_v35 }
  0xb5   : > { %13378 = vmatmul.mubr.f32.gmra.mrb[2].mxu0 %v23532_v8  ;;  %v23542_v8 = vand.u32 4294901760, %v18685_v21  ;;  %v23546_v21 = vand.u32 4294901760, %v18770_v56 }
  0xb6   : > { %15997 = vmatpush3.bf16.msra.mxu0 %v23531_v35  ;;  %13380 = vmatprep.mubr.f32.mxu0 %v23533_v14  ;;  %v23539_v35 = vand.u32 4294901760, %v23520_v13  ;;  %v23543_v13 = vand.u32 4294901760, %v18694_v45  ;;  %v1685_v45 = vld [vmem:[#allocation2 + $0xf8] sm:$0xff] }
  0xb7   : > { %15999 = vmatprep.subr.bf16.mxu0 %v23534_v9  ;;  %v1732_v6 = vand.u32 4294901760, %v1685_v45 }
  0xb9   : > { %13381 = vmatmul.mubr.f32.gmra.mrb[4].mxu0 %v23535_v50 }
  0xba   : > { %16001 = vmatpush3.bf16.msra.mxu0 %v23534_v9  ;;  %13383 = vmatprep.mubr.f32.mxu0 %v23536_v24 }
  0xbb   : > { %16003 = vmatprep.subr.bf16.mxu0 %v23537_v36 }
  0xbd   : > { %13384 = vmatmul.mubr.f32.gmra.mrb[6].mxu0 %v23538_v20 }
  0xbe   : > { %16005 = vmatpush3.bf16.msra.mxu0 %v23537_v36  ;;  %13386 = vmatprep.mubr.f32.mxu0 %v23539_v35  ;;  %v19083_v36 = vsub.f32 %v1685_v45, %v1732_v6 }
  0xbf   : > { %16007 = vmatprep.subr.bf16.mxu0 %v18762_v54 }
  0xc0   : > { %23558 = vst [vmem:[#allocation9_spill] sm:$0xff] %v19083_v36 }
  0xc1   : > { %13387 = vmatmul.mubr.f32.gmra.mrb[8].mxu0 %v23540_v10 }
  0xc2   : > { %16009 = vmatpush3.bf16.msra.mxu0 %v18762_v54  ;;  %13389 = vmatprep.mubr.f32.mxu0 %v23541_v52  ;;  %v23545_v54 = vand.u32 4294901760, %v18727_v3  ;;  %v23089_v52 = vand.u32 4294901760, %v19083_v36 }
  0xc3   : > { %16011 = vmatprep.subr.bf16.mxu0 %v18766_v42 }
  0xc5   : > { %13390 = vmatmul.mubr.f32.gmra.mrb[10].mxu0 %v23542_v8 }
  0xc6   : > { %16013 = vmatpush3.bf16.msra.mxu0 %v18766_v42  ;;  %13392 = vmatprep.mubr.f32.mxu0 %v23543_v13 }
  0xc7   : > { %16015 = vmatprep.subr.bf16.mxu0 %v18772_v53 }
  0xc9   : > { %13393 = vmatmul.mubr.f32.gmra.mrb[12].mxu0 %v23544_v31  ;;  %v2036_v31 = vsub.f32 %v19083_v36, %v23089_v52 }
  0xca   : > { %16017 = vmatpush3.bf16.msra.mxu0 %v18772_v53  ;;  %13395 = vmatprep.mubr.f32.mxu0 %v23545_v54 }
  0xcb   : > { %16019 = vmatprep.subr.bf16.mxu0 %v18774_v30 }
  0xcd   : > { %13396 = vmatmul.mubr.f32.gmra.mrb[14].mxu0 %v23546_v21  ;;  %v2037_v21 = vand.u32 4294901760, %v2036_v31 }
  0xce   : > { %16021 = vmatpush3.bf16.msra.mxu0 %v18774_v30  ;;  %13430 = vmatprep.mubr.f32.mxu0 %v18383_v18 }
  0xcf   : > { %16023 = vmatprep.subr.bf16.mxu0 %v23508_v5 }
  0xd1   : > { %13431 = vmatmul.mubr.f32.vlgmr.msra.gmra.mrb[0].mxu0 %v18401_v25 }
  0xd2   : > { %16025 = vmatpush3.bf16.msra.mxu0 %v23508_v5  ;;  %13433 = vmatprep.mubr.f32.mxu0 %v18430_v38 }
  0xd3   : > { %16027 = vmatprep.subr.bf16.mxu0 %v23511_v47 }
  0xd5   : > { %13434 = vmatmul.mubr.f32.gmra.mrb[2].mxu0 %v18432_v39 }
  0xd6   : > { %16029 = vmatpush3.bf16.msra.mxu0 %v23511_v47  ;;  %13436 = vmatprep.mubr.f32.mxu0 %v18472_v61 }
  0xd7   : > { %16031 = vmatprep.subr.bf16.mxu0 %v23514_v51 }
  0xd9   : > { %13437 = vmatmul.mubr.f32.gmra.mrb[4].mxu0 %v18474_v62 }
  0xda   : > { %16033 = vmatpush3.bf16.msra.mxu0 %v23514_v51  ;;  %13439 = vmatprep.mubr.f32.mxu0 %v18519_v44 }
  0xdb   : > { %16035 = vmatprep.subr.bf16.mxu0 %v23517_v49 }
  0xdd   : > { %13440 = vmatmul.mubr.f32.gmra.mrb[6].mxu0 %v18553_v60 }
  0xde   : > { %16037 = vmatpush3.bf16.msra.mxu0 %v23517_v49  ;;  %13442 = vmatprep.mubr.f32.mxu0 %v18572_v57 }
  0xdf   : > { %16039 = vmatprep.subr.bf16.mxu0 %v23521_v63 }
  0xe1   : > { %13443 = vmatmul.mubr.f32.gmra.mrb[8].mxu0 %v18574_v46 }
  0xe2   : > { %16041 = vmatpush3.bf16.msra.mxu0 %v23521_v63  ;;  %13445 = vmatprep.mubr.f32.mxu0 %v18619_v0 }
  0xe3   : > { %16043 = vmatprep.subr.bf16.mxu0 %v23524_v58 }
  0xe5   : > { %13446 = vmatmul.mubr.f32.gmra.mrb[10].mxu0 %v18647_v28 }
  0xe6   : > { %16045 = vmatpush3.bf16.msra.mxu0 %v23524_v58  ;;  %13448 = vmatprep.mubr.f32.mxu0 %v18663_v19 }
  0xe7   : > { %16047 = vmatprep.subr.bf16.mxu0 %v23525_v34 }
  0xe9   : > { %13449 = vmatmul.mubr.f32.gmra.mrb[12].mxu0 %v18696_v4 }
  0xea   : > { %16049 = vmatpush3.bf16.msra.mxu0 %v23525_v34  ;;  %13451 = vmatprep.mubr.f32.mxu0 %v18700_v32 }
  0xeb   : > { %16051 = vmatprep.subr.bf16.mxu0 %v23526_v33 }
  0xed   : > { %13452 = vmatmul.mubr.f32.gmra.mrb[14].mxu0 %v18722_v41 }
  0xee   : > { %16053 = vmatpush3.bf16.msra.mxu0 %v23526_v33  ;;  %13486 = vmatprep.mubr.f32.mxu0 %v18383_v18  ;;  %v1680_v18 = vld [vmem:[#allocation2 + $0xd0] sm:$0xff] }
  0xf1   : > { %13487 = vmatmul.mubr.f32.vlgmr.msra.gmra.mrb[0].mxu0 %v18401_v25  ;;  %v1681_v25 = vld [vmem:[#allocation2 + $0xd8] sm:$0xff] }
  0xf2   : > { %13489 = vmatprep.mubr.f32.mxu0 %v18430_v38  ;;  %v1717_v38 = vand.u32 4294901760, %v1680_v18 }
  0xf4   : > { %v19055_v5 = vsub.f32 %v1680_v18, %v1717_v38 }
  0xf5   : > { %13490 = vmatmul.mubr.f32.gmra.mrb[2].mxu0 %v18432_v39  ;;  %v1720_v39 = vand.u32 4294901760, %v1681_v25 }
  0xf6   : > { %13492 = vmatprep.mubr.f32.mxu0 %v18472_v61  ;;  %23553 = vst [vmem:[#allocation13_spill] sm:$0xff] %v19055_v5  ;;  %v23094_v63 = vand.u32 4294901760, %v19055_v5 }
  0xf7   : > { %v19022_v56 = vpack.c.bf16 %v1720_v39, %v1717_v38  ;;  %v19057_v7 = vsub.f32 %v1681_v25, %v1720_v39 }
  0xf8   : > { %v2001_v37 = vsub.f32 %v19055_v5, %v23094_v63 }
  0xf9   : > { %13493 = vmatmul.mubr.f32.gmra.mrb[4].mxu0 %v18474_v62  ;;  %16075 = vmatprep.subr.bf16.mxu1 %v19022_v56  ;;  %v23548_v62 = vand.u32 4294901760, %v18824_v17  ;;  %23554 = vst [vmem:[#allocation15_spill] sm:$0xff] %v19057_v7  ;;  %v23093_v47 = vand.u32 4294901760, %v19057_v7  ;;  %v19103_v38 = vpack.c.bf16 %v19057_v7, %v19055_v5 }
  0xfa   : > { %13495 = vmatprep.mubr.f32.mxu0 %v18519_v44  ;;  %16077 = vmatpush3.bf16.msra.mxu1 %v19022_v56  ;;  %v23550_v44 = vand.u32 4294901760, %v18826_v26  ;;  %v2002_v34 = vand.u32 4294901760, %v2001_v37 }
  0xfb   : > { %v2008_v51 = vsub.f32 %v19057_v7, %v23093_v47 }
  0xfd   : > { %13496 = vmatmul.mubr.f32.gmra.mrb[6].mxu0 %v18553_v60  ;;  %v2009_v40 = vand.u32 4294901760, %v2008_v51 }
  0xfe   : > { %13498 = vmatprep.mubr.f32.mxu0 %v18572_v57  ;;  %v1682_v57 = vld [vmem:[#allocation2 + $0xe0] sm:$0xff] }
  0xff   : > { %v1723_v60 = vand.u32 4294901760, %v1682_v57  ;;  %v19073_v14 = vpack.c.bf16 %v2009_v40, %v2002_v34 }
 0x101   : > { %13499 = vmatmul.mubr.f32.gmra.mrb[8].mxu0 %v18574_v46  ;;  %v1683_v46 = vld [vmem:[#allocation2 + $0xe8] sm:$0xff]  ;;  %v19067_v27 = vsub.f32 %v1682_v57, %v1723_v60 }
 0x102   : > { %13501 = vmatprep.mubr.f32.mxu0 %v18619_v0  ;;  %v1726_v61 = vand.u32 4294901760, %v1683_v46  ;;  %v19031_v0 = vsub.f32 %v18824_v17, %v23548_v62 }
 0x103   : > { %23555 = vst [vmem:[#allocation7_spill] sm:$0xff] %v19067_v27  ;;  %v23092_v49 = vand.u32 4294901760, %v19067_v27 }
 0x104   : > { %23549 = vst [vmem:[#allocation10_spill] sm:$0xff] %v19031_v0  ;;  %v19069_v33 = vsub.f32 %v1683_v46, %v1726_v61  ;;  %v379_v46 = vlaneseq }
 0x105   : > { %13502 = vmatmul.mubr.f32.gmra.mrb[10].mxu0 %v18647_v28  ;;  %v1684_v28 = vld [vmem:[#allocation2 + $0xf0] sm:$0xff]  ;;  %v2015_v9 = vsub.f32 %v19067_v27, %v23092_v49 }
 0x106   : > { %13504 = vmatprep.mubr.f32.mxu0 %v18663_v19  ;;  %v19026_v19 = vpack.c.bf16 %v1726_v61, %v1723_v60  ;;  %23556 = vst [vmem:[#allocation16_spill] sm:$0xff] %v19069_v33  ;;  %v23091_v59 = vand.u32 4294901760, %v19069_v33  ;;  %v19107_v39 = vpack.c.bf16 %v19069_v33, %v19067_v27  ;;  %v19113_v60 = vshrl.u32 %v379_v46, 7 }
 0x107   : > { %v2016_v20 = vand.u32 4294901760, %v2015_v9  ;;  %v23560_v61 = vand.u32 4294901760, %v18828_v16 }
 0x108   : > { %23547 = vst [vmem:[#allocation5_spill] sm:$0xff] %v19026_v19  ;;  %16079 = vmatprep.subr.bf16.mxu1 %v19026_v19  ;;  %v2022_v50 = vsub.f32 %v19069_v33, %v23091_v59  ;;  %23559 = vst [vmem:[#allocation20_spill] sm:$0xff] %v19113_v60  ;;  %v381_v45 = vsub.s32 0, %v19113_v60 }
 0x109   : > { %13505 = vmatmul.mubr.f32.gmra.mrb[12].mxu0 %v18696_v4  ;;  %v19036_v4 = vsub.f32 %v18826_v26, %v23550_v44  ;;  %16081 = vmatpush3.bf16.msra.mxu1 %v19026_v19  ;;  %v19118_v62 = vsub.f32 %v18828_v16, %v23560_v61  ;;  %v23561_v44 = vand.u32 4294901760, %v18833_v48  ;;  %v362_v16 = vld [vmem:[%s23009_s5] sm:$0xff] }
 0x10a   : > { %13507 = vmatprep.mubr.f32.mxu0 %v18700_v32  ;;  %v1729_v32 = vand.u32 4294901760, %v1684_v28  ;;  %v2023_v35 = vand.u32 4294901760, %v2022_v50 }
 0x10b   : > { %23551 = vst [vmem:[#allocation12_spill] sm:$0xff] %v19036_v4  ;;  %v23103_v3 = vand.u32 4294901760, %v19036_v4  ;;  %v19099_v25 = vpack.c.bf16 %v19036_v4, %v19031_v0 }
 0x10c   : > { %v19042_v53 = vpack.c.bf16 %v1732_v6, %v1729_v32  ;;  %v19081_v24 = vsub.f32 %v1684_v28, %v1729_v32  ;;  %v19087_v8 = vpack.c.bf16 %v2023_v35, %v2016_v20  ;;  %v19123_v28 = vsub.f32 %v18833_v48, %v23561_v44 }
 0x10d   : > { %13508 = vmatmul.mubr.f32.gmra.mrb[14].mxu0 %v18722_v41  ;;  %v23104_v41 = vand.u32 4294901760, %v19031_v0  ;;  %v1938_v30 = vsub.f32 %v19036_v4, %v23103_v3  ;;  %v23562_v32 = vand.u32 4294901760, %v18836_v12 }
 0x10e   : > { %23552 = vst [vmem:[#allocation6_spill] sm:$0xff] %v19042_v53  ;;  %16083 = vmatprep.subr.bf16.mxu1 %v19042_v53  ;;  %23557 = vst [vmem:[#allocation19_spill] sm:$0xff] %v19081_v24  ;;  %v23090_v10 = vand.u32 4294901760, %v19081_v24  ;;  %v19111_v57 = vpack.c.bf16 %v19083_v36, %v19081_v24  ;;  %v23099_v48 = vand.u32 4294901760, %v19123_v28 }
 0x10f   : > { %v1931_v42 = vsub.f32 %v19031_v0, %v23104_v41  ;;  %v1939_v26 = vand.u32 4294901760, %v1938_v30  ;;  %16085 = vmatpush3.bf16.msra.mxu1 %v19042_v53  ;;  %v19129_v6 = vsub.f32 %v18836_v12, %v23562_v32 }
 0x110   : > { %v2029_v13 = vsub.f32 %v19081_v24, %v23090_v10  ;;  %v1952_v34 = vsub.f32 %v19123_v28, %v23099_v48 }
 0x111   : > { %v1932_v17 = vand.u32 4294901760, %v1931_v42  ;;  %v23563_v42 = vand.u32 4294901760, %v18838_v15  ;;  %v23096_v37 = vand.u32 4294901760, %v19129_v6 }
 0x112   : > { %v2030_v54 = vand.u32 4294901760, %v2029_v13  ;;  %v23564_v13 = vand.u32 4294901760, %v18859_v23  ;;  %v1953_v32 = vand.u32 4294901760, %v1952_v34 }
 0x113   : > { %v19052_v58 = vpack.c.bf16 %v1939_v26, %v1932_v17  ;;  %v19134_v30 = vsub.f32 %v18838_v15, %v23563_v42  ;;  %v23100_v17 = vand.u32 4294901760, %v19118_v62  ;;  %v19141_v26 = vrot.slane %v362_v16, %v381_v45 }
 0x114   : > { %v19095_v18 = vpack.c.bf16 %v2037_v21, %v2030_v54  ;;  %v1959_v50 = vsub.f32 %v19129_v6, %v23096_v37  ;;  %v19162_v31 = vsub.f32 %v18859_v23, %v23564_v13  ;;  %v23565_v21 = vand.u32 4294901760, %v18861_v29 }
 0x115   : > { %16087 = vmatprep.subr.bf16.mxu1 %v19052_v58  ;;  %v23095_v12 = vand.u32 4294901760, %v19134_v30  ;;  %v1945_v15 = vsub.f32 %v19118_v62, %v23100_v17 }
 0x116   : > { %v19169_v46 = vsub.f32 %v18861_v29, %v23565_v21  ;;  %v1960_v23 = vand.u32 4294901760, %v1959_v50  ;;  %v23098_v29 = vand.u32 4294901760, %v19162_v31 }
 0x117   : > { %v1966_v20 = vsub.f32 %v19134_v30, %v23095_v12  ;;  %v1946_v45 = vand.u32 4294901760, %v1945_v15 }
 0x118   : > { %v23102_v34 = vand.u32 4294901760, %v19169_v46 }
 0x119   : > { %v16090_v10 = vpack.c.bf16 %v1953_v32, %v1946_v45  ;;  %v1973_v32 = vsub.f32 %v19162_v31, %v23098_v29 }
 0x1c4   : > { %v13488_v51 = vpop.f32.mrb[0].mxu0 }
 0x1c5   : > { %v17398_v40 = vadd.f32 %v13488_v51, %v19141_v26  ;;  %v1575_v9 = vpop.f32.mrb[1].mxu0 }
 0x1c6   : > { %v17399_v35 = vadd.f32 %v1575_v9, %v19141_v26  ;;  %v1967_v9 = vand.u32 4294901760, %v1966_v20 }
 0x1c7   : > { %v19164_v54 = vand.u32 4294901760, %v17398_v40 }
 0x1c8   : > { %v19171_v61 = vand.u32 4294901760, %v17399_v35  ;;  %v13491_v44 = vpop.f32.mrb[2].mxu0 }
 0x1c9   : > { %v19174_v42 = vsub.f32 %v17398_v40, %v19164_v54  ;;  %v17400_v16 = vadd.f32 %v13491_v44, %v19141_v26  ;;  %v1587_v51 = vpop.f32.mrb[3].mxu0  ;;  %v23566_v40 = vand.u32 4294901760, %v18878_v55 }
 0x1ca   : > { %v19178_v13 = vsub.f32 %v17399_v35, %v19171_v61  ;;  %v17401_v52 = vadd.f32 %v1587_v51, %v19141_v26  ;;  %v23567_v51 = vand.u32 4294901760, %v18880_v2 }
 0x1cb   : > { %v19182_v21 = vand.u32 4294901760, %v17400_v16  ;;  %v23097_v15 = vand.u32 4294901760, %v19174_v42  ;;  %v19189_v44 = vsub.f32 %v18878_v55, %v23566_v40  ;;  %v19206_v40 = vpack.c.bf16 %v1967_v9, %v1960_v23 }
 0x1cc   : > { %v19191_v50 = vand.u32 4294901760, %v17401_v52  ;;  %v13494_v20 = vpop.f32.mrb[4].mxu0  ;;  %v23101_v35 = vand.u32 4294901760, %v19178_v13  ;;  %v19197_v59 = vsub.f32 %v18880_v2, %v23567_v51  ;;  %v1980_v23 = vsub.f32 %v19169_v46, %v23102_v34 }
 0x1cd   : > { %v19200_v49 = vsub.f32 %v17400_v16, %v19182_v21  ;;  %v17402_v47 = vadd.f32 %v13494_v20, %v19141_v26  ;;  %v1599_v63 = vpop.f32.mrb[5].mxu0  ;;  %v1780_v55 = vsub.f32 %v19174_v42, %v23097_v15 }
 0x1ce   : > { %v19209_v12 = vsub.f32 %v17401_v52, %v19191_v50  ;;  %v17403_v45 = vadd.f32 %v1599_v63, %v19141_v26  ;;  %v1770_v2 = vsub.f32 %v19178_v13, %v23101_v35  ;;  %v23110_v52 = vand.u32 4294901760, %v19189_v44 }
 0x1cf   : > { %v19218_v16 = vand.u32 4294901760, %v17402_v47  ;;  %v23105_v20 = vand.u32 4294901760, %v19200_v49  ;;  %v1781_v35 = vand.u32 4294901760, %v1780_v55 }
 0x1d0   : > { %v19225_v9 = vand.u32 4294901760, %v17403_v45  ;;  %v13497_v63 = vpop.f32.mrb[6].mxu0  ;;  %v1771_v51 = vand.u32 4294901760, %v1770_v2  ;;  %v23108_v37 = vand.u32 4294901760, %v19209_v12 }
 0x1d1   : > { %v19230_v29 = vsub.f32 %v17402_v47, %v19218_v16  ;;  %v17404_v48 = vadd.f32 %v13497_v63, %v19141_v26  ;;  %v1611_v17 = vpop.f32.mrb[7].mxu0  ;;  %v1800_v34 = vsub.f32 %v19200_v49, %v23105_v20  ;;  %v1974_v47 = vand.u32 4294901760, %v1973_v32 }
 0x1d2   : > { %v19237_v3 = vsub.f32 %v17403_v45, %v19225_v9  ;;  %v17405_v2 = vadd.f32 %v1611_v17, %v19141_v26  ;;  %13542 = vmatprep.mubr.f32.mxu1 %v1771_v51  ;;  %v1790_v41 = vsub.f32 %v19209_v12, %v23108_v37  ;;  %v1981_v63 = vand.u32 4294901760, %v1980_v23 }
 0x1d3   : > { %v19243_v15 = vand.u32 4294901760, %v17404_v48  ;;  %13543 = vmatmul.mubr.f32.vlgmr.msra.gmra.mrb[0].mxu1 %v1781_v35  ;;  %v1987_v20 = vsub.f32 %v19189_v44, %v23110_v52  ;;  %v23568_v32 = vand.u32 4294901760, %v19197_v59  ;;  %v1801_v36 = vand.u32 4294901760, %v1800_v34 }
 0x1d4   : > { %v19249_v45 = vand.u32 4294901760, %v17405_v2  ;;  %v13500_v60 = vpop.f32.mrb[8].mxu0  ;;  %16089 = vmatpush3.bf16.msra.mxu1 %v19052_v58  ;;  %v1791_v17 = vand.u32 4294901760, %v1790_v41  ;;  %v23115_v51 = vand.u32 4294901760, %v19237_v3  ;;  %v23569_v52 = vand.u32 4294901760, %v19230_v29 }
 0x1d5   : > { %v1994_v37 = vsub.f32 %v19197_v59, %v23568_v32  ;;  %v19257_v35 = vsub.f32 %v17404_v48, %v19243_v15  ;;  %v17406_v23 = vadd.f32 %v13500_v60, %v19141_v26  ;;  %v1623_v55 = vpop.f32.mrb[9].mxu0  ;;  %16091 = vmatprep.subr.bf16.mxu1 %v16090_v10  ;;  %v16098_v34 = vpack.c.bf16 %v1981_v63, %v1974_v47 }
 0x1d6   : > { %v1820_v24 = vsub.f32 %v19230_v29, %v23569_v52  ;;  %v19264_v41 = vsub.f32 %v17405_v2, %v19249_v45  ;;  %v17407_v58 = vadd.f32 %v1623_v55, %v19141_v26  ;;  %13545 = vmatprep.mubr.f32.mxu1 %v1791_v17  ;;  %v1810_v48 = vsub.f32 %v19237_v3, %v23115_v51 }
 0x1d7   : > { %v19270_v32 = vand.u32 4294901760, %v17406_v23  ;;  %13546 = vmatmul.mubr.f32.gmra.mrb[2].mxu1 %v1801_v36  ;;  %v23118_v60 = vand.u32 4294901760, %v19257_v35  ;;  %v1988_v33 = vand.u32 4294901760, %v1987_v20  ;;  %v1995_v55 = vand.u32 4294901760, %v1994_v37 }
 0x1d8   : > { %v19273_v27 = vand.u32 4294901760, %v17407_v58  ;;  %v13503_v52 = vpop.f32.mrb[10].mxu0  ;;  %16093 = vmatpush3.bf16.msra.mxu1 %v16090_v10  ;;  %v1811_v2 = vand.u32 4294901760, %v1810_v48  ;;  %v23119_v7 = vand.u32 4294901760, %v19264_v41  ;;  %v1821_v4 = vand.u32 4294901760, %v1820_v24 }
 0x1d9   : > { %v19277_v17 = vsub.f32 %v17406_v23, %v19270_v32  ;;  %v17408_v51 = vadd.f32 %v13503_v52, %v19141_v26  ;;  %v1635_v5 = vpop.f32.mrb[11].mxu0  ;;  %16095 = vmatprep.subr.bf16.mxu1 %v19206_v40  ;;  %v1840_v36 = vsub.f32 %v19257_v35, %v23118_v60  ;;  %v16102_v52 = vpack.c.bf16 %v1995_v55, %v1988_v33 }
 0x1da   : > { %v19285_v20 = vsub.f32 %v17407_v58, %v19273_v27  ;;  %v17409_v10 = vadd.f32 %v1635_v5, %v19141_v26  ;;  %13548 = vmatprep.mubr.f32.mxu1 %v1811_v2  ;;  %v1830_v37 = vsub.f32 %v19264_v41, %v23119_v7 }
 0x1db   : > { %v19291_v47 = vand.u32 4294901760, %v17408_v51  ;;  %13549 = vmatmul.mubr.f32.gmra.mrb[4].mxu1 %v1821_v4  ;;  %v23121_v24 = vand.u32 4294901760, %v19277_v17  ;;  %v1841_v7 = vand.u32 4294901760, %v1840_v36 }
 0x1dc   : > { %v19294_v63 = vand.u32 4294901760, %v17409_v10  ;;  %v13506_v23 = vpop.f32.mrb[12].mxu0  ;;  %16097 = vmatpush3.bf16.msra.mxu1 %v19206_v40  ;;  %v1831_v48 = vand.u32 4294901760, %v1830_v37  ;;  %v23124_v58 = vand.u32 4294901760, %v19285_v20 }
 0x1dd   : > { %v19299_v5 = vsub.f32 %v17408_v51, %v19291_v47  ;;  %v17410_v2 = vadd.f32 %v13506_v23, %v19141_v26  ;;  %v1647_v60 = vpop.f32.mrb[13].mxu0  ;;  %16099 = vmatprep.subr.bf16.mxu1 %v16098_v34  ;;  %v1860_v4 = vsub.f32 %v19277_v17, %v23121_v24 }
 0x1de   : > { %v19306_v0 = vsub.f32 %v17409_v10, %v19294_v63  ;;  %v17411_v40 = vadd.f32 %v1647_v60, %v19141_v26  ;;  %13551 = vmatprep.mubr.f32.mxu1 %v1831_v48  ;;  %v1850_v33 = vsub.f32 %v19285_v20, %v23124_v58 }
 0x1df   : > { %v19312_v51 = vand.u32 4294901760, %v17410_v2  ;;  %13552 = vmatmul.mubr.f32.gmra.mrb[6].mxu1 %v1841_v7  ;;  %v23127_v55 = vand.u32 4294901760, %v19299_v5  ;;  %v1861_v53 = vand.u32 4294901760, %v1860_v4 }
 0x1e0   : > { %v19315_v36 = vand.u32 4294901760, %v17411_v40  ;;  %v13509_v37 = vpop.f32.mrb[14].mxu0  ;;  %16101 = vmatpush3.bf16.msra.mxu1 %v16098_v34  ;;  %v1851_v23 = vand.u32 4294901760, %v1850_v33  ;;  %v1869_v10 = vand.u32 4294901760, %v19306_v0 }
 0x1e1   : > { %v19319_v24 = vsub.f32 %v17410_v2, %v19312_v51  ;;  %v17412_v60 = vadd.f32 %v13509_v37, %v19141_v26  ;;  %v1659_v48 = vpop.f32.mrb[15].mxu0  ;;  %16103 = vmatprep.subr.bf16.mxu1 %v16102_v52  ;;  %v1880_v7 = vsub.f32 %v19299_v5, %v23127_v55 }
 0x1e2   : > { %v19326_v58 = vsub.f32 %v17411_v40, %v19315_v36  ;;  %v17413_v34 = vadd.f32 %v1659_v48, %v19141_v26  ;;  %13554 = vmatprep.mubr.f32.mxu1 %v1851_v23  ;;  %v1870_v2 = vsub.f32 %v19306_v0, %v1869_v10 }
 0x1e3   : > { %v19332_v33 = vand.u32 4294901760, %v17412_v60  ;;  %13555 = vmatmul.mubr.f32.gmra.mrb[8].mxu1 %v1861_v53  ;;  %v1899_v4 = vand.u32 4294901760, %v19319_v24  ;;  %v1881_v26 = vand.u32 4294901760, %v1880_v7 }
 0x1e4   : > { %v19335_v37 = vand.u32 4294901760, %v17413_v34  ;;  %16105 = vmatpush3.bf16.msra.mxu1 %v16102_v52  ;;  %v1871_v19 = vand.u32 4294901760, %v1870_v2  ;;  %v1889_v55 = vand.u32 4294901760, %v19326_v58 }
 0x1e5   : > { %v19339_v40 = vsub.f32 %v17412_v60, %v19332_v33  ;;  %16107 = vmatprep.subr.bf16.mxu1 %v19073_v14  ;;  %v1900_v23 = vsub.f32 %v19319_v24, %v1899_v4 }
 0x1e6   : > { %v19346_v53 = vsub.f32 %v17413_v34, %v19335_v37  ;;  %13557 = vmatprep.mubr.f32.mxu1 %v1871_v19  ;;  %v1890_v52 = vsub.f32 %v19326_v58, %v1889_v55 }
 0x1e7   : > { %13558 = vmatmul.mubr.f32.gmra.mrb[10].mxu1 %v1881_v26  ;;  %v1919_v48 = vand.u32 4294901760, %v19339_v40  ;;  %v1901_v2 = vand.u32 4294901760, %v1900_v23  ;;  %v16122_v23 = vpack.c.bf16 %v19123_v28, %v19118_v62 }
 0x1e8   : > { %16109 = vmatpush3.bf16.msra.mxu1 %v19073_v14  ;;  %v1891_v60 = vand.u32 4294901760, %v1890_v52  ;;  %v1909_v7 = vand.u32 4294901760, %v19346_v53  ;;  %v23573_v52 = vld [vmem:[#allocation10_spill] sm:$0xff] }
 0x1e9   : > { %16111 = vmatprep.subr.bf16.mxu1 %v19087_v8  ;;  %v1920_v34 = vsub.f32 %v19339_v40, %v1919_v48 }
 0x1ea   : > { %13560 = vmatprep.mubr.f32.mxu1 %v1891_v60  ;;  %v1910_v19 = vsub.f32 %v19346_v53, %v1909_v7  ;;  %v23574_v60 = vand.u32 4294901760, %v23573_v52  ;;  %v23582_v52 = vand.u32 4294901760, %v19129_v6 }
 0x1eb   : > { %13561 = vmatmul.mubr.f32.gmra.mrb[12].mxu1 %v1901_v2  ;;  %v1921_v14 = vand.u32 4294901760, %v1920_v34  ;;  %v23575_v2 = vld [vmem:[#allocation12_spill] sm:$0xff] }
 0x1ec   : > { %16113 = vmatpush3.bf16.msra.mxu1 %v19087_v8  ;;  %v1911_v26 = vand.u32 4294901760, %v1910_v19  ;;  %v16126_v8 = vpack.c.bf16 %v19134_v30, %v19129_v6  ;;  %v23576_v34 = vand.u32 4294901760, %v23575_v2  ;;  %v23584_v2 = vand.u32 4294901760, %v19200_v49 }
 0x1ed   : > { %16115 = vmatprep.subr.bf16.mxu1 %v19095_v18  ;;  %v23589_v6 = vand.u32 4294901760, %v19264_v41 }
 0x1ee   : > { %13563 = vmatprep.mubr.f32.mxu1 %v1911_v26  ;;  %v16182_v19 = vpack.c.bf16 %v23576_v34, %v23574_v60  ;;  %v23577_v26 = vand.u32 4294901760, %v19178_v13  ;;  %v23583_v60 = vand.u32 4294901760, %v19134_v30  ;;  %v23588_v34 = vand.u32 4294901760, %v19230_v29 }
 0x1ef   : > { %13564 = vmatmul.mubr.f32.gmra.mrb[14].mxu1 %v1921_v14  ;;  %v23578_v14 = vand.u32 4294901760, %v19118_v62  ;;  %v23585_v62 = vand.u32 4294901760, %v19237_v3 }
 0x1f0   : > { %16117 = vmatpush3.bf16.msra.mxu1 %v19095_v18  ;;  %13598 = vmatprep.mubr.f32.mxu1 %v19171_v61  ;;  %v16130_v18 = vpack.c.bf16 %v19169_v46, %v19162_v31 }
 0x1f1   : > { %16119 = vmatprep.subr.bf16.mxu1 %v19099_v25 }
 0x1f3   : > { %13599 = vmatmul.mubr.f32.vlgmr.msra.gmra.mrb[0].mxu1 %v19164_v54 }
 0x1f4   : > { %13601 = vmatprep.mubr.f32.mxu1 %v19191_v50  ;;  %16121 = vmatpush3.bf16.msra.mxu1 %v19099_v25  ;;  %v16134_v25 = vpack.c.bf16 %v19197_v59, %v19189_v44 }
 0x1f5   : > { %16123 = vmatprep.subr.bf16.mxu1 %v16122_v23 }
 0x1f7   : > { %13602 = vmatmul.mubr.f32.gmra.mrb[2].mxu1 %v19182_v21 }
 0x1f8   : > { %13604 = vmatprep.mubr.f32.mxu1 %v19225_v9  ;;  %16125 = vmatpush3.bf16.msra.mxu1 %v16122_v23  ;;  %v23579_v23 = vand.u32 4294901760, %v19123_v28  ;;  %v23586_v28 = vand.u32 4294901760, %v19162_v31  ;;  %v23593_v31 = vand.u32 4294901760, %v19285_v20 }
 0x1f9   : > { %16127 = vmatprep.subr.bf16.mxu1 %v16126_v8 }
 0x1fb   : > { %13605 = vmatmul.mubr.f32.gmra.mrb[4].mxu1 %v19218_v16 }
 0x1fc   : > { %13607 = vmatprep.mubr.f32.mxu1 %v19249_v45  ;;  %16129 = vmatpush3.bf16.msra.mxu1 %v16126_v8  ;;  %v16186_v8 = vpack.c.bf16 %v23579_v23, %v23578_v14  ;;  %v23598_v23 = vand.u32 4294901760, %v19277_v17 }
 0x1fd   : > { %16131 = vmatprep.subr.bf16.mxu1 %v16130_v18 }
 0x1ff   : > { %13608 = vmatmul.mubr.f32.gmra.mrb[6].mxu1 %v19243_v15 }
 0x200   : > { %13610 = vmatprep.mubr.f32.mxu1 %v19273_v27  ;;  %16133 = vmatpush3.bf16.msra.mxu1 %v16130_v18  ;;  %v23580_v18 = vand.u32 4294901760, %v19174_v42 }
 0x201   : > { %16135 = vmatprep.subr.bf16.mxu1 %v16134_v25 }
 0x203   : > { %13611 = vmatmul.mubr.f32.gmra.mrb[8].mxu1 %v19270_v32 }
 0x204   : > { %13613 = vmatprep.mubr.f32.mxu1 %v19294_v63  ;;  %16137 = vmatpush3.bf16.msra.mxu1 %v16134_v25  ;;  %v23581_v25 = vand.u32 4294901760, %v19209_v12 }
 0x205   : > { %16139 = vmatprep.subr.bf16.mxu1 %v19103_v38 }
 0x207   : > { %13614 = vmatmul.mubr.f32.gmra.mrb[10].mxu1 %v19291_v47 }
 0x208   : > { %13616 = vmatprep.mubr.f32.mxu1 %v19315_v36  ;;  %16141 = vmatpush3.bf16.msra.mxu1 %v19103_v38  ;;  %v23570_v38 = vld [vmem:[#allocation8_spill] sm:$0xff] }
 0x209   : > { %16143 = vmatprep.subr.bf16.mxu1 %v19107_v39 }
 0x20b   : > { %13617 = vmatmul.mubr.f32.gmra.mrb[12].mxu1 %v19312_v51 }
 0x20c   : > { %13619 = vmatprep.mubr.f32.mxu1 %v19335_v37  ;;  %16145 = vmatpush3.bf16.msra.mxu1 %v19107_v39  ;;  %v23571_v39 = vld [vmem:[#allocation5_spill] sm:$0xff] }
 0x20d   : > { %16147 = vmatprep.subr.bf16.mxu1 %v19111_v57 }
 0x20f   : > { %13620 = vmatmul.mubr.f32.gmra.mrb[14].mxu1 %v19332_v33 }
 0x210   : > { %16149 = vmatpush3.bf16.msra.mxu1 %v19111_v57  ;;  %13654 = vmatprep.mubr.f32.mxu1 %v19178_v13  ;;  %v23572_v57 = vld [vmem:[#allocation6_spill] sm:$0xff]  ;;  %v16190_v13 = vpack.c.bf16 %v23583_v60, %v23582_v52  ;;  %v23606_v52 = vld [vmem:[#allocation9_spill] sm:$0xff] }
 0x211   : > { %16151 = vmatprep.subr.bf16.mxu1 %v18846_v1  ;;  %v335_v60 = vld [vmem:[%s19548_s27 + $0x28] sm:$0xff] }
 0x213   : > { %13655 = vmatmul.mubr.f32.vlgmr.msra.gmra.mrb[0].mxu1 %v19174_v42 }
 0x214   : > { %13657 = vmatprep.mubr.f32.mxu1 %v19209_v12  ;;  %16153 = vmatpush3.bf16.msra.mxu1 %v18846_v1  ;;  %v23587_v12 = vand.u32 4294901760, %v19169_v46  ;;  %v23594_v46 = vld [vmem:[#allocation13_spill] sm:$0xff] }
 0x215   : > { %16155 = vmatprep.subr.bf16.mxu1 %v18853_v43 }
 0x216   : > { %v16194_v42 = vpack.c.bf16 %v23587_v12, %v23586_v28 }
 0x217   : > { %13658 = vmatmul.mubr.f32.gmra.mrb[2].mxu1 %v19200_v49  ;;  %v23590_v49 = vand.u32 4294901760, %v19189_v44 }
 0x218   : > { %13660 = vmatprep.mubr.f32.mxu1 %v19237_v3  ;;  %16157 = vmatpush3.bf16.msra.mxu1 %v18853_v43  ;;  %v23591_v3 = vand.u32 4294901760, %v19197_v59  ;;  %v23599_v59 = vld [vmem:[#allocation7_spill] sm:$0xff] }
 0x219   : > { %16159 = vmatprep.subr.bf16.mxu1 %v18872_v11  ;;  %v23600_v44 = vand.u32 4294901760, %v23599_v59 }
 0x21a   : > { %v16198_v30 = vpack.c.bf16 %v23591_v3, %v23590_v49 }
 0x21b   : > { %13661 = vmatmul.mubr.f32.gmra.mrb[4].mxu1 %v19230_v29  ;;  %v23595_v29 = vand.u32 4294901760, %v23594_v46 }
 0x21c   : > { %13663 = vmatprep.mubr.f32.mxu1 %v19264_v41  ;;  %16161 = vmatpush3.bf16.msra.mxu1 %v18872_v11 }
 0x21d   : > { %16163 = vmatprep.subr.bf16.mxu1 %v18890_v22 }
 0x21f   : > { %13664 = vmatmul.mubr.f32.gmra.mrb[6].mxu1 %v19257_v35 }
 0x220   : > { %13666 = vmatprep.mubr.f32.mxu1 %v19285_v20  ;;  %16165 = vmatpush3.bf16.msra.mxu1 %v18890_v22 }
 0x221   : > { %16167 = vmatprep.subr.bf16.mxu1 %v23570_v38 }
 0x223   : > { %13667 = vmatmul.mubr.f32.gmra.mrb[8].mxu1 %v19277_v17  ;;  %v23604_v17 = vld [vmem:[#allocation19_spill] sm:$0xff] }
 0x224   : > { %13669 = vmatprep.mubr.f32.mxu1 %v19306_v0  ;;  %16169 = vmatpush3.bf16.msra.mxu1 %v23570_v38  ;;  %v23607_v0 = vand.u32 4294901760, %v23606_v52 }
 0x225   : > { %16171 = vmatprep.subr.bf16.mxu1 %v19022_v56 }
 0x227   : > { %13670 = vmatmul.mubr.f32.gmra.mrb[10].mxu1 %v19299_v5 }
 0x228   : > { %13672 = vmatprep.mubr.f32.mxu1 %v19326_v58  ;;  %16173 = vmatpush3.bf16.msra.mxu1 %v19022_v56 }
 0x229   : > { %16175 = vmatprep.subr.bf16.mxu1 %v23571_v39 }
 0x22b   : > { %13673 = vmatmul.mubr.f32.gmra.mrb[12].mxu1 %v19319_v24 }
 0x22c   : > { %13675 = vmatprep.mubr.f32.mxu1 %v19346_v53  ;;  %16177 = vmatpush3.bf16.msra.mxu1 %v23571_v39 }
 0x22d   : > { %16179 = vmatprep.subr.bf16.mxu1 %v23572_v57 }
 0x22f   : > { %13676 = vmatmul.mubr.f32.gmra.mrb[14].mxu1 %v19339_v40 }
 0x230   : > { %16181 = vmatpush3.bf16.msra.mxu1 %v23572_v57  ;;  %13710 = vmatprep.mubr.f32.mxu1 %v23577_v26  ;;  %v23596_v26 = vld [vmem:[#allocation15_spill] sm:$0xff] }
 0x231   : > { %16183 = vmatprep.subr.bf16.mxu1 %v16182_v19  ;;  %v23597_v41 = vand.u32 4294901760, %v23596_v26 }
 0x233   : > { %13711 = vmatmul.mubr.f32.vlgmr.msra.gmra.mrb[0].mxu1 %v23580_v18  ;;  %v16202_v14 = vpack.c.bf16 %v23597_v41, %v23595_v29  ;;  %v23603_v18 = vand.u32 4294901760, %v19299_v5  ;;  %v19609_v29 = vand.u32 4294901760, %v335_v60 }
 0x234   : > { %13713 = vmatprep.mubr.f32.mxu1 %v23581_v25  ;;  %16185 = vmatpush3.bf16.msra.mxu1 %v16182_v19  ;;  %v23592_v19 = vand.u32 4294901760, %v19257_v35  ;;  %v23601_v35 = vld [vmem:[#allocation16_spill] sm:$0xff]  ;;  %v23605_v25 = vand.u32 4294901760, %v23604_v17 }
 0x235   : > { %16187 = vmatprep.subr.bf16.mxu1 %v16186_v8  ;;  %v23602_v20 = vand.u32 4294901760, %v23601_v35  ;;  %23624 = vst [vmem:[#allocation13_spill] sm:$0xff] %v19609_v29 }
 0x237   : > { %13714 = vmatmul.mubr.f32.gmra.mrb[2].mxu1 %v23584_v2 }
 0x238   : > { %13716 = vmatprep.mubr.f32.mxu1 %v23585_v62  ;;  %16189 = vmatpush3.bf16.msra.mxu1 %v16186_v8  ;;  %v16206_v8 = vpack.c.bf16 %v23602_v20, %v23600_v44 }
 0x239   : > { %16191 = vmatprep.subr.bf16.mxu1 %v16190_v13 }
 0x23b   : > { %13717 = vmatmul.mubr.f32.gmra.mrb[4].mxu1 %v23588_v34 }
 0x23c   : > { %13719 = vmatprep.mubr.f32.mxu1 %v23589_v6  ;;  %16193 = vmatpush3.bf16.msra.mxu1 %v16190_v13 }
 0x23d   : > { %16195 = vmatprep.subr.bf16.mxu1 %v16194_v42 }
 0x23f   : > { %13720 = vmatmul.mubr.f32.gmra.mrb[6].mxu1 %v23592_v19 }
 0x240   : > { %13722 = vmatprep.mubr.f32.mxu1 %v23593_v31  ;;  %16197 = vmatpush3.bf16.msra.mxu1 %v16194_v42 }
 0x241   : > { %16199 = vmatprep.subr.bf16.mxu1 %v16198_v30 }
 0x243   : > { %13723 = vmatmul.mubr.f32.gmra.mrb[8].mxu1 %v23598_v23 }
 0x244   : > { %13725 = vmatprep.mubr.f32.mxu1 %v1869_v10  ;;  %16201 = vmatpush3.bf16.msra.mxu1 %v16198_v30  ;;  %v16210_v10 = vpack.c.bf16 %v23607_v0, %v23605_v25 }
 0x245   : > { %16203 = vmatprep.subr.bf16.mxu1 %v16202_v14 }
 0x247   : > { %13726 = vmatmul.mubr.f32.gmra.mrb[10].mxu1 %v23603_v18 }
 0x248   : > { %13728 = vmatprep.mubr.f32.mxu1 %v1889_v55  ;;  %16205 = vmatpush3.bf16.msra.mxu1 %v16202_v14 }
 0x249   : > { %16207 = vmatprep.subr.bf16.mxu1 %v16206_v8 }
 0x24b   : > { %13729 = vmatmul.mubr.f32.gmra.mrb[12].mxu1 %v1899_v4 }
 0x24c   : > { %13731 = vmatprep.mubr.f32.mxu1 %v1909_v7  ;;  %16209 = vmatpush3.bf16.msra.mxu1 %v16206_v8 }
 0x24d   : > { %16211 = vmatprep.subr.bf16.mxu1 %v16210_v10 }
 0x24f   : > { %13732 = vmatmul.mubr.f32.gmra.mrb[14].mxu1 %v1919_v48 }
 0x250   : > { %16213 = vmatpush3.bf16.msra.mxu1 %v16210_v10  ;;  %13766 = vmatprep.mubr.f32.mxu1 %v19171_v61 }
 0x251   : > { %16215 = vmatprep.subr.bf16.mxu1 %v18846_v1 }
 0x253   : > { %13767 = vmatmul.mubr.f32.vlgmr.msra.gmra.mrb[0].mxu1 %v19164_v54 }
 0x254   : > { %13769 = vmatprep.mubr.f32.mxu1 %v19191_v50  ;;  %16217 = vmatpush3.bf16.msra.mxu1 %v18846_v1  ;;  %v330_v1 = vld [vmem:[%s19548_s27] sm:$0xff] }
 0x255   : > { %16219 = vmatprep.subr.bf16.mxu1 %v18853_v43 }
 0x257   : > { %13770 = vmatmul.mubr.f32.gmra.mrb[2].mxu1 %v19182_v21 }
 0x258   : > { %13772 = vmatprep.mubr.f32.mxu1 %v19225_v9  ;;  %16221 = vmatpush3.bf16.msra.mxu1 %v18853_v43  ;;  %v19551_v43 = vand.u32 4294901760, %v330_v1 }
 0x259   : > { %16223 = vmatprep.subr.bf16.mxu1 %v18872_v11 }
 0x25a   : > { %23608 = vst [vmem:[#allocation21_spill] sm:$0xff] %v19551_v43 }
 0x25b   : > { %13773 = vmatmul.mubr.f32.gmra.mrb[4].mxu1 %v19218_v16 }
 0x25c   : > { %13775 = vmatprep.mubr.f32.mxu1 %v19249_v45  ;;  %16225 = vmatpush3.bf16.msra.mxu1 %v18872_v11  ;;  %v19554_v11 = vsub.f32 %v330_v1, %v19551_v43 }
 0x25d   : > { %16227 = vmatprep.subr.bf16.mxu1 %v18890_v22 }
 0x25e   : > { %23609 = vst [vmem:[#allocation11_spill] sm:$0xff] %v19554_v11 }
 0x25f   : > { %13776 = vmatmul.mubr.f32.gmra.mrb[6].mxu1 %v19243_v15 }
 0x260   : > { %13778 = vmatprep.mubr.f32.mxu1 %v19273_v27  ;;  %16229 = vmatpush3.bf16.msra.mxu1 %v18890_v22  ;;  %v19557_v22 = vand.u32 4294901760, %v19554_v11 }
 0x261   : > { %16231 = vmatprep.subr.bf16.mxu1 %v23570_v38 }
 0x262   : > { %23610 = vst [vmem:[#allocation22_spill] sm:$0xff] %v19557_v22 }
 0x263   : > { %13779 = vmatmul.mubr.f32.gmra.mrb[8].mxu1 %v19270_v32 }
 0x264   : > { %13781 = vmatprep.mubr.f32.mxu1 %v19294_v63  ;;  %16233 = vmatpush3.bf16.msra.mxu1 %v23570_v38 }
 0x265   : > { %16235 = vmatprep.subr.bf16.mxu1 %v19022_v56 }
 0x267   : > { %13782 = vmatmul.mubr.f32.gmra.mrb[10].mxu1 %v19291_v47 }
 0x268   : > { %13784 = vmatprep.mubr.f32.mxu1 %v19315_v36  ;;  %16237 = vmatpush3.bf16.msra.mxu1 %v19022_v56  ;;  %v3060_v56 = vsub.f32 %v19554_v11, %v19557_v22 }
 0x269   : > { %16239 = vmatprep.subr.bf16.mxu1 %v23571_v39 }
 0x26b   : > { %13785 = vmatmul.mubr.f32.gmra.mrb[12].mxu1 %v19312_v51 }
 0x26c   : > { %13787 = vmatprep.mubr.f32.mxu1 %v19335_v37  ;;  %16241 = vmatpush3.bf16.msra.mxu1 %v23571_v39 }
 0x26d   : > { %16243 = vmatprep.subr.bf16.mxu1 %v23572_v57 }
 0x26f   : > { %13788 = vmatmul.mubr.f32.gmra.mrb[14].mxu1 %v19332_v33 }
 0x270   : > { %16245 = vmatpush3.bf16.msra.mxu1 %v23572_v57  ;;  %13822 = vmatprep.mubr.f32.mxu1 %v19171_v61 }
 0x273   : > { %13823 = vmatmul.mubr.f32.vlgmr.msra.gmra.mrb[0].mxu1 %v19164_v54  ;;  %v331_v54 = vld [vmem:[%s19548_s27 + $0x8] sm:$0xff] }
 0x274   : > { %13825 = vmatprep.mubr.f32.mxu1 %v19191_v50  ;;  %v19565_v61 = vand.u32 4294901760, %v331_v54  ;;  %v333_v50 = vld [vmem:[%s19548_s27 + $0x18] sm:$0xff] }
 0x276   : > { %23612 = vst [vmem:[#allocation14_spill] sm:$0xff] %v19565_v61 }
 0x277   : > { %13826 = vmatmul.mubr.f32.gmra.mrb[2].mxu1 %v19182_v21  ;;  %v332_v21 = vld [vmem:[%s19548_s27 + $0x10] sm:$0xff] }
 0x278   : > { %13828 = vmatprep.mubr.f32.mxu1 %v19225_v9 }
 0x27b   : > { %13829 = vmatmul.mubr.f32.gmra.mrb[4].mxu1 %v19218_v16  ;;  %v19572_v16 = vand.u32 4294901760, %v332_v21 }
 0x27c   : > { %13831 = vmatprep.mubr.f32.mxu1 %v19249_v45  ;;  %v19577_v45 = vand.u32 4294901760, %v333_v50 }
 0x27d   : > { %23614 = vst [vmem:[#allocation18_spill] sm:$0xff] %v19572_v16 }
 0x27e   : > { %23616 = vst [vmem:[#allocation25_spill] sm:$0xff] %v19577_v45  ;;  %v19585_v55 = vsub.f32 %v333_v50, %v19577_v45 }
 0x27f   : > { %13832 = vmatmul.mubr.f32.gmra.mrb[6].mxu1 %v19243_v15  ;;  %v19569_v15 = vsub.f32 %v331_v54, %v19565_v61 }
 0x280   : > { %13834 = vmatprep.mubr.f32.mxu1 %v19273_v27  ;;  %v19561_v27 = vand.u32 4294901760, %v3060_v56  ;;  %23618 = vst [vmem:[#allocation27_spill] sm:$0xff] %v19585_v55  ;;  %v19603_v12 = vand.u32 4294901760, %v19585_v55 }
 0x281   : > { %23613 = vst [vmem:[#allocation17_spill] sm:$0xff] %v19569_v15  ;;  %v19575_v9 = vand.u32 4294901760, %v19569_v15 }
 0x282   : > { %23611 = vst [vmem:[#allocation23_spill] sm:$0xff] %v19561_v27  ;;  %13878 = vmatprep.mubr.f32.mxu0 %v19561_v27  ;;  %23622 = vst [vmem:[#allocation10_spill] sm:$0xff] %v19603_v12 }
 0x283   : > { %13835 = vmatmul.mubr.f32.gmra.mrb[8].mxu1 %v19270_v32  ;;  %23615 = vst [vmem:[#allocation24_spill] sm:$0xff] %v19575_v9 }
 0x284   : > { %13837 = vmatprep.mubr.f32.mxu1 %v19294_v63  ;;  %v19580_v63 = vsub.f32 %v332_v21, %v19572_v16 }
 0x286   : > { %23617 = vst [vmem:[#allocation26_spill] sm:$0xff] %v19580_v63  ;;  %v19591_v7 = vand.u32 4294901760, %v19580_v63 }
 0x287   : > { %13838 = vmatmul.mubr.f32.gmra.mrb[10].mxu1 %v19291_v47 }
 0x288   : > { %13840 = vmatprep.mubr.f32.mxu1 %v19315_v36  ;;  %v334_v36 = vld [vmem:[%s19548_s27 + $0x20] sm:$0xff]  ;;  %23619 = vst [vmem:[#allocation8_spill] sm:$0xff] %v19591_v7  ;;  %v3080_v35 = vsub.f32 %v19580_v63, %v19591_v7 }
 0x289   : > { %v19594_v57 = vand.u32 4294901760, %v334_v36 }
 0x28b   : > { %13841 = vmatmul.mubr.f32.gmra.mrb[12].mxu1 %v19312_v51  ;;  %v3070_v51 = vsub.f32 %v19569_v15, %v19575_v9  ;;  %23620 = vst [vmem:[#allocation5_spill] sm:$0xff] %v19594_v57  ;;  %v19618_v20 = vsub.f32 %v334_v36, %v19594_v57 }
 0x28c   : > { %13843 = vmatprep.mubr.f32.mxu1 %v19335_v37 }
 0x28d   : > { %v19600_v28 = vand.u32 4294901760, %v3070_v51  ;;  %23625 = vst [vmem:[#allocation15_spill] sm:$0xff] %v19618_v20  ;;  %v19633_v51 = vsub.f32 %v335_v60, %v19609_v29 }
 0x28f   : > { %13844 = vmatmul.mubr.f32.gmra.mrb[14].mxu1 %v19332_v33  ;;  %23621 = vst [vmem:[#allocation6_spill] sm:$0xff] %v19600_v28  ;;  %23627 = vst [vmem:[#allocation16_spill] sm:$0xff] %v19633_v51 }
 0x346   : > { %v13824_v32 = vpop.f32.mrb[0].mxu1 }
 0x347   : > { %v2980_v47 = vand.u32 4294901760, %v13824_v32  ;;  %v2878_v24 = vpop.f32.mrb[1].mxu1 }
 0x348   : > { %v2977_v58 = vand.u32 4294901760, %v2878_v24 }
 0x349   : > { %v3226_v5 = vsub.f32 %v13824_v32, %v2980_v47 }
 0x34a   : > { %v19588_v33 = vpack.c.bf16 %v2980_v47, %v2977_v58  ;;  %v3219_v4 = vsub.f32 %v2878_v24, %v2977_v58  ;;  %v13827_v37 = vpop.f32.mrb[2].mxu1 }
 0x34b   : > { %v3227_v40 = vand.u32 4294901760, %v3226_v5  ;;  %v2986_v53 = vand.u32 4294901760, %v13827_v37  ;;  %v2890_v48 = vpop.f32.mrb[3].mxu1 }
 0x34c   : > { %v3220_v38 = vand.u32 4294901760, %v3219_v4  ;;  %v2983_v39 = vand.u32 4294901760, %v2890_v48  ;;  %16247 = vmatprep.subr.bf16.mxu0 %v19588_v33  ;;  %v19597_v13 = vpack.c.bf16 %v3226_v5, %v3219_v4 }
 0x34d   : > { %v3228_v2 = vsub.f32 %v3226_v5, %v3227_v40  ;;  %v3240_v62 = vsub.f32 %v13827_v37, %v2986_v53  ;;  %16249 = vmatpush3.bf16.msra.mxu0 %v19588_v33 }
 0x34e   : > { %v3221_v42 = vsub.f32 %v3219_v4, %v3220_v38  ;;  %v19605_v34 = vpack.c.bf16 %v2986_v53, %v2983_v39  ;;  %v3233_v6 = vsub.f32 %v2890_v48, %v2983_v39  ;;  %v13830_v49 = vpop.f32.mrb[4].mxu1  ;;  %v19607_v3 = vpack.c.bf16 %v3227_v40, %v3220_v38 }
 0x34f   : > { %v3241_v30 = vand.u32 4294901760, %v3240_v62  ;;  %v2992_v19 = vand.u32 4294901760, %v13830_v49  ;;  %v2902_v31 = vpop.f32.mrb[5].mxu1  ;;  %v3229_v46 = vand.u32 4294901760, %v3228_v2 }
 0x350   : > { %23623 = vst [vmem:[#allocation12_spill] sm:$0xff] %v19607_v3  ;;  %v3234_v26 = vand.u32 4294901760, %v3233_v6  ;;  %v2989_v41 = vand.u32 4294901760, %v2902_v31  ;;  %16251 = vmatprep.subr.bf16.mxu0 %v19605_v34  ;;  %v3222_v14 = vand.u32 4294901760, %v3221_v42  ;;  %v19612_v23 = vpack.c.bf16 %v3240_v62, %v3233_v6 }
 0x351   : > { %v3242_v59 = vsub.f32 %v3240_v62, %v3241_v30  ;;  %v3254_v44 = vsub.f32 %v13830_v49, %v2992_v19  ;;  %16253 = vmatpush3.bf16.msra.mxu0 %v19605_v34 }
 0x352   : > { %v3235_v8 = vsub.f32 %v3233_v6, %v3234_v26  ;;  %v19620_v18 = vpack.c.bf16 %v2992_v19, %v2989_v41  ;;  %v3247_v17 = vsub.f32 %v2902_v31, %v2989_v41  ;;  %v13833_v25 = vpop.f32.mrb[6].mxu1  ;;  %v19622_v52 = vpack.c.bf16 %v3229_v46, %v3222_v14 }
 0x353   : > { %v3255_v0 = vand.u32 4294901760, %v3254_v44  ;;  %v2998_v10 = vand.u32 4294901760, %v13833_v25  ;;  %v2914_v1 = vpop.f32.mrb[7].mxu1  ;;  %v3243_v56 = vand.u32 4294901760, %v3242_v59  ;;  %v19624_v54 = vpack.c.bf16 %v3241_v30, %v3234_v26 }
 0x354   : > { %v3248_v21 = vand.u32 4294901760, %v3247_v17  ;;  %v2995_v50 = vand.u32 4294901760, %v2914_v1  ;;  %16255 = vmatprep.subr.bf16.mxu0 %v19620_v18  ;;  %v3236_v32 = vand.u32 4294901760, %v3235_v8  ;;  %v19627_v47 = vpack.c.bf16 %v3254_v44, %v3247_v17  ;;  %v336_v8 = vld [vmem:[%s19548_s27 + $0x30] sm:$0xff] }
 0x355   : > { %23626 = vst [vmem:[#allocation7_spill] sm:$0xff] %v19624_v54  ;;  %v3256_v24 = vsub.f32 %v3254_v44, %v3255_v0  ;;  %v3268_v58 = vsub.f32 %v13833_v25, %v2998_v10  ;;  %16257 = vmatpush3.bf16.msra.mxu0 %v19620_v18  ;;  %v19645_v31 = vand.u32 4294901760, %v3080_v35  ;;  %v19648_v46 = vand.u32 4294901760, %v19618_v20 }
 0x356   : > { %v3249_v36 = vsub.f32 %v3247_v17, %v3248_v21  ;;  %v19635_v4 = vpack.c.bf16 %v2998_v10, %v2995_v50  ;;  %v3261_v37 = vsub.f32 %v2914_v1, %v2995_v50  ;;  %v13836_v40 = vpop.f32.mrb[8].mxu1  ;;  %v19637_v53 = vpack.c.bf16 %v3243_v56, %v3236_v32 }
 0x357   : > { %v3269_v48 = vand.u32 4294901760, %v3268_v58  ;;  %v3004_v38 = vand.u32 4294901760, %v13836_v40  ;;  %v2926_v39 = vpop.f32.mrb[9].mxu1  ;;  %v3257_v2 = vand.u32 4294901760, %v3256_v24  ;;  %v19639_v62 = vpack.c.bf16 %v3255_v0, %v3248_v21  ;;  %23629 = vst [vmem:[#allocation9_spill] sm:$0xff] %v19645_v31  ;;  %23630 = vst [vmem:[#allocation28_spill] sm:$0xff] %v19648_v46 }
 0x358   : > { %v3262_v42 = vand.u32 4294901760, %v3261_v37  ;;  %v3001_v6 = vand.u32 4294901760, %v2926_v39  ;;  %16259 = vmatprep.subr.bf16.mxu0 %v19635_v4  ;;  %v3250_v60 = vand.u32 4294901760, %v3249_v36  ;;  %v19642_v49 = vpack.c.bf16 %v3268_v58, %v3261_v37 }
 0x359   : > { %23628 = vst [vmem:[#allocation19_spill] sm:$0xff] %v19639_v62  ;;  %v3270_v30 = vsub.f32 %v3268_v58, %v3269_v48  ;;  %v3282_v19 = vsub.f32 %v13836_v40, %v3004_v38  ;;  %16261 = vmatpush3.bf16.msra.mxu0 %v19635_v4  ;;  %v19662_v58 = vand.u32 4294901760, %v19633_v51  ;;  %v19664_v36 = vand.u32 4294901760, %v336_v8 }
 0x35a   : > { %v3263_v26 = vsub.f32 %v3261_v37, %v3262_v42  ;;  %v19650_v41 = vpack.c.bf16 %v3004_v38, %v3001_v6  ;;  %v3275_v14 = vsub.f32 %v2926_v39, %v3001_v6  ;;  %v13839_v59 = vpop.f32.mrb[10].mxu1  ;;  %v19652_v44 = vpack.c.bf16 %v3257_v2, %v3250_v60  ;;  %v337_v2 = vld [vmem:[%s19548_s27 + $0x38] sm:$0xff] }
 0x35b   : > { %v3283_v17 = vand.u32 4294901760, %v3282_v19  ;;  %v3010_v25 = vand.u32 4294901760, %v13839_v59  ;;  %v2938_v0 = vpop.f32.mrb[11].mxu1  ;;  %v3271_v10 = vand.u32 4294901760, %v3270_v30  ;;  %v19655_v1 = vpack.c.bf16 %v3269_v48, %v3262_v42  ;;  %23632 = vst [vmem:[#allocation30_spill] sm:$0xff] %v19662_v58  ;;  %23633 = vst [vmem:[#allocation31_spill] sm:$0xff] %v19664_v36 }
 0x35c   : > { %v3276_v35 = vand.u32 4294901760, %v3275_v14  ;;  %v3007_v56 = vand.u32 4294901760, %v2938_v0  ;;  %16263 = vmatprep.subr.bf16.mxu0 %v19650_v41  ;;  %v3264_v21 = vand.u32 4294901760, %v3263_v26  ;;  %v19658_v50 = vpack.c.bf16 %v3282_v19, %v3275_v14 }
 0x35d   : > { %23631 = vst [vmem:[#allocation29_spill] sm:$0xff] %v19655_v1  ;;  %v3284_v32 = vsub.f32 %v3282_v19, %v3283_v17  ;;  %v3296_v24 = vsub.f32 %v13839_v59, %v3010_v25  ;;  %16265 = vmatpush3.bf16.msra.mxu0 %v19650_v41 }
 0x35e   : > { %v3277_v37 = vsub.f32 %v3275_v14, %v3276_v35  ;;  %v19666_v40 = vpack.c.bf16 %v3010_v25, %v3007_v56  ;;  %v3289_v48 = vsub.f32 %v2938_v0, %v3007_v56  ;;  %v13842_v38 = vpop.f32.mrb[12].mxu1  ;;  %v19668_v39 = vpack.c.bf16 %v3271_v10, %v3264_v21 }
 0x35f   : > { %v3297_v42 = vand.u32 4294901760, %v3296_v24  ;;  %v3016_v6 = vand.u32 4294901760, %v13842_v38  ;;  %v2950_v60 = vpop.f32.mrb[13].mxu1  ;;  %v3285_v30 = vand.u32 4294901760, %v3284_v32  ;;  %v19671_v19 = vpack.c.bf16 %v3283_v17, %v3276_v35 }
 0x360   : > { %v3290_v26 = vand.u32 4294901760, %v3289_v48  ;;  %v3013_v59 = vand.u32 4294901760, %v2950_v60  ;;  %16267 = vmatprep.subr.bf16.mxu0 %v19666_v40  ;;  %v3278_v5 = vand.u32 4294901760, %v3277_v37  ;;  %v19674_v14 = vpack.c.bf16 %v3296_v24, %v3289_v48 }
 0x361   : > { %23634 = vst [vmem:[#allocation32_spill] sm:$0xff] %v19671_v19  ;;  %v3298_v25 = vsub.f32 %v3296_v24, %v3297_v42  ;;  %v3310_v0 = vsub.f32 %v13842_v38, %v3016_v6  ;;  %16269 = vmatpush3.bf16.msra.mxu0 %v19666_v40  ;;  %v19678_v10 = vsub.f32 %v336_v8, %v19664_v36  ;;  %v19680_v56 = vand.u32 4294901760, %v337_v2  ;;  %v338_v19 = vld [vmem:[%s19548_s27 + $0x40] sm:$0xff] }
 0x362   : > { %v3291_v21 = vsub.f32 %v3289_v48, %v3290_v26  ;;  %v19682_v17 = vpack.c.bf16 %v3016_v6, %v3013_v59  ;;  %v3303_v35 = vsub.f32 %v2950_v60, %v3013_v59  ;;  %v13845_v32 = vpop.f32.mrb[14].mxu1  ;;  %v19684_v27 = vpack.c.bf16 %v3285_v30, %v3278_v5 }
 0x363   : > { %23635 = vst [vmem:[#allocation33_spill] sm:$0xff] %v19678_v10  ;;  %23636 = vst [vmem:[#allocation34_spill] sm:$0xff] %v19680_v56  ;;  %v3311_v37 = vand.u32 4294901760, %v3310_v0  ;;  %v3022_v1 = vand.u32 4294901760, %v13845_v32  ;;  %v2962_v24 = vpop.f32.mrb[15].mxu1  ;;  %v3299_v38 = vand.u32 4294901760, %v3298_v25  ;;  %v19687_v62 = vpack.c.bf16 %v3297_v42, %v3290_v26 }
 0x364   : > { %v3304_v8 = vand.u32 4294901760, %v3303_v35  ;;  %v3019_v54 = vand.u32 4294901760, %v2962_v24  ;;  %16271 = vmatprep.subr.bf16.mxu0 %v19682_v17  ;;  %v3292_v48 = vand.u32 4294901760, %v3291_v21  ;;  %v19690_v6 = vpack.c.bf16 %v3310_v0, %v3303_v35  ;;  %v339_v25 = vld [vmem:[%s19548_s27 + $0x48] sm:$0xff]  ;;  %v340_v21 = vld [vmem:[%s19548_s27 + $0x50] sm:$0xff] }
 0x365   : > { %23637 = vst [vmem:[#allocation35_spill] sm:$0xff] %v19687_v62  ;;  %v3312_v60 = vsub.f32 %v3310_v0, %v3311_v37  ;;  %v3324_v59 = vsub.f32 %v13845_v32, %v3022_v1  ;;  %16273 = vmatpush3.bf16.msra.mxu0 %v19682_v17  ;;  %v19694_v5 = vsub.f32 %v337_v2, %v19680_v56  ;;  %v19696_v30 = vand.u32 4294901760, %v338_v19 }
 0x366   : > { %v3305_v42 = vsub.f32 %v3303_v35, %v3304_v8  ;;  %v19699_v26 = vpack.c.bf16 %v3022_v1, %v3019_v54  ;;  %v3317_v62 = vsub.f32 %v2962_v24, %v3019_v54  ;;  %v19701_v7 = vpack.c.bf16 %v3299_v38, %v3292_v48 }
 0x367   : > { %23638 = vst [vmem:[#allocation36_spill] sm:$0xff] %v19694_v5  ;;  %23639 = vst [vmem:[#allocation37_spill] sm:$0xff] %v19696_v30  ;;  %v3325_v9 = vand.u32 4294901760, %v3324_v59  ;;  %v19705_v0 = vand.u32 4294901760, %v19678_v10  ;;  %v3313_v32 = vand.u32 4294901760, %v3312_v60  ;;  %v19707_v3 = vpack.c.bf16 %v3311_v37, %v3304_v8  ;;  %v341_v37 = vld [vmem:[%s19548_s27 + $0x58] sm:$0xff] }
 0x368   : > { %23640 = vst [vmem:[#allocation38_spill] sm:$0xff] %v19699_v26  ;;  %v3318_v2 = vand.u32 4294901760, %v3317_v62  ;;  %16275 = vmatprep.subr.bf16.mxu0 %v19699_v26  ;;  %v19710_v22 = vand.u32 4294901760, %v339_v25  ;;  %v3306_v1 = vand.u32 4294901760, %v3305_v42  ;;  %v19712_v35 = vpack.c.bf16 %v3324_v59, %v3317_v62  ;;  %v342_v42 = vld [vmem:[%s19548_s27 + $0x60] sm:$0xff] }
 0x369   : > { %23641 = vst [vmem:[#allocation39_spill] sm:$0xff] %v19705_v0  ;;  %23642 = vst [vmem:[#allocation40_spill] sm:$0xff] %v19707_v3  ;;  %v3326_v54 = vsub.f32 %v3324_v59, %v3325_v9  ;;  %16277 = vmatpush3.bf16.msra.mxu0 %v19699_v26  ;;  %v3100_v24 = vsub.f32 %v19618_v20, %v19648_v46  ;;  %v19718_v38 = vsub.f32 %v338_v19, %v19696_v30 }
 0x36a   : > { %23643 = vst [vmem:[#allocation41_spill] sm:$0xff] %v19710_v22  ;;  %v19720_v48 = vand.u32 4294901760, %v340_v21  ;;  %v3319_v8 = vsub.f32 %v3317_v62, %v3318_v2  ;;  %16279 = vmatprep.subr.bf16.mxu0 %v19622_v52  ;;  %v19724_v60 = vpack.c.bf16 %v3313_v32, %v3306_v1  ;;  %v19727_v3 = vpack.c.bf16 %v3325_v9, %v3318_v2 }
 0x36b   : > { %23644 = vst [vmem:[#allocation42_spill] sm:$0xff] %v19718_v38  ;;  %v23647_v59 = vsub.f32 %v19585_v55, %v19603_v12  ;;  %v3110_v19 = vsub.f32 %v19633_v51, %v19662_v58  ;;  %v19737_v46 = vand.u32 4294901760, %v19694_v5  ;;  %v3327_v62 = vand.u32 4294901760, %v3326_v54 }
 0x36c   : > { %23645 = vst [vmem:[#allocation43_spill] sm:$0xff] %v19720_v48  ;;  %23646 = vst [vmem:[#allocation44_spill] sm:$0xff] %v19727_v3  ;;  %13879 = vmatmul.mubr.f32.vlgmr.msra.gmra.mrb[16].mxu0 %v19600_v28  ;;  %v3120_v9 = vsub.f32 %v19678_v10, %v19705_v0  ;;  %v19743_v32 = vsub.f32 %v339_v25, %v19710_v22  ;;  %v19745_v2 = vand.u32 4294901760, %v341_v37  ;;  %v3320_v1 = vand.u32 4294901760, %v3319_v8  ;;  %v343_v0 = vld [vmem:[%s19548_s27 + $0x68] sm:$0xff]  ;;  %v344_v8 = vld [vmem:[%s19548_s27 + $0x70] sm:$0xff] }
 0x36d   : > { %v19732_v26 = vand.u32 4294901760, %v23647_v59  ;;  %23649 = vst [vmem:[#allocation46_spill] sm:$0xff] %v19737_v46  ;;  %16281 = vmatpush3.bf16.msra.mxu0 %v19622_v52  ;;  %13881 = vmatprep.mubr.f32.mxu0 %v19645_v31  ;;  %v19749_v59 = vand.u32 4294901760, %v3100_v24  ;;  %v19752_v3 = vand.u32 4294901760, %v19718_v38  ;;  %v19755_v54 = vsub.f32 %v340_v21, %v19720_v48 }
 0x36e   : > { %23650 = vst [vmem:[#allocation47_spill] sm:$0xff] %v19743_v32  ;;  %23651 = vst [vmem:[#allocation48_spill] sm:$0xff] %v19745_v2  ;;  %v19757_v28 = vand.u32 4294901760, %v342_v42  ;;  %16283 = vmatprep.subr.bf16.mxu0 %v19637_v53  ;;  %v16306_v25 = vpack.c.bf16 %v3327_v62, %v3320_v1  ;;  %v19762_v58 = vand.u32 4294901760, %v3110_v19  ;;  %v3130_v52 = vsub.f32 %v19694_v5, %v19737_v46 }
 0x36f   : > { %23648 = vst [vmem:[#allocation45_spill] sm:$0xff] %v19732_v26  ;;  %23652 = vst [vmem:[#allocation49_spill] sm:$0xff] %v19749_v59  ;;  %v19767_v24 = vand.u32 4294901760, %v3120_v9  ;;  %v19770_v21 = vand.u32 4294901760, %v19743_v32  ;;  %v19773_v31 = vsub.f32 %v341_v37, %v19745_v2  ;;  %v19775_v12 = vand.u32 4294901760, %v343_v0 }
 0x370   : > { %23653 = vst [vmem:[#allocation50_spill] sm:$0xff] %v19752_v3  ;;  %23654 = vst [vmem:[#allocation51_spill] sm:$0xff] %v19755_v54  ;;  %13882 = vmatmul.mubr.f32.gmra.mrb[18].mxu0 %v19732_v26  ;;  %v3140_v19 = vsub.f32 %v19718_v38, %v19752_v3  ;;  %v19782_v62 = vand.u32 4294901760, %v19755_v54  ;;  %v19785_v9 = vsub.f32 %v342_v42, %v19757_v28  ;;  %v19787_v1 = vand.u32 4294901760, %v344_v8  ;;  %v345_v26 = vld [vmem:[%s19548_s27 + $0x78] sm:$0xff] }
 0x371   : > { %23655 = vst [vmem:[#allocation52_spill] sm:$0xff] %v19757_v28  ;;  %23656 = vst [vmem:[#allocation53_spill] sm:$0xff] %v19762_v58  ;;  %16285 = vmatpush3.bf16.msra.mxu0 %v19637_v53  ;;  %13884 = vmatprep.mubr.f32.mxu0 %v19749_v59  ;;  %v19791_v37 = vand.u32 4294901760, %v3130_v52  ;;  %v3150_v53 = vsub.f32 %v19743_v32, %v19770_v21  ;;  %v19797_v59 = vand.u32 4294901760, %v19773_v31  ;;  %v19802_v42 = vand.u32 4294901760, %v345_v26 }
 0x372   : > { %23657 = vst [vmem:[#allocation54_spill] sm:$0xff] %v19767_v24  ;;  %23658 = vst [vmem:[#allocation55_spill] sm:$0xff] %v19770_v21  ;;  %16287 = vmatprep.subr.bf16.mxu0 %v19652_v44  ;;  %v19800_v3 = vsub.f32 %v343_v0, %v19775_v12  ;;  %v19806_v46 = vand.u32 4294901760, %v3140_v19  ;;  %v3160_v52 = vsub.f32 %v19755_v54, %v19782_v62 }
 0x373   : > { %23659 = vst [vmem:[#allocation56_spill] sm:$0xff] %v19773_v31  ;;  %23660 = vst [vmem:[#allocation57_spill] sm:$0xff] %v19775_v12  ;;  %v19814_v21 = vsub.f32 %v344_v8, %v19787_v1  ;;  %v19818_v0 = vand.u32 4294901760, %v3150_v53 }
 0x374   : > { %23661 = vst [vmem:[#allocation58_spill] sm:$0xff] %v19782_v62  ;;  %23662 = vst [vmem:[#allocation59_spill] sm:$0xff] %v19785_v9  ;;  %13885 = vmatmul.mubr.f32.gmra.mrb[20].mxu0 %v19762_v58  ;;  %v19811_v58 = vand.u32 4294901760, %v19785_v9  ;;  %v19823_v19 = vand.u32 4294901760, %v19800_v3  ;;  %v19830_v8 = vand.u32 4294901760, %v3160_v52 }
 0x375   : > { %23663 = vst [vmem:[#allocation60_spill] sm:$0xff] %v19787_v1  ;;  %23664 = vst [vmem:[#allocation61_spill] sm:$0xff] %v19791_v37  ;;  %16289 = vmatpush3.bf16.msra.mxu0 %v19652_v44  ;;  %13887 = vmatprep.mubr.f32.mxu0 %v19767_v24  ;;  %v3170_v44 = vsub.f32 %v19773_v31, %v19797_v59  ;;  %v19826_v24 = vsub.f32 %v345_v26, %v19802_v42  ;;  %v19835_v53 = vand.u32 4294901760, %v19814_v21 }
 0x376   : > { %23665 = vst [vmem:[#allocation62_spill] sm:$0xff] %v19797_v59  ;;  %23666 = vst [vmem:[#allocation63_spill] sm:$0xff] %v19800_v3  ;;  %16291 = vmatprep.subr.bf16.mxu0 %v19668_v39  ;;  %v3190_v26 = vsub.f32 %v19800_v3, %v19823_v19 }
 0x377   : > { %23667 = vst [vmem:[#allocation64_spill] sm:$0xff] %v19802_v42  ;;  %23668 = vst [vmem:[#allocation65_spill] sm:$0xff] %v19806_v46  ;;  %v19839_v59 = vand.u32 4294901760, %v3170_v44 }
 0x378   : > { %23669 = vst [vmem:[#allocation66_spill] sm:$0xff] %v19811_v58  ;;  %23670 = vst [vmem:[#allocation67_spill] sm:$0xff] %v19814_v21  ;;  %13888 = vmatmul.mubr.f32.gmra.mrb[22].mxu0 %v19791_v37  ;;  %v3180_v37 = vsub.f32 %v19785_v9, %v19811_v58  ;;  %v19854_v44 = vand.u32 4294901760, %v3190_v26 }
 0x379   : > { %23671 = vst [vmem:[#allocation68_spill] sm:$0xff] %v19818_v0  ;;  %23672 = vst [vmem:[#allocation69_spill] sm:$0xff] %v19823_v19  ;;  %16293 = vmatpush3.bf16.msra.mxu0 %v19668_v39  ;;  %13890 = vmatprep.mubr.f32.mxu0 %v19806_v46  ;;  %v19844_v39 = vand.u32 4294901760, %v19826_v24  ;;  %v3200_v46 = vsub.f32 %v19814_v21, %v19835_v53 }
 0x37a   : > { %23673 = vst [vmem:[#allocation70_spill] sm:$0xff] %v19826_v24  ;;  %23674 = vst [vmem:[#allocation71_spill] sm:$0xff] %v19830_v8  ;;  %16295 = vmatprep.subr.bf16.mxu0 %v19684_v27  ;;  %v19848_v52 = vand.u32 4294901760, %v3180_v37 }
 0x37b   : > { %23675 = vst [vmem:[#allocation72_spill] sm:$0xff] %v19835_v53  ;;  %23676 = vst [vmem:[#allocation73_spill] sm:$0xff] %v19839_v59 }
 0x37c   : > { %13891 = vmatmul.mubr.f32.gmra.mrb[24].mxu0 %v19818_v0  ;;  %23677 = vst [vmem:[#allocation74_spill] sm:$0xff] %v19844_v39  ;;  %23678 = vst [vmem:[#allocation75_spill] sm:$0xff] %v19848_v52  ;;  %v3210_v0 = vsub.f32 %v19826_v24, %v19844_v39 }
 0x37d   : > { %16297 = vmatpush3.bf16.msra.mxu0 %v19684_v27  ;;  %13893 = vmatprep.mubr.f32.mxu0 %v19830_v8  ;;  %23679 = vst [vmem:[#allocation76_spill] sm:$0xff] %v19854_v44  ;;  %v19860_v27 = vand.u32 4294901760, %v3200_v46  ;;  %v19910_v46 = vld [vmem:[#allocation2 + $0x118] sm:$0xff] }
 0x37e   : > { %16299 = vmatprep.subr.bf16.mxu0 %v19701_v7  ;;  %v19864_v37 = vand.u32 4294901760, %v3210_v0 }
 0x37f   : > { %23680 = vst [vmem:[#allocation77_spill] sm:$0xff] %v19860_v27 }
 0x380   : > { %13894 = vmatmul.mubr.f32.gmra.mrb[26].mxu0 %v19839_v59  ;;  %23681 = vst [vmem:[#allocation78_spill] sm:$0xff] %v19864_v37 }
 0x381   : > { %16301 = vmatpush3.bf16.msra.mxu0 %v19701_v7  ;;  %13896 = vmatprep.mubr.f32.mxu0 %v19848_v52  ;;  %v19900_v7 = vld [vmem:[#allocation2 + $0x100] sm:$0xff] }
 0x382   : > { %16303 = vmatprep.subr.bf16.mxu0 %v19724_v60 }
 0x384   : > { %13897 = vmatmul.mubr.f32.gmra.mrb[28].mxu0 %v19854_v44 }
 0x385   : > { %16305 = vmatpush3.bf16.msra.mxu0 %v19724_v60  ;;  %13899 = vmatprep.mubr.f32.mxu0 %v19860_v27  ;;  %v23172_v60 = vand.u32 4294901760, %v19910_v46 }
 0x386   : > { %16307 = vmatprep.subr.bf16.mxu0 %v16306_v25 }
 0x388   : > { %13900 = vmatmul.mubr.f32.gmra.mrb[30].mxu0 %v19864_v37 }
 0x389   : > { %16309 = vmatpush3.bf16.msra.mxu0 %v16306_v25  ;;  %13934 = vmatprep.mubr.f32.mxu0 %v19551_v43 }
 0x38a   : > { %16311 = vmatprep.subr.bf16.mxu0 %v19597_v13 }
 0x38c   : > { %13935 = vmatmul.mubr.f32.vlgmr.msra.gmra.mrb[16].mxu0 %v19565_v61 }
 0x38d   : > { %16313 = vmatpush3.bf16.msra.mxu0 %v19597_v13  ;;  %13937 = vmatprep.mubr.f32.mxu0 %v19572_v16  ;;  %v19902_v13 = vld [vmem:[#allocation2 + $0x108] sm:$0xff] }
 0x38e   : > { %16315 = vmatprep.subr.bf16.mxu0 %v19612_v23 }
 0x390   : > { %13938 = vmatmul.mubr.f32.gmra.mrb[18].mxu0 %v19577_v45 }
 0x391   : > { %16317 = vmatpush3.bf16.msra.mxu0 %v19612_v23  ;;  %13940 = vmatprep.mubr.f32.mxu0 %v19594_v57  ;;  %v19904_v23 = vld [vmem:[#allocation2 + $0x110] sm:$0xff] }
 0x392   : > { %16319 = vmatprep.subr.bf16.mxu0 %v19627_v47 }
 0x394   : > { %13941 = vmatmul.mubr.f32.gmra.mrb[20].mxu0 %v19609_v29 }
 0x395   : > { %16321 = vmatpush3.bf16.msra.mxu0 %v19627_v47  ;;  %13943 = vmatprep.mubr.f32.mxu0 %v19664_v36  ;;  %v23174_v47 = vand.u32 4294901760, %v19900_v7 }
 0x396   : > { %16323 = vmatprep.subr.bf16.mxu0 %v19642_v49 }
 0x398   : > { %13944 = vmatmul.mubr.f32.gmra.mrb[22].mxu0 %v19680_v56 }
 0x399   : > { %16325 = vmatpush3.bf16.msra.mxu0 %v19642_v49  ;;  %13946 = vmatprep.mubr.f32.mxu0 %v19696_v30  ;;  %v23171_v49 = vand.u32 4294901760, %v19902_v13 }
 0x39a   : > { %16327 = vmatprep.subr.bf16.mxu0 %v19658_v50 }
 0x39c   : > { %13947 = vmatmul.mubr.f32.gmra.mrb[24].mxu0 %v19710_v22 }
 0x39d   : > { %16329 = vmatpush3.bf16.msra.mxu0 %v19658_v50  ;;  %13949 = vmatprep.mubr.f32.mxu0 %v19720_v48  ;;  %v23173_v50 = vand.u32 4294901760, %v19904_v23 }
 0x39e   : > { %16331 = vmatprep.subr.bf16.mxu0 %v19674_v14 }
 0x39f   : > { %v19930_v25 = vpack.c.bf16 %v23172_v60, %v23173_v50 }
 0x3a0   : > { %13950 = vmatmul.mubr.f32.gmra.mrb[26].mxu0 %v19745_v2 }
 0x3a1   : > { %16333 = vmatpush3.bf16.msra.mxu0 %v19674_v14  ;;  %13952 = vmatprep.mubr.f32.mxu0 %v19757_v28  ;;  %v19913_v14 = vld [vmem:[#allocation2 + $0x120] sm:$0xff] }
 0x3a2   : > { %16335 = vmatprep.subr.bf16.mxu0 %v19690_v6  ;;  %v23178_v0 = vand.u32 4294901760, %v19913_v14 }
 0x3a4   : > { %13953 = vmatmul.mubr.f32.gmra.mrb[28].mxu0 %v19775_v12 }
 0x3a5   : > { %16337 = vmatpush3.bf16.msra.mxu0 %v19690_v6  ;;  %13955 = vmatprep.mubr.f32.mxu0 %v19787_v1  ;;  %v19915_v6 = vld [vmem:[#allocation2 + $0x128] sm:$0xff] }
 0x3a6   : > { %16339 = vmatprep.subr.bf16.mxu0 %v19712_v35  ;;  %v23175_v26 = vand.u32 4294901760, %v19915_v6 }
 0x3a8   : > { %13956 = vmatmul.mubr.f32.gmra.mrb[30].mxu0 %v19802_v42  ;;  %v19949_v60 = vpack.c.bf16 %v23175_v26, %v23178_v0  ;;  %v23684_v0 = vld [vmem:[#allocation12_spill] sm:$0xff] }
 0x3a9   : > { %16341 = vmatpush3.bf16.msra.mxu0 %v19712_v35  ;;  %13990 = vmatprep.mubr.f32.mxu0 %v19554_v11  ;;  %v19923_v35 = vpack.c.bf16 %v23171_v49, %v23174_v47  ;;  %v19936_v11 = vld [vmem:[#allocation2 + $0x130] sm:$0xff]  ;;  %v19938_v49 = vld [vmem:[#allocation2 + $0x138] sm:$0xff] }
 0x3aa   : > { %16343 = vmatprep.subr.bf16.mxu0 %v19588_v33  ;;  %v23177_v50 = vand.u32 4294901760, %v19936_v11  ;;  %v23176_v47 = vand.u32 4294901760, %v19938_v49 }
 0x3ab   : > { %16439 = vmatprep.subr.bf16.mxu1 %v19923_v35 }
 0x3ac   : > { %13991 = vmatmul.mubr.f32.vlgmr.msra.gmra.mrb[16].mxu0 %v19569_v15  ;;  %16441 = vmatpush3.bf16.msra.mxu1 %v19923_v35  ;;  %v19963_v26 = vpack.c.bf16 %v23176_v47, %v23177_v50  ;;  %v23682_v47 = vld [vmem:[#allocation38_spill] sm:$0xff] }
 0x3ad   : > { %16345 = vmatpush3.bf16.msra.mxu0 %v19588_v33  ;;  %13993 = vmatprep.mubr.f32.mxu0 %v19580_v63  ;;  %v23683_v50 = vld [vmem:[#allocation22_spill] sm:$0xff] }
 0x3ae   : > { %16347 = vmatprep.subr.bf16.mxu0 %v19605_v34  ;;  %16443 = vmatprep.subr.bf16.mxu1 %v19930_v25 }
 0x3b0   : > { %13994 = vmatmul.mubr.f32.gmra.mrb[18].mxu0 %v19585_v55  ;;  %16445 = vmatpush3.bf16.msra.mxu1 %v19930_v25 }
 0x3b1   : > { %16349 = vmatpush3.bf16.msra.mxu0 %v19605_v34  ;;  %13996 = vmatprep.mubr.f32.mxu0 %v19618_v20 }
 0x3b2   : > { %16351 = vmatprep.subr.bf16.mxu0 %v19620_v18  ;;  %16447 = vmatprep.subr.bf16.mxu1 %v19949_v60 }
 0x3b4   : > { %13997 = vmatmul.mubr.f32.gmra.mrb[20].mxu0 %v19633_v51  ;;  %16449 = vmatpush3.bf16.msra.mxu1 %v19949_v60 }
 0x3b5   : > { %16353 = vmatpush3.bf16.msra.mxu0 %v19620_v18  ;;  %13999 = vmatprep.mubr.f32.mxu0 %v19678_v10 }
 0x3b6   : > { %16355 = vmatprep.subr.bf16.mxu0 %v19635_v4  ;;  %16451 = vmatprep.subr.bf16.mxu1 %v19963_v26 }
 0x3b8   : > { %14000 = vmatmul.mubr.f32.gmra.mrb[22].mxu0 %v19694_v5  ;;  %16453 = vmatpush3.bf16.msra.mxu1 %v19963_v26 }
 0x3b9   : > { %16357 = vmatpush3.bf16.msra.mxu0 %v19635_v4  ;;  %14002 = vmatprep.mubr.f32.mxu0 %v19718_v38 }
 0x3ba   : > { %16359 = vmatprep.subr.bf16.mxu0 %v19650_v41 }
 0x3bc   : > { %14003 = vmatmul.mubr.f32.gmra.mrb[24].mxu0 %v19743_v32  ;;  %v23691_v32 = vld [vmem:[#allocation30_spill] sm:$0xff] }
 0x3bd   : > { %16361 = vmatpush3.bf16.msra.mxu0 %v19650_v41  ;;  %14005 = vmatprep.mubr.f32.mxu0 %v19755_v54  ;;  %v23688_v54 = vld [vmem:[#allocation10_spill] sm:$0xff] }
 0x3be   : > { %16363 = vmatprep.subr.bf16.mxu0 %v19666_v40 }
 0x3c0   : > { %14006 = vmatmul.mubr.f32.gmra.mrb[26].mxu0 %v19773_v31  ;;  %v23685_v31 = vld [vmem:[#allocation24_spill] sm:$0xff] }
 0x3c1   : > { %16365 = vmatpush3.bf16.msra.mxu0 %v19666_v40  ;;  %14008 = vmatprep.mubr.f32.mxu0 %v19785_v9  ;;  %v23686_v9 = vld [vmem:[#allocation8_spill] sm:$0xff] }
 0x3c2   : > { %16367 = vmatprep.subr.bf16.mxu0 %v19682_v17 }
 0x3c4   : > { %14009 = vmatmul.mubr.f32.gmra.mrb[28].mxu0 %v19800_v3  ;;  %v23687_v3 = vld [vmem:[#allocation7_spill] sm:$0xff] }
 0x3c5   : > { %16369 = vmatpush3.bf16.msra.mxu0 %v19682_v17  ;;  %14011 = vmatprep.mubr.f32.mxu0 %v19814_v21  ;;  %v23689_v21 = vld [vmem:[#allocation28_spill] sm:$0xff] }
 0x3c6   : > { %16371 = vmatprep.subr.bf16.mxu0 %v23682_v47 }
 0x3c8   : > { %14012 = vmatmul.mubr.f32.gmra.mrb[30].mxu0 %v19826_v24  ;;  %v23690_v24 = vld [vmem:[#allocation19_spill] sm:$0xff] }
 0x3c9   : > { %16373 = vmatpush3.bf16.msra.mxu0 %v23682_v47  ;;  %14046 = vmatprep.mubr.f32.mxu0 %v23683_v50  ;;  %v23692_v50 = vld [vmem:[#allocation39_spill] sm:$0xff] }
 0x3ca   : > { %16375 = vmatprep.subr.bf16.mxu0 %v23684_v0 }
 0x3cc   : > { %14047 = vmatmul.mubr.f32.vlgmr.msra.gmra.mrb[16].mxu0 %v23685_v31  ;;  %v23693_v31 = vld [vmem:[#allocation29_spill] sm:$0xff] }
 0x3cd   : > { %16377 = vmatpush3.bf16.msra.mxu0 %v23684_v0  ;;  %14049 = vmatprep.mubr.f32.mxu0 %v23686_v9  ;;  %v23694_v0 = vld [vmem:[#allocation46_spill] sm:$0xff] }
 0x3ce   : > { %16379 = vmatprep.subr.bf16.mxu0 %v23687_v3  ;;  %v23695_v9 = vld [vmem:[#allocation50_spill] sm:$0xff] }
 0x3d0   : > { %14050 = vmatmul.mubr.f32.gmra.mrb[18].mxu0 %v23688_v54  ;;  %v23696_v54 = vld [vmem:[#allocation32_spill] sm:$0xff] }
 0x3d1   : > { %16381 = vmatpush3.bf16.msra.mxu0 %v23687_v3  ;;  %14052 = vmatprep.mubr.f32.mxu0 %v23689_v21  ;;  %v23697_v3 = vld [vmem:[#allocation55_spill] sm:$0xff] }
 0x3d2   : > { %16383 = vmatprep.subr.bf16.mxu0 %v23690_v24 }
 0x3d4   : > { %14053 = vmatmul.mubr.f32.gmra.mrb[20].mxu0 %v23691_v32  ;;  %v23698_v32 = vld [vmem:[#allocation35_spill] sm:$0xff] }
 0x3d5   : > { %16385 = vmatpush3.bf16.msra.mxu0 %v23690_v24  ;;  %14055 = vmatprep.mubr.f32.mxu0 %v23692_v50  ;;  %v23699_v24 = vld [vmem:[#allocation62_spill] sm:$0xff]  ;;  %v4294_v50 = vld [vmem:[#allocation2 + $0x178] sm:$0xff] }
 0x3d6   : > { %16387 = vmatprep.subr.bf16.mxu0 %v23693_v31  ;;  %v4341_v38 = vand.u32 4294901760, %v4294_v50 }
 0x3d8   : > { %14056 = vmatmul.mubr.f32.gmra.mrb[22].mxu0 %v23694_v0  ;;  %v23700_v0 = vld [vmem:[#allocation40_spill] sm:$0xff] }
 0x3d9   : > { %16389 = vmatpush3.bf16.msra.mxu0 %v23693_v31  ;;  %14058 = vmatprep.mubr.f32.mxu0 %v23695_v9  ;;  %v23701_v31 = vld [vmem:[#allocation44_spill] sm:$0xff]  ;;  %v4293_v9 = vld [vmem:[#allocation2 + $0x170] sm:$0xff] }
 0x3da   : > { %16391 = vmatprep.subr.bf16.mxu0 %v23696_v54  ;;  %v4338_v21 = vand.u32 4294901760, %v4293_v9 }
 0x3dc   : > { %14059 = vmatmul.mubr.f32.gmra.mrb[24].mxu0 %v23697_v3  ;;  %v20094_v51 = vpack.c.bf16 %v4341_v38, %v4338_v21 }
 0x3dd   : > { %16393 = vmatpush3.bf16.msra.mxu0 %v23696_v54  ;;  %14061 = vmatprep.mubr.f32.mxu0 %v19782_v62  ;;  %v23707_v62 = vand.u32 4294901760, %v19902_v13 }
 0x3de   : > { %16395 = vmatprep.subr.bf16.mxu0 %v23698_v32  ;;  %23709 = vst [vmem:[#allocation29_spill] sm:$0xff] %v20094_v51 }
 0x3df   : > { %v20088_v3 = vsub.f32 %v19902_v13, %v23707_v62 }
 0x3e0   : > { %14062 = vmatmul.mubr.f32.gmra.mrb[26].mxu0 %v23699_v24 }
 0x3e1   : > { %16397 = vmatpush3.bf16.msra.mxu0 %v23698_v32  ;;  %14064 = vmatprep.mubr.f32.mxu0 %v19811_v58  ;;  %v4290_v32 = vld [vmem:[#allocation2 + $0x158] sm:$0xff]  ;;  %v23705_v58 = vand.u32 4294901760, %v19900_v7  ;;  %23708 = vst [vmem:[#allocation19_spill] sm:$0xff] %v20088_v3  ;;  %v23200_v10 = vand.u32 4294901760, %v20088_v3 }
 0x3e2   : > { %16399 = vmatprep.subr.bf16.mxu0 %v23700_v0 }
 0x3e3   : > { %v20083_v24 = vsub.f32 %v19900_v7, %v23705_v58  ;;  %v4547_v62 = vsub.f32 %v20088_v3, %v23200_v10 }
 0x3e4   : > { %14065 = vmatmul.mubr.f32.gmra.mrb[28].mxu0 %v19823_v19 }
 0x3e5   : > { %16401 = vmatpush3.bf16.msra.mxu0 %v23700_v0  ;;  %14067 = vmatprep.mubr.f32.mxu0 %v19835_v53  ;;  %23706 = vst [vmem:[#allocation7_spill] sm:$0xff] %v20083_v24  ;;  %v23198_v5 = vand.u32 4294901760, %v20083_v24  ;;  %v4548_v13 = vand.u32 4294901760, %v4547_v62 }
 0x3e6   : > { %16403 = vmatprep.subr.bf16.mxu0 %v23701_v31 }
 0x3e7   : > { %v4540_v58 = vsub.f32 %v20083_v24, %v23198_v5 }
 0x3e8   : > { %14068 = vmatmul.mubr.f32.gmra.mrb[30].mxu0 %v19844_v39  ;;  %v4292_v39 = vld [vmem:[#allocation2 + $0x168] sm:$0xff] }
 0x3e9   : > { %16405 = vmatpush3.bf16.msra.mxu0 %v23701_v31  ;;  %14102 = vmatprep.mubr.f32.mxu0 %v19551_v43  ;;  %v4291_v31 = vld [vmem:[#allocation2 + $0x160] sm:$0xff]  ;;  %v4335_v53 = vand.u32 4294901760, %v4292_v39  ;;  %v4541_v7 = vand.u32 4294901760, %v4540_v58 }
 0x3ea   : > { %16407 = vmatprep.subr.bf16.mxu0 %v19588_v33 }
 0x3eb   : > { %v20104_v20 = vpack.c.bf16 %v4548_v13, %v4541_v7 }
 0x3ec   : > { %14103 = vmatmul.mubr.f32.vlgmr.msra.gmra.mrb[16].mxu0 %v19565_v61 }
 0x3ed   : > { %16409 = vmatpush3.bf16.msra.mxu0 %v19588_v33  ;;  %14105 = vmatprep.mubr.f32.mxu0 %v19572_v16  ;;  %v23702_v33 = vld [vmem:[#allocation23_spill] sm:$0xff] }
 0x3ee   : > { %16411 = vmatprep.subr.bf16.mxu0 %v19605_v34 }
 0x3f0   : > { %14106 = vmatmul.mubr.f32.gmra.mrb[18].mxu0 %v19577_v45 }
 0x3f1   : > { %16413 = vmatpush3.bf16.msra.mxu0 %v19605_v34  ;;  %14108 = vmatprep.mubr.f32.mxu0 %v19594_v57  ;;  %v4287_v34 = vld [vmem:[#allocation2 + $0x140] sm:$0xff] }
 0x3f2   : > { %16415 = vmatprep.subr.bf16.mxu0 %v19620_v18 }
 0x3f4   : > { %14109 = vmatmul.mubr.f32.gmra.mrb[20].mxu0 %v19609_v29 }
 0x3f5   : > { %16417 = vmatpush3.bf16.msra.mxu0 %v19620_v18  ;;  %14111 = vmatprep.mubr.f32.mxu0 %v19664_v36  ;;  %v4288_v18 = vld [vmem:[#allocation2 + $0x148] sm:$0xff] }
 0x3f6   : > { %16419 = vmatprep.subr.bf16.mxu0 %v19635_v4 }
 0x3f8   : > { %14112 = vmatmul.mubr.f32.gmra.mrb[22].mxu0 %v19680_v56 }
 0x3f9   : > { %16421 = vmatpush3.bf16.msra.mxu0 %v19635_v4  ;;  %14114 = vmatprep.mubr.f32.mxu0 %v19696_v30  ;;  %v4320_v4 = vand.u32 4294901760, %v4287_v34 }
 0x3fa   : > { %16423 = vmatprep.subr.bf16.mxu0 %v19650_v41 }
 0x3fb   : > { %v20107_v55 = vsub.f32 %v4287_v34, %v4320_v4 }
 0x3fc   : > { %14115 = vmatmul.mubr.f32.gmra.mrb[24].mxu0 %v19710_v22 }
 0x3fd   : > { %16425 = vmatpush3.bf16.msra.mxu0 %v19650_v41  ;;  %14117 = vmatprep.mubr.f32.mxu0 %v19720_v48  ;;  %v4323_v41 = vand.u32 4294901760, %v4288_v18  ;;  %23710 = vst [vmem:[#allocation32_spill] sm:$0xff] %v20107_v55  ;;  %v23202_v5 = vand.u32 4294901760, %v20107_v55 }
 0x3fe   : > { %16427 = vmatprep.subr.bf16.mxu0 %v19666_v40 }
 0x3ff   : > { %v20109_v63 = vsub.f32 %v4288_v18, %v4323_v41  ;;  %v4596_v10 = vsub.f32 %v20107_v55, %v23202_v5 }
 0x400   : > { %14118 = vmatmul.mubr.f32.gmra.mrb[26].mxu0 %v19745_v2 }
 0x401   : > { %16429 = vmatpush3.bf16.msra.mxu0 %v19666_v40  ;;  %14120 = vmatprep.mubr.f32.mxu0 %v19757_v28  ;;  %v20070_v40 = vpack.c.bf16 %v4323_v41, %v4320_v4  ;;  %23711 = vst [vmem:[#allocation35_spill] sm:$0xff] %v20109_v63  ;;  %v23201_v15 = vand.u32 4294901760, %v20109_v63  ;;  %v4597_v34 = vand.u32 4294901760, %v4596_v10 }
 0x402   : > { %16431 = vmatprep.subr.bf16.mxu0 %v19682_v17 }
 0x403   : > { %16455 = vmatprep.subr.bf16.mxu1 %v20070_v40  ;;  %v4603_v7 = vsub.f32 %v20109_v63, %v23201_v15 }
 0x404   : > { %14121 = vmatmul.mubr.f32.gmra.mrb[28].mxu0 %v19775_v12  ;;  %16457 = vmatpush3.bf16.msra.mxu1 %v20070_v40 }
 0x405   : > { %16433 = vmatpush3.bf16.msra.mxu0 %v19682_v17  ;;  %14123 = vmatprep.mubr.f32.mxu0 %v19787_v1  ;;  %v4289_v17 = vld [vmem:[#allocation2 + $0x150] sm:$0xff]  ;;  %v4604_v41 = vand.u32 4294901760, %v4603_v7 }
 0x406   : > { %16435 = vmatprep.subr.bf16.mxu0 %v23682_v47  ;;  %v4326_v54 = vand.u32 4294901760, %v4289_v17 }
 0x408   : > { %14124 = vmatmul.mubr.f32.gmra.mrb[30].mxu0 %v19802_v42  ;;  %v20116_v58 = vsub.f32 %v4289_v17, %v4326_v54 }
 0x409   : > { %16437 = vmatpush3.bf16.msra.mxu0 %v23682_v47  ;;  %14158 = vmatprep.mubr.f32.mxu0 %v19551_v43  ;;  %v4329_v47 = vand.u32 4294901760, %v4290_v32 }
 0x40a   : > { %23712 = vst [vmem:[#allocation40_spill] sm:$0xff] %v20116_v58  ;;  %v23205_v18 = vand.u32 4294901760, %v20116_v58 }
 0x40b   : > { %v20074_v0 = vpack.c.bf16 %v4329_v47, %v4326_v54  ;;  %v20118_v62 = vsub.f32 %v4290_v32, %v4329_v47  ;;  %v20133_v54 = vsub.f32 %v4292_v39, %v4335_v53  ;;  %v20135_v47 = vpack.c.bf16 %v4604_v41, %v4597_v34 }
 0x40c   : > { %14159 = vmatmul.mubr.f32.vlgmr.msra.gmra.mrb[16].mxu0 %v19565_v61  ;;  %v4610_v13 = vsub.f32 %v20116_v58, %v23205_v18  ;;  %v20149_v39 = vsub.f32 %v4294_v50, %v4341_v38  ;;  %v20165_v50 = vpack.c.bf16 %v20088_v3, %v20083_v24 }
 0x40d   : > { %14161 = vmatprep.mubr.f32.mxu0 %v19572_v16  ;;  %23703 = vst [vmem:[#allocation38_spill] sm:$0xff] %v20074_v0  ;;  %16459 = vmatprep.subr.bf16.mxu1 %v20074_v0  ;;  %23713 = vst [vmem:[#allocation44_spill] sm:$0xff] %v20118_v62  ;;  %v23210_v4 = vand.u32 4294901760, %v20118_v62  ;;  %v23208_v7 = vand.u32 4294901760, %v20133_v54 }
 0x40e   : > { %16461 = vmatpush3.bf16.msra.mxu1 %v20074_v0  ;;  %23715 = vst [vmem:[#allocation79_spill] sm:$0xff] %v20133_v54  ;;  %v4611_v10 = vand.u32 4294901760, %v4610_v13  ;;  %23717 = vst [vmem:[#allocation81_spill] sm:$0xff] %v20149_v39  ;;  %v23206_v13 = vand.u32 4294901760, %v20149_v39 }
 0x40f   : > { %v4617_v17 = vsub.f32 %v20118_v62, %v23210_v4  ;;  %v23722_v4 = vand.u32 4294901760, %v19915_v6 }
 0x410   : > { %14162 = vmatmul.mubr.f32.gmra.mrb[18].mxu0 %v19577_v45 }
 0x411   : > { %14164 = vmatprep.mubr.f32.mxu0 %v19594_v57  ;;  %v4618_v15 = vand.u32 4294901760, %v4617_v17 }
 0x414   : > { %14165 = vmatmul.mubr.f32.gmra.mrb[20].mxu0 %v19609_v29 }
 0x415   : > { %14167 = vmatprep.mubr.f32.mxu0 %v19664_v36 }
 0x418   : > { %14168 = vmatmul.mubr.f32.gmra.mrb[22].mxu0 %v19680_v56  ;;  %v23724_v56 = vand.u32 4294901760, %v19938_v49 }
 0x419   : > { %14170 = vmatprep.mubr.f32.mxu0 %v19696_v30 }
 0x41c   : > { %14171 = vmatmul.mubr.f32.gmra.mrb[24].mxu0 %v19710_v22 }
 0x41d   : > { %14173 = vmatprep.mubr.f32.mxu0 %v19720_v48 }
 0x420   : > { %14174 = vmatmul.mubr.f32.gmra.mrb[26].mxu0 %v19745_v2 }
 0x421   : > { %14176 = vmatprep.mubr.f32.mxu0 %v19757_v28 }
 0x424   : > { %14177 = vmatmul.mubr.f32.gmra.mrb[28].mxu0 %v19775_v12 }
 0x425   : > { %14179 = vmatprep.mubr.f32.mxu0 %v19787_v1  ;;  %v20202_v1 = vsub.f32 %v19915_v6, %v23722_v4 }
 0x428   : > { %14180 = vmatmul.mubr.f32.gmra.mrb[30].mxu0 %v19802_v42  ;;  %v20139_v42 = vpack.c.bf16 %v4618_v15, %v4611_v10  ;;  %v4645_v10 = vsub.f32 %v20149_v39, %v23206_v13  ;;  %v23720_v13 = vand.u32 4294901760, %v19910_v46 }
 0x429   : > { %14550 = vmatprep.mubr.f32.mxu0 %v23702_v33  ;;  %v4332_v33 = vand.u32 4294901760, %v4291_v31 }
 0x42b   : > { %v20078_v19 = vpack.c.bf16 %v4335_v53, %v4332_v33  ;;  %v20131_v32 = vsub.f32 %v4291_v31, %v4332_v33  ;;  %v4631_v31 = vsub.f32 %v20133_v54, %v23208_v7  ;;  %v20147_v53 = vsub.f32 %v4293_v9, %v4338_v21 }
 0x42c   : > { %v4646_v9 = vand.u32 4294901760, %v4645_v10  ;;  %v23721_v7 = vand.u32 4294901760, %v19913_v14 }
 0x42d   : > { %23704 = vst [vmem:[#allocation12_spill] sm:$0xff] %v20078_v19  ;;  %16463 = vmatprep.subr.bf16.mxu1 %v20078_v19  ;;  %23714 = vst [vmem:[#allocation23_spill] sm:$0xff] %v20131_v32  ;;  %v23209_v5 = vand.u32 4294901760, %v20131_v32  ;;  %v4632_v34 = vand.u32 4294901760, %v4631_v31  ;;  %v23207_v41 = vand.u32 4294901760, %v20147_v53  ;;  %v20173_v31 = vpack.c.bf16 %v20118_v62, %v20116_v58 }
 0x42e   : > { %16465 = vmatpush3.bf16.msra.mxu1 %v20078_v19  ;;  %23716 = vst [vmem:[#allocation80_spill] sm:$0xff] %v20147_v53 }
 0x42f   : > { %16467 = vmatprep.subr.bf16.mxu1 %v20094_v51  ;;  %v4624_v18 = vsub.f32 %v20131_v32, %v23209_v5  ;;  %v4638_v17 = vsub.f32 %v20147_v53, %v23207_v41  ;;  %v20192_v41 = vsub.f32 %v19910_v46, %v23720_v13  ;;  %v20197_v5 = vsub.f32 %v19913_v14, %v23721_v7 }
 0x430   : > { %v23232_v14 = vand.u32 4294901760, %v20202_v1 }
 0x431   : > { %v4625_v33 = vand.u32 4294901760, %v4624_v18  ;;  %v4639_v21 = vand.u32 4294901760, %v4638_v17  ;;  %v20169_v18 = vpack.c.bf16 %v20109_v63, %v20107_v55  ;;  %v23718_v17 = vld [vmem:[#allocation20_spill] sm:$0xff]  ;;  %v23226_v46 = vand.u32 4294901760, %v20192_v41 }
 0x432   : > { %16469 = vmatpush3.bf16.msra.mxu1 %v20094_v51  ;;  %v2974_v10 = vsub.s32 1, %v23718_v17  ;;  %v23229_v13 = vand.u32 4294901760, %v20197_v5 }
 0x433   : > { %16471 = vmatprep.subr.bf16.mxu1 %v20104_v20  ;;  %v20153_v15 = vpack.c.bf16 %v4632_v34, %v4625_v33  ;;  %v20161_v38 = vpack.c.bf16 %v4646_v9, %v4639_v21  ;;  %v20177_v33 = vpack.c.bf16 %v20133_v54, %v20131_v32  ;;  %v20181_v34 = vpack.c.bf16 %v20149_v39, %v20147_v53 }
 0x434   : > { %v23719_v21 = vand.u32 4294901760, %v19904_v23  ;;  %v4568_v2 = vsub.f32 %v20197_v5, %v23229_v13  ;;  %v20238_v13 = vsub.f32 %v19938_v49, %v23724_v56 }
 0x436   : > { %v20187_v9 = vsub.f32 %v19904_v23, %v23719_v21  ;;  %v18224_v23 = vld [vmem:[%s23009_s5] sm:$0xff] }
 0x437   : > { %v20207_v21 = vrot.slane %v18224_v23, %v2974_v10  ;;  %v4561_v10 = vsub.f32 %v20192_v41, %v23226_v46 }
 0x438   : > { %v23225_v17 = vand.u32 4294901760, %v20187_v9 }
 0x439   : > { %v4562_v29 = vand.u32 4294901760, %v4561_v10 }
 0x43a   : > { %v4554_v4 = vsub.f32 %v20187_v9, %v23225_v17 }
 0x4df   : > { %v14160_v7 = vpop.f32.mrb[16].mxu0 }
 0x4e0   : > { %v17414_v12 = vadd.f32 %v14160_v7, %v20207_v21  ;;  %v4168_v28 = vpop.f32.mrb[17].mxu0  ;;  %v4575_v7 = vsub.f32 %v20202_v1, %v23232_v14  ;;  %v4555_v14 = vand.u32 4294901760, %v4554_v4 }
 0x4e1   : > { %v17415_v6 = vadd.f32 %v4168_v28, %v20207_v21  ;;  %v23723_v28 = vand.u32 4294901760, %v19936_v11 }
 0x4e2   : > { %v4263_v23 = vmax.f32 %v17414_v12, 0.0  ;;  %v4576_v45 = vand.u32 4294901760, %v4575_v7 }
 0x4e3   : > { %v4262_v48 = vmax.f32 %v17415_v6, 0.0  ;;  %v14163_v22 = vpop.f32.mrb[18].mxu0  ;;  %v20230_v30 = vsub.f32 %v19936_v11, %v23723_v28  ;;  %v4569_v28 = vand.u32 4294901760, %v4568_v2 }
 0x4e4   : > { %v20232_v17 = vand.u32 4294901760, %v4263_v23  ;;  %v17416_v46 = vadd.f32 %v14163_v22, %v20207_v21  ;;  %v4180_v12 = vpop.f32.mrb[19].mxu0 }
 0x4e5   : > { %v20240_v36 = vand.u32 4294901760, %v4262_v48  ;;  %v17417_v6 = vadd.f32 %v4180_v12, %v20207_v21  ;;  %v20265_v37 = vpack.c.bf16 %v4576_v45, %v4569_v28 }
 0x4e6   : > { %v20244_v57 = vsub.f32 %v4263_v23, %v20232_v17  ;;  %v4265_v11 = vmax.f32 %v17416_v46, 0.0  ;;  %v16474_v46 = vpack.c.bf16 %v4562_v29, %v4555_v14  ;;  %v23725_v29 = vand.u32 4294901760, %v20230_v30 }
 0x4e7   : > { %v20247_v22 = vsub.f32 %v4262_v48, %v20240_v36  ;;  %v4264_v16 = vmax.f32 %v17417_v6, 0.0  ;;  %v14166_v61 = vpop.f32.mrb[20].mxu0 }
 0x4e8   : > { %v23247_v49 = vand.u32 4294901760, %v20244_v57  ;;  %v20251_v43 = vand.u32 4294901760, %v4265_v11  ;;  %v17418_v4 = vadd.f32 %v14166_v61, %v20207_v21  ;;  %v4192_v10 = vpop.f32.mrb[21].mxu0  ;;  %v4582_v14 = vsub.f32 %v20230_v30, %v23725_v29 }
 0x4e9   : > { %v20255_v12 = vand.u32 4294901760, %v4264_v16  ;;  %v17419_v2 = vadd.f32 %v4192_v10, %v20207_v21  ;;  %v23249_v48 = vand.u32 4294901760, %v20247_v22 }
 0x4ea   : > { %v4389_v7 = vsub.f32 %v20244_v57, %v23247_v49  ;;  %v20263_v6 = vsub.f32 %v4265_v11, %v20251_v43  ;;  %v4267_v56 = vmax.f32 %v17418_v4, 0.0 }
 0x4eb   : > { %v20268_v61 = vsub.f32 %v4264_v16, %v20255_v12  ;;  %v4266_v23 = vmax.f32 %v17419_v2, 0.0  ;;  %v14169_v27 = vpop.f32.mrb[22].mxu0  ;;  %v4379_v10 = vsub.f32 %v20247_v22, %v23249_v48  ;;  %v23726_v16 = vand.u32 4294901760, %v20238_v13 }
 0x4ec   : > { %v20276_v49 = vand.u32 4294901760, %v4267_v56  ;;  %v17420_v11 = vadd.f32 %v14169_v27, %v20207_v21  ;;  %v4204_v4 = vpop.f32.mrb[23].mxu0  ;;  %v23256_v45 = vand.u32 4294901760, %v20263_v6  ;;  %v4390_v59 = vand.u32 4294901760, %v4389_v7 }
 0x4ed   : > { %v4589_v28 = vsub.f32 %v20238_v13, %v23726_v16  ;;  %v20283_v2 = vand.u32 4294901760, %v4266_v23  ;;  %v17421_v44 = vadd.f32 %v4204_v4, %v20207_v21  ;;  %v4380_v48 = vand.u32 4294901760, %v4379_v10 }
 0x4ee   : > { %v23258_v52 = vand.u32 4294901760, %v20268_v61  ;;  %v20288_v29 = vsub.f32 %v4267_v56, %v20276_v49  ;;  %v4269_v8 = vmax.f32 %v17420_v11, 0.0  ;;  %v4409_v27 = vsub.f32 %v20263_v6, %v23256_v45 }
 0x4ef   : > { %v20294_v39 = vsub.f32 %v4266_v23, %v20283_v2  ;;  %v4268_v16 = vmax.f32 %v17421_v44, 0.0  ;;  %v14172_v53 = vpop.f32.mrb[24].mxu0  ;;  %14214 = vmatprep.mubr.f32.mxu1 %v4380_v48  ;;  %v4583_v4 = vand.u32 4294901760, %v4582_v14  ;;  %v4590_v45 = vand.u32 4294901760, %v4589_v28 }
 0x4f0   : > { %v4399_v10 = vsub.f32 %v20268_v61, %v23258_v52  ;;  %v20299_v7 = vand.u32 4294901760, %v4269_v8  ;;  %v17422_v56 = vadd.f32 %v14172_v53, %v20207_v21  ;;  %v4216_v11 = vpop.f32.mrb[25].mxu0  ;;  %14215 = vmatmul.mubr.f32.vlgmr.msra.gmra.mrb[16].mxu1 %v4390_v59  ;;  %v23261_v54 = vand.u32 4294901760, %v20288_v29 }
 0x4f1   : > { %v20303_v32 = vand.u32 4294901760, %v4268_v16  ;;  %v17423_v44 = vadd.f32 %v4216_v11, %v20207_v21  ;;  %16473 = vmatpush3.bf16.msra.mxu1 %v20104_v20  ;;  %v23263_v48 = vand.u32 4294901760, %v20294_v39  ;;  %v4410_v62 = vand.u32 4294901760, %v4409_v27 }
 0x4f2   : > { %v4400_v23 = vand.u32 4294901760, %v4399_v10  ;;  %v20309_v14 = vsub.f32 %v4269_v8, %v20299_v7  ;;  %v4271_v52 = vmax.f32 %v17422_v56, 0.0  ;;  %16475 = vmatprep.subr.bf16.mxu1 %v16474_v46  ;;  %v4429_v59 = vsub.f32 %v20288_v29, %v23261_v54 }
 0x4f3   : > { %v20315_v53 = vsub.f32 %v4268_v16, %v20303_v32  ;;  %v4270_v28 = vmax.f32 %v17423_v44, 0.0  ;;  %v14175_v11 = vpop.f32.mrb[26].mxu0  ;;  %v4419_v20 = vsub.f32 %v20294_v39, %v23263_v48  ;;  %v16482_v58 = vpack.c.bf16 %v4590_v45, %v4583_v4 }
 0x4f4   : > { %14217 = vmatprep.mubr.f32.mxu1 %v4400_v23  ;;  %v20320_v10 = vand.u32 4294901760, %v4271_v52  ;;  %v17424_v8 = vadd.f32 %v14175_v11, %v20207_v21  ;;  %v4228_v27 = vpop.f32.mrb[27].mxu0  ;;  %v23265_v56 = vand.u32 4294901760, %v20309_v14  ;;  %v4430_v55 = vand.u32 4294901760, %v4429_v59 }
 0x4f5   : > { %14218 = vmatmul.mubr.f32.gmra.mrb[18].mxu1 %v4410_v62  ;;  %v20324_v54 = vand.u32 4294901760, %v4270_v28  ;;  %v17425_v16 = vadd.f32 %v4228_v27, %v20207_v21  ;;  %v4420_v44 = vand.u32 4294901760, %v4419_v20  ;;  %v23266_v23 = vand.u32 4294901760, %v20315_v53 }
 0x4f6   : > { %16477 = vmatpush3.bf16.msra.mxu1 %v16474_v46  ;;  %v20329_v63 = vsub.f32 %v4271_v52, %v20320_v10  ;;  %v4273_v48 = vmax.f32 %v17424_v8, 0.0  ;;  %v4449_v62 = vsub.f32 %v20309_v14, %v23265_v56 }
 0x4f7   : > { %16479 = vmatprep.subr.bf16.mxu1 %v20265_v37  ;;  %v20336_v45 = vsub.f32 %v4270_v28, %v20324_v54  ;;  %v4272_v4 = vmax.f32 %v17425_v16, 0.0  ;;  %v14178_v11 = vpop.f32.mrb[28].mxu0  ;;  %14220 = vmatprep.mubr.f32.mxu1 %v4420_v44  ;;  %v4439_v46 = vsub.f32 %v20315_v53, %v23266_v23 }
 0x4f8   : > { %v20341_v52 = vand.u32 4294901760, %v4273_v48  ;;  %v17426_v59 = vadd.f32 %v14178_v11, %v20207_v21  ;;  %v4240_v20 = vpop.f32.mrb[29].mxu0  ;;  %v23271_v8 = vand.u32 4294901760, %v20329_v63  ;;  %v4450_v3 = vand.u32 4294901760, %v4449_v62 }
 0x4f9   : > { %14221 = vmatmul.mubr.f32.gmra.mrb[20].mxu1 %v4430_v55  ;;  %v20345_v27 = vand.u32 4294901760, %v4272_v4  ;;  %v17427_v28 = vadd.f32 %v4240_v20, %v20207_v21  ;;  %v4440_v16 = vand.u32 4294901760, %v4439_v46  ;;  %v23272_v44 = vand.u32 4294901760, %v20336_v45 }
 0x4fa   : > { %16481 = vmatpush3.bf16.msra.mxu1 %v20265_v37  ;;  %v20351_v56 = vsub.f32 %v4273_v48, %v20341_v52  ;;  %v4275_v23 = vmax.f32 %v17426_v59, 0.0  ;;  %v4469_v55 = vsub.f32 %v20329_v63, %v23271_v8 }
 0x4fb   : > { %16483 = vmatprep.subr.bf16.mxu1 %v16482_v58  ;;  %v20357_v11 = vsub.f32 %v4272_v4, %v20345_v27  ;;  %v4274_v24 = vmax.f32 %v17427_v28, 0.0  ;;  %v14181_v20 = vpop.f32.mrb[30].mxu0  ;;  %14223 = vmatprep.mubr.f32.mxu1 %v4440_v16  ;;  %v4459_v37 = vsub.f32 %v20336_v45, %v23272_v44 }
 0x4fc   : > { %v20362_v46 = vand.u32 4294901760, %v4275_v23  ;;  %v17428_v48 = vadd.f32 %v14181_v20, %v20207_v21  ;;  %v4252_v62 = vpop.f32.mrb[31].mxu0  ;;  %v4488_v59 = vand.u32 4294901760, %v20351_v56  ;;  %v4470_v19 = vand.u32 4294901760, %v4469_v55 }
 0x4fd   : > { %14224 = vmatmul.mubr.f32.gmra.mrb[22].mxu1 %v4450_v3  ;;  %v20366_v51 = vand.u32 4294901760, %v4274_v24  ;;  %v17429_v4 = vadd.f32 %v4252_v62, %v20207_v21  ;;  %v4460_v28 = vand.u32 4294901760, %v4459_v37  ;;  %v4478_v16 = vand.u32 4294901760, %v20357_v11 }
 0x4fe   : > { %16485 = vmatpush3.bf16.msra.mxu1 %v16482_v58  ;;  %v20371_v8 = vsub.f32 %v4275_v23, %v20362_v46  ;;  %v4277_v44 = vmax.f32 %v17428_v48, 0.0  ;;  %v4489_v3 = vsub.f32 %v20351_v56, %v4488_v59 }
 0x4ff   : > { %16487 = vmatprep.subr.bf16.mxu1 %v20135_v47  ;;  %v20378_v20 = vsub.f32 %v4274_v24, %v20366_v51  ;;  %v4276_v0 = vmax.f32 %v17429_v4, 0.0  ;;  %14226 = vmatprep.mubr.f32.mxu1 %v4460_v28  ;;  %v4479_v58 = vsub.f32 %v20357_v11, %v4478_v16 }
 0x500   : > { %v20383_v21 = vand.u32 4294901760, %v4277_v44  ;;  %v4508_v23 = vand.u32 4294901760, %v20371_v8  ;;  %v4490_v62 = vand.u32 4294901760, %v4489_v3 }
 0x501   : > { %14227 = vmatmul.mubr.f32.gmra.mrb[24].mxu1 %v4470_v19  ;;  %v20386_v55 = vand.u32 4294901760, %v4276_v0  ;;  %v4480_v37 = vand.u32 4294901760, %v4479_v58  ;;  %v4498_v48 = vand.u32 4294901760, %v20378_v20 }
 0x502   : > { %16489 = vmatpush3.bf16.msra.mxu1 %v20135_v47  ;;  %v20391_v24 = vsub.f32 %v4277_v44, %v20383_v21  ;;  %v4509_v4 = vsub.f32 %v20371_v8, %v4508_v23 }
 0x503   : > { %16491 = vmatprep.subr.bf16.mxu1 %v20139_v42  ;;  %v20398_v19 = vsub.f32 %v4276_v0, %v20386_v55  ;;  %14229 = vmatprep.mubr.f32.mxu1 %v4480_v37  ;;  %v4499_v47 = vsub.f32 %v20378_v20, %v4498_v48 }
 0x504   : > { %v4528_v28 = vand.u32 4294901760, %v20391_v24  ;;  %v4510_v58 = vand.u32 4294901760, %v4509_v4  ;;  %v16506_v4 = vpack.c.bf16 %v20192_v41, %v20187_v9 }
 0x505   : > { %14230 = vmatmul.mubr.f32.gmra.mrb[26].mxu1 %v4490_v62  ;;  %v4500_v44 = vand.u32 4294901760, %v4499_v47  ;;  %v4518_v3 = vand.u32 4294901760, %v20398_v19  ;;  %v23732_v47 = vld [vmem:[#allocation19_spill] sm:$0xff] }
 0x506   : > { %16493 = vmatpush3.bf16.msra.mxu1 %v20139_v42  ;;  %v4529_v0 = vsub.f32 %v20391_v24, %v4528_v28 }
 0x507   : > { %16495 = vmatprep.subr.bf16.mxu1 %v20153_v15  ;;  %14232 = vmatprep.mubr.f32.mxu1 %v4500_v44  ;;  %v4519_v37 = vsub.f32 %v20398_v19, %v4518_v3  ;;  %v23733_v44 = vand.u32 4294901760, %v23732_v47  ;;  %v23745_v47 = vand.u32 4294901760, %v20288_v29 }
 0x508   : > { %v4530_v42 = vand.u32 4294901760, %v4529_v0  ;;  %v23734_v0 = vand.u32 4294901760, %v20247_v22 }
 0x509   : > { %14233 = vmatmul.mubr.f32.gmra.mrb[28].mxu1 %v4510_v58  ;;  %v4520_v62 = vand.u32 4294901760, %v4519_v37  ;;  %v23735_v37 = vand.u32 4294901760, %v20187_v9  ;;  %v23742_v9 = vand.u32 4294901760, %v20294_v39 }
 0x50a   : > { %16497 = vmatpush3.bf16.msra.mxu1 %v20153_v15  ;;  %v16510_v15 = vpack.c.bf16 %v20202_v1, %v20197_v5 }
 0x50b   : > { %16499 = vmatprep.subr.bf16.mxu1 %v20161_v38  ;;  %14235 = vmatprep.mubr.f32.mxu1 %v4520_v62  ;;  %v23736_v62 = vand.u32 4294901760, %v20192_v41  ;;  %v23744_v41 = vand.u32 4294901760, %v20238_v13 }
 0x50d   : > { %14236 = vmatmul.mubr.f32.gmra.mrb[30].mxu1 %v4530_v42  ;;  %v16570_v42 = vpack.c.bf16 %v23736_v62, %v23735_v37  ;;  %v23755_v37 = vld [vmem:[#allocation44_spill] sm:$0xff] }
 0x50e   : > { %16501 = vmatpush3.bf16.msra.mxu1 %v20161_v38  ;;  %14270 = vmatprep.mubr.f32.mxu1 %v20240_v36  ;;  %v16514_v38 = vpack.c.bf16 %v20238_v13, %v20230_v30  ;;  %v23753_v13 = vld [vmem:[#allocation40_spill] sm:$0xff] }
 0x50f   : > { %16503 = vmatprep.subr.bf16.mxu1 %v20165_v50 }
 0x511   : > { %14271 = vmatmul.mubr.f32.vlgmr.msra.gmra.mrb[16].mxu1 %v20232_v17 }
 0x512   : > { %14273 = vmatprep.mubr.f32.mxu1 %v20255_v12  ;;  %16505 = vmatpush3.bf16.msra.mxu1 %v20165_v50  ;;  %v23727_v50 = vld [vmem:[#allocation38_spill] sm:$0xff] }
 0x513   : > { %16507 = vmatprep.subr.bf16.mxu1 %v16506_v4 }
 0x515   : > { %14274 = vmatmul.mubr.f32.gmra.mrb[18].mxu1 %v20251_v43 }
 0x516   : > { %14276 = vmatprep.mubr.f32.mxu1 %v20283_v2  ;;  %16509 = vmatpush3.bf16.msra.mxu1 %v16506_v4  ;;  %v23737_v4 = vand.u32 4294901760, %v20244_v57 }
 0x517   : > { %16511 = vmatprep.subr.bf16.mxu1 %v16510_v15 }
 0x519   : > { %14277 = vmatmul.mubr.f32.gmra.mrb[20].mxu1 %v20276_v49 }
 0x51a   : > { %14279 = vmatprep.mubr.f32.mxu1 %v20303_v32  ;;  %16513 = vmatpush3.bf16.msra.mxu1 %v16510_v15  ;;  %v23738_v15 = vand.u32 4294901760, %v20268_v61 }
 0x51b   : > { %16515 = vmatprep.subr.bf16.mxu1 %v16514_v38 }
 0x51d   : > { %14280 = vmatmul.mubr.f32.gmra.mrb[22].mxu1 %v20299_v7 }
 0x51e   : > { %14282 = vmatprep.mubr.f32.mxu1 %v20324_v54  ;;  %16517 = vmatpush3.bf16.msra.mxu1 %v16514_v38  ;;  %v23739_v38 = vand.u32 4294901760, %v20197_v5  ;;  %v23746_v5 = vand.u32 4294901760, %v20315_v53 }
 0x51f   : > { %16519 = vmatprep.subr.bf16.mxu1 %v20169_v18 }
 0x521   : > { %14283 = vmatmul.mubr.f32.gmra.mrb[24].mxu1 %v20320_v10 }
 0x522   : > { %14285 = vmatprep.mubr.f32.mxu1 %v20345_v27  ;;  %16521 = vmatpush3.bf16.msra.mxu1 %v20169_v18  ;;  %v23728_v18 = vld [vmem:[#allocation12_spill] sm:$0xff] }
 0x523   : > { %16523 = vmatprep.subr.bf16.mxu1 %v20173_v31 }
 0x525   : > { %14286 = vmatmul.mubr.f32.gmra.mrb[26].mxu1 %v20341_v52 }
 0x526   : > { %14288 = vmatprep.mubr.f32.mxu1 %v20366_v51  ;;  %16525 = vmatpush3.bf16.msra.mxu1 %v20173_v31  ;;  %v23729_v31 = vld [vmem:[#allocation29_spill] sm:$0xff] }
 0x527   : > { %16527 = vmatprep.subr.bf16.mxu1 %v20177_v33 }
 0x529   : > { %14289 = vmatmul.mubr.f32.gmra.mrb[28].mxu1 %v20362_v46 }
 0x52a   : > { %14291 = vmatprep.mubr.f32.mxu1 %v20386_v55  ;;  %16529 = vmatpush3.bf16.msra.mxu1 %v20177_v33  ;;  %v23730_v33 = vld [vmem:[#allocation7_spill] sm:$0xff] }
 0x52b   : > { %16531 = vmatprep.subr.bf16.mxu1 %v20181_v34 }
 0x52d   : > { %14292 = vmatmul.mubr.f32.gmra.mrb[30].mxu1 %v20383_v21 }
 0x52e   : > { %16533 = vmatpush3.bf16.msra.mxu1 %v20181_v34  ;;  %14326 = vmatprep.mubr.f32.mxu1 %v20247_v22  ;;  %v23731_v34 = vand.u32 4294901760, %v23730_v33  ;;  %v23740_v33 = vand.u32 4294901760, %v20202_v1  ;;  %v23747_v1 = vld [vmem:[#allocation32_spill] sm:$0xff] }
 0x52f   : > { %16535 = vmatprep.subr.bf16.mxu1 %v19923_v35 }
 0x530   : > { %v16566_v58 = vpack.c.bf16 %v23733_v44, %v23731_v34  ;;  %v16574_v22 = vpack.c.bf16 %v23740_v33, %v23739_v38  ;;  %v23741_v34 = vand.u32 4294901760, %v20263_v6  ;;  %v23749_v44 = vld [vmem:[#allocation35_spill] sm:$0xff] }
 0x531   : > { %14327 = vmatmul.mubr.f32.vlgmr.msra.gmra.mrb[16].mxu1 %v20244_v57  ;;  %v23743_v57 = vand.u32 4294901760, %v20230_v30  ;;  %v23752_v30 = vand.u32 4294901760, %v20336_v45 }
 0x532   : > { %14329 = vmatprep.mubr.f32.mxu1 %v20268_v61  ;;  %16537 = vmatpush3.bf16.msra.mxu1 %v19923_v35 }
 0x533   : > { %16539 = vmatprep.subr.bf16.mxu1 %v19930_v25  ;;  %v16578_v61 = vpack.c.bf16 %v23744_v41, %v23743_v57 }
 0x535   : > { %14330 = vmatmul.mubr.f32.gmra.mrb[18].mxu1 %v20263_v6  ;;  %v23748_v6 = vand.u32 4294901760, %v23747_v1 }
 0x536   : > { %14332 = vmatprep.mubr.f32.mxu1 %v20294_v39  ;;  %16541 = vmatpush3.bf16.msra.mxu1 %v19930_v25  ;;  %v23750_v39 = vand.u32 4294901760, %v23749_v44 }
 0x537   : > { %16543 = vmatprep.subr.bf16.mxu1 %v19949_v60 }
 0x539   : > { %14333 = vmatmul.mubr.f32.gmra.mrb[20].mxu1 %v20288_v29  ;;  %v23754_v29 = vand.u32 4294901760, %v23753_v13 }
 0x53a   : > { %14335 = vmatprep.mubr.f32.mxu1 %v20315_v53  ;;  %16545 = vmatpush3.bf16.msra.mxu1 %v19949_v60  ;;  %v23756_v53 = vand.u32 4294901760, %v23755_v37 }
 0x53b   : > { %16547 = vmatprep.subr.bf16.mxu1 %v19963_v26 }
 0x53c   : > { %v16586_v62 = vpack.c.bf16 %v23756_v53, %v23754_v29 }
 0x53d   : > { %14336 = vmatmul.mubr.f32.gmra.mrb[22].mxu1 %v20309_v14 }
 0x53e   : > { %14338 = vmatprep.mubr.f32.mxu1 %v20336_v45  ;;  %16549 = vmatpush3.bf16.msra.mxu1 %v19963_v26 }
 0x53f   : > { %16551 = vmatprep.subr.bf16.mxu1 %v20070_v40 }
 0x541   : > { %14339 = vmatmul.mubr.f32.gmra.mrb[24].mxu1 %v20329_v63 }
 0x542   : > { %14341 = vmatprep.mubr.f32.mxu1 %v20357_v11  ;;  %16553 = vmatpush3.bf16.msra.mxu1 %v20070_v40 }
 0x543   : > { %16555 = vmatprep.subr.bf16.mxu1 %v23727_v50 }
 0x545   : > { %14342 = vmatmul.mubr.f32.gmra.mrb[26].mxu1 %v20351_v56 }
 0x546   : > { %14344 = vmatprep.mubr.f32.mxu1 %v20378_v20  ;;  %16557 = vmatpush3.bf16.msra.mxu1 %v23727_v50 }
 0x547   : > { %16559 = vmatprep.subr.bf16.mxu1 %v23728_v18 }
 0x549   : > { %14345 = vmatmul.mubr.f32.gmra.mrb[28].mxu1 %v20371_v8 }
 0x54a   : > { %14347 = vmatprep.mubr.f32.mxu1 %v20398_v19  ;;  %16561 = vmatpush3.bf16.msra.mxu1 %v23728_v18 }
 0x54b   : > { %16563 = vmatprep.subr.bf16.mxu1 %v23729_v31 }
 0x54d   : > { %14348 = vmatmul.mubr.f32.gmra.mrb[30].mxu1 %v20391_v24 }
 0x54e   : > { %16565 = vmatpush3.bf16.msra.mxu1 %v23729_v31  ;;  %14382 = vmatprep.mubr.f32.mxu1 %v23734_v0  ;;  %v23751_v0 = vand.u32 4294901760, %v20309_v14  ;;  %v23758_v14 = vld [vmem:[#allocation23_spill] sm:$0xff] }
 0x54f   : > { %16567 = vmatprep.subr.bf16.mxu1 %v16566_v58 }
 0x551   : > { %14383 = vmatmul.mubr.f32.vlgmr.msra.gmra.mrb[16].mxu1 %v23737_v4  ;;  %v23759_v4 = vand.u32 4294901760, %v23758_v14 }
 0x552   : > { %14385 = vmatprep.mubr.f32.mxu1 %v23738_v15  ;;  %16569 = vmatpush3.bf16.msra.mxu1 %v16566_v58  ;;  %v16582_v58 = vpack.c.bf16 %v23750_v39, %v23748_v6  ;;  %v23760_v15 = vld [vmem:[#allocation79_spill] sm:$0xff] }
 0x553   : > { %16571 = vmatprep.subr.bf16.mxu1 %v16570_v42  ;;  %v23761_v45 = vand.u32 4294901760, %v23760_v15 }
 0x555   : > { %14386 = vmatmul.mubr.f32.gmra.mrb[18].mxu1 %v23741_v34  ;;  %v16590_v38 = vpack.c.bf16 %v23761_v45, %v23759_v4 }
 0x556   : > { %14388 = vmatprep.mubr.f32.mxu1 %v23742_v9  ;;  %16573 = vmatpush3.bf16.msra.mxu1 %v16570_v42  ;;  %v23757_v42 = vand.u32 4294901760, %v20329_v63  ;;  %v23762_v63 = vld [vmem:[#allocation80_spill] sm:$0xff] }
 0x557   : > { %16575 = vmatprep.subr.bf16.mxu1 %v16574_v22  ;;  %v23763_v33 = vand.u32 4294901760, %v23762_v63 }
 0x559   : > { %14389 = vmatmul.mubr.f32.gmra.mrb[20].mxu1 %v23745_v47 }
 0x55a   : > { %14391 = vmatprep.mubr.f32.mxu1 %v23746_v5  ;;  %16577 = vmatpush3.bf16.msra.mxu1 %v16574_v22  ;;  %v23764_v22 = vld [vmem:[#allocation81_spill] sm:$0xff] }
 0x55b   : > { %16579 = vmatprep.subr.bf16.mxu1 %v16578_v61  ;;  %v23765_v11 = vand.u32 4294901760, %v23764_v22 }
 0x55d   : > { %14392 = vmatmul.mubr.f32.gmra.mrb[22].mxu1 %v23751_v0 }
 0x55e   : > { %14394 = vmatprep.mubr.f32.mxu1 %v23752_v30  ;;  %16581 = vmatpush3.bf16.msra.mxu1 %v16578_v61 }
 0x55f   : > { %16583 = vmatprep.subr.bf16.mxu1 %v16582_v58 }
 0x561   : > { %14395 = vmatmul.mubr.f32.gmra.mrb[24].mxu1 %v23757_v42 }
 0x562   : > { %14397 = vmatprep.mubr.f32.mxu1 %v4478_v16  ;;  %16585 = vmatpush3.bf16.msra.mxu1 %v16582_v58  ;;  %v16594_v16 = vpack.c.bf16 %v23765_v11, %v23763_v33 }
 0x563   : > { %16587 = vmatprep.subr.bf16.mxu1 %v16586_v62 }
 0x565   : > { %14398 = vmatmul.mubr.f32.gmra.mrb[26].mxu1 %v4488_v59 }
 0x566   : > { %14400 = vmatprep.mubr.f32.mxu1 %v4498_v48  ;;  %16589 = vmatpush3.bf16.msra.mxu1 %v16586_v62 }
 0x567   : > { %16591 = vmatprep.subr.bf16.mxu1 %v16590_v38 }
 0x569   : > { %14401 = vmatmul.mubr.f32.gmra.mrb[28].mxu1 %v4508_v23 }
 0x56a   : > { %14403 = vmatprep.mubr.f32.mxu1 %v4518_v3  ;;  %16593 = vmatpush3.bf16.msra.mxu1 %v16590_v38 }
 0x56b   : > { %16595 = vmatprep.subr.bf16.mxu1 %v16594_v16 }
 0x56d   : > { %14404 = vmatmul.mubr.f32.gmra.mrb[30].mxu1 %v4528_v28 }
 0x56e   : > { %16597 = vmatpush3.bf16.msra.mxu1 %v16594_v16  ;;  %14438 = vmatprep.mubr.f32.mxu1 %v20240_v36 }
 0x56f   : > { %16599 = vmatprep.subr.bf16.mxu1 %v19923_v35 }
 0x571   : > { %14439 = vmatmul.mubr.f32.vlgmr.msra.gmra.mrb[16].mxu1 %v20232_v17 }
 0x572   : > { %14441 = vmatprep.mubr.f32.mxu1 %v20255_v12  ;;  %16601 = vmatpush3.bf16.msra.mxu1 %v19923_v35 }
 0x573   : > { %16603 = vmatprep.subr.bf16.mxu1 %v19930_v25 }
 0x575   : > { %14442 = vmatmul.mubr.f32.gmra.mrb[18].mxu1 %v20251_v43 }
 0x576   : > { %14444 = vmatprep.mubr.f32.mxu1 %v20283_v2  ;;  %16605 = vmatpush3.bf16.msra.mxu1 %v19930_v25 }
 0x577   : > { %16607 = vmatprep.subr.bf16.mxu1 %v19949_v60 }
 0x579   : > { %14445 = vmatmul.mubr.f32.gmra.mrb[20].mxu1 %v20276_v49 }
 0x57a   : > { %14447 = vmatprep.mubr.f32.mxu1 %v20303_v32  ;;  %16609 = vmatpush3.bf16.msra.mxu1 %v19949_v60 }
 0x57b   : > { %16611 = vmatprep.subr.bf16.mxu1 %v19963_v26 }
 0x57d   : > { %14448 = vmatmul.mubr.f32.gmra.mrb[22].mxu1 %v20299_v7 }
 0x57e   : > { %14450 = vmatprep.mubr.f32.mxu1 %v20324_v54  ;;  %16613 = vmatpush3.bf16.msra.mxu1 %v19963_v26 }
 0x57f   : > { %16615 = vmatprep.subr.bf16.mxu1 %v20070_v40 }
 0x581   : > { %14451 = vmatmul.mubr.f32.gmra.mrb[24].mxu1 %v20320_v10 }
 0x582   : > { %14453 = vmatprep.mubr.f32.mxu1 %v20345_v27  ;;  %16617 = vmatpush3.bf16.msra.mxu1 %v20070_v40 }
 0x583   : > { %16619 = vmatprep.subr.bf16.mxu1 %v23727_v50 }
 0x585   : > { %14454 = vmatmul.mubr.f32.gmra.mrb[26].mxu1 %v20341_v52 }
 0x586   : > { %14456 = vmatprep.mubr.f32.mxu1 %v20366_v51  ;;  %16621 = vmatpush3.bf16.msra.mxu1 %v23727_v50 }
 0x587   : > { %16623 = vmatprep.subr.bf16.mxu1 %v23728_v18 }
 0x589   : > { %14457 = vmatmul.mubr.f32.gmra.mrb[28].mxu1 %v20362_v46 }
 0x58a   : > { %14459 = vmatprep.mubr.f32.mxu1 %v20386_v55  ;;  %16625 = vmatpush3.bf16.msra.mxu1 %v23728_v18 }
 0x58b   : > { %16627 = vmatprep.subr.bf16.mxu1 %v23729_v31 }
 0x58d   : > { %14460 = vmatmul.mubr.f32.gmra.mrb[30].mxu1 %v20383_v21 }
 0x58e   : > { %16629 = vmatpush3.bf16.msra.mxu1 %v23729_v31  ;;  %14494 = vmatprep.mubr.f32.mxu1 %v20240_v36 }
 0x591   : > { %14495 = vmatmul.mubr.f32.vlgmr.msra.gmra.mrb[16].mxu1 %v20232_v17 }
 0x592   : > { %14497 = vmatprep.mubr.f32.mxu1 %v20255_v12 }
 0x595   : > { %14498 = vmatmul.mubr.f32.gmra.mrb[18].mxu1 %v20251_v43 }
 0x596   : > { %14500 = vmatprep.mubr.f32.mxu1 %v20283_v2 }
 0x599   : > { %14501 = vmatmul.mubr.f32.gmra.mrb[20].mxu1 %v20276_v49 }
 0x59a   : > { %14503 = vmatprep.mubr.f32.mxu1 %v20303_v32 }
 0x59d   : > { %14504 = vmatmul.mubr.f32.gmra.mrb[22].mxu1 %v20299_v7 }
 0x59e   : > { %14506 = vmatprep.mubr.f32.mxu1 %v20324_v54 }
 0x5a1   : > { %14507 = vmatmul.mubr.f32.gmra.mrb[24].mxu1 %v20320_v10 }
 0x5a2   : > { %14509 = vmatprep.mubr.f32.mxu1 %v20345_v27 }
 0x5a5   : > { %14510 = vmatmul.mubr.f32.gmra.mrb[26].mxu1 %v20341_v52 }
 0x5a6   : > { %14512 = vmatprep.mubr.f32.mxu1 %v20366_v51 }
 0x5a9   : > { %14513 = vmatmul.mubr.f32.gmra.mrb[28].mxu1 %v20362_v46 }
 0x5aa   : > { %14515 = vmatprep.mubr.f32.mxu1 %v20386_v55 }
 0x5ad   : > { %14516 = vmatmul.mubr.f32.gmra.mrb[30].mxu1 %v20383_v21 }
 0x664   : > { %v14496_v43 = vpop.f32.mrb[16].mxu1 }
 0x665   : > { %v5589_v36 = vand.u32 4294901760, %v14496_v43  ;;  %v5487_v60 = vpop.f32.mrb[17].mxu1 }
 0x666   : > { %v5586_v35 = vand.u32 4294901760, %v5487_v60 }
 0x667   : > { %v5835_v25 = vsub.f32 %v14496_v43, %v5589_v36 }
 0x668   : > { %v20592_v26 = vpack.c.bf16 %v5589_v36, %v5586_v35  ;;  %v5828_v40 = vsub.f32 %v5487_v60, %v5586_v35  ;;  %v14499_v32 = vpop.f32.mrb[18].mxu1 }
 0x669   : > { %v5836_v54 = vand.u32 4294901760, %v5835_v25  ;;  %v5595_v17 = vand.u32 4294901760, %v14499_v32  ;;  %v5499_v49 = vpop.f32.mrb[19].mxu1 }
 0x66a   : > { %v5829_v12 = vand.u32 4294901760, %v5828_v40  ;;  %v5592_v51 = vand.u32 4294901760, %v5499_v49  ;;  %16631 = vmatprep.subr.bf16.mxu0 %v20592_v26  ;;  %v20595_v2 = vpack.c.bf16 %v5835_v25, %v5828_v40 }
 0x66b   : > { %v5837_v7 = vsub.f32 %v5835_v25, %v5836_v54  ;;  %v5849_v10 = vsub.f32 %v14499_v32, %v5595_v17  ;;  %16633 = vmatpush3.bf16.msra.mxu0 %v20592_v26 }
 0x66c   : > { %v5830_v56 = vsub.f32 %v5828_v40, %v5829_v12  ;;  %v20598_v52 = vpack.c.bf16 %v5595_v17, %v5592_v51  ;;  %v5842_v8 = vsub.f32 %v5499_v49, %v5592_v51  ;;  %v14502_v27 = vpop.f32.mrb[20].mxu1  ;;  %v20600_v46 = vpack.c.bf16 %v5836_v54, %v5829_v12 }
 0x66d   : > { %v5850_v59 = vand.u32 4294901760, %v5849_v10  ;;  %v5601_v20 = vand.u32 4294901760, %v14502_v27  ;;  %v5511_v21 = vpop.f32.mrb[21].mxu1  ;;  %v5838_v23 = vand.u32 4294901760, %v5837_v7 }
 0x66e   : > { %v5843_v55 = vand.u32 4294901760, %v5842_v8  ;;  %v5598_v48 = vand.u32 4294901760, %v5511_v21  ;;  %16635 = vmatprep.subr.bf16.mxu0 %v20598_v52  ;;  %v5831_v24 = vand.u32 4294901760, %v5830_v56  ;;  %v20603_v19 = vpack.c.bf16 %v5849_v10, %v5842_v8 }
 0x66f   : > { %v5851_v28 = vsub.f32 %v5849_v10, %v5850_v59  ;;  %v5863_v3 = vsub.f32 %v14502_v27, %v5601_v20  ;;  %16637 = vmatpush3.bf16.msra.mxu0 %v20598_v52 }
 0x670   : > { %v5844_v50 = vsub.f32 %v5842_v8, %v5843_v55  ;;  %v20606_v18 = vpack.c.bf16 %v5601_v20, %v5598_v48  ;;  %v5856_v31 = vsub.f32 %v5511_v21, %v5598_v48  ;;  %v14505_v34 = vpop.f32.mrb[22].mxu1  ;;  %v20608_v9 = vpack.c.bf16 %v5838_v23, %v5831_v24 }
 0x671   : > { %v5864_v57 = vand.u32 4294901760, %v5863_v3  ;;  %v5607_v41 = vand.u32 4294901760, %v14505_v34  ;;  %v5523_v61 = vpop.f32.mrb[23].mxu1  ;;  %v5852_v47 = vand.u32 4294901760, %v5851_v28  ;;  %v20610_v5 = vpack.c.bf16 %v5850_v59, %v5843_v55 }
 0x672   : > { %v5857_v1 = vand.u32 4294901760, %v5856_v31  ;;  %v5604_v6 = vand.u32 4294901760, %v5523_v61  ;;  %16639 = vmatprep.subr.bf16.mxu0 %v20606_v18  ;;  %v5845_v44 = vand.u32 4294901760, %v5844_v50  ;;  %v20613_v39 = vpack.c.bf16 %v5863_v3, %v5856_v31 }
 0x673   : > { %v5865_v58 = vsub.f32 %v5863_v3, %v5864_v57  ;;  %v5877_v0 = vsub.f32 %v14505_v34, %v5607_v41  ;;  %16641 = vmatpush3.bf16.msra.mxu0 %v20606_v18 }
 0x674   : > { %v5858_v30 = vsub.f32 %v5856_v31, %v5857_v1  ;;  %v20616_v13 = vpack.c.bf16 %v5607_v41, %v5604_v6  ;;  %v5870_v29 = vsub.f32 %v5523_v61, %v5604_v6  ;;  %v14508_v37 = vpop.f32.mrb[24].mxu1  ;;  %v20618_v53 = vpack.c.bf16 %v5852_v47, %v5845_v44 }
 0x675   : > { %v5878_v62 = vand.u32 4294901760, %v5877_v0  ;;  %v5613_v42 = vand.u32 4294901760, %v14508_v37  ;;  %v5535_v14 = vpop.f32.mrb[25].mxu1  ;;  %v5866_v4 = vand.u32 4294901760, %v5865_v58  ;;  %v20620_v15 = vpack.c.bf16 %v5864_v57, %v5857_v1 }
 0x676   : > { %v5871_v45 = vand.u32 4294901760, %v5870_v29  ;;  %v5610_v38 = vand.u32 4294901760, %v5535_v14  ;;  %16643 = vmatprep.subr.bf16.mxu0 %v20616_v13  ;;  %v5859_v63 = vand.u32 4294901760, %v5858_v30  ;;  %v20623_v33 = vpack.c.bf16 %v5877_v0, %v5870_v29 }
 0x677   : > { %v5879_v22 = vsub.f32 %v5877_v0, %v5878_v62  ;;  %v5891_v11 = vsub.f32 %v14508_v37, %v5613_v42  ;;  %16645 = vmatpush3.bf16.msra.mxu0 %v20616_v13 }
 0x678   : > { %v5872_v16 = vsub.f32 %v5870_v29, %v5871_v45  ;;  %v20626_v43 = vpack.c.bf16 %v5613_v42, %v5610_v38  ;;  %v5884_v36 = vsub.f32 %v5535_v14, %v5610_v38  ;;  %v14511_v60 = vpop.f32.mrb[26].mxu1  ;;  %v20628_v35 = vpack.c.bf16 %v5866_v4, %v5859_v63 }
 0x679   : > { %v5892_v25 = vand.u32 4294901760, %v5891_v11  ;;  %v5619_v40 = vand.u32 4294901760, %v14511_v60  ;;  %v5547_v32 = vpop.f32.mrb[27].mxu1  ;;  %v5880_v54 = vand.u32 4294901760, %v5879_v22  ;;  %v20630_v17 = vpack.c.bf16 %v5878_v62, %v5871_v45 }
 0x67a   : > { %v5885_v49 = vand.u32 4294901760, %v5884_v36  ;;  %v5616_v12 = vand.u32 4294901760, %v5547_v32  ;;  %16647 = vmatprep.subr.bf16.mxu0 %v20626_v43  ;;  %v5873_v51 = vand.u32 4294901760, %v5872_v16  ;;  %v20633_v7 = vpack.c.bf16 %v5891_v11, %v5884_v36 }
 0x67b   : > { %v5893_v10 = vsub.f32 %v5891_v11, %v5892_v25  ;;  %v5905_v56 = vsub.f32 %v14511_v60, %v5619_v40  ;;  %16649 = vmatpush3.bf16.msra.mxu0 %v20626_v43 }
 0x67c   : > { %v5886_v8 = vsub.f32 %v5884_v36, %v5885_v49  ;;  %v20636_v27 = vpack.c.bf16 %v5619_v40, %v5616_v12  ;;  %v5898_v59 = vsub.f32 %v5547_v32, %v5616_v12  ;;  %v14514_v20 = vpop.f32.mrb[28].mxu1  ;;  %v20638_v21 = vpack.c.bf16 %v5880_v54, %v5873_v51 }
 0x67d   : > { %v5906_v23 = vand.u32 4294901760, %v5905_v56  ;;  %v5625_v55 = vand.u32 4294901760, %v14514_v20  ;;  %v5559_v48 = vpop.f32.mrb[29].mxu1  ;;  %v5894_v24 = vand.u32 4294901760, %v5893_v10  ;;  %v20640_v28 = vpack.c.bf16 %v5892_v25, %v5885_v49 }
 0x67e   : > { %v5899_v3 = vand.u32 4294901760, %v5898_v59  ;;  %v5622_v50 = vand.u32 4294901760, %v5559_v48  ;;  %16651 = vmatprep.subr.bf16.mxu0 %v20636_v27  ;;  %v5887_v31 = vand.u32 4294901760, %v5886_v8  ;;  %v20643_v34 = vpack.c.bf16 %v5905_v56, %v5898_v59  ;;  %v23766_v8 = vld [vmem:[#allocation6_spill] sm:$0xff] }
 0x67f   : > { %v5907_v57 = vsub.f32 %v5905_v56, %v5906_v23  ;;  %v5919_v41 = vsub.f32 %v14514_v20, %v5625_v55  ;;  %16653 = vmatpush3.bf16.msra.mxu0 %v20636_v27  ;;  %v23767_v20 = vld [vmem:[#allocation9_spill] sm:$0xff] }
 0x680   : > { %v5900_v61 = vsub.f32 %v5898_v59, %v5899_v3  ;;  %v20646_v47 = vpack.c.bf16 %v5625_v55, %v5622_v50  ;;  %v5912_v1 = vsub.f32 %v5559_v48, %v5622_v50  ;;  %v14517_v6 = vpop.f32.mrb[30].mxu1  ;;  %v16678_v44 = vpack.c.bf16 %v5894_v24, %v5887_v31  ;;  %v23768_v55 = vld [vmem:[#allocation45_spill] sm:$0xff]  ;;  %v23775_v31 = vld [vmem:[#allocation71_spill] sm:$0xff] }
 0x681   : > { %v5920_v58 = vand.u32 4294901760, %v5919_v41  ;;  %v5631_v0 = vand.u32 4294901760, %v14517_v6  ;;  %v5571_v30 = vpop.f32.mrb[31].mxu1  ;;  %v5908_v29 = vand.u32 4294901760, %v5907_v57  ;;  %v20648_v37 = vpack.c.bf16 %v5906_v23, %v5899_v3  ;;  %v23769_v48 = vld [vmem:[#allocation49_spill] sm:$0xff]  ;;  %v23771_v3 = vld [vmem:[#allocation54_spill] sm:$0xff] }
 0x682   : > { %v5913_v62 = vand.u32 4294901760, %v5912_v1  ;;  %v5628_v42 = vand.u32 4294901760, %v5571_v30  ;;  %16655 = vmatprep.subr.bf16.mxu0 %v20646_v47  ;;  %v5901_v14 = vand.u32 4294901760, %v5900_v61  ;;  %v20651_v4 = vpack.c.bf16 %v5919_v41, %v5912_v1  ;;  %v23770_v24 = vld [vmem:[#allocation53_spill] sm:$0xff] }
 0x683   : > { %v5921_v45 = vsub.f32 %v5919_v41, %v5920_v58  ;;  %v5933_v38 = vsub.f32 %v14517_v6, %v5631_v0  ;;  %16657 = vmatpush3.bf16.msra.mxu0 %v20646_v47  ;;  %v23773_v50 = vld [vmem:[#allocation65_spill] sm:$0xff]  ;;  %v23778_v41 = vld [vmem:[#allocation76_spill] sm:$0xff]  ;;  %v23782_v6 = vld [vmem:[#allocation14_spill] sm:$0xff] }
 0x684   : > { %v5914_v63 = vsub.f32 %v5912_v1, %v5913_v62  ;;  %v20654_v22 = vpack.c.bf16 %v5631_v0, %v5628_v42  ;;  %v5926_v11 = vsub.f32 %v5571_v30, %v5628_v42  ;;  %v16682_v16 = vpack.c.bf16 %v5908_v29, %v5901_v14  ;;  %v23776_v57 = vld [vmem:[#allocation73_spill] sm:$0xff]  ;;  %v23787_v29 = vld [vmem:[#allocation31_spill] sm:$0xff]  ;;  %v23793_v14 = vld [vmem:[#allocation52_spill] sm:$0xff] }
 0x685   : > { %v5934_v36 = vand.u32 4294901760, %v5933_v38  ;;  %v5922_v60 = vand.u32 4294901760, %v5921_v45  ;;  %v20656_v25 = vpack.c.bf16 %v5920_v58, %v5913_v62  ;;  %v23779_v61 = vld [vmem:[#allocation77_spill] sm:$0xff]  ;;  %v23791_v42 = vld [vmem:[#allocation43_spill] sm:$0xff] }
 0x686   : > { %v5927_v40 = vand.u32 4294901760, %v5926_v11  ;;  %16659 = vmatprep.subr.bf16.mxu0 %v20654_v22  ;;  %v5915_v32 = vand.u32 4294901760, %v5914_v63  ;;  %v20659_v54 = vpack.c.bf16 %v5933_v38, %v5926_v11  ;;  %v23781_v1 = vld [vmem:[#allocation21_spill] sm:$0xff] }
 0x687   : > { %v5935_v49 = vsub.f32 %v5933_v38, %v5934_v36  ;;  %16661 = vmatpush3.bf16.msra.mxu0 %v20654_v22  ;;  %v23784_v58 = vld [vmem:[#allocation25_spill] sm:$0xff]  ;;  %v23796_v38 = vld [vmem:[#allocation64_spill] sm:$0xff] }
 0x688   : > { %v5928_v12 = vsub.f32 %v5926_v11, %v5927_v40  ;;  %16663 = vmatprep.subr.bf16.mxu0 %v20608_v9  ;;  %v16686_v51 = vpack.c.bf16 %v5922_v60, %v5915_v32  ;;  %v20663_v10 = vpack.c.bf16 %v5934_v36, %v5927_v40  ;;  %v23785_v0 = vld [vmem:[#allocation5_spill] sm:$0xff]  ;;  %v6872_v11 = vld [vmem:[%s20717_s7 + $0x8] sm:$0xff]  ;;  %v6873_v60 = vld [vmem:[%s20717_s7 + $0x10] sm:$0xff] }
 0x689   : > { %v5936_v56 = vand.u32 4294901760, %v5935_v49  ;;  %v23786_v30 = vld [vmem:[#allocation13_spill] sm:$0xff]  ;;  %v23799_v40 = vld [vmem:[#allocation26_spill] sm:$0xff]  ;;  %v6874_v32 = vld [vmem:[%s20717_s7 + $0x18] sm:$0xff] }
 0x68a   : > { %14551 = vmatmul.mubr.f32.vlgmr.msra.gmra.mrb[32].mxu0 %v23766_v8  ;;  %v5929_v59 = vand.u32 4294901760, %v5928_v12  ;;  %v23789_v62 = vld [vmem:[#allocation37_spill] sm:$0xff]  ;;  %v7081_v49 = vld [vmem:[%s20728_s10 + $0x10] sm:$0xff] }
 0x68b   : > { %16665 = vmatpush3.bf16.msra.mxu0 %v20608_v9  ;;  %14553 = vmatprep.mubr.f32.mxu0 %v23767_v20  ;;  %v23772_v9 = vld [vmem:[#allocation61_spill] sm:$0xff]  ;;  %v23801_v12 = vld [vmem:[#allocation15_spill] sm:$0xff]  ;;  %v6876_v20 = vld [vmem:[%s20717_s7 + $0x28] sm:$0xff] }
 0x68c   : > { %16667 = vmatprep.subr.bf16.mxu0 %v20618_v53  ;;  %v16690_v23 = vpack.c.bf16 %v5936_v56, %v5929_v59  ;;  %v6871_v45 = vld [vmem:[%s20717_s7] sm:$0xff]  ;;  %v23802_v56 = vld [vmem:[#allocation16_spill] sm:$0xff] }
 0x68d   : > { %v7079_v63 = vld [vmem:[%s20728_s10] sm:$0xff] }
 0x68e   : > { %14554 = vmatmul.mubr.f32.gmra.mrb[34].mxu0 %v23768_v55  ;;  %v23798_v36 = vld [vmem:[#allocation17_spill] sm:$0xff] }
 0x68f   : > { %16669 = vmatpush3.bf16.msra.mxu0 %v20618_v53  ;;  %14556 = vmatprep.mubr.f32.mxu0 %v23769_v48  ;;  %v23774_v53 = vld [vmem:[#allocation68_spill] sm:$0xff]  ;;  %v6875_v8 = vld [vmem:[%s20717_s7 + $0x20] sm:$0xff]  ;;  %v23805_v48 = vld [vmem:[#allocation42_spill] sm:$0xff] }
 0x690   : > { %16671 = vmatprep.subr.bf16.mxu0 %v20628_v35  ;;  %v23803_v59 = vld [vmem:[#allocation33_spill] sm:$0xff] }
 0x691   : > { %v7083_v55 = vld [vmem:[%s20728_s10 + $0x20] sm:$0xff] }
 0x692   : > { %14557 = vmatmul.mubr.f32.gmra.mrb[36].mxu0 %v23770_v24  ;;  %v7084_v24 = vld [vmem:[%s20728_s10 + $0x28] sm:$0xff] }
 0x693   : > { %16673 = vmatpush3.bf16.msra.mxu0 %v20628_v35  ;;  %14559 = vmatprep.mubr.f32.mxu0 %v23771_v3  ;;  %v23777_v35 = vld [vmem:[#allocation75_spill] sm:$0xff] }
 0x694   : > { %16675 = vmatprep.subr.bf16.mxu0 %v20638_v21  ;;  %v23806_v3 = vld [vmem:[#allocation47_spill] sm:$0xff] }
 0x696   : > { %14560 = vmatmul.mubr.f32.gmra.mrb[38].mxu0 %v23772_v9  ;;  %v6877_v9 = vld [vmem:[%s20717_s7 + $0x30] sm:$0xff] }
 0x697   : > { %16677 = vmatpush3.bf16.msra.mxu0 %v20638_v21  ;;  %14562 = vmatprep.mubr.f32.mxu0 %v23773_v50  ;;  %v23780_v21 = vld [vmem:[#allocation78_spill] sm:$0xff]  ;;  %v23807_v50 = vld [vmem:[#allocation51_spill] sm:$0xff] }
 0x698   : > { %16679 = vmatprep.subr.bf16.mxu0 %v16678_v44 }
 0x69a   : > { %14563 = vmatmul.mubr.f32.gmra.mrb[40].mxu0 %v23774_v53  ;;  %v6878_v53 = vld [vmem:[%s20717_s7 + $0x38] sm:$0xff] }
 0x69b   : > { %16681 = vmatpush3.bf16.msra.mxu0 %v16678_v44  ;;  %14565 = vmatprep.mubr.f32.mxu0 %v23775_v31  ;;  %v23783_v44 = vld [vmem:[#allocation18_spill] sm:$0xff]  ;;  %v23808_v31 = vld [vmem:[#allocation56_spill] sm:$0xff] }
 0x69c   : > { %16683 = vmatprep.subr.bf16.mxu0 %v16682_v16 }
 0x69e   : > { %14566 = vmatmul.mubr.f32.gmra.mrb[42].mxu0 %v23776_v57  ;;  %v7085_v57 = vld [vmem:[%s20728_s10 + $0x30] sm:$0xff] }
 0x69f   : > { %16685 = vmatpush3.bf16.msra.mxu0 %v16682_v16  ;;  %14568 = vmatprep.mubr.f32.mxu0 %v23777_v35  ;;  %v7080_v16 = vld [vmem:[%s20728_s10 + $0x8] sm:$0xff]  ;;  %v23809_v35 = vld [vmem:[#allocation59_spill] sm:$0xff] }
 0x6a0   : > { %16687 = vmatprep.subr.bf16.mxu0 %v16686_v51 }
 0x6a2   : > { %14569 = vmatmul.mubr.f32.gmra.mrb[44].mxu0 %v23778_v41  ;;  %v7086_v41 = vld [vmem:[%s20728_s10 + $0x38] sm:$0xff] }
 0x6a3   : > { %16689 = vmatpush3.bf16.msra.mxu0 %v16686_v51  ;;  %14571 = vmatprep.mubr.f32.mxu0 %v23779_v61  ;;  %v7082_v51 = vld [vmem:[%s20728_s10 + $0x18] sm:$0xff]  ;;  %v23810_v61 = vld [vmem:[#allocation63_spill] sm:$0xff] }
 0x6a4   : > { %16691 = vmatprep.subr.bf16.mxu0 %v16690_v23 }
 0x6a6   : > { %14572 = vmatmul.mubr.f32.gmra.mrb[46].mxu0 %v23780_v21  ;;  %v6879_v21 = vld [vmem:[%s20717_s7 + $0x40] sm:$0xff] }
 0x6a7   : > { %16693 = vmatpush3.bf16.msra.mxu0 %v16690_v23  ;;  %14606 = vmatprep.mubr.f32.mxu0 %v23781_v1  ;;  %v23804_v23 = vld [vmem:[#allocation36_spill] sm:$0xff] }
 0x6a8   : > { %16695 = vmatprep.subr.bf16.mxu0 %v20595_v2 }
 0x6aa   : > { %14607 = vmatmul.mubr.f32.vlgmr.msra.gmra.mrb[32].mxu0 %v23782_v6 }
 0x6ab   : > { %16697 = vmatpush3.bf16.msra.mxu0 %v20595_v2  ;;  %14609 = vmatprep.mubr.f32.mxu0 %v23783_v44  ;;  %v23788_v2 = vld [vmem:[#allocation34_spill] sm:$0xff] }
 0x6ac   : > { %16699 = vmatprep.subr.bf16.mxu0 %v20603_v19 }
 0x6ae   : > { %14610 = vmatmul.mubr.f32.gmra.mrb[34].mxu0 %v23784_v58 }
 0x6af   : > { %16701 = vmatpush3.bf16.msra.mxu0 %v20603_v19  ;;  %14612 = vmatprep.mubr.f32.mxu0 %v23785_v0  ;;  %v23790_v19 = vld [vmem:[#allocation41_spill] sm:$0xff] }
 0x6b0   : > { %16703 = vmatprep.subr.bf16.mxu0 %v20613_v39 }
 0x6b2   : > { %14613 = vmatmul.mubr.f32.gmra.mrb[36].mxu0 %v23786_v30 }
 0x6b3   : > { %16705 = vmatpush3.bf16.msra.mxu0 %v20613_v39  ;;  %14615 = vmatprep.mubr.f32.mxu0 %v23787_v29  ;;  %v23792_v39 = vld [vmem:[#allocation48_spill] sm:$0xff] }
 0x6b4   : > { %16707 = vmatprep.subr.bf16.mxu0 %v20623_v33 }
 0x6b6   : > { %14616 = vmatmul.mubr.f32.gmra.mrb[38].mxu0 %v23788_v2 }
 0x6b7   : > { %16709 = vmatpush3.bf16.msra.mxu0 %v20623_v33  ;;  %14618 = vmatprep.mubr.f32.mxu0 %v23789_v62  ;;  %v18271_v33 = vmov 0  }
 0x6b8   : > { %16711 = vmatprep.subr.bf16.mxu0 %v20633_v7  ;;  %18158 = vset.pattern.permute.xlu0 %v18271_v33 }
 0x6b9   : > { %18159 = vset.pattern.permute.xlu1 %v18271_v33  ;;  %6889 = vperm.xlu0 %18158, %v6871_v45   ;;  %v23811_v33 = vld [vmem:[#allocation67_spill] sm:$0xff]  ;;  %v6880_v45 = vld [vmem:[%s20717_s7 + $0x48] sm:$0xff] }
 0x6ba   : > { %14619 = vmatmul.mubr.f32.gmra.mrb[40].mxu0 %v23790_v19  ;;  %7097 = vperm.xlu1 %18159, %v7079_v63   ;;  %v23812_v63 = vld [vmem:[#allocation70_spill] sm:$0xff] }
 0x6bb   : > { %16713 = vmatpush3.bf16.msra.mxu0 %v20633_v7  ;;  %14621 = vmatprep.mubr.f32.mxu0 %v23791_v42  ;;  %v23794_v7 = vld [vmem:[#allocation57_spill] sm:$0xff] }
 0x6bc   : > { %16715 = vmatprep.subr.bf16.mxu0 %v20643_v34 }
 0x6bd   : > { %6894 = vperm.xlu0 %18158, %v6872_v11   ;;  %v7087_v11 = vld [vmem:[%s20728_s10 + $0x40] sm:$0xff] }
 0x6be   : > { %14622 = vmatmul.mubr.f32.gmra.mrb[42].mxu0 %v23792_v39  ;;  %7102 = vperm.xlu1 %18159, %v7080_v16   ;;  %v7088_v16 = vld [vmem:[%s20728_s10 + $0x48] sm:$0xff] }
 0x6bf   : > { %16717 = vmatpush3.bf16.msra.mxu0 %v20643_v34  ;;  %14624 = vmatprep.mubr.f32.mxu0 %v23793_v14  ;;  %v23795_v34 = vld [vmem:[#allocation60_spill] sm:$0xff] }
 0x6c0   : > { %16719 = vmatprep.subr.bf16.mxu0 %v20651_v4 }
 0x6c1   : > { %6899 = vperm.xlu0 %18158, %v6873_v60   ;;  %v6881_v60 = vld [vmem:[%s20717_s7 + $0x50] sm:$0xff] }
 0x6c2   : > { %14625 = vmatmul.mubr.f32.gmra.mrb[44].mxu0 %v23794_v7  ;;  %6904 = vperm.xlu1 %18159, %v6874_v32   ;;  %v6882_v32 = vld [vmem:[%s20717_s7 + $0x58] sm:$0xff] }
 0x6c3   : > { %16721 = vmatpush3.bf16.msra.mxu0 %v20651_v4  ;;  %14627 = vmatprep.mubr.f32.mxu0 %v23795_v34  ;;  %v23797_v4 = vld [vmem:[#allocation11_spill] sm:$0xff] }
 0x6c4   : > { %16723 = vmatprep.subr.bf16.mxu0 %v20659_v54 }
 0x6c5   : > { %7107 = vperm.xlu0 %18158, %v7081_v49   ;;  %v7089_v49 = vld [vmem:[%s20728_s10 + $0x50] sm:$0xff] }
 0x6c6   : > { %14628 = vmatmul.mubr.f32.gmra.mrb[46].mxu0 %v23796_v38  ;;  %7112 = vperm.xlu1 %18159, %v7082_v51   ;;  %v23818_v51 = vld [vmem:[#allocation30_spill] sm:$0xff] }
 0x6c7   : > { %16725 = vmatpush3.bf16.msra.mxu0 %v20659_v54  ;;  %14662 = vmatprep.mubr.f32.mxu0 %v23797_v4  ;;  %v23800_v54 = vld [vmem:[#allocation27_spill] sm:$0xff]  ;;  %v23813_v4 = vld [vmem:[#allocation22_spill] sm:$0xff] }
 0x6c8   : > { %16727 = vmatprep.subr.bf16.mxu0 %v20592_v26 }
 0x6c9   : > { %6909 = vperm.xlu0 %18158, %v6875_v8   ;;  %v23819_v8 = vld [vmem:[#allocation39_spill] sm:$0xff] }
 0x6ca   : > { %14663 = vmatmul.mubr.f32.vlgmr.msra.gmra.mrb[32].mxu0 %v23798_v36  ;;  %6914 = vperm.xlu1 %18159, %v6876_v20   ;;  %v23814_v36 = vld [vmem:[#allocation24_spill] sm:$0xff]  ;;  %v7091_v20 = vld [vmem:[%s20728_s10 + $0x60] sm:$0xff] }
 0x6cb   : > { %16729 = vmatpush3.bf16.msra.mxu0 %v20592_v26  ;;  %14665 = vmatprep.mubr.f32.mxu0 %v23799_v40  ;;  %v23815_v40 = vld [vmem:[#allocation8_spill] sm:$0xff] }
 0x6cc   : > { %16731 = vmatprep.subr.bf16.mxu0 %v20598_v52 }
 0x6cd   : > { %7117 = vperm.xlu0 %18158, %v7083_v55   ;;  %v23822_v55 = vld [vmem:[#allocation55_spill] sm:$0xff] }
 0x6ce   : > { %14666 = vmatmul.mubr.f32.gmra.mrb[34].mxu0 %v23800_v54  ;;  %7122 = vperm.xlu1 %18159, %v7084_v24   ;;  %v23816_v54 = vld [vmem:[#allocation10_spill] sm:$0xff] }
 0x6cf   : > { %16733 = vmatpush3.bf16.msra.mxu0 %v20598_v52  ;;  %14668 = vmatprep.mubr.f32.mxu0 %v23801_v12  ;;  %v23817_v12 = vld [vmem:[#allocation28_spill] sm:$0xff]  ;;  %v23823_v24 = vld [vmem:[#allocation58_spill] sm:$0xff] }
 0x6d0   : > { %16735 = vmatprep.subr.bf16.mxu0 %v20606_v18 }
 0x6d1   : > { %6919 = vperm.xlu0 %18158, %v6877_v9   ;;  %v7093_v9 = vld [vmem:[%s20728_s10 + $0x70] sm:$0xff] }
 0x6d2   : > { %14669 = vmatmul.mubr.f32.gmra.mrb[36].mxu0 %v23802_v56  ;;  %6924 = vperm.xlu1 %18159, %v6878_v53   ;;  %v6883_v56 = vld [vmem:[%s20717_s7 + $0x60] sm:$0xff]  ;;  %v7094_v53 = vld [vmem:[%s20728_s10 + $0x78] sm:$0xff] }
 0x6d3   : > { %16737 = vmatpush3.bf16.msra.mxu0 %v20606_v18  ;;  %14671 = vmatprep.mubr.f32.mxu0 %v23803_v59  ;;  %v23820_v59 = vld [vmem:[#allocation46_spill] sm:$0xff] }
 0x6d4   : > { %16739 = vmatprep.subr.bf16.mxu0 %v20616_v13 }
 0x6d5   : > { %7127 = vperm.xlu0 %18158, %v7085_v57   ;;  %v23828_v57 = vld [vmem:[#allocation74_spill] sm:$0xff] }
 0x6d6   : > { %14672 = vmatmul.mubr.f32.gmra.mrb[38].mxu0 %v23804_v23  ;;  %7132 = vperm.xlu1 %18159, %v7086_v41   ;;  %v23821_v23 = vld [vmem:[#allocation50_spill] sm:$0xff] }
 0x6d7   : > { %16741 = vmatpush3.bf16.msra.mxu0 %v20616_v13  ;;  %14674 = vmatprep.mubr.f32.mxu0 %v23805_v48  ;;  %v6885_v48 = vld [vmem:[%s20717_s7 + $0x70] sm:$0xff] }
 0x6d8   : > { %16743 = vmatprep.subr.bf16.mxu0 %v20626_v43 }
 0x6d9   : > { %6929 = vperm.xlu0 %18158, %v6879_v21   ;;  %v23833_v21 = vld [vmem:[#allocation20_spill] sm:$0xff] }
 0x6da   : > { %14675 = vmatmul.mubr.f32.gmra.mrb[40].mxu0 %v23806_v3  ;;  %6934 = vperm.xlu1 %18159, %v6880_v45   ;;  %v23824_v3 = vld [vmem:[#allocation62_spill] sm:$0xff] }
 0x6db   : > { %16745 = vmatpush3.bf16.msra.mxu0 %v20626_v43  ;;  %14677 = vmatprep.mubr.f32.mxu0 %v23807_v50  ;;  %v23825_v50 = vld [vmem:[#allocation66_spill] sm:$0xff] }
 0x6dc   : > { %16747 = vmatprep.subr.bf16.mxu0 %v20636_v27 }
 0x6dd   : > { %7137 = vperm.xlu0 %18158, %v7087_v11  }
 0x6de   : > { %14678 = vmatmul.mubr.f32.gmra.mrb[42].mxu0 %v23808_v31  ;;  %7142 = vperm.xlu1 %18159, %v7088_v16   ;;  %v23827_v31 = vld [vmem:[#allocation72_spill] sm:$0xff] }
 0x6df   : > { %16749 = vmatpush3.bf16.msra.mxu0 %v20636_v27  ;;  %14680 = vmatprep.mubr.f32.mxu0 %v23809_v35 }
 0x6e0   : > { %16751 = vmatprep.subr.bf16.mxu0 %v20646_v47 }
 0x6e1   : > { %6939 = vperm.xlu0 %18158, %v6881_v60  }
 0x6e2   : > { %14681 = vmatmul.mubr.f32.gmra.mrb[44].mxu0 %v23810_v61  ;;  %6944 = vperm.xlu1 %18159, %v6882_v32  }
 0x6e3   : > { %16753 = vmatpush3.bf16.msra.mxu0 %v20646_v47  ;;  %14683 = vmatprep.mubr.f32.mxu0 %v23811_v33  ;;  %v5583_v33 = vsub.s32 2, %v23833_v21 }
 0x6e4   : > { %16755 = vmatprep.subr.bf16.mxu0 %v20654_v22 }
 0x6e5   : > { %7147 = vperm.xlu0 %18158, %v7089_v49  }
 0x6e6   : > { %14684 = vmatmul.mubr.f32.gmra.mrb[46].mxu0 %v23812_v63  ;;  %v18225_v63 = vld [vmem:[%s23009_s5] sm:$0xff] }
 0x6e7   : > { %16757 = vmatpush3.bf16.msra.mxu0 %v20654_v22  ;;  %14718 = vmatprep.mubr.f32.mxu0 %v23813_v4  ;;  %v20943_v11 = vrot.slane %v18225_v63, %v5583_v33 }
 0x6e8   : > { %16759 = vmatprep.subr.bf16.mxu0 %v20600_v46 }
 0x6e9   : > { %6949 = vperm.xlu0 %18158, %v6883_v56  }
 0x6ea   : > { %14719 = vmatmul.mubr.f32.vlgmr.msra.gmra.mrb[32].mxu0 %v23814_v36 }
 0x6eb   : > { %16761 = vmatpush3.bf16.msra.mxu0 %v20600_v46  ;;  %14721 = vmatprep.mubr.f32.mxu0 %v23815_v40  ;;  %v7090_v46 = vld [vmem:[%s20728_s10 + $0x58] sm:$0xff] }
 0x6ec   : > { %16763 = vmatprep.subr.bf16.mxu0 %v20610_v5  ;;  %7152 = vperm.xlu1 %18159, %v7090_v46  }
 0x6ed   : > { %7157 = vperm.xlu0 %18158, %v7091_v20  }
 0x6ee   : > { %14722 = vmatmul.mubr.f32.gmra.mrb[34].mxu0 %v23816_v54 }
 0x6ef   : > { %16765 = vmatpush3.bf16.msra.mxu0 %v20610_v5  ;;  %14724 = vmatprep.mubr.f32.mxu0 %v23817_v12  ;;  %v6884_v5 = vld [vmem:[%s20717_s7 + $0x68] sm:$0xff] }
 0x6f0   : > { %16767 = vmatprep.subr.bf16.mxu0 %v20620_v15  ;;  %6954 = vperm.xlu1 %18159, %v6884_v5  }
 0x6f1   : > { %6959 = vperm.xlu0 %18158, %v6885_v48  }
 0x6f2   : > { %14725 = vmatmul.mubr.f32.gmra.mrb[36].mxu0 %v23818_v51 }
 0x6f3   : > { %16769 = vmatpush3.bf16.msra.mxu0 %v20620_v15  ;;  %14727 = vmatprep.mubr.f32.mxu0 %v23819_v8  ;;  %v7092_v15 = vld [vmem:[%s20728_s10 + $0x68] sm:$0xff] }
 0x6f4   : > { %16771 = vmatprep.subr.bf16.mxu0 %v20630_v17  ;;  %7162 = vperm.xlu1 %18159, %v7092_v15  }
 0x6f5   : > { %7167 = vperm.xlu0 %18158, %v7093_v9  }
 0x6f6   : > { %14728 = vmatmul.mubr.f32.gmra.mrb[38].mxu0 %v23820_v59 }
 0x6f7   : > { %16773 = vmatpush3.bf16.msra.mxu0 %v20630_v17  ;;  %14730 = vmatprep.mubr.f32.mxu0 %v23821_v23  ;;  %v6886_v17 = vld [vmem:[%s20717_s7 + $0x78] sm:$0xff] }
 0x6f8   : > { %16775 = vmatprep.subr.bf16.mxu0 %v20640_v28  ;;  %6964 = vperm.xlu1 %18159, %v6886_v17  }
 0x6fa   : > { %14731 = vmatmul.mubr.f32.gmra.mrb[40].mxu0 %v23822_v55 }
 0x6fb   : > { %16777 = vmatpush3.bf16.msra.mxu0 %v20640_v28  ;;  %14733 = vmatprep.mubr.f32.mxu0 %v23823_v24  ;;  %v23826_v28 = vld [vmem:[#allocation69_spill] sm:$0xff] }
 0x6fc   : > { %16779 = vmatprep.subr.bf16.mxu0 %v20648_v37  ;;  %7172 = vperm.xlu1 %18159, %v7094_v53  }
 0x6fe   : > { %14734 = vmatmul.mubr.f32.gmra.mrb[42].mxu0 %v23824_v3 }
 0x6ff   : > { %16781 = vmatpush3.bf16.msra.mxu0 %v20648_v37  ;;  %14736 = vmatprep.mubr.f32.mxu0 %v23825_v50 }
 0x700   : > { %16783 = vmatprep.subr.bf16.mxu0 %v20656_v25 }
 0x702   : > { %14737 = vmatmul.mubr.f32.gmra.mrb[44].mxu0 %v23826_v28 }
 0x703   : > { %16785 = vmatpush3.bf16.msra.mxu0 %v20656_v25  ;;  %14739 = vmatprep.mubr.f32.mxu0 %v23827_v31  ;;  %v20890_v25 = vld [vmem:[#allocation2 + $0x1a8] sm:$0xff] }
 0x704   : > { %16787 = vmatprep.subr.bf16.mxu0 %v20663_v10 }
 0x706   : > { %14740 = vmatmul.mubr.f32.gmra.mrb[46].mxu0 %v23828_v57 }
 0x707   : > { %16789 = vmatpush3.bf16.msra.mxu0 %v20663_v10  ;;  %14774 = vmatprep.mubr.f32.mxu0 %v23781_v1 }
 0x708   : > { %16791 = vmatprep.subr.bf16.mxu0 %v20592_v26 }
 0x70a   : > { %14775 = vmatmul.mubr.f32.vlgmr.msra.gmra.mrb[32].mxu0 %v23782_v6 }
 0x70b   : > { %16793 = vmatpush3.bf16.msra.mxu0 %v20592_v26  ;;  %14777 = vmatprep.mubr.f32.mxu0 %v23783_v44 }
 0x70c   : > { %16795 = vmatprep.subr.bf16.mxu0 %v20598_v52 }
 0x70e   : > { %14778 = vmatmul.mubr.f32.gmra.mrb[34].mxu0 %v23784_v58 }
 0x70f   : > { %16797 = vmatpush3.bf16.msra.mxu0 %v20598_v52  ;;  %14780 = vmatprep.mubr.f32.mxu0 %v23785_v0  ;;  %v20877_v52 = vld [vmem:[#allocation2 + $0x180] sm:$0xff] }
 0x710   : > { %16799 = vmatprep.subr.bf16.mxu0 %v20606_v18 }
 0x712   : > { %14781 = vmatmul.mubr.f32.gmra.mrb[36].mxu0 %v23786_v30 }
 0x713   : > { %16801 = vmatpush3.bf16.msra.mxu0 %v20606_v18  ;;  %14783 = vmatprep.mubr.f32.mxu0 %v23787_v29  ;;  %v20879_v18 = vld [vmem:[#allocation2 + $0x188] sm:$0xff] }
 0x714   : > { %16803 = vmatprep.subr.bf16.mxu0 %v20616_v13 }
 0x716   : > { %14784 = vmatmul.mubr.f32.gmra.mrb[38].mxu0 %v23788_v2 }
 0x717   : > { %16805 = vmatpush3.bf16.msra.mxu0 %v20616_v13  ;;  %14786 = vmatprep.mubr.f32.mxu0 %v23789_v62  ;;  %v20881_v13 = vld [vmem:[#allocation2 + $0x190] sm:$0xff] }
 0x718   : > { %16807 = vmatprep.subr.bf16.mxu0 %v20626_v43  ;;  %v23282_v37 = vand.u32 4294901760, %v20881_v13 }
 0x71a   : > { %14787 = vmatmul.mubr.f32.gmra.mrb[40].mxu0 %v23790_v19 }
 0x71b   : > { %16809 = vmatpush3.bf16.msra.mxu0 %v20626_v43  ;;  %14789 = vmatprep.mubr.f32.mxu0 %v23791_v42  ;;  %v23284_v43 = vand.u32 4294901760, %v20877_v52 }
 0x71c   : > { %16811 = vmatprep.subr.bf16.mxu0 %v20636_v27 }
 0x71e   : > { %14790 = vmatmul.mubr.f32.gmra.mrb[42].mxu0 %v23792_v39 }
 0x71f   : > { %16813 = vmatpush3.bf16.msra.mxu0 %v20636_v27  ;;  %14792 = vmatprep.mubr.f32.mxu0 %v23793_v14  ;;  %v23283_v27 = vand.u32 4294901760, %v20879_v18 }
 0x720   : > { %16815 = vmatprep.subr.bf16.mxu0 %v20646_v47 }
 0x722   : > { %14793 = vmatmul.mubr.f32.gmra.mrb[44].mxu0 %v23794_v7 }
 0x723   : > { %16817 = vmatpush3.bf16.msra.mxu0 %v20646_v47  ;;  %14795 = vmatprep.mubr.f32.mxu0 %v23795_v34  ;;  %v20885_v47 = vld [vmem:[#allocation2 + $0x198] sm:$0xff] }
 0x724   : > { %16819 = vmatprep.subr.bf16.mxu0 %v20654_v22  ;;  %v23281_v10 = vand.u32 4294901760, %v20885_v47 }
 0x726   : > { %14796 = vmatmul.mubr.f32.gmra.mrb[46].mxu0 %v23796_v38 }
 0x727   : > { %16821 = vmatpush3.bf16.msra.mxu0 %v20654_v22  ;;  %14830 = vmatprep.mubr.f32.mxu0 %v23781_v1  ;;  %v20888_v22 = vld [vmem:[#allocation2 + $0x1a0] sm:$0xff] }
 0x72a   : > { %14831 = vmatmul.mubr.f32.vlgmr.msra.gmra.mrb[32].mxu0 %v23782_v6  ;;  %v20897_v6 = vpack.c.bf16 %v23283_v27, %v23284_v43 }
 0x72b   : > { %14833 = vmatprep.mubr.f32.mxu0 %v23783_v44  ;;  %v23280_v44 = vand.u32 4294901760, %v20888_v22 }
 0x72c   : > { %23829 = vst [vmem:[#allocation38_spill] sm:$0xff] %v20897_v6  ;;  %16823 = vmatprep.subr.bf16.mxu1 %v20897_v6 }
 0x72d   : > { %16825 = vmatpush3.bf16.msra.mxu1 %v20897_v6 }
 0x72e   : > { %14834 = vmatmul.mubr.f32.gmra.mrb[34].mxu0 %v23784_v58  ;;  %v23279_v58 = vand.u32 4294901760, %v20890_v25 }
 0x72f   : > { %14836 = vmatprep.mubr.f32.mxu0 %v23785_v0 }
 0x732   : > { %14837 = vmatmul.mubr.f32.gmra.mrb[36].mxu0 %v23786_v30  ;;  %v20905_v30 = vpack.c.bf16 %v23281_v10, %v23282_v37 }
 0x733   : > { %14839 = vmatprep.mubr.f32.mxu0 %v23787_v29  ;;  %v20907_v29 = vld [vmem:[#allocation2 + $0x1b0] sm:$0xff] }
 0x734   : > { %23830 = vst [vmem:[#allocation12_spill] sm:$0xff] %v20905_v30  ;;  %16827 = vmatprep.subr.bf16.mxu1 %v20905_v30 }
 0x735   : > { %16829 = vmatpush3.bf16.msra.mxu1 %v20905_v30 }
 0x736   : > { %14840 = vmatmul.mubr.f32.gmra.mrb[38].mxu0 %v23788_v2  ;;  %v20909_v2 = vld [vmem:[#allocation2 + $0x1b8] sm:$0xff] }
 0x737   : > { %14842 = vmatprep.mubr.f32.mxu0 %v23789_v62  ;;  %v20918_v62 = vpack.c.bf16 %v23279_v58, %v23280_v44 }
 0x738   : > { %v6890_v1 = vpop.permute.xlu0 %6889 }
 0x739   : > { %v20875_v26 = vpop.permute.xlu1 %7097  ;;  %23831 = vst [vmem:[#allocation29_spill] sm:$0xff] %v20918_v62  ;;  %16831 = vmatprep.subr.bf16.mxu1 %v20918_v62 }
 0x73a   : > { %14843 = vmatmul.mubr.f32.gmra.mrb[40].mxu0 %v23790_v19  ;;  %v23278_v19 = vand.u32 4294901760, %v20907_v29  ;;  %16833 = vmatpush3.bf16.msra.mxu1 %v20918_v62 }
 0x73b   : > { %14845 = vmatprep.mubr.f32.mxu0 %v23791_v42  ;;  %v23277_v42 = vand.u32 4294901760, %v20909_v2 }
 0x73d   : > { %v7103_v0 = vpop.permute.xlu1 %7102 }
 0x73e   : > { %14846 = vmatmul.mubr.f32.gmra.mrb[42].mxu0 %v23792_v39  ;;  %v6895_v39 = vpop.permute.xlu0 %6894 }
 0x73f   : > { %14848 = vmatprep.mubr.f32.mxu0 %v23793_v14 }
 0x741   : > { %v6905_v14 = vpop.permute.xlu1 %6904 }
 0x742   : > { %14849 = vmatmul.mubr.f32.gmra.mrb[44].mxu0 %v23794_v7  ;;  %v20928_v7 = vpack.c.bf16 %v23277_v42, %v23278_v19 }
 0x743   : > { %14851 = vmatprep.mubr.f32.mxu0 %v23795_v34  ;;  %v6900_v34 = vpop.permute.xlu0 %6899 }
 0x744   : > { %23832 = vst [vmem:[#allocation7_spill] sm:$0xff] %v20928_v7  ;;  %16835 = vmatprep.subr.bf16.mxu1 %v20928_v7 }
 0x745   : > { %16837 = vmatpush3.bf16.msra.mxu1 %v20928_v7 }
 0x746   : > { %14852 = vmatmul.mubr.f32.gmra.mrb[46].mxu0 %v23796_v38  ;;  %v7113_v38 = vpop.permute.xlu1 %7112 }
 0x747   : > { %v7108_v35 = vpop.permute.xlu0 %7107 }
 0x74a   : > { %v20933_v41 = vpop.permute.xlu1 %6914 }
 0x74b   : > { %v20935_v61 = vpop.permute.xlu0 %6909 }
 0x74e   : > { %v20938_v45 = vpop.permute.xlu1 %7122 }
 0x74f   : > { %v20945_v4 = vpop.permute.xlu0 %7117 }
 0x752   : > { %v20947_v16 = vpop.permute.xlu1 %6924 }
 0x753   : > { %v20957_v46 = vpop.permute.xlu0 %6919 }
 0x756   : > { %v20959_v8 = vpop.permute.xlu1 %7132 }
 0x757   : > { %v7128_v17 = vpop.permute.xlu0 %7127 }
 0x75a   : > { %v20967_v50 = vpop.permute.xlu1 %6934 }
 0x7fd   : > { %v14832_v36 = vpop.f32.mrb[32].mxu0 }
 0x7fe   : > { %v20950_v60 = vadd.f32 %v14832_v36, %v20943_v11  ;;  %v6777_v40 = vpop.f32.mrb[33].mxu0  ;;  %v20973_v36 = vpop.permute.xlu0 %6929 }
 0x7ff   : > { %v20953_v32 = vadd.f32 %v6777_v40, %v20943_v11 }
 0x800   : > { %v6968_v54 = vmul.f32 %v20950_v60, %v6895_v39  ;;  %v7176_v48 = vmul.f32 %v20950_v60, %v7103_v0 }
 0x801   : > { %v6967_v49 = vmul.f32 %v20953_v32, %v6890_v1  ;;  %v14835_v12 = vpop.f32.mrb[34].mxu0  ;;  %v7175_v3 = vmul.f32 %v20953_v32, %v20875_v26 }
 0x802   : > { %v6989_v51 = vrot.slane %v6968_v54, 4  ;;  %v6789_v56 = vpop.f32.mrb[35].mxu0  ;;  %v20965_v9 = vadd.f32 %v14835_v12, %v20943_v11  ;;  %v7197_v57 = vrot.slane %v7176_v48, 4 }
 0x803   : > { %v6983_v5 = vrot.slane %v6967_v49, 4  ;;  %v20970_v1 = vadd.f32 %v6789_v56, %v20943_v11  ;;  %v7191_v33 = vrot.slane %v7175_v3, 4 }
 0x804   : > { %v6990_v59 = vadd.f32 %v6989_v51, %v6968_v54  ;;  %v6970_v0 = vmul.f32 %v20965_v9, %v6905_v14  ;;  %v7178_v26 = vmul.f32 %v20965_v9, %v7113_v38  ;;  %v7198_v12 = vadd.f32 %v7197_v57, %v7176_v48 }
 0x805   : > { %v6984_v20 = vadd.f32 %v6983_v5, %v6967_v49  ;;  %v14838_v23 = vpop.f32.mrb[36].mxu0  ;;  %23834 = vst [vmem:[#allocation19_spill] sm:$0xff] %v20970_v1  ;;  %v20976_v49 = vpop.permute.xlu1 %7142  ;;  %v6969_v51 = vmul.f32 %v20970_v1, %v6900_v34 }
 0x806   : > { %v6801_v15 = vpop.f32.mrb[37].mxu0  ;;  %v6991_v55 = vrot.slane %v6990_v59, 2  ;;  %v7001_v56 = vrot.slane %v6970_v0, 4  ;;  %v7209_v42 = vrot.slane %v7178_v26, 4 }
 0x807   : > { %v6985_v24 = vrot.slane %v6984_v20, 2  ;;  %v20986_v38 = vadd.f32 %v6801_v15, %v20943_v11  ;;  %v6995_v48 = vrot.slane %v6969_v51, 4 }
 0x808   : > { %v6992_v31 = vadd.f32 %v6991_v55, %v6990_v59  ;;  %v7192_v59 = vadd.f32 %v7191_v33, %v7175_v3  ;;  %v20981_v55 = vadd.f32 %v14838_v23, %v20943_v11  ;;  %v20994_v23 = vpop.permute.xlu0 %7137  ;;  %v7002_v3 = vadd.f32 %v7001_v56, %v6970_v0 }
 0x809   : > { %v14841_v53 = vpop.f32.mrb[38].mxu0  ;;  %v6986_v39 = vadd.f32 %v6985_v24, %v6984_v20  ;;  %v7177_v20 = vmul.f32 %v20970_v1, %v7108_v35  ;;  %23836 = vst [vmem:[#allocation35_spill] sm:$0xff] %v20986_v38  ;;  %v7199_v35 = vrot.slane %v7198_v12, 2  ;;  %v6971_v0 = vmul.f32 %v20986_v38, %v20935_v61 }
 0x80a   : > { %v6813_v28 = vpop.f32.mrb[39].mxu0  ;;  %v6993_v40 = vrot.slane %v6992_v31, 1  ;;  %23835 = vst [vmem:[#allocation32_spill] sm:$0xff] %v20981_v55  ;;  %v20991_v34 = vadd.f32 %v14841_v53, %v20943_v11  ;;  %v6972_v57 = vmul.f32 %v20981_v55, %v20933_v41  ;;  %v7193_v15 = vrot.slane %v7192_v59, 2 }
 0x80b   : > { %v6987_v5 = vrot.slane %v6986_v39, 1  ;;  %v21002_v33 = vadd.f32 %v6813_v28, %v20943_v11  ;;  %v7200_v53 = vadd.f32 %v7199_v35, %v7198_v12  ;;  %v7179_v44 = vmul.f32 %v20986_v38, %v20945_v4 }
 0x80c   : > { %v6994_v14 = vadd.f32 %v6993_v40, %v6992_v31  ;;  %23837 = vst [vmem:[#allocation40_spill] sm:$0xff] %v20991_v34  ;;  %v7203_v31 = vrot.slane %v7177_v20, 4  ;;  %v7194_v56 = vadd.f32 %v7193_v15, %v7192_v59  ;;  %v6974_v28 = vmul.f32 %v20991_v34, %v20947_v16  ;;  %v21026_v37 = vpop.permute.xlu0 %6939 }
 0x80d   : > { %v14844_v63 = vpop.f32.mrb[40].mxu0  ;;  %v6988_v19 = vadd.f32 %v6987_v5, %v6986_v39  ;;  %v20999_v39 = vpop.permute.xlu1 %6944  ;;  %23838 = vst [vmem:[#allocation44_spill] sm:$0xff] %v21002_v33  ;;  %v7210_v5 = vadd.f32 %v7209_v42, %v7178_v26  ;;  %v7201_v12 = vrot.slane %v7200_v53, 1  ;;  %v7013_v42 = vrot.slane %v6972_v57, 4 }
 0x80e   : > { %v6825_v54 = vpop.f32.mrb[41].mxu0  ;;  %7289 = vrot.lane.b32.xlu1 %v6994_v14, %s18272_s13  ;;  %v7180_v14 = vmul.f32 %v20981_v55, %v20938_v45  ;;  %v21016_v35 = vadd.f32 %v7203_v31, %v7177_v20  ;;  %v7195_v26 = vrot.slane %v7194_v56, 1  ;;  %v7003_v10 = vrot.slane %v7002_v3, 2 }
 0x80f   : > { %7287 = vrot.lane.b32.xlu0 %v6988_v19, %s18272_s13  ;;  %v6996_v19 = vadd.f32 %v6995_v48, %v6969_v51  ;;  %v7182_v45 = vmul.f32 %v20991_v34, %v20959_v8  ;;  %v6973_v61 = vmul.f32 %v21002_v33, %v20957_v46  ;;  %v7181_v51 = vmul.f32 %v21002_v33, %v7128_v17 }
 0x810   : > { %v7202_v59 = vadd.f32 %v7201_v12, %v7200_v53  ;;  %v7221_v4 = vrot.slane %v7180_v14, 4  ;;  %v7007_v15 = vrot.slane %v6971_v0, 4  ;;  %v21024_v16 = vadd.f32 %v14844_v63, %v20943_v11  ;;  %v7148_v55 = vpop.permute.xlu0 %7147 }
 0x811   : > { %v20983_v24 = vpop.f32.mrb[42].mxu0  ;;  %v7196_v20 = vadd.f32 %v7195_v26, %v7194_v56  ;;  %v21028_v27 = vpop.permute.xlu1 %7152  ;;  %v7215_v43 = vrot.slane %v7179_v44, 4  ;;  %v7025_v8 = vrot.slane %v6974_v28, 4  ;;  %v7004_v46 = vadd.f32 %v7003_v10, %v7002_v3 }
 0x812   : > { %v20988_v58 = vpop.f32.mrb[43].mxu0  ;;  %7337 = vrot.lane.b32.xlu1 %v7202_v59, %s18273_s14  ;;  %v6997_v17 = vrot.slane %v6996_v19, 2  ;;  %v21032_v53 = vadd.f32 %v6825_v54, %v20943_v11  ;;  %v7211_v56 = vrot.slane %v7210_v5, 2  ;;  %v7233_v26 = vrot.slane %v7182_v45, 4 }
 0x813   : > { %7335 = vrot.lane.b32.xlu0 %v7196_v20, %s18273_s14  ;;  %v7019_v21 = vrot.slane %v6973_v61, 4  ;;  %v7227_v7 = vrot.slane %v7181_v51, 4  ;;  %v7005_v62 = vrot.slane %v7004_v46, 1  ;;  %v7014_v30 = vadd.f32 %v7013_v42, %v6972_v57 }
 0x814   : > { %v6976_v10 = vmul.f32 %v21024_v16, %v20967_v50  ;;  %v7184_v54 = vmul.f32 %v21024_v16, %v20976_v49  ;;  %v6998_v3 = vadd.f32 %v6997_v17, %v6996_v19  ;;  %v7222_v59 = vadd.f32 %v7221_v4, %v7180_v14 }
 0x815   : > { %v21004_v40 = vpop.f32.mrb[44].mxu0  ;;  %v7008_v20 = vadd.f32 %v7007_v15, %v6971_v0  ;;  %v7212_v6 = vadd.f32 %v7211_v56, %v7210_v5  ;;  %v7216_v33 = vadd.f32 %v7215_v43, %v7179_v44  ;;  %v7026_v34 = vadd.f32 %v7025_v8, %v6974_v28  ;;  %v21047_v1 = vpop.permute.xlu1 %6954 }
 0x816   : > { %v21010_v41 = vpop.f32.mrb[45].mxu0  ;;  %v6999_v38 = vrot.slane %v6998_v3, 1  ;;  %v7234_v57 = vadd.f32 %v7233_v26, %v7182_v45  ;;  %v7020_v42 = vadd.f32 %v7019_v21, %v6973_v61  ;;  %v21049_v50 = vadd.f32 %v7227_v7, %v7181_v51  ;;  %v6950_v8 = vpop.permute.xlu0 %6949 }
 0x817   : > { %v7213_v49 = vrot.slane %v7212_v6, 1  ;;  %v7037_v14 = vrot.slane %v6976_v10, 4  ;;  %v7245_v0 = vrot.slane %v7184_v54, 4  ;;  %v21054_v43 = vadd.f32 %v20983_v24, %v20943_v11 }
 0x818   : > { %v7000_v44 = vadd.f32 %v6999_v38, %v6998_v3  ;;  %v7205_v5 = vrot.slane %v21016_v35, 2  ;;  %v7015_v19 = vrot.slane %v7014_v30, 2  ;;  %v7009_v7 = vrot.slane %v7008_v20, 2 }
 0x819   : > { %v14853_v48 = vpop.f32.mrb[46].mxu0  ;;  %v7223_v28 = vrot.slane %v7222_v59, 2  ;;  %v7217_v45 = vrot.slane %v7216_v33, 2  ;;  %v21062_v61 = vadd.f32 %v20988_v58, %v20943_v11  ;;  %v6978_v51 = vmul.f32 %v21054_v43, %v20999_v39 }
 0x81a   : > { %v6861_v31 = vpop.f32.mrb[47].mxu0  ;;  %v21036_v63 = vadd.f32 %v14853_v48, %v20943_v11  ;;  %v7006_v48 = vadd.f32 %v7005_v62, %v7004_v46  ;;  %v7183_v62 = vmul.f32 %v21032_v53, %v20994_v23  ;;  %7291 = vrot.lane.b32.xlu0 %v7000_v44, %s18272_s13  ;;  %v7206_v24 = vadd.f32 %v7205_v5, %v21016_v35  ;;  %v7163_v46 = vpop.permute.xlu1 %7162 }
 0x81b   : > { %v21039_v12 = vadd.f32 %v6861_v31, %v20943_v11  ;;  %v6975_v31 = vmul.f32 %v21032_v53, %v20973_v36  ;;  %v7214_v36 = vadd.f32 %v7213_v49, %v7212_v6  ;;  %v7016_v38 = vadd.f32 %v7015_v19, %v7014_v30  ;;  %v7158_v19 = vpop.permute.xlu0 %7157 }
 0x81c   : > { %7293 = vrot.lane.b32.xlu1 %v7006_v48, %s18272_s13  ;;  %v7027_v23 = vrot.slane %v7026_v34, 2  ;;  %v7038_v6 = vadd.f32 %v7037_v14, %v6976_v10  ;;  %v7010_v4 = vadd.f32 %v7009_v7, %v7008_v20  ;;  %v7224_v15 = vadd.f32 %v7223_v28, %v7222_v59 }
 0x81d   : > { %v7031_v21 = vrot.slane %v6975_v31, 4  ;;  %v21068_v17 = vadd.f32 %v7245_v0, %v7184_v54  ;;  %v7239_v56 = vrot.slane %v7183_v62, 4  ;;  %v7207_v26 = vrot.slane %v7206_v24, 1 }
 0x81e   : > { %v7017_v58 = vrot.slane %v7016_v38, 1  ;;  %v7218_v3 = vadd.f32 %v7217_v45, %v7216_v33  ;;  %v7028_v48 = vadd.f32 %v7027_v23, %v7026_v34  ;;  %v7021_v49 = vrot.slane %v7020_v42, 2 }
 0x81f   : > { %v7235_v44 = vrot.slane %v7234_v57, 2  ;;  %v7208_v35 = vadd.f32 %v7207_v26, %v7206_v24  ;;  %v7225_v10 = vrot.slane %v7224_v15, 1  ;;  %v7032_v14 = vadd.f32 %v7031_v21, %v6975_v31 }
 0x820   : > { %7341 = vrot.lane.b32.xlu1 %v7214_v36, %s18273_s14  ;;  %v7018_v30 = vadd.f32 %v7017_v58, %v7016_v38  ;;  %v7011_v36 = vrot.slane %v7010_v4, 1  ;;  %v7049_v5 = vrot.slane %v6978_v51, 4  ;;  %v7186_v39 = vmul.f32 %v21054_v43, %v21028_v27 }
 0x821   : > { %v6977_v54 = vmul.f32 %v21062_v61, %v21026_v37  ;;  %v7185_v59 = vmul.f32 %v21062_v61, %v7148_v55  ;;  %v21077_v33 = vadd.f32 %v21004_v40, %v20943_v11  ;;  %v21081_v34 = vadd.f32 %v21010_v41, %v20943_v11  ;;  %7339 = vrot.lane.b32.xlu0 %v7208_v35, %s18273_s14  ;;  %v6965_v37 = vpop.permute.xlu1 %6964 }
 0x822   : > { %v7219_v20 = vrot.slane %v7218_v3, 1  ;;  %v7029_v31 = vrot.slane %v7028_v48, 1  ;;  %v7022_v27 = vadd.f32 %v7021_v49, %v7020_v42  ;;  %v7236_v0 = vadd.f32 %v7235_v44, %v7234_v57  ;;  %v6960_v44 = vpop.permute.xlu0 %6959 }
 0x823   : > { %v7012_v21 = vadd.f32 %v7011_v36, %v7010_v4  ;;  %v7226_v55 = vadd.f32 %v7225_v10, %v7224_v15  ;;  %v7229_v7 = vrot.slane %v21049_v50, 2  ;;  %v7039_v40 = vrot.slane %v7038_v6, 2 }
 0x824   : > { %7297 = vrot.lane.b32.xlu1 %v7018_v30, %s18272_s13  ;;  %v7240_v28 = vadd.f32 %v7239_v56, %v7183_v62  ;;  %v7050_v45 = vadd.f32 %v7049_v5, %v6978_v51  ;;  %v7257_v24 = vrot.slane %v7186_v39, 4  ;;  %v7043_v11 = vrot.slane %v6977_v54, 4 }
 0x825   : > { %v7251_v41 = vrot.slane %v7185_v59, 4  ;;  %v6980_v38 = vmul.f32 %v21077_v33, %v21047_v1  ;;  %v7188_v23 = vmul.f32 %v21077_v33, %v7163_v46  ;;  %v6979_v42 = vmul.f32 %v21081_v34, %v6950_v8  ;;  %7295 = vrot.lane.b32.xlu0 %v7012_v21, %s18272_s13  ;;  %v7173_v35 = vpop.permute.xlu1 %7172 }
 0x826   : > { %v7220_v57 = vadd.f32 %v7219_v20, %v7218_v3  ;;  %v7030_v4 = vadd.f32 %v7029_v31, %v7028_v48  ;;  %v7023_v15 = vrot.slane %v7022_v27, 1  ;;  %v7237_v26 = vrot.slane %v7236_v0, 1 }
 0x827   : > { %v7230_v62 = vadd.f32 %v7229_v7, %v21049_v50  ;;  %v7040_v51 = vadd.f32 %v7039_v40, %v7038_v6  ;;  %v7033_v56 = vrot.slane %v7032_v14, 2  ;;  %v7247_v58 = vrot.slane %v21068_v17, 2 }
 0x828   : > { %7345 = vrot.lane.b32.xlu1 %v7226_v55, %s18273_s14  ;;  %v7258_v49 = vadd.f32 %v7257_v24, %v7186_v39  ;;  %v7044_v1 = vadd.f32 %v7043_v11, %v6977_v54  ;;  %v7187_v46 = vmul.f32 %v21081_v34, %v7158_v19  ;;  %v6982_v8 = vmul.f32 %v21036_v63, %v6965_v37 }
 0x829   : > { %v7061_v30 = vrot.slane %v6980_v38, 4  ;;  %v7269_v36 = vrot.slane %v7188_v23, 4  ;;  %7343 = vrot.lane.b32.xlu0 %v7220_v57, %s18273_s14  ;;  %v7241_v3 = vrot.slane %v7240_v28, 2  ;;  %v7051_v50 = vrot.slane %v7050_v45, 2 }
 0x82a   : > { %v7055_v6 = vrot.slane %v6979_v42, 4  ;;  %v21099_v48 = vmul.f32 %v21036_v63, %v7173_v35  ;;  %v7024_v10 = vadd.f32 %v7023_v15, %v7022_v27  ;;  %v7238_v5 = vadd.f32 %v7237_v26, %v7236_v0  ;;  %v21114_v26 = vld [vmem:[#allocation2 + $0x1c8] sm:$0xff] }
 0x82b   : > { %v7231_v39 = vrot.slane %v7230_v62, 1  ;;  %v7041_v54 = vrot.slane %v7040_v51, 1  ;;  %v7034_v20 = vadd.f32 %v7033_v56, %v7032_v14  ;;  %v7248_v31 = vadd.f32 %v7247_v58, %v21068_v17  ;;  %v21116_v56 = vld [vmem:[#allocation2 + $0x1d0] sm:$0xff] }
 0x82c   : > { %7301 = vrot.lane.b32.xlu1 %v7030_v4, %s18272_s13  ;;  %v7252_v19 = vadd.f32 %v7251_v41, %v7185_v59  ;;  %v7263_v37 = vrot.slane %v7187_v46, 4  ;;  %v7073_v21 = vrot.slane %v6982_v8, 4  ;;  %v21103_v55 = vmul.f32 %v21039_v12, %v6960_v44  ;;  %v21112_v59 = vld [vmem:[#allocation2 + $0x1c0] sm:$0xff]  ;;  %v7168_v41 = vpop.permute.xlu0 %7167 }
 0x82d   : > { %v7062_v7 = vadd.f32 %v7061_v30, %v6980_v38  ;;  %7299 = vrot.lane.b32.xlu0 %v7024_v10, %s18272_s13  ;;  %v7242_v40 = vadd.f32 %v7241_v3, %v7240_v28  ;;  %v7052_v24 = vadd.f32 %v7051_v50, %v7050_v45  ;;  %v7045_v27 = vrot.slane %v7044_v1, 2  ;;  %v21118_v28 = vld [vmem:[#allocation2 + $0x1d8] sm:$0xff]  ;;  %v21131_v30 = vld [vmem:[#allocation2 + $0x1e0] sm:$0xff] }
 0x82e   : > { %v21107_v0 = vadd.f32 %v7269_v36, %v7188_v23  ;;  %v21109_v11 = vadd.f32 %v7055_v6, %v6979_v42  ;;  %v7281_v17 = vrot.slane %v21099_v48, 4  ;;  %v7259_v14 = vrot.slane %v7258_v49, 2 }
 0x82f   : > { %v7232_v57 = vadd.f32 %v7231_v39, %v7230_v62  ;;  %v7042_v4 = vadd.f32 %v7041_v54, %v7040_v51  ;;  %v7035_v38 = vrot.slane %v7034_v20, 1  ;;  %v7249_v15 = vrot.slane %v7248_v31, 1 }
 0x830   : > { %7349 = vrot.lane.b32.xlu1 %v7238_v5, %s18273_s14  ;;  %v21120_v45 = vadd.f32 %v7263_v37, %v7187_v46  ;;  %v21122_v23 = vadd.f32 %v7073_v21, %v6982_v8  ;;  %v7067_v42 = vrot.slane %v21103_v55, 4  ;;  %v21126_v58 = vmul.f32 %v21039_v12, %v7168_v41  ;;  %v21133_v46 = vld [vmem:[#allocation2 + $0x1e8] sm:$0xff]  ;;  %v21154_v21 = vld [vmem:[#allocation2 + $0x1f0] sm:$0xff] }
 0x831   : > { %7347 = vrot.lane.b32.xlu0 %v7232_v57, %s18273_s14  ;;  %v7243_v62 = vrot.slane %v7242_v40, 1  ;;  %v7053_v51 = vrot.slane %v7052_v24, 1  ;;  %v7046_v44 = vadd.f32 %v7045_v27, %v7044_v1  ;;  %v7429_v35 = vand.u32 4294901760, %v21112_v59  ;;  %v21156_v27 = vld [vmem:[#allocation2 + $0x1f8] sm:$0xff] }
 0x832   : > { %v7260_v8 = vadd.f32 %v7259_v14, %v7258_v49  ;;  %v7432_v36 = vand.u32 4294901760, %v21114_v26  ;;  %v23301_v3 = vand.u32 4294901760, %v21116_v56  ;;  %v23298_v50 = vand.u32 4294901760, %v21118_v28 }
 0x833   : > { %v7036_v6 = vadd.f32 %v7035_v38, %v7034_v20  ;;  %v7250_v10 = vadd.f32 %v7249_v15, %v7248_v31  ;;  %v7253_v5 = vrot.slane %v7252_v19, 2  ;;  %v7063_v39 = vrot.slane %v7062_v7, 2 }
 0x834   : > { %7305 = vrot.lane.b32.xlu1 %v7042_v4, %s18272_s13  ;;  %v21142_v1 = vpack.c.bf16 %v7432_v36, %v7429_v35  ;;  %v21148_v49 = vpack.c.bf16 %v23298_v50, %v23301_v3  ;;  %v23300_v54 = vand.u32 4294901760, %v21131_v30  ;;  %v23299_v37 = vand.u32 4294901760, %v21133_v46 }
 0x835   : > { %7303 = vrot.lane.b32.xlu0 %v7036_v6, %s18272_s13  ;;  %v7244_v20 = vadd.f32 %v7243_v62, %v7242_v40  ;;  %v7047_v31 = vrot.slane %v7046_v44, 1  ;;  %v23839_v14 = vand.u32 4294901760, %v20877_v52  ;;  %v23840_v57 = vand.u32 4294901760, %v20879_v18 }
 0x836   : > { %v7054_v38 = vadd.f32 %v7053_v51, %v7052_v24  ;;  %v7261_v15 = vrot.slane %v7260_v8, 1  ;;  %v7057_v6 = vrot.slane %v21109_v11, 2  ;;  %v7271_v40 = vrot.slane %v21107_v0, 2  ;;  %16839 = vmatprep.subr.bf16.mxu1 %v21142_v1 }
 0x837   : > { %v21161_v41 = vsub.f32 %v20877_v52, %v23839_v14  ;;  %v21166_v4 = vsub.f32 %v20879_v18, %v23840_v57  ;;  %v7254_v62 = vadd.f32 %v7253_v5, %v7252_v19  ;;  %16841 = vmatpush3.bf16.msra.mxu1 %v21142_v1  ;;  %v7282_v50 = vadd.f32 %v7281_v17, %v21099_v48 }
 0x838   : > { %7353 = vrot.lane.b32.xlu1 %v7250_v10, %s18273_s14  ;;  %v7064_v10 = vadd.f32 %v7063_v39, %v7062_v7  ;;  %16843 = vmatprep.subr.bf16.mxu1 %v21148_v49  ;;  %v21180_v18 = vpack.c.bf16 %v23299_v37, %v23300_v54  ;;  %v7447_v24 = vand.u32 4294901760, %v21154_v21  ;;  %v7450_v19 = vand.u32 4294901760, %v21156_v27 }
 0x839   : > { %v23303_v52 = vand.u32 4294901760, %v21161_v41  ;;  %v23302_v14 = vand.u32 4294901760, %v21166_v4  ;;  %v7275_v7 = vrot.slane %v21126_v58, 4  ;;  %7351 = vrot.lane.b32.xlu0 %v7244_v20, %s18273_s14  ;;  %v7265_v48 = vrot.slane %v21120_v45, 2 }
 0x83a   : > { %v7068_v5 = vadd.f32 %v7067_v42, %v21103_v55  ;;  %v7048_v39 = vadd.f32 %v7047_v31, %v7046_v44  ;;  %v7058_v57 = vadd.f32 %v7057_v6, %v21109_v11  ;;  %v7075_v37 = vrot.slane %v21122_v23, 2 }
 0x83b   : > { %v7649_v17 = vsub.f32 %v21161_v41, %v23303_v52  ;;  %v7656_v51 = vsub.f32 %v21166_v4, %v23302_v14  ;;  %v7262_v20 = vadd.f32 %v7261_v15, %v7260_v8  ;;  %v7255_v54 = vrot.slane %v7254_v62, 1  ;;  %16845 = vmatpush3.bf16.msra.mxu1 %v21148_v49 }
 0x83c   : > { %7309 = vrot.lane.b32.xlu1 %v7054_v38, %s18272_s13  ;;  %v7065_v38 = vrot.slane %v7064_v10, 1  ;;  %v7272_v3 = vadd.f32 %v7271_v40, %v21107_v0  ;;  %16847 = vmatprep.subr.bf16.mxu1 %v21180_v18  ;;  %v21204_v14 = vpack.c.bf16 %v7450_v19, %v7447_v24  ;;  %v7266_v11 = vadd.f32 %v7265_v48, %v21120_v45 }
 0x83d   : > { %v7650_v55 = vand.u32 4294901760, %v7649_v17  ;;  %v7657_v42 = vand.u32 4294901760, %v7656_v51  ;;  %7307 = vrot.lane.b32.xlu0 %v7048_v39, %s18272_s13  ;;  %v7059_v44 = vrot.slane %v7058_v57, 1  ;;  %v7076_v0 = vadd.f32 %v7075_v37, %v21122_v23 }
 0x83e   : > { %v7069_v8 = vrot.slane %v7068_v5, 2  ;;  %v7283_v31 = vrot.slane %v7282_v50, 2  ;;  %v7276_v15 = vadd.f32 %v7275_v7, %v21126_v58  ;;  %v7256_v6 = vadd.f32 %v7255_v54, %v7254_v62 }
 0x83f   : > { %v7066_v40 = vadd.f32 %v7065_v38, %v7064_v10  ;;  %v7273_v52 = vrot.slane %v7272_v3, 1  ;;  %16849 = vmatpush3.bf16.msra.mxu1 %v21180_v18  ;;  %v21213_v17 = vpack.c.bf16 %v7657_v42, %v7650_v55  ;;  %v7267_v45 = vrot.slane %v7266_v11, 1 }
 0x840   : > { %7357 = vrot.lane.b32.xlu1 %v7262_v20, %s18273_s14  ;;  %16851 = vmatprep.subr.bf16.mxu1 %v21204_v14  ;;  %v7060_v48 = vadd.f32 %v7059_v44, %v7058_v57  ;;  %v7077_v23 = vrot.slane %v7076_v0, 1  ;;  %v7070_v37 = vadd.f32 %v7069_v8, %v7068_v5  ;;  %v7284_v51 = vadd.f32 %v7283_v31, %v7282_v50 }
 0x841   : > { %7355 = vrot.lane.b32.xlu0 %v7256_v6, %s18273_s14  ;;  %v7274_v39 = vadd.f32 %v7273_v52, %v7272_v3  ;;  %v7277_v58 = vrot.slane %v7276_v15, 2  ;;  %v21221_v54 = vsub.f32 %v21112_v59, %v7429_v35  ;;  %v21226_v62 = vsub.f32 %v21114_v26, %v7432_v36 }
 0x842   : > { %v7268_v10 = vadd.f32 %v7267_v45, %v7266_v11  ;;  %v7078_v52 = vadd.f32 %v7077_v23, %v7076_v0  ;;  %v7071_v7 = vrot.slane %v7070_v37, 1  ;;  %v7285_v59 = vrot.slane %v7284_v51, 1 }
 0x843   : > { %16853 = vmatpush3.bf16.msra.mxu1 %v21204_v14  ;;  %23841 = vst [vmem:[#allocation23_spill] sm:$0xff] %v21221_v54  ;;  %23842 = vst [vmem:[#allocation79_spill] sm:$0xff] %v21226_v62  ;;  %v23311_v3 = vand.u32 4294901760, %v21221_v54  ;;  %v23310_v50 = vand.u32 4294901760, %v21226_v62  ;;  %v7278_v35 = vadd.f32 %v7277_v58, %v7276_v15  ;;  %v23843_v5 = vand.u32 4294901760, %v21116_v56 }
 0x844   : > { %7313 = vrot.lane.b32.xlu1 %v7066_v40, %s18272_s13  ;;  %16855 = vmatprep.subr.bf16.mxu1 %v21213_v17  ;;  %v23845_v20 = vand.u32 4294901760, %v21118_v28  ;;  %v23847_v44 = vand.u32 4294901760, %v21131_v30  ;;  %v7286_v8 = vadd.f32 %v7285_v59, %v7284_v51 }
 0x845   : > { %7311 = vrot.lane.b32.xlu0 %v7060_v48, %s18272_s13  ;;  %v7705_v26 = vsub.f32 %v21221_v54, %v23311_v3  ;;  %v7712_v36 = vsub.f32 %v21226_v62, %v23310_v50  ;;  %v21242_v57 = vsub.f32 %v21116_v56, %v23843_v5  ;;  %v7072_v56 = vadd.f32 %v7071_v7, %v7070_v37 }
 0x846   : > { %v21247_v38 = vsub.f32 %v21118_v28, %v23845_v20  ;;  %v21255_v0 = vsub.f32 %v21131_v30, %v23847_v44  ;;  %v23849_v28 = vand.u32 4294901760, %v21133_v46  ;;  %v7279_v6 = vrot.slane %v7278_v35, 1 }
 0x847   : > { %23844 = vst [vmem:[#allocation80_spill] sm:$0xff] %v21242_v57  ;;  %v7706_v55 = vand.u32 4294901760, %v7705_v26  ;;  %v7713_v42 = vand.u32 4294901760, %v7712_v36  ;;  %v23309_v11 = vand.u32 4294901760, %v21242_v57  ;;  %v21289_v7 = vsub.f32 %v21156_v27, %v7450_v19 }
 0x848   : > { %7361 = vrot.lane.b32.xlu1 %v7274_v39, %s18273_s14  ;;  %23846 = vst [vmem:[#allocation81_spill] sm:$0xff] %v21247_v38  ;;  %23848 = vst [vmem:[#allocation6_spill] sm:$0xff] %v21255_v0  ;;  %v23308_v31 = vand.u32 4294901760, %v21247_v38  ;;  %v21261_v15 = vsub.f32 %v21133_v46, %v23849_v28  ;;  %v23307_v48 = vand.u32 4294901760, %v21255_v0  ;;  %v7280_v58 = vadd.f32 %v7279_v6, %v7278_v35 }
 0x849   : > { %7359 = vrot.lane.b32.xlu0 %v7268_v10, %s18273_s14  ;;  %v21263_v40 = vpack.c.bf16 %v7713_v42, %v7706_v55  ;;  %v7719_v45 = vsub.f32 %v21242_v57, %v23309_v11  ;;  %23852 = vst [vmem:[#allocation49_spill] sm:$0xff] %v21289_v7  ;;  %v23304_v35 = vand.u32 4294901760, %v21289_v7  ;;  %v21306_v20 = vpack.c.bf16 %v21166_v4, %v21161_v41 }
 0x84a   : > { %23850 = vst [vmem:[#allocation9_spill] sm:$0xff] %v21261_v15  ;;  %v7726_v30 = vsub.f32 %v21247_v38, %v23308_v31  ;;  %v23306_v23 = vand.u32 4294901760, %v21261_v15  ;;  %v7733_v37 = vsub.f32 %v21255_v0, %v23307_v48  ;;  %v23853_v55 = vand.u32 4294901760, %v20881_v13 }
 0x84b   : > { %v7720_v46 = vand.u32 4294901760, %v7719_v45  ;;  %v7754_v27 = vsub.f32 %v21289_v7, %v23304_v35  ;;  %v23854_v44 = vand.u32 4294901760, %v20885_v47  ;;  %v23855_v6 = vand.u32 4294901760, %v20888_v22 }
 0x84c   : > { %7317 = vrot.lane.b32.xlu1 %v7078_v52, %s18272_s13  ;;  %v7727_v51 = vand.u32 4294901760, %v7726_v30  ;;  %v7740_v39 = vsub.f32 %v21261_v15, %v23306_v23  ;;  %v7734_v10 = vand.u32 4294901760, %v7733_v37  ;;  %v21284_v52 = vsub.f32 %v21154_v21, %v7447_v24 }
 0x84d   : > { %7315 = vrot.lane.b32.xlu0 %v7072_v56, %s18272_s13  ;;  %v7755_v19 = vand.u32 4294901760, %v7754_v27  ;;  %v21311_v42 = vsub.f32 %v20881_v13, %v23853_v55  ;;  %v21316_v56 = vsub.f32 %v20885_v47, %v23854_v44  ;;  %v21327_v45 = vsub.f32 %v20888_v22, %v23855_v6 }
 0x84e   : > { %23851 = vst [vmem:[#allocation45_spill] sm:$0xff] %v21284_v52  ;;  %v21291_v59 = vpack.c.bf16 %v7727_v51, %v7720_v46  ;;  %v7741_v26 = vand.u32 4294901760, %v7740_v39  ;;  %v23305_v36 = vand.u32 4294901760, %v21284_v52  ;;  %v23856_v30 = vand.u32 4294901760, %v20890_v25 }
 0x84f   : > { %v21322_v28 = vpack.c.bf16 %v21316_v56, %v21311_v42  ;;  %v23857_v46 = vand.u32 4294901760, %v20907_v29  ;;  %v23858_v51 = vand.u32 4294901760, %v20909_v2  ;;  %v23314_v27 = vand.u32 4294901760, %v21311_v42 }
 0x850   : > { %7365 = vrot.lane.b32.xlu1 %v7286_v8, %s18273_s14  ;;  %v21296_v5 = vpack.c.bf16 %v7741_v26, %v7734_v10  ;;  %v7747_v21 = vsub.f32 %v21284_v52, %v23305_v36  ;;  %v21332_v13 = vsub.f32 %v20890_v25, %v23856_v30  ;;  %v21354_v25 = vpack.c.bf16 %v21226_v62, %v21221_v54 }
 0x851   : > { %7363 = vrot.lane.b32.xlu0 %v7280_v58, %s18273_s14  ;;  %v21341_v37 = vsub.f32 %v20907_v29, %v23857_v46  ;;  %v21346_v39 = vsub.f32 %v20909_v2, %v23858_v51  ;;  %v21358_v58 = vpack.c.bf16 %v21247_v38, %v21242_v57  ;;  %v21362_v29 = vpack.c.bf16 %v21261_v15, %v21255_v0 }
 0x852   : > { %v7748_v24 = vand.u32 4294901760, %v7747_v21  ;;  %v21336_v47 = vpack.c.bf16 %v21332_v13, %v21327_v45  ;;  %v21366_v2 = vpack.c.bf16 %v21289_v7, %v21284_v52  ;;  %v23313_v55 = vand.u32 4294901760, %v21316_v56 }
 0x853   : > { %23859 = vst [vmem:[#allocation53_spill] sm:$0xff] %v21346_v39  ;;  %v21350_v22 = vpack.c.bf16 %v21346_v39, %v21341_v37  ;;  %v7663_v51 = vsub.f32 %v21311_v42, %v23314_v27  ;;  %v23321_v11 = vand.u32 4294901760, %v21341_v37 }
 0x854   : > { %v21318_v8 = vpack.c.bf16 %v7755_v19, %v7748_v24 }
 0x880   : > { %v7290_v10 = vpop.permute.xlu1 %7289 }
 0x881   : > { %v7288_v26 = vpop.permute.xlu0 %7287  ;;  %v7320_v21 = vadd.f32 %v20950_v60, %v7290_v10  ;;  %v7670_v60 = vsub.f32 %v21316_v56, %v23313_v55  ;;  %v23315_v10 = vand.u32 4294901760, %v21332_v13 }
 0x882   : > { %v7319_v24 = vadd.f32 %v20953_v32, %v7288_v26  ;;  %v23312_v32 = vand.u32 4294901760, %v21327_v45 }
 0x883   : > { %v7671_v23 = vand.u32 4294901760, %v7670_v60  ;;  %v7684_v31 = vsub.f32 %v21332_v13, %v23315_v10 }
 0x884   : > { %v7338_v19 = vpop.permute.xlu1 %7337  ;;  %v7677_v48 = vsub.f32 %v21327_v45, %v23312_v32 }
 0x885   : > { %v7368_v44 = vadd.f32 %v7338_v19, %v7320_v21  ;;  %v7336_v6 = vpop.permute.xlu0 %7335  ;;  %v7685_v7 = vand.u32 4294901760, %v7684_v31 }
 0x886   : > { %v7367_v30 = vadd.f32 %v7336_v6, %v7319_v24  ;;  %v7664_v6 = vand.u32 4294901760, %v7663_v51  ;;  %v23322_v51 = vand.u32 4294901760, %v21346_v39  ;;  %v7678_v10 = vand.u32 4294901760, %v7677_v48 }
 0x887   : > { %v21372_v46 = vand.u32 4294901760, %v7368_v44 }
 0x888   : > { %v21377_v35 = vand.u32 4294901760, %v7367_v30  ;;  %v16858_v27 = vpack.c.bf16 %v7671_v23, %v7664_v6  ;;  %v16862_v6 = vpack.c.bf16 %v7685_v7, %v7678_v10 }
 0x889   : > { %v21385_v26 = vsub.f32 %v7368_v44, %v21372_v46 }
 0x88a   : > { %v21388_v21 = vsub.f32 %v7367_v30, %v21377_v35 }
 0x88b   : > { %v23319_v19 = vand.u32 4294901760, %v21385_v26 }
 0x88c   : > { %v23323_v36 = vand.u32 4294901760, %v21388_v21  ;;  %v7292_v50 = vpop.permute.xlu0 %7291 }
 0x88d   : > { %v7498_v44 = vsub.f32 %v21385_v26, %v23319_v19  ;;  %v23860_v19 = vld [vmem:[#allocation19_spill] sm:$0xff] }
 0x88e   : > { %v7294_v24 = vpop.permute.xlu1 %7293  ;;  %v7488_v3 = vsub.f32 %v21388_v21, %v23323_v36  ;;  %v7321_v0 = vadd.f32 %v23860_v19, %v7292_v50 }
 0x88f   : > { %v7322_v30 = vadd.f32 %v20965_v9, %v7294_v24  ;;  %v7499_v52 = vand.u32 4294901760, %v7498_v44  ;;  %v7691_v9 = vsub.f32 %v21341_v37, %v23321_v11  ;;  %v7698_v24 = vsub.f32 %v21346_v39, %v23322_v51  ;;  %v23861_v11 = vld [vmem:[#allocation32_spill] sm:$0xff] }
 0x890   : > { %v7489_v55 = vand.u32 4294901760, %v7488_v3 }
 0x891   : > { %v7692_v44 = vand.u32 4294901760, %v7691_v9 }
 0x892   : > { %v7342_v60 = vpop.permute.xlu1 %7341  ;;  %14886 = vmatprep.mubr.f32.mxu1 %v7489_v55 }
 0x893   : > { %v7370_v32 = vadd.f32 %v7342_v60, %v7322_v30  ;;  %14887 = vmatmul.mubr.f32.vlgmr.msra.gmra.mrb[32].mxu1 %v7499_v52  ;;  %v7340_v48 = vpop.permute.xlu0 %7339  ;;  %v7699_v30 = vand.u32 4294901760, %v7698_v24 }
 0x894   : > { %16857 = vmatpush3.bf16.msra.mxu1 %v21213_v17  ;;  %v7369_v23 = vadd.f32 %v7340_v48, %v7321_v0  ;;  %v23862_v0 = vld [vmem:[#allocation35_spill] sm:$0xff] }
 0x895   : > { %v21407_v15 = vand.u32 4294901760, %v7370_v32  ;;  %16859 = vmatprep.subr.bf16.mxu1 %v16858_v27  ;;  %v16866_v17 = vpack.c.bf16 %v7699_v30, %v7692_v44 }
 0x896   : > { %v7298_v31 = vpop.permute.xlu1 %7297  ;;  %v21420_v60 = vand.u32 4294901760, %v7369_v23 }
 0x897   : > { %v21417_v3 = vsub.f32 %v7370_v32, %v21407_v15  ;;  %v7324_v51 = vadd.f32 %v23861_v11, %v7298_v31  ;;  %v7296_v55 = vpop.permute.xlu0 %7295  ;;  %v23863_v31 = vld [vmem:[#allocation40_spill] sm:$0xff] }
 0x898   : > { %16861 = vmatpush3.bf16.msra.mxu1 %v16858_v27  ;;  %v21425_v52 = vsub.f32 %v7369_v23, %v21420_v60  ;;  %v7323_v19 = vadd.f32 %v23862_v0, %v7296_v55 }
 0x899   : > { %v23324_v50 = vand.u32 4294901760, %v21417_v3  ;;  %16863 = vmatprep.subr.bf16.mxu1 %v16862_v6 }
 0x89a   : > { %v7346_v36 = vpop.permute.xlu1 %7345  ;;  %v23325_v10 = vand.u32 4294901760, %v21425_v52 }
 0x89b   : > { %v7372_v32 = vadd.f32 %v7346_v36, %v7324_v51  ;;  %v7344_v9 = vpop.permute.xlu0 %7343  ;;  %v7518_v11 = vsub.f32 %v21417_v3, %v23324_v50 }
 0x89c   : > { %16865 = vmatpush3.bf16.msra.mxu1 %v16862_v6  ;;  %v7371_v48 = vadd.f32 %v7344_v9, %v7323_v19  ;;  %v7508_v36 = vsub.f32 %v21425_v52, %v23325_v10  ;;  %v23864_v19 = vld [vmem:[#allocation44_spill] sm:$0xff] }
 0x89d   : > { %v21428_v7 = vand.u32 4294901760, %v7372_v32  ;;  %16867 = vmatprep.subr.bf16.mxu1 %v16866_v17  ;;  %v7519_v55 = vand.u32 4294901760, %v7518_v11 }
 0x89e   : > { %v7302_v24 = vpop.permute.xlu1 %7301  ;;  %v21440_v51 = vand.u32 4294901760, %v7371_v48  ;;  %v7509_v44 = vand.u32 4294901760, %v7508_v36 }
 0x89f   : > { %v21435_v27 = vsub.f32 %v7372_v32, %v21428_v7  ;;  %v7326_v23 = vadd.f32 %v23863_v31, %v7302_v24  ;;  %v7300_v30 = vpop.permute.xlu0 %7299 }
 0x8a0   : > { %16869 = vmatpush3.bf16.msra.mxu1 %v16866_v17  ;;  %v21445_v6 = vsub.f32 %v7371_v48, %v21440_v51  ;;  %14889 = vmatprep.mubr.f32.mxu1 %v7509_v44  ;;  %v7325_v9 = vadd.f32 %v23864_v19, %v7300_v30 }
 0x8a1   : > { %v23326_v50 = vand.u32 4294901760, %v21435_v27  ;;  %14890 = vmatmul.mubr.f32.gmra.mrb[34].mxu1 %v7519_v55  ;;  %16871 = vmatprep.subr.bf16.mxu1 %v21263_v40 }
 0x8a2   : > { %v7350_v0 = vpop.permute.xlu1 %7349  ;;  %v23327_v24 = vand.u32 4294901760, %v21445_v6 }
 0x8a3   : > { %v7374_v32 = vadd.f32 %v7350_v0, %v7326_v23  ;;  %v7348_v36 = vpop.permute.xlu0 %7347  ;;  %v7538_v17 = vsub.f32 %v21435_v27, %v23326_v50 }
 0x8a4   : > { %16873 = vmatpush3.bf16.msra.mxu1 %v21263_v40  ;;  %v7373_v31 = vadd.f32 %v7348_v36, %v7325_v9  ;;  %v7528_v23 = vsub.f32 %v21445_v6, %v23327_v24 }
 0x8a5   : > { %v21449_v10 = vand.u32 4294901760, %v7374_v32  ;;  %16875 = vmatprep.subr.bf16.mxu1 %v21291_v59  ;;  %v7539_v19 = vand.u32 4294901760, %v7538_v17 }
 0x8a6   : > { %v7306_v11 = vpop.permute.xlu1 %7305  ;;  %v21463_v44 = vand.u32 4294901760, %v7373_v31  ;;  %v7529_v55 = vand.u32 4294901760, %v7528_v23 }
 0x8a7   : > { %v21457_v48 = vsub.f32 %v7374_v32, %v21449_v10  ;;  %v7328_v30 = vadd.f32 %v21024_v16, %v7306_v11  ;;  %v7304_v0 = vpop.permute.xlu0 %7303 }
 0x8a8   : > { %16877 = vmatpush3.bf16.msra.mxu1 %v21291_v59  ;;  %v21469_v32 = vsub.f32 %v7373_v31, %v21463_v44  ;;  %14892 = vmatprep.mubr.f32.mxu1 %v7529_v55  ;;  %v7327_v36 = vadd.f32 %v21032_v53, %v7304_v0 }
 0x8a9   : > { %v23328_v40 = vand.u32 4294901760, %v21457_v48  ;;  %14893 = vmatmul.mubr.f32.gmra.mrb[36].mxu1 %v7539_v19  ;;  %16879 = vmatprep.subr.bf16.mxu1 %v21296_v5 }
 0x8aa   : > { %v7354_v50 = vpop.permute.xlu1 %7353  ;;  %v23329_v16 = vand.u32 4294901760, %v21469_v32 }
 0x8ab   : > { %v7376_v9 = vadd.f32 %v7354_v50, %v7328_v30  ;;  %v7352_v11 = vpop.permute.xlu0 %7351  ;;  %v7558_v59 = vsub.f32 %v21457_v48, %v23328_v40 }
 0x8ac   : > { %16881 = vmatpush3.bf16.msra.mxu1 %v21296_v5  ;;  %v7375_v50 = vadd.f32 %v7352_v11, %v7327_v36  ;;  %v7548_v53 = vsub.f32 %v21469_v32, %v23329_v16 }
 0x8ad   : > { %v21473_v24 = vand.u32 4294901760, %v7376_v9  ;;  %16883 = vmatprep.subr.bf16.mxu1 %v21318_v8  ;;  %v7559_v19 = vand.u32 4294901760, %v7558_v59 }
 0x8ae   : > { %v7310_v17 = vpop.permute.xlu1 %7309  ;;  %v21487_v23 = vand.u32 4294901760, %v7375_v50  ;;  %v7549_v55 = vand.u32 4294901760, %v7548_v53 }
 0x8af   : > { %v21481_v31 = vsub.f32 %v7376_v9, %v21473_v24  ;;  %v7330_v30 = vadd.f32 %v21054_v43, %v7310_v17  ;;  %v7308_v0 = vpop.permute.xlu0 %7307 }
 0x8b0   : > { %16885 = vmatpush3.bf16.msra.mxu1 %v21318_v8  ;;  %v21493_v9 = vsub.f32 %v7375_v50, %v21487_v23  ;;  %14895 = vmatprep.mubr.f32.mxu1 %v7549_v55  ;;  %v7329_v11 = vadd.f32 %v21062_v61, %v7308_v0 }
 0x8b1   : > { %v23332_v5 = vand.u32 4294901760, %v21481_v31  ;;  %14896 = vmatmul.mubr.f32.gmra.mrb[38].mxu1 %v7559_v19  ;;  %16887 = vmatprep.subr.bf16.mxu1 %v21306_v20 }
 0x8b2   : > { %v7358_v40 = vpop.permute.xlu1 %7357  ;;  %v23333_v43 = vand.u32 4294901760, %v21493_v9 }
 0x8b3   : > { %v7378_v36 = vadd.f32 %v7358_v40, %v7330_v30  ;;  %v7356_v17 = vpop.permute.xlu0 %7355  ;;  %v7578_v8 = vsub.f32 %v21481_v31, %v23332_v5 }
 0x8b4   : > { %v7377_v53 = vadd.f32 %v7356_v17, %v7329_v11  ;;  %v7568_v40 = vsub.f32 %v21493_v9, %v23333_v43 }
 0x8b5   : > { %v21497_v16 = vand.u32 4294901760, %v7378_v36  ;;  %v7579_v19 = vand.u32 4294901760, %v7578_v8 }
 0x8b6   : > { %v7314_v59 = vpop.permute.xlu1 %7313  ;;  %v21509_v30 = vand.u32 4294901760, %v7377_v53  ;;  %v7569_v55 = vand.u32 4294901760, %v7568_v40 }
 0x8b7   : > { %v21504_v50 = vsub.f32 %v7378_v36, %v21497_v16  ;;  %v7332_v61 = vadd.f32 %v21077_v33, %v7314_v59  ;;  %v7312_v0 = vpop.permute.xlu0 %7311 }
 0x8b8   : > { %v21514_v5 = vsub.f32 %v7377_v53, %v21509_v30  ;;  %14898 = vmatprep.mubr.f32.mxu1 %v7569_v55  ;;  %v7331_v11 = vadd.f32 %v21081_v34, %v7312_v0 }
 0x8b9   : > { %v23336_v57 = vand.u32 4294901760, %v21504_v50  ;;  %14899 = vmatmul.mubr.f32.gmra.mrb[40].mxu1 %v7579_v19 }
 0x8ba   : > { %v7362_v38 = vpop.permute.xlu1 %7361  ;;  %v23337_v43 = vand.u32 4294901760, %v21514_v5 }
 0x8bb   : > { %v7380_v36 = vadd.f32 %v7362_v38, %v7332_v61  ;;  %v7360_v62 = vpop.permute.xlu0 %7359  ;;  %v7598_v59 = vsub.f32 %v21504_v50, %v23336_v57 }
 0x8bc   : > { %v7379_v53 = vadd.f32 %v7360_v62, %v7331_v11  ;;  %v7588_v38 = vsub.f32 %v21514_v5, %v23337_v43 }
 0x8bd   : > { %v21517_v17 = vand.u32 4294901760, %v7380_v36  ;;  %v7599_v0 = vand.u32 4294901760, %v7598_v59 }
 0x8be   : > { %v7318_v33 = vpop.permute.xlu1 %7317  ;;  %v21529_v40 = vand.u32 4294901760, %v7379_v53  ;;  %v7589_v61 = vand.u32 4294901760, %v7588_v38 }
 0x8bf   : > { %v21524_v8 = vsub.f32 %v7380_v36, %v21517_v17  ;;  %v7334_v34 = vadd.f32 %v21036_v63, %v7318_v33  ;;  %v7316_v55 = vpop.permute.xlu0 %7315 }
 0x8c0   : > { %v21534_v57 = vsub.f32 %v7379_v53, %v21529_v40  ;;  %14901 = vmatprep.mubr.f32.mxu1 %v7589_v61  ;;  %v7333_v62 = vadd.f32 %v21039_v12, %v7316_v55 }
 0x8c1   : > { %v23349_v54 = vand.u32 4294901760, %v21524_v8  ;;  %14902 = vmatmul.mubr.f32.gmra.mrb[42].mxu1 %v7599_v0 }
 0x8c2   : > { %v7366_v19 = vpop.permute.xlu1 %7365  ;;  %v23350_v43 = vand.u32 4294901760, %v21534_v57 }
 0x8c3   : > { %v7382_v36 = vadd.f32 %v7366_v19, %v7334_v34  ;;  %v7364_v39 = vpop.permute.xlu0 %7363  ;;  %v7618_v63 = vsub.f32 %v21524_v8, %v23349_v54  ;;  %v23874_v54 = vand.u32 4294901760, %v21388_v21 }
 0x8c4   : > { %v7381_v59 = vadd.f32 %v7364_v39, %v7333_v62  ;;  %v7608_v53 = vsub.f32 %v21534_v57, %v23350_v43  ;;  %v23875_v43 = vand.u32 4294901760, %v21311_v42  ;;  %v23882_v42 = vand.u32 4294901760, %v21445_v6 }
 0x8c5   : > { %v21537_v11 = vand.u32 4294901760, %v7382_v36  ;;  %v7619_v34 = vand.u32 4294901760, %v7618_v63  ;;  %v21605_v63 = vld [vmem:[#allocation2 + $0x220] sm:$0xff] }
 0x8c6   : > { %v21549_v38 = vand.u32 4294901760, %v7381_v59  ;;  %v7609_v12 = vand.u32 4294901760, %v7608_v53  ;;  %v23865_v53 = vld [vmem:[#allocation38_spill] sm:$0xff] }
 0x8c7   : > { %v21544_v33 = vsub.f32 %v7382_v36, %v21537_v11 }
 0x8c8   : > { %v21553_v55 = vsub.f32 %v7381_v59, %v21549_v38  ;;  %14904 = vmatprep.mubr.f32.mxu1 %v7609_v12  ;;  %v21607_v59 = vld [vmem:[#allocation2 + $0x228] sm:$0xff] }
 0x8c9   : > { %v23343_v61 = vand.u32 4294901760, %v21544_v33  ;;  %14905 = vmatmul.mubr.f32.gmra.mrb[44].mxu1 %v7619_v34 }
 0x8ca   : > { %v23348_v0 = vand.u32 4294901760, %v21553_v55 }
 0x8cb   : > { %v7638_v39 = vsub.f32 %v21544_v33, %v23343_v61  ;;  %v23869_v61 = vld [vmem:[#allocation29_spill] sm:$0xff] }
 0x8cc   : > { %v7628_v19 = vsub.f32 %v21553_v55, %v23348_v0 }
 0x8cd   : > { %v7639_v62 = vand.u32 4294901760, %v7638_v39  ;;  %v23345_v39 = vand.u32 4294901760, %v21605_v63 }
 0x8ce   : > { %v7629_v36 = vand.u32 4294901760, %v7628_v19  ;;  %v23344_v19 = vand.u32 4294901760, %v21607_v59 }
 0x8d0   : > { %14907 = vmatprep.mubr.f32.mxu1 %v7629_v36  ;;  %v21628_v36 = vld [vmem:[#allocation2 + $0x230] sm:$0xff] }
 0x8d1   : > { %14908 = vmatmul.mubr.f32.gmra.mrb[46].mxu1 %v7639_v62  ;;  %v21630_v62 = vld [vmem:[#allocation2 + $0x238] sm:$0xff] }
 0x8d2   : > { %14942 = vmatprep.mubr.f32.mxu1 %v21377_v35 }
 0x8d5   : > { %14943 = vmatmul.mubr.f32.vlgmr.msra.gmra.mrb[32].mxu1 %v21372_v46 }
 0x8d6   : > { %14945 = vmatprep.mubr.f32.mxu1 %v21420_v60  ;;  %16889 = vmatpush3.bf16.msra.mxu1 %v21306_v20  ;;  %v21592_v20 = vld [vmem:[#allocation2 + $0x200] sm:$0xff] }
 0x8d7   : > { %16891 = vmatprep.subr.bf16.mxu1 %v21322_v28 }
 0x8d9   : > { %14946 = vmatmul.mubr.f32.gmra.mrb[34].mxu1 %v21407_v15 }
 0x8da   : > { %14948 = vmatprep.mubr.f32.mxu1 %v21440_v51  ;;  %16893 = vmatpush3.bf16.msra.mxu1 %v21322_v28  ;;  %v21594_v28 = vld [vmem:[#allocation2 + $0x208] sm:$0xff] }
 0x8db   : > { %16895 = vmatprep.subr.bf16.mxu1 %v21336_v47 }
 0x8dd   : > { %14949 = vmatmul.mubr.f32.gmra.mrb[36].mxu1 %v21428_v7 }
 0x8de   : > { %14951 = vmatprep.mubr.f32.mxu1 %v21463_v44  ;;  %16897 = vmatpush3.bf16.msra.mxu1 %v21336_v47  ;;  %v21596_v47 = vld [vmem:[#allocation2 + $0x210] sm:$0xff] }
 0x8df   : > { %16899 = vmatprep.subr.bf16.mxu1 %v21350_v22 }
 0x8e1   : > { %14952 = vmatmul.mubr.f32.gmra.mrb[38].mxu1 %v21449_v10 }
 0x8e2   : > { %14954 = vmatprep.mubr.f32.mxu1 %v21487_v23  ;;  %16901 = vmatpush3.bf16.msra.mxu1 %v21350_v22  ;;  %v23342_v22 = vand.u32 4294901760, %v21592_v20 }
 0x8e3   : > { %16903 = vmatprep.subr.bf16.mxu1 %v21354_v25 }
 0x8e5   : > { %14955 = vmatmul.mubr.f32.gmra.mrb[40].mxu1 %v21473_v24 }
 0x8e6   : > { %14957 = vmatprep.mubr.f32.mxu1 %v21509_v30  ;;  %16905 = vmatpush3.bf16.msra.mxu1 %v21354_v25  ;;  %v23339_v25 = vand.u32 4294901760, %v21594_v28 }
 0x8e7   : > { %16907 = vmatprep.subr.bf16.mxu1 %v21358_v58 }
 0x8e9   : > { %14958 = vmatmul.mubr.f32.gmra.mrb[42].mxu1 %v21497_v16 }
 0x8ea   : > { %14960 = vmatprep.mubr.f32.mxu1 %v21529_v40  ;;  %16909 = vmatpush3.bf16.msra.mxu1 %v21358_v58  ;;  %v21602_v58 = vld [vmem:[#allocation2 + $0x218] sm:$0xff] }
 0x8eb   : > { %16911 = vmatprep.subr.bf16.mxu1 %v21362_v29  ;;  %v23340_v12 = vand.u32 4294901760, %v21602_v58 }
 0x8ed   : > { %14961 = vmatmul.mubr.f32.gmra.mrb[44].mxu1 %v21517_v17 }
 0x8ee   : > { %14963 = vmatprep.mubr.f32.mxu1 %v21549_v38  ;;  %16913 = vmatpush3.bf16.msra.mxu1 %v21362_v29  ;;  %v23341_v29 = vand.u32 4294901760, %v21596_v47 }
 0x8ef   : > { %16915 = vmatprep.subr.bf16.mxu1 %v21366_v2 }
 0x8f0   : > { %v21622_v34 = vpack.c.bf16 %v23340_v12, %v23341_v29  ;;  %v21641_v12 = vpack.c.bf16 %v23344_v19, %v23345_v39  ;;  %v23347_v29 = vand.u32 4294901760, %v21628_v36  ;;  %v23871_v39 = vld [vmem:[#allocation7_spill] sm:$0xff] }
 0x8f1   : > { %14964 = vmatmul.mubr.f32.gmra.mrb[46].mxu1 %v21537_v11 }
 0x8f2   : > { %16917 = vmatpush3.bf16.msra.mxu1 %v21366_v2  ;;  %14998 = vmatprep.mubr.f32.mxu1 %v21388_v21  ;;  %v21615_v2 = vpack.c.bf16 %v23339_v25, %v23342_v22  ;;  %23866 = vst [vmem:[#allocation54_spill] sm:$0xff] %v21622_v34  ;;  %v23867_v25 = vld [vmem:[#allocation12_spill] sm:$0xff]  ;;  %23868 = vst [vmem:[#allocation61_spill] sm:$0xff] %v21641_v12  ;;  %v23346_v22 = vand.u32 4294901760, %v21630_v62 }
 0x8f3   : > { %16919 = vmatprep.subr.bf16.mxu1 %v23865_v53 }
 0x8f4   : > { %17015 = vmatprep.subr.bf16.mxu0 %v21615_v2  ;;  %v21655_v19 = vpack.c.bf16 %v23346_v22, %v23347_v29  ;;  %v23872_v22 = vand.u32 4294901760, %v21161_v41  ;;  %v23873_v29 = vand.u32 4294901760, %v21166_v4  ;;  %v23878_v41 = vand.u32 4294901760, %v21425_v52 }
 0x8f5   : > { %14999 = vmatmul.mubr.f32.vlgmr.msra.gmra.mrb[32].mxu1 %v21385_v26  ;;  %17017 = vmatpush3.bf16.msra.mxu0 %v21615_v2  ;;  %v23879_v4 = vand.u32 4294901760, %v21327_v45  ;;  %v23887_v45 = vand.u32 4294901760, %v21469_v32 }
 0x8f6   : > { %15001 = vmatprep.mubr.f32.mxu1 %v21425_v52  ;;  %16921 = vmatpush3.bf16.msra.mxu1 %v23865_v53  ;;  %23870 = vst [vmem:[#allocation65_spill] sm:$0xff] %v21655_v19  ;;  %v16950_v0 = vpack.c.bf16 %v23873_v29, %v23872_v22  ;;  %v23880_v22 = vand.u32 4294901760, %v21332_v13  ;;  %v23888_v13 = vld [vmem:[#allocation23_spill] sm:$0xff] }
 0x8f7   : > { %16923 = vmatprep.subr.bf16.mxu1 %v23867_v25  ;;  %17019 = vmatprep.subr.bf16.mxu0 %v21622_v34  ;;  %v23890_v29 = vld [vmem:[#allocation79_spill] sm:$0xff] }
 0x8f8   : > { %v16958_v21 = vpack.c.bf16 %v23880_v22, %v23879_v4  ;;  %v23898_v22 = vand.u32 4294901760, %v21481_v31 }
 0x8f9   : > { %15002 = vmatmul.mubr.f32.gmra.mrb[34].mxu1 %v21417_v3  ;;  %17021 = vmatpush3.bf16.msra.mxu0 %v21622_v34  ;;  %v23877_v34 = vand.u32 4294901760, %v21385_v26  ;;  %v23884_v26 = vld [vmem:[#allocation53_spill] sm:$0xff] }
 0x8fa   : > { %15004 = vmatprep.mubr.f32.mxu1 %v21445_v6  ;;  %16925 = vmatpush3.bf16.msra.mxu1 %v23867_v25  ;;  %v23885_v52 = vand.u32 4294901760, %v23884_v26  ;;  %v23891_v6 = vand.u32 4294901760, %v23890_v29  ;;  %v23904_v26 = vand.u32 4294901760, %v21504_v50 }
 0x8fb   : > { %16927 = vmatprep.subr.bf16.mxu1 %v23869_v61  ;;  %17023 = vmatprep.subr.bf16.mxu0 %v21641_v12 }
 0x8fd   : > { %15005 = vmatmul.mubr.f32.gmra.mrb[36].mxu1 %v21435_v27  ;;  %17025 = vmatpush3.bf16.msra.mxu0 %v21641_v12 }
 0x8fe   : > { %15007 = vmatprep.mubr.f32.mxu1 %v21469_v32  ;;  %16929 = vmatpush3.bf16.msra.mxu1 %v23869_v61 }
 0x8ff   : > { %16931 = vmatprep.subr.bf16.mxu1 %v23871_v39  ;;  %17027 = vmatprep.subr.bf16.mxu0 %v21655_v19 }
 0x901   : > { %15008 = vmatmul.mubr.f32.gmra.mrb[38].mxu1 %v21457_v48  ;;  %17029 = vmatpush3.bf16.msra.mxu0 %v21655_v19  ;;  %v23876_v19 = vand.u32 4294901760, %v21316_v56  ;;  %v23883_v56 = vand.u32 4294901760, %v21341_v37  ;;  %v23893_v37 = vand.u32 4294901760, %v21493_v9 }
 0x902   : > { %15010 = vmatprep.mubr.f32.mxu1 %v21493_v9  ;;  %16933 = vmatpush3.bf16.msra.mxu1 %v23871_v39 }
 0x903   : > { %16935 = vmatprep.subr.bf16.mxu1 %v21142_v1  ;;  %v16954_v12 = vpack.c.bf16 %v23876_v19, %v23875_v43  ;;  %v16962_v43 = vpack.c.bf16 %v23885_v52, %v23883_v56  ;;  %v23905_v52 = vand.u32 4294901760, %v21534_v57 }
 0x905   : > { %15011 = vmatmul.mubr.f32.gmra.mrb[40].mxu1 %v21481_v31  ;;  %v23906_v31 = vld [vmem:[#allocation45_spill] sm:$0xff] }
 0x906   : > { %15013 = vmatprep.mubr.f32.mxu1 %v21514_v5  ;;  %16937 = vmatpush3.bf16.msra.mxu1 %v21142_v1 }
 0x907   : > { %16939 = vmatprep.subr.bf16.mxu1 %v21148_v49 }
 0x909   : > { %15014 = vmatmul.mubr.f32.gmra.mrb[42].mxu1 %v21504_v50  ;;  %v23912_v50 = vand.u32 4294901760, %v21544_v33 }
 0x90a   : > { %15016 = vmatprep.mubr.f32.mxu1 %v21534_v57  ;;  %16941 = vmatpush3.bf16.msra.mxu1 %v21148_v49 }
 0x90b   : > { %16943 = vmatprep.subr.bf16.mxu1 %v21180_v18 }
 0x90d   : > { %15017 = vmatmul.mubr.f32.gmra.mrb[44].mxu1 %v21524_v8 }
 0x90e   : > { %15019 = vmatprep.mubr.f32.mxu1 %v21553_v55  ;;  %16945 = vmatpush3.bf16.msra.mxu1 %v21180_v18 }
 0x90f   : > { %16947 = vmatprep.subr.bf16.mxu1 %v21204_v14 }
 0x911   : > { %15020 = vmatmul.mubr.f32.gmra.mrb[46].mxu1 %v21544_v33 }
 0x912   : > { %16949 = vmatpush3.bf16.msra.mxu1 %v21204_v14  ;;  %15054 = vmatprep.mubr.f32.mxu1 %v23874_v54  ;;  %v23881_v54 = vand.u32 4294901760, %v21417_v3  ;;  %v23889_v3 = vand.u32 4294901760, %v23888_v13  ;;  %v23910_v13 = vand.u32 4294901760, %v21524_v8 }
 0x913   : > { %16951 = vmatprep.subr.bf16.mxu1 %v16950_v0 }
 0x915   : > { %15055 = vmatmul.mubr.f32.vlgmr.msra.gmra.mrb[32].mxu1 %v23877_v34  ;;  %v16966_v34 = vpack.c.bf16 %v23891_v6, %v23889_v3  ;;  %v23911_v3 = vand.u32 4294901760, %v21553_v55 }
 0x916   : > { %15057 = vmatprep.mubr.f32.mxu1 %v23878_v41  ;;  %16953 = vmatpush3.bf16.msra.mxu1 %v16950_v0  ;;  %v23886_v0 = vand.u32 4294901760, %v21435_v27  ;;  %v23894_v27 = vld [vmem:[#allocation80_spill] sm:$0xff]  ;;  %v23896_v41 = vld [vmem:[#allocation81_spill] sm:$0xff] }
 0x917   : > { %16955 = vmatprep.subr.bf16.mxu1 %v16954_v12  ;;  %v23895_v19 = vand.u32 4294901760, %v23894_v27  ;;  %v23897_v32 = vand.u32 4294901760, %v23896_v41 }
 0x919   : > { %15058 = vmatmul.mubr.f32.gmra.mrb[34].mxu1 %v23881_v54  ;;  %v16970_v4 = vpack.c.bf16 %v23897_v32, %v23895_v19 }
 0x91a   : > { %15060 = vmatprep.mubr.f32.mxu1 %v23882_v42  ;;  %16957 = vmatpush3.bf16.msra.mxu1 %v16954_v12  ;;  %v23892_v12 = vand.u32 4294901760, %v21457_v48  ;;  %v23900_v48 = vld [vmem:[#allocation6_spill] sm:$0xff]  ;;  %v23902_v42 = vld [vmem:[#allocation9_spill] sm:$0xff] }
 0x91b   : > { %16959 = vmatprep.subr.bf16.mxu1 %v16958_v21  ;;  %v23901_v54 = vand.u32 4294901760, %v23900_v48  ;;  %v23903_v9 = vand.u32 4294901760, %v23902_v42 }
 0x91d   : > { %15061 = vmatmul.mubr.f32.gmra.mrb[36].mxu1 %v23886_v0  ;;  %v16974_v56 = vpack.c.bf16 %v23903_v9, %v23901_v54  ;;  %v23908_v0 = vld [vmem:[#allocation49_spill] sm:$0xff] }
 0x91e   : > { %15063 = vmatprep.mubr.f32.mxu1 %v23887_v45  ;;  %16961 = vmatpush3.bf16.msra.mxu1 %v16958_v21  ;;  %v23899_v21 = vand.u32 4294901760, %v21514_v5  ;;  %v23909_v5 = vand.u32 4294901760, %v23908_v0 }
 0x91f   : > { %16963 = vmatprep.subr.bf16.mxu1 %v16962_v43 }
 0x921   : > { %15064 = vmatmul.mubr.f32.gmra.mrb[38].mxu1 %v23892_v12 }
 0x922   : > { %15066 = vmatprep.mubr.f32.mxu1 %v23893_v37  ;;  %16965 = vmatpush3.bf16.msra.mxu1 %v16962_v43  ;;  %v23907_v43 = vand.u32 4294901760, %v23906_v31 }
 0x923   : > { %16967 = vmatprep.subr.bf16.mxu1 %v16966_v34 }
 0x924   : > { %v16978_v45 = vpack.c.bf16 %v23909_v5, %v23907_v43 }
 0x925   : > { %15067 = vmatmul.mubr.f32.gmra.mrb[40].mxu1 %v23898_v22 }
 0x926   : > { %15069 = vmatprep.mubr.f32.mxu1 %v23899_v21  ;;  %16969 = vmatpush3.bf16.msra.mxu1 %v16966_v34 }
 0x927   : > { %16971 = vmatprep.subr.bf16.mxu1 %v16970_v4 }
 0x929   : > { %15070 = vmatmul.mubr.f32.gmra.mrb[42].mxu1 %v23904_v26 }
 0x92a   : > { %15072 = vmatprep.mubr.f32.mxu1 %v23905_v52  ;;  %16973 = vmatpush3.bf16.msra.mxu1 %v16970_v4 }
 0x92b   : > { %16975 = vmatprep.subr.bf16.mxu1 %v16974_v56 }
 0x92d   : > { %15073 = vmatmul.mubr.f32.gmra.mrb[44].mxu1 %v23910_v13 }
 0x92e   : > { %15075 = vmatprep.mubr.f32.mxu1 %v23911_v3  ;;  %16977 = vmatpush3.bf16.msra.mxu1 %v16974_v56 }
 0x92f   : > { %16979 = vmatprep.subr.bf16.mxu1 %v16978_v45 }
 0x931   : > { %15076 = vmatmul.mubr.f32.gmra.mrb[46].mxu1 %v23912_v50 }
 0x932   : > { %16981 = vmatpush3.bf16.msra.mxu1 %v16978_v45  ;;  %15110 = vmatprep.mubr.f32.mxu1 %v21377_v35 }
 0x933   : > { %16983 = vmatprep.subr.bf16.mxu1 %v23865_v53 }
 0x935   : > { %15111 = vmatmul.mubr.f32.vlgmr.msra.gmra.mrb[32].mxu1 %v21372_v46 }
 0x936   : > { %15113 = vmatprep.mubr.f32.mxu1 %v21420_v60  ;;  %16985 = vmatpush3.bf16.msra.mxu1 %v23865_v53 }
 0x937   : > { %16987 = vmatprep.subr.bf16.mxu1 %v23867_v25 }
 0x939   : > { %15114 = vmatmul.mubr.f32.gmra.mrb[34].mxu1 %v21407_v15 }
 0x93a   : > { %15116 = vmatprep.mubr.f32.mxu1 %v21440_v51  ;;  %16989 = vmatpush3.bf16.msra.mxu1 %v23867_v25 }
 0x93b   : > { %16991 = vmatprep.subr.bf16.mxu1 %v23869_v61 }
 0x93d   : > { %15117 = vmatmul.mubr.f32.gmra.mrb[36].mxu1 %v21428_v7 }
 0x93e   : > { %15119 = vmatprep.mubr.f32.mxu1 %v21463_v44  ;;  %16993 = vmatpush3.bf16.msra.mxu1 %v23869_v61 }
 0x93f   : > { %16995 = vmatprep.subr.bf16.mxu1 %v23871_v39 }
 0x941   : > { %15120 = vmatmul.mubr.f32.gmra.mrb[38].mxu1 %v21449_v10 }
 0x942   : > { %15122 = vmatprep.mubr.f32.mxu1 %v21487_v23  ;;  %16997 = vmatpush3.bf16.msra.mxu1 %v23871_v39 }
 0x943   : > { %16999 = vmatprep.subr.bf16.mxu1 %v21142_v1 }
 0x945   : > { %15123 = vmatmul.mubr.f32.gmra.mrb[40].mxu1 %v21473_v24 }
 0x946   : > { %15125 = vmatprep.mubr.f32.mxu1 %v21509_v30  ;;  %17001 = vmatpush3.bf16.msra.mxu1 %v21142_v1  ;;  %v8715_v1 = vld [vmem:[#allocation2 + $0x240] sm:$0xff] }
 0x947   : > { %17003 = vmatprep.subr.bf16.mxu1 %v21148_v49 }
 0x949   : > { %15126 = vmatmul.mubr.f32.gmra.mrb[42].mxu1 %v21497_v16 }
 0x94a   : > { %15128 = vmatprep.mubr.f32.mxu1 %v21529_v40  ;;  %17005 = vmatpush3.bf16.msra.mxu1 %v21148_v49  ;;  %v8716_v49 = vld [vmem:[#allocation2 + $0x248] sm:$0xff] }
 0x94b   : > { %17007 = vmatprep.subr.bf16.mxu1 %v21180_v18 }
 0x94d   : > { %15129 = vmatmul.mubr.f32.gmra.mrb[44].mxu1 %v21517_v17 }
 0x94e   : > { %15131 = vmatprep.mubr.f32.mxu1 %v21549_v38  ;;  %17009 = vmatpush3.bf16.msra.mxu1 %v21180_v18  ;;  %v8755_v18 = vand.u32 4294901760, %v8716_v49 }
 0x94f   : > { %17011 = vmatprep.subr.bf16.mxu1 %v21204_v14 }
 0x950   : > { %v21832_v34 = vsub.f32 %v8716_v49, %v8755_v18 }
 0x951   : > { %15132 = vmatmul.mubr.f32.gmra.mrb[46].mxu1 %v21537_v11 }
 0x952   : > { %17013 = vmatpush3.bf16.msra.mxu1 %v21204_v14  ;;  %15166 = vmatprep.mubr.f32.mxu1 %v21377_v35  ;;  %v8752_v14 = vand.u32 4294901760, %v8715_v1  ;;  %v8718_v35 = vld [vmem:[#allocation2 + $0x258] sm:$0xff]  ;;  %23918 = vst [vmem:[#allocation75_spill] sm:$0xff] %v21832_v34  ;;  %v23363_v37 = vand.u32 4294901760, %v21832_v34 }
 0x954   : > { %v21793_v57 = vpack.c.bf16 %v8755_v18, %v8752_v14  ;;  %v21830_v6 = vsub.f32 %v8715_v1, %v8752_v14  ;;  %v9035_v32 = vsub.f32 %v21832_v34, %v23363_v37 }
 0x955   : > { %15167 = vmatmul.mubr.f32.vlgmr.msra.gmra.mrb[32].mxu1 %v21372_v46 }
 0x956   : > { %15169 = vmatprep.mubr.f32.mxu1 %v21420_v60  ;;  %17031 = vmatprep.subr.bf16.mxu0 %v21793_v57  ;;  %v8761_v60 = vand.u32 4294901760, %v8718_v35  ;;  %23917 = vst [vmem:[#allocation73_spill] sm:$0xff] %v21830_v6  ;;  %v23364_v12 = vand.u32 4294901760, %v21830_v6  ;;  %v9036_v48 = vand.u32 4294901760, %v9035_v32  ;;  %v23929_v32 = vand.u32 4294901760, %v21607_v59 }
 0x957   : > { %17033 = vmatpush3.bf16.msra.mxu0 %v21793_v57 }
 0x958   : > { %v9028_v27 = vsub.f32 %v21830_v6, %v23364_v12  ;;  %v21841_v41 = vsub.f32 %v8718_v35, %v8761_v60 }
 0x959   : > { %15170 = vmatmul.mubr.f32.gmra.mrb[34].mxu1 %v21407_v15  ;;  %v8717_v15 = vld [vmem:[#allocation2 + $0x250] sm:$0xff] }
 0x95a   : > { %15172 = vmatprep.mubr.f32.mxu1 %v21440_v51  ;;  %v8758_v46 = vand.u32 4294901760, %v8717_v15  ;;  %v8720_v51 = vld [vmem:[#allocation2 + $0x268] sm:$0xff]  ;;  %23920 = vst [vmem:[#allocation77_spill] sm:$0xff] %v21841_v41  ;;  %v9029_v4 = vand.u32 4294901760, %v9028_v27  ;;  %v23361_v21 = vand.u32 4294901760, %v21841_v41 }
 0x95c   : > { %v21839_v19 = vsub.f32 %v8717_v15, %v8758_v46  ;;  %v9049_v42 = vsub.f32 %v21841_v41, %v23361_v21  ;;  %v21858_v26 = vpack.c.bf16 %v9036_v48, %v9029_v4  ;;  %v21925_v4 = vsub.f32 %v21607_v59, %v23929_v32 }
 0x95d   : > { %15173 = vmatmul.mubr.f32.gmra.mrb[36].mxu1 %v21428_v7  ;;  %v21797_v7 = vpack.c.bf16 %v8761_v60, %v8758_v46 }
 0x95e   : > { %15175 = vmatprep.mubr.f32.mxu1 %v21463_v44  ;;  %v8767_v44 = vand.u32 4294901760, %v8720_v51  ;;  %23919 = vst [vmem:[#allocation76_spill] sm:$0xff] %v21839_v19  ;;  %v23362_v22 = vand.u32 4294901760, %v21839_v19  ;;  %v9050_v31 = vand.u32 4294901760, %v9049_v42  ;;  %v23365_v42 = vand.u32 4294901760, %v21925_v4 }
 0x95f   : > { %17035 = vmatprep.subr.bf16.mxu0 %v21797_v7 }
 0x960   : > { %17037 = vmatpush3.bf16.msra.mxu0 %v21797_v7  ;;  %v9042_v54 = vsub.f32 %v21839_v19, %v23362_v22  ;;  %v21856_v56 = vsub.f32 %v8720_v51, %v8767_v44 }
 0x961   : > { %15176 = vmatmul.mubr.f32.gmra.mrb[38].mxu1 %v21449_v10  ;;  %v8719_v10 = vld [vmem:[#allocation2 + $0x260] sm:$0xff] }
 0x962   : > { %15178 = vmatprep.mubr.f32.mxu1 %v21487_v23  ;;  %v23913_v23 = vand.u32 4294901760, %v21592_v20  ;;  %23922 = vst [vmem:[#allocation21_spill] sm:$0xff] %v21856_v56  ;;  %v9043_v52 = vand.u32 4294901760, %v9042_v54  ;;  %v23359_v0 = vand.u32 4294901760, %v21856_v56 }
 0x964   : > { %v21862_v5 = vpack.c.bf16 %v9050_v31, %v9043_v52  ;;  %v9063_v13 = vsub.f32 %v21856_v56, %v23359_v0 }
 0x965   : > { %15179 = vmatmul.mubr.f32.gmra.mrb[40].mxu1 %v21473_v24  ;;  %v8764_v24 = vand.u32 4294901760, %v8719_v10 }
 0x966   : > { %15181 = vmatprep.mubr.f32.mxu1 %v21509_v30  ;;  %v21806_v30 = vsub.f32 %v21592_v20, %v23913_v23  ;;  %v9064_v49 = vand.u32 4294901760, %v9063_v13  ;;  %v21896_v23 = vpack.c.bf16 %v21841_v41, %v21839_v19 }
 0x967   : > { %v21854_v9 = vsub.f32 %v8719_v10, %v8764_v24 }
 0x968   : > { %23914 = vst [vmem:[#allocation68_spill] sm:$0xff] %v21806_v30  ;;  %v23373_v61 = vand.u32 4294901760, %v21806_v30 }
 0x969   : > { %15182 = vmatmul.mubr.f32.gmra.mrb[42].mxu1 %v21497_v16  ;;  %v21801_v16 = vpack.c.bf16 %v8767_v44, %v8764_v24  ;;  %23921 = vst [vmem:[#allocation78_spill] sm:$0xff] %v21854_v9  ;;  %v23360_v43 = vand.u32 4294901760, %v21854_v9  ;;  %v21892_v44 = vpack.c.bf16 %v21832_v34, %v21830_v6 }
 0x96a   : > { %15184 = vmatprep.mubr.f32.mxu1 %v21529_v40  ;;  %v8721_v40 = vld [vmem:[#allocation2 + $0x270] sm:$0xff]  ;;  %v8972_v20 = vsub.f32 %v21806_v30, %v23373_v61 }
 0x96b   : > { %17039 = vmatprep.subr.bf16.mxu0 %v21801_v16  ;;  %v8770_v33 = vand.u32 4294901760, %v8721_v40  ;;  %v9056_v45 = vsub.f32 %v21854_v9, %v23360_v43 }
 0x96c   : > { %17041 = vmatpush3.bf16.msra.mxu0 %v21801_v16  ;;  %v8973_v53 = vand.u32 4294901760, %v8972_v20 }
 0x96d   : > { %15185 = vmatmul.mubr.f32.gmra.mrb[44].mxu1 %v21517_v17  ;;  %v23915_v17 = vand.u32 4294901760, %v21594_v28  ;;  %v21870_v3 = vsub.f32 %v8721_v40, %v8770_v33  ;;  %v9057_v1 = vand.u32 4294901760, %v9056_v45 }
 0x96e   : > { %15187 = vmatprep.mubr.f32.mxu1 %v21549_v38 }
 0x96f   : > { %v21811_v8 = vsub.f32 %v21594_v28, %v23915_v17  ;;  %23923 = vst [vmem:[#allocation14_spill] sm:$0xff] %v21870_v3  ;;  %v23358_v14 = vand.u32 4294901760, %v21870_v3  ;;  %v21876_v15 = vpack.c.bf16 %v9064_v49, %v9057_v1  ;;  %v21900_v17 = vpack.c.bf16 %v21856_v56, %v21854_v9 }
 0x971   : > { %15188 = vmatmul.mubr.f32.gmra.mrb[46].mxu1 %v21537_v11  ;;  %23916 = vst [vmem:[#allocation71_spill] sm:$0xff] %v21811_v8  ;;  %v8722_v11 = vld [vmem:[#allocation2 + $0x278] sm:$0xff]  ;;  %v23372_v55 = vand.u32 4294901760, %v21811_v8  ;;  %v9070_v35 = vsub.f32 %v21870_v3, %v23358_v14  ;;  %v21886_v10 = vpack.c.bf16 %v21811_v8, %v21806_v30 }
 0x972   : > { %v8773_v38 = vand.u32 4294901760, %v8722_v11 }
 0x973   : > { %v8979_v28 = vsub.f32 %v21811_v8, %v23372_v55  ;;  %v9071_v60 = vand.u32 4294901760, %v9070_v35 }
 0x974   : > { %v21817_v25 = vpack.c.bf16 %v8773_v38, %v8770_v33  ;;  %v21872_v50 = vsub.f32 %v8722_v11, %v8773_v38  ;;  %v23925_v11 = vld [vmem:[#allocation20_spill] sm:$0xff]  ;;  %v23926_v38 = vand.u32 4294901760, %v21596_v47 }
 0x975   : > { %v8980_v39 = vand.u32 4294901760, %v8979_v28  ;;  %v7402_v33 = vsub.s32 3, %v23925_v11  ;;  %v23927_v28 = vand.u32 4294901760, %v21602_v58 }
 0x976   : > { %17043 = vmatprep.subr.bf16.mxu0 %v21817_v25  ;;  %23924 = vst [vmem:[#allocation18_spill] sm:$0xff] %v21872_v50  ;;  %v23357_v18 = vand.u32 4294901760, %v21872_v50  ;;  %v21904_v40 = vpack.c.bf16 %v21872_v50, %v21870_v3  ;;  %v21910_v20 = vsub.f32 %v21596_v47, %v23926_v38  ;;  %v21930_v47 = vld [vmem:[%s23009_s5] sm:$0xff] }
 0x977   : > { %17045 = vmatpush3.bf16.msra.mxu0 %v21817_v25  ;;  %v21827_v29 = vpack.c.bf16 %v8980_v39, %v8973_v53  ;;  %v21915_v53 = vsub.f32 %v21602_v58, %v23927_v28  ;;  %v23928_v39 = vand.u32 4294901760, %v21605_v63  ;;  %23930 = vst [vmem:[#allocation25_spill] sm:$0xff] %v21930_v47  ;;  %v21933_v48 = vrot.slane %v21930_v47, %v7402_v33 }
 0x978   : > { %v9077_v46 = vsub.f32 %v21872_v50, %v23357_v18  ;;  %v23369_v58 = vand.u32 4294901760, %v21910_v20  ;;  %v23931_v33 = vand.u32 4294901760, %v21628_v36 }
 0x979   : > { %17047 = vmatprep.subr.bf16.mxu0 %v21827_v29  ;;  %v21920_v27 = vsub.f32 %v21605_v63, %v23928_v39  ;;  %v23367_v54 = vand.u32 4294901760, %v21915_v53 }
 0x97a   : > { %v9078_v51 = vand.u32 4294901760, %v9077_v46  ;;  %v8986_v13 = vsub.f32 %v21910_v20, %v23369_v58  ;;  %v9007_v46 = vsub.f32 %v21925_v4, %v23365_v42  ;;  %v21956_v38 = vsub.f32 %v21628_v36, %v23931_v33 }
 0x97b   : > { %v23366_v63 = vand.u32 4294901760, %v21920_v27  ;;  %v8993_v1 = vsub.f32 %v21915_v53, %v23367_v54 }
 0x97c   : > { %v21888_v24 = vpack.c.bf16 %v9078_v51, %v9071_v60  ;;  %v8987_v18 = vand.u32 4294901760, %v8986_v13  ;;  %v9008_v43 = vand.u32 4294901760, %v9007_v46 }
 0x97d   : > { %v9000_v35 = vsub.f32 %v21920_v27, %v23366_v63  ;;  %v8994_v14 = vand.u32 4294901760, %v8993_v1 }
 0x97f   : > { %v9001_v33 = vand.u32 4294901760, %v9000_v35 }
 0x981   : > { %v21991_v42 = vpack.c.bf16 %v9008_v43, %v9001_v33 }
 0xa28   : > { %v15168_v52 = vpop.f32.mrb[32].mxu1 }
 0xa29   : > { %v17446_v59 = vadd.f32 %v15168_v52, %v21933_v48  ;;  %v8596_v31 = vpop.f32.mrb[33].mxu1  ;;  %v23932_v52 = vand.u32 4294901760, %v21630_v62 }
 0xa2a   : > { %v17447_v45 = vadd.f32 %v8596_v31, %v21933_v48 }
 0xa2b   : > { %v8691_v49 = vmax.f32 %v17446_v59, 0.0  ;;  %v21964_v59 = vsub.f32 %v21630_v62, %v23932_v52  ;;  %v23371_v62 = vand.u32 4294901760, %v21956_v38 }
 0xa2c   : > { %v8690_v60 = vmax.f32 %v17447_v45, 0.0  ;;  %v15171_v51 = vpop.f32.mrb[34].mxu1 }
 0xa2d   : > { %v21958_v28 = vand.u32 4294901760, %v8691_v49  ;;  %v17448_v39 = vadd.f32 %v15171_v51, %v21933_v48  ;;  %v8608_v32 = vpop.f32.mrb[35].mxu1 }
 0xa2e   : > { %v21966_v31 = vand.u32 4294901760, %v8690_v60  ;;  %v17449_v45 = vadd.f32 %v8608_v32, %v21933_v48 }
 0xa2f   : > { %v21970_v0 = vsub.f32 %v8691_v49, %v21958_v28  ;;  %v8693_v36 = vmax.f32 %v17448_v39, 0.0  ;;  %v23374_v49 = vand.u32 4294901760, %v21964_v59 }
 0xa30   : > { %v21973_v51 = vsub.f32 %v8690_v60, %v21966_v31  ;;  %v8692_v21 = vmax.f32 %v17449_v45, 0.0  ;;  %v15174_v22 = vpop.f32.mrb[36].mxu1  ;;  %v17050_v60 = vpack.c.bf16 %v8994_v14, %v8987_v18  ;;  %v9014_v14 = vsub.f32 %v21956_v38, %v23371_v62 }
 0xa31   : > { %v23368_v52 = vand.u32 4294901760, %v21970_v0  ;;  %v21977_v37 = vand.u32 4294901760, %v8693_v36  ;;  %v17450_v13 = vadd.f32 %v15174_v22, %v21933_v48  ;;  %v8620_v1 = vpop.f32.mrb[37].mxu1 }
 0xa32   : > { %v21981_v32 = vand.u32 4294901760, %v8692_v21  ;;  %v17451_v35 = vadd.f32 %v8620_v1, %v21933_v48  ;;  %v23370_v46 = vand.u32 4294901760, %v21973_v51 }
 0xa33   : > { %v8821_v39 = vsub.f32 %v21970_v0, %v23368_v52  ;;  %v21989_v45 = vsub.f32 %v8693_v36, %v21977_v37  ;;  %v8695_v12 = vmax.f32 %v17450_v13, 0.0 }
 0xa34   : > { %v21994_v22 = vsub.f32 %v8692_v21, %v21981_v32  ;;  %v8694_v63 = vmax.f32 %v17451_v35, 0.0  ;;  %v15177_v54 = vpop.f32.mrb[38].mxu1  ;;  %v8811_v1 = vsub.f32 %v21973_v51, %v23370_v46  ;;  %v9021_v21 = vsub.f32 %v21964_v59, %v23374_v49 }
 0xa35   : > { %v22002_v18 = vand.u32 4294901760, %v8695_v12  ;;  %v17452_v36 = vadd.f32 %v15177_v54, %v21933_v48  ;;  %v8632_v13 = vpop.f32.mrb[39].mxu1  ;;  %v23376_v43 = vand.u32 4294901760, %v21989_v45  ;;  %v8822_v46 = vand.u32 4294901760, %v8821_v39 }
 0xa36   : > { %v22009_v33 = vand.u32 4294901760, %v8694_v63  ;;  %v17453_v35 = vadd.f32 %v8632_v13, %v21933_v48  ;;  %v8812_v52 = vand.u32 4294901760, %v8811_v1  ;;  %v23378_v58 = vand.u32 4294901760, %v21994_v22 }
 0xa37   : > { %v22014_v62 = vsub.f32 %v8695_v12, %v22002_v18  ;;  %v8697_v55 = vmax.f32 %v17452_v36, 0.0  ;;  %v8841_v54 = vsub.f32 %v21989_v45, %v23376_v43  ;;  %v9015_v13 = vand.u32 4294901760, %v9014_v14 }
 0xa38   : > { %v22020_v61 = vsub.f32 %v8694_v63, %v22009_v33  ;;  %v8696_v49 = vmax.f32 %v17453_v35, 0.0  ;;  %v15180_v47 = vpop.f32.mrb[40].mxu1  ;;  %15222 = vmatprep.mubr.f32.mxu0 %v8812_v52  ;;  %v8831_v1 = vsub.f32 %v21994_v22, %v23378_v58  ;;  %v9022_v43 = vand.u32 4294901760, %v9021_v21 }
 0xa39   : > { %v22025_v39 = vand.u32 4294901760, %v8697_v55  ;;  %v17454_v12 = vadd.f32 %v15180_v47, %v21933_v48  ;;  %v8644_v36 = vpop.f32.mrb[41].mxu1  ;;  %15223 = vmatmul.mubr.f32.vlgmr.msra.gmra.mrb[48].mxu0 %v8822_v46  ;;  %v23381_v11 = vand.u32 4294901760, %v22014_v62  ;;  %v8842_v3 = vand.u32 4294901760, %v8841_v54 }
 0xa3a   : > { %v22029_v50 = vand.u32 4294901760, %v8696_v49  ;;  %v17455_v63 = vadd.f32 %v8644_v36, %v21933_v48  ;;  %17049 = vmatpush3.bf16.msra.mxu0 %v21827_v29  ;;  %v8832_v52 = vand.u32 4294901760, %v8831_v1  ;;  %v23383_v35 = vand.u32 4294901760, %v22020_v61 }
 0xa3b   : > { %v22035_v14 = vsub.f32 %v8697_v55, %v22025_v39  ;;  %v8699_v58 = vmax.f32 %v17454_v12, 0.0  ;;  %17051 = vmatprep.subr.bf16.mxu0 %v17050_v60  ;;  %v8861_v47 = vsub.f32 %v22014_v62, %v23381_v11  ;;  %v17058_v56 = vpack.c.bf16 %v9022_v43, %v9015_v13 }
 0xa3c   : > { %v22041_v46 = vsub.f32 %v8696_v49, %v22029_v50  ;;  %v8698_v21 = vmax.f32 %v17455_v63, 0.0  ;;  %v15183_v36 = vpop.f32.mrb[42].mxu1  ;;  %15225 = vmatprep.mubr.f32.mxu0 %v8832_v52  ;;  %v8851_v29 = vsub.f32 %v22020_v61, %v23383_v35 }
 0xa3d   : > { %v22046_v1 = vand.u32 4294901760, %v8699_v58  ;;  %v17456_v55 = vadd.f32 %v15183_v36, %v21933_v48  ;;  %v8656_v54 = vpop.f32.mrb[43].mxu1  ;;  %15226 = vmatmul.mubr.f32.gmra.mrb[50].mxu0 %v8842_v3  ;;  %v23385_v12 = vand.u32 4294901760, %v22035_v14  ;;  %v8862_v41 = vand.u32 4294901760, %v8861_v47 }
 0xa3e   : > { %v22050_v11 = vand.u32 4294901760, %v8698_v21  ;;  %v17457_v49 = vadd.f32 %v8656_v54, %v21933_v48  ;;  %17053 = vmatpush3.bf16.msra.mxu0 %v17050_v60  ;;  %v8852_v63 = vand.u32 4294901760, %v8851_v29  ;;  %v23386_v52 = vand.u32 4294901760, %v22041_v46 }
 0xa3f   : > { %v22055_v9 = vsub.f32 %v8699_v58, %v22046_v1  ;;  %v8701_v35 = vmax.f32 %v17456_v55, 0.0  ;;  %17055 = vmatprep.subr.bf16.mxu0 %v21991_v42  ;;  %v8881_v3 = vsub.f32 %v22035_v14, %v23385_v12 }
 0xa40   : > { %v22062_v43 = vsub.f32 %v8698_v21, %v22050_v11  ;;  %v8700_v13 = vmax.f32 %v17457_v49, 0.0  ;;  %v15186_v36 = vpop.f32.mrb[44].mxu1  ;;  %15228 = vmatprep.mubr.f32.mxu0 %v8852_v63  ;;  %v8871_v60 = vsub.f32 %v22041_v46, %v23386_v52 }
 0xa41   : > { %v22067_v58 = vand.u32 4294901760, %v8701_v35  ;;  %v17458_v47 = vadd.f32 %v15186_v36, %v21933_v48  ;;  %v8668_v29 = vpop.f32.mrb[45].mxu1  ;;  %15229 = vmatmul.mubr.f32.gmra.mrb[52].mxu0 %v8862_v41  ;;  %v23390_v55 = vand.u32 4294901760, %v22055_v9  ;;  %v8882_v19 = vand.u32 4294901760, %v8881_v3 }
 0xa42   : > { %v22071_v54 = vand.u32 4294901760, %v8700_v13  ;;  %v17459_v21 = vadd.f32 %v8668_v29, %v21933_v48  ;;  %17057 = vmatpush3.bf16.msra.mxu0 %v21991_v42  ;;  %v8872_v49 = vand.u32 4294901760, %v8871_v60  ;;  %v23391_v63 = vand.u32 4294901760, %v22062_v43 }
 0xa43   : > { %v22077_v12 = vsub.f32 %v8701_v35, %v22067_v58  ;;  %v8703_v52 = vmax.f32 %v17458_v47, 0.0  ;;  %17059 = vmatprep.subr.bf16.mxu0 %v17058_v56  ;;  %v8901_v41 = vsub.f32 %v22055_v9, %v23390_v55 }
 0xa44   : > { %v22083_v36 = vsub.f32 %v8700_v13, %v22071_v54  ;;  %v8702_v34 = vmax.f32 %v17459_v21, 0.0  ;;  %v15189_v29 = vpop.f32.mrb[46].mxu1  ;;  %15231 = vmatprep.mubr.f32.mxu0 %v8872_v49  ;;  %v8891_v42 = vsub.f32 %v22062_v43, %v23391_v63 }
 0xa45   : > { %v22088_v60 = vand.u32 4294901760, %v8703_v52  ;;  %v17460_v35 = vadd.f32 %v15189_v29, %v21933_v48  ;;  %v8680_v3 = vpop.f32.mrb[47].mxu1  ;;  %15232 = vmatmul.mubr.f32.gmra.mrb[54].mxu0 %v8882_v19  ;;  %v23406_v47 = vand.u32 4294901760, %v22077_v12  ;;  %v8902_v8 = vand.u32 4294901760, %v8901_v41 }
 0xa46   : > { %v22092_v6 = vand.u32 4294901760, %v8702_v34  ;;  %v17461_v13 = vadd.f32 %v8680_v3, %v21933_v48  ;;  %17061 = vmatpush3.bf16.msra.mxu0 %v17058_v56  ;;  %v8892_v21 = vand.u32 4294901760, %v8891_v42  ;;  %v23407_v49 = vand.u32 4294901760, %v22083_v36 }
 0xa47   : > { %v22097_v55 = vsub.f32 %v8703_v52, %v22088_v60  ;;  %v8705_v63 = vmax.f32 %v17460_v35, 0.0  ;;  %17063 = vmatprep.subr.bf16.mxu0 %v21858_v26  ;;  %v8921_v19 = vsub.f32 %v22077_v12, %v23406_v47 }
 0xa48   : > { %v22104_v29 = vsub.f32 %v8702_v34, %v22092_v6  ;;  %v8704_v30 = vmax.f32 %v17461_v13, 0.0  ;;  %15234 = vmatprep.mubr.f32.mxu0 %v8892_v21  ;;  %v8911_v56 = vsub.f32 %v22083_v36, %v23407_v49  ;;  %v23944_v49 = vand.u32 4294901760, %v21973_v51 }
 0xa49   : > { %v22109_v48 = vand.u32 4294901760, %v8705_v63  ;;  %15235 = vmatmul.mubr.f32.gmra.mrb[56].mxu0 %v8902_v8  ;;  %v23404_v52 = vand.u32 4294901760, %v22097_v55  ;;  %v8922_v3 = vand.u32 4294901760, %v8921_v19 }
 0xa4a   : > { %v22112_v41 = vand.u32 4294901760, %v8704_v30  ;;  %17065 = vmatpush3.bf16.msra.mxu0 %v21858_v26  ;;  %v8912_v42 = vand.u32 4294901760, %v8911_v56  ;;  %v23405_v35 = vand.u32 4294901760, %v22104_v29 }
 0xa4b   : > { %v22117_v34 = vsub.f32 %v8705_v63, %v22109_v48  ;;  %17067 = vmatprep.subr.bf16.mxu0 %v21862_v5  ;;  %v8941_v13 = vsub.f32 %v22097_v55, %v23404_v52  ;;  %v23942_v52 = vld [vmem:[#allocation71_spill] sm:$0xff] }
 0xa4c   : > { %v22124_v8 = vsub.f32 %v8704_v30, %v22112_v41  ;;  %15237 = vmatprep.mubr.f32.mxu0 %v8912_v42  ;;  %v8931_v26 = vsub.f32 %v22104_v29, %v23405_v35  ;;  %v23943_v35 = vand.u32 4294901760, %v23942_v52  ;;  %v23949_v52 = vand.u32 4294901760, %v21920_v27 }
 0xa4d   : > { %15238 = vmatmul.mubr.f32.gmra.mrb[58].mxu0 %v8922_v3  ;;  %v23398_v21 = vand.u32 4294901760, %v22117_v34  ;;  %v8942_v56 = vand.u32 4294901760, %v8941_v13  ;;  %v17082_v13 = vpack.c.bf16 %v21915_v53, %v21910_v20 }
 0xa4e   : > { %17069 = vmatpush3.bf16.msra.mxu0 %v21862_v5  ;;  %v8932_v63 = vand.u32 4294901760, %v8931_v26  ;;  %v23399_v19 = vand.u32 4294901760, %v22124_v8  ;;  %v22177_v26 = vld [vmem:[#allocation2 + $0x290] sm:$0xff] }
 0xa4f   : > { %17071 = vmatprep.subr.bf16.mxu0 %v21876_v15  ;;  %v8961_v30 = vsub.f32 %v22117_v34, %v23398_v21 }
 0xa50   : > { %15240 = vmatprep.mubr.f32.mxu0 %v8932_v63  ;;  %v8951_v42 = vsub.f32 %v22124_v8, %v23399_v19  ;;  %v23937_v19 = vld [vmem:[#allocation61_spill] sm:$0xff] }
 0xa51   : > { %15241 = vmatmul.mubr.f32.gmra.mrb[60].mxu0 %v8942_v56  ;;  %v8962_v5 = vand.u32 4294901760, %v8961_v30  ;;  %v22183_v56 = vld [vmem:[#allocation2 + $0x298] sm:$0xff]  ;;  %v22186_v30 = vld [vmem:[#allocation2 + $0x2a0] sm:$0xff] }
 0xa52   : > { %17073 = vmatpush3.bf16.msra.mxu0 %v21876_v15  ;;  %v8952_v3 = vand.u32 4294901760, %v8951_v42  ;;  %v17086_v15 = vpack.c.bf16 %v21925_v4, %v21920_v27  ;;  %v22188_v42 = vld [vmem:[#allocation2 + $0x2a8] sm:$0xff]  ;;  %v23956_v27 = vand.u32 4294901760, %v22041_v46 }
 0xa53   : > { %17075 = vmatprep.subr.bf16.mxu0 %v21888_v24 }
 0xa54   : > { %15243 = vmatprep.mubr.f32.mxu0 %v8952_v3  ;;  %v23396_v3 = vand.u32 4294901760, %v22183_v56 }
 0xa55   : > { %15244 = vmatmul.mubr.f32.gmra.mrb[62].mxu0 %v8962_v5 }
 0xa56   : > { %17077 = vmatpush3.bf16.msra.mxu0 %v21888_v24  ;;  %15278 = vmatprep.mubr.f32.mxu0 %v21966_v31  ;;  %v17090_v24 = vpack.c.bf16 %v21964_v59, %v21956_v38 }
 0xa57   : > { %17079 = vmatprep.subr.bf16.mxu0 %v21886_v10 }
 0xa59   : > { %15279 = vmatmul.mubr.f32.vlgmr.msra.gmra.mrb[48].mxu0 %v21958_v28 }
 0xa5a   : > { %15281 = vmatprep.mubr.f32.mxu0 %v21981_v32  ;;  %17081 = vmatpush3.bf16.msra.mxu0 %v21886_v10  ;;  %v22173_v10 = vld [vmem:[#allocation2 + $0x280] sm:$0xff] }
 0xa5b   : > { %17083 = vmatprep.subr.bf16.mxu0 %v17082_v13 }
 0xa5d   : > { %15282 = vmatmul.mubr.f32.gmra.mrb[50].mxu0 %v21977_v37 }
 0xa5e   : > { %15284 = vmatprep.mubr.f32.mxu0 %v22009_v33  ;;  %17085 = vmatpush3.bf16.msra.mxu0 %v17082_v13  ;;  %v23401_v13 = vand.u32 4294901760, %v22186_v30 }
 0xa5f   : > { %17087 = vmatprep.subr.bf16.mxu0 %v17086_v15 }
 0xa61   : > { %15285 = vmatmul.mubr.f32.gmra.mrb[52].mxu0 %v22002_v18 }
 0xa62   : > { %15287 = vmatprep.mubr.f32.mxu0 %v22029_v50  ;;  %17089 = vmatpush3.bf16.msra.mxu0 %v17086_v15  ;;  %v23400_v15 = vand.u32 4294901760, %v22188_v42 }
 0xa63   : > { %17091 = vmatprep.subr.bf16.mxu0 %v17090_v24 }
 0xa65   : > { %15288 = vmatmul.mubr.f32.gmra.mrb[54].mxu0 %v22025_v39 }
 0xa66   : > { %15290 = vmatprep.mubr.f32.mxu0 %v22050_v11  ;;  %17093 = vmatpush3.bf16.msra.mxu0 %v17090_v24  ;;  %v22209_v24 = vld [vmem:[#allocation2 + $0x2b0] sm:$0xff] }
 0xa67   : > { %17095 = vmatprep.subr.bf16.mxu0 %v21892_v44 }
 0xa69   : > { %15291 = vmatmul.mubr.f32.gmra.mrb[56].mxu0 %v22046_v1 }
 0xa6a   : > { %15293 = vmatprep.mubr.f32.mxu0 %v22071_v54  ;;  %17097 = vmatpush3.bf16.msra.mxu0 %v21892_v44  ;;  %v22175_v44 = vld [vmem:[#allocation2 + $0x288] sm:$0xff] }
 0xa6b   : > { %17099 = vmatprep.subr.bf16.mxu0 %v21896_v23  ;;  %v23394_v63 = vand.u32 4294901760, %v22175_v44 }
 0xa6d   : > { %15294 = vmatmul.mubr.f32.gmra.mrb[58].mxu0 %v22067_v58 }
 0xa6e   : > { %15296 = vmatprep.mubr.f32.mxu0 %v22092_v6  ;;  %17101 = vmatpush3.bf16.msra.mxu0 %v21896_v23  ;;  %v23395_v23 = vand.u32 4294901760, %v22173_v10 }
 0xa6f   : > { %17103 = vmatprep.subr.bf16.mxu0 %v21900_v17 }
 0xa71   : > { %15297 = vmatmul.mubr.f32.gmra.mrb[60].mxu0 %v22088_v60 }
 0xa72   : > { %15299 = vmatprep.mubr.f32.mxu0 %v22112_v41  ;;  %17105 = vmatpush3.bf16.msra.mxu0 %v21900_v17  ;;  %v23397_v17 = vand.u32 4294901760, %v22177_v26 }
 0xa73   : > { %17107 = vmatprep.subr.bf16.mxu0 %v21904_v40 }
 0xa74   : > { %v22203_v5 = vpack.c.bf16 %v23396_v3, %v23397_v17  ;;  %v22222_v3 = vpack.c.bf16 %v23400_v15, %v23401_v13  ;;  %v23403_v17 = vand.u32 4294901760, %v22209_v24  ;;  %v23939_v13 = vld [vmem:[#allocation65_spill] sm:$0xff] }
 0xa75   : > { %15300 = vmatmul.mubr.f32.gmra.mrb[62].mxu0 %v22109_v48 }
 0xa76   : > { %17109 = vmatpush3.bf16.msra.mxu0 %v21904_v40  ;;  %15334 = vmatprep.mubr.f32.mxu0 %v21973_v51  ;;  %v22196_v40 = vpack.c.bf16 %v23394_v63, %v23395_v23  ;;  %23934 = vst [vmem:[#allocation13_spill] sm:$0xff] %v22203_v5  ;;  %v22211_v63 = vld [vmem:[#allocation2 + $0x2b8] sm:$0xff]  ;;  %v23935_v23 = vld [vmem:[#allocation54_spill] sm:$0xff]  ;;  %23936 = vst [vmem:[#allocation31_spill] sm:$0xff] %v22222_v3 }
 0xa77   : > { %17111 = vmatprep.subr.bf16.mxu0 %v21615_v2  ;;  %v23402_v21 = vand.u32 4294901760, %v22211_v63 }
 0xa78   : > { %23933 = vst [vmem:[#allocation5_spill] sm:$0xff] %v22196_v40  ;;  %17207 = vmatprep.subr.bf16.mxu1 %v22196_v40 }
 0xa79   : > { %15335 = vmatmul.mubr.f32.vlgmr.msra.gmra.mrb[48].mxu0 %v21970_v0  ;;  %17209 = vmatpush3.bf16.msra.mxu1 %v22196_v40  ;;  %v22236_v15 = vpack.c.bf16 %v23402_v21, %v23403_v17  ;;  %v23940_v21 = vld [vmem:[#allocation68_spill] sm:$0xff]  ;;  %v23947_v40 = vand.u32 4294901760, %v21970_v0  ;;  %v23953_v0 = vand.u32 4294901760, %v21956_v38  ;;  %v23962_v38 = vand.u32 4294901760, %v22062_v43 }
 0xa7a   : > { %15337 = vmatprep.mubr.f32.mxu0 %v21994_v22  ;;  %17113 = vmatpush3.bf16.msra.mxu0 %v21615_v2  ;;  %v23941_v17 = vand.u32 4294901760, %v23940_v21  ;;  %v23948_v21 = vand.u32 4294901760, %v21994_v22 }
 0xa7b   : > { %17115 = vmatprep.subr.bf16.mxu0 %v23935_v23  ;;  %17211 = vmatprep.subr.bf16.mxu1 %v22203_v5  ;;  %23938 = vst [vmem:[#allocation34_spill] sm:$0xff] %v22236_v15 }
 0xa7c   : > { %v17142_v47 = vpack.c.bf16 %v23943_v35, %v23941_v17  ;;  %v23950_v35 = vand.u32 4294901760, %v21925_v4  ;;  %v23957_v4 = vld [vmem:[#allocation73_spill] sm:$0xff]  ;;  %v23959_v17 = vld [vmem:[#allocation75_spill] sm:$0xff] }
 0xa7d   : > { %15338 = vmatmul.mubr.f32.gmra.mrb[50].mxu0 %v21989_v45  ;;  %17213 = vmatpush3.bf16.msra.mxu1 %v22203_v5 }
 0xa7e   : > { %15340 = vmatprep.mubr.f32.mxu0 %v22020_v61  ;;  %17117 = vmatpush3.bf16.msra.mxu0 %v23935_v23  ;;  %v17150_v51 = vpack.c.bf16 %v23950_v35, %v23949_v52  ;;  %v23968_v52 = vand.u32 4294901760, %v22083_v36 }
 0xa7f   : > { %17119 = vmatprep.subr.bf16.mxu0 %v23937_v19  ;;  %17215 = vmatprep.subr.bf16.mxu1 %v22222_v3 }
 0xa81   : > { %15341 = vmatmul.mubr.f32.gmra.mrb[52].mxu0 %v22014_v62  ;;  %17217 = vmatpush3.bf16.msra.mxu1 %v22222_v3  ;;  %v23946_v3 = vand.u32 4294901760, %v21915_v53  ;;  %v23954_v53 = vand.u32 4294901760, %v21964_v59  ;;  %v23963_v59 = vld [vmem:[#allocation76_spill] sm:$0xff] }
 0xa82   : > { %15343 = vmatprep.mubr.f32.mxu0 %v22041_v46  ;;  %17121 = vmatpush3.bf16.msra.mxu0 %v23937_v19 }
 0xa83   : > { %17123 = vmatprep.subr.bf16.mxu0 %v23939_v13  ;;  %17219 = vmatprep.subr.bf16.mxu1 %v22236_v15  ;;  %v17154_v22 = vpack.c.bf16 %v23954_v53, %v23953_v0  ;;  %v23974_v0 = vand.u32 4294901760, %v22104_v29 }
 0xa85   : > { %15344 = vmatmul.mubr.f32.gmra.mrb[54].mxu0 %v22035_v14  ;;  %17221 = vmatpush3.bf16.msra.mxu1 %v22236_v15  ;;  %v23945_v15 = vand.u32 4294901760, %v21910_v20  ;;  %v23952_v20 = vand.u32 4294901760, %v22020_v61  ;;  %v23960_v61 = vand.u32 4294901760, %v23959_v17 }
 0xa86   : > { %15346 = vmatprep.mubr.f32.mxu0 %v22062_v43  ;;  %17125 = vmatpush3.bf16.msra.mxu0 %v23939_v13 }
 0xa87   : > { %17127 = vmatprep.subr.bf16.mxu0 %v21793_v57  ;;  %v17146_v5 = vpack.c.bf16 %v23946_v3, %v23945_v15 }
 0xa89   : > { %15347 = vmatmul.mubr.f32.gmra.mrb[56].mxu0 %v22055_v9 }
 0xa8a   : > { %15349 = vmatprep.mubr.f32.mxu0 %v22083_v36  ;;  %17129 = vmatpush3.bf16.msra.mxu0 %v21793_v57 }
 0xa8b   : > { %17131 = vmatprep.subr.bf16.mxu0 %v21797_v7 }
 0xa8d   : > { %15350 = vmatmul.mubr.f32.gmra.mrb[58].mxu0 %v22077_v12 }
 0xa8e   : > { %15352 = vmatprep.mubr.f32.mxu0 %v22104_v29  ;;  %17133 = vmatpush3.bf16.msra.mxu0 %v21797_v7  ;;  %v10045_v29 = vld [vmem:[#allocation2 + $0x2f8] sm:$0xff] }
 0xa8f   : > { %17135 = vmatprep.subr.bf16.mxu0 %v21801_v16 }
 0xa91   : > { %15353 = vmatmul.mubr.f32.gmra.mrb[60].mxu0 %v22097_v55 }
 0xa92   : > { %15355 = vmatprep.mubr.f32.mxu0 %v22124_v8  ;;  %17137 = vmatpush3.bf16.msra.mxu0 %v21801_v16 }
 0xa93   : > { %17139 = vmatprep.subr.bf16.mxu0 %v21817_v25 }
 0xa95   : > { %15356 = vmatmul.mubr.f32.gmra.mrb[62].mxu0 %v22117_v34 }
 0xa96   : > { %17141 = vmatpush3.bf16.msra.mxu0 %v21817_v25  ;;  %15390 = vmatprep.mubr.f32.mxu0 %v23944_v49  ;;  %v23951_v49 = vand.u32 4294901760, %v21989_v45  ;;  %v23958_v45 = vand.u32 4294901760, %v23957_v4  ;;  %v23980_v4 = vand.u32 4294901760, %v22124_v8 }
 0xa97   : > { %17143 = vmatprep.subr.bf16.mxu0 %v17142_v47 }
 0xa98   : > { %v17158_v3 = vpack.c.bf16 %v23960_v61, %v23958_v45 }
 0xa99   : > { %15391 = vmatmul.mubr.f32.vlgmr.msra.gmra.mrb[48].mxu0 %v23947_v40  ;;  %v23961_v40 = vand.u32 4294901760, %v22035_v14  ;;  %v23969_v14 = vld [vmem:[#allocation78_spill] sm:$0xff] }
 0xa9a   : > { %15393 = vmatprep.mubr.f32.mxu0 %v23948_v21  ;;  %17145 = vmatpush3.bf16.msra.mxu0 %v17142_v47  ;;  %v23955_v47 = vand.u32 4294901760, %v22014_v62  ;;  %v23964_v62 = vand.u32 4294901760, %v23963_v59  ;;  %v23967_v21 = vand.u32 4294901760, %v22055_v9  ;;  %v23970_v35 = vand.u32 4294901760, %v23969_v14  ;;  %v23975_v9 = vld [vmem:[#allocation14_spill] sm:$0xff] }
 0xa9b   : > { %17147 = vmatprep.subr.bf16.mxu0 %v17146_v5  ;;  %v23976_v53 = vand.u32 4294901760, %v23975_v9 }
 0xa9d   : > { %15394 = vmatmul.mubr.f32.gmra.mrb[50].mxu0 %v23951_v49 }
 0xa9e   : > { %15396 = vmatprep.mubr.f32.mxu0 %v23952_v20  ;;  %17149 = vmatpush3.bf16.msra.mxu0 %v17146_v5  ;;  %v23965_v5 = vld [vmem:[#allocation77_spill] sm:$0xff]  ;;  %v23973_v20 = vand.u32 4294901760, %v22077_v12  ;;  %v23981_v12 = vand.u32 4294901760, %v22117_v34 }
 0xa9f   : > { %17151 = vmatprep.subr.bf16.mxu0 %v17150_v51  ;;  %v23966_v46 = vand.u32 4294901760, %v23965_v5 }
 0xaa1   : > { %15397 = vmatmul.mubr.f32.gmra.mrb[52].mxu0 %v23955_v47  ;;  %v17162_v15 = vpack.c.bf16 %v23966_v46, %v23964_v62 }
 0xaa2   : > { %15399 = vmatprep.mubr.f32.mxu0 %v23956_v27  ;;  %17153 = vmatpush3.bf16.msra.mxu0 %v17150_v51  ;;  %v23971_v51 = vld [vmem:[#allocation21_spill] sm:$0xff]  ;;  %v23979_v27 = vand.u32 4294901760, %v22097_v55  ;;  %v23983_v55 = vand.u32 4294901760, %v22175_v44 }
 0xaa3   : > { %17155 = vmatprep.subr.bf16.mxu0 %v17154_v22  ;;  %v23972_v43 = vand.u32 4294901760, %v23971_v51 }
 0xaa5   : > { %15400 = vmatmul.mubr.f32.gmra.mrb[54].mxu0 %v23961_v40  ;;  %v17166_v49 = vpack.c.bf16 %v23972_v43, %v23970_v35 }
 0xaa6   : > { %15402 = vmatprep.mubr.f32.mxu0 %v23962_v38  ;;  %17157 = vmatpush3.bf16.msra.mxu0 %v17154_v22  ;;  %v23977_v22 = vld [vmem:[#allocation18_spill] sm:$0xff] }
 0xaa7   : > { %17159 = vmatprep.subr.bf16.mxu0 %v17158_v3  ;;  %v23978_v36 = vand.u32 4294901760, %v23977_v22 }
 0xaa9   : > { %15403 = vmatmul.mubr.f32.gmra.mrb[56].mxu0 %v23967_v21  ;;  %v17170_v47 = vpack.c.bf16 %v23978_v36, %v23976_v53 }
 0xaaa   : > { %15405 = vmatprep.mubr.f32.mxu0 %v23968_v52  ;;  %17161 = vmatpush3.bf16.msra.mxu0 %v17158_v3 }
 0xaab   : > { %17163 = vmatprep.subr.bf16.mxu0 %v17162_v15 }
 0xaad   : > { %15406 = vmatmul.mubr.f32.gmra.mrb[58].mxu0 %v23973_v20 }
 0xaae   : > { %15408 = vmatprep.mubr.f32.mxu0 %v23974_v0  ;;  %17165 = vmatpush3.bf16.msra.mxu0 %v17162_v15 }
 0xaaf   : > { %17167 = vmatprep.subr.bf16.mxu0 %v17166_v49 }
 0xab1   : > { %15409 = vmatmul.mubr.f32.gmra.mrb[60].mxu0 %v23979_v27 }
 0xab2   : > { %15411 = vmatprep.mubr.f32.mxu0 %v23980_v4  ;;  %17169 = vmatpush3.bf16.msra.mxu0 %v17166_v49 }
 0xab3   : > { %17171 = vmatprep.subr.bf16.mxu0 %v17170_v47 }
 0xab5   : > { %15412 = vmatmul.mubr.f32.gmra.mrb[62].mxu0 %v23981_v12 }
 0xab6   : > { %17173 = vmatpush3.bf16.msra.mxu0 %v17170_v47  ;;  %15446 = vmatprep.mubr.f32.mxu0 %v21966_v31 }
 0xab7   : > { %17175 = vmatprep.subr.bf16.mxu0 %v21615_v2 }
 0xab9   : > { %15447 = vmatmul.mubr.f32.vlgmr.msra.gmra.mrb[48].mxu0 %v21958_v28 }
 0xaba   : > { %15449 = vmatprep.mubr.f32.mxu0 %v21981_v32  ;;  %17177 = vmatpush3.bf16.msra.mxu0 %v21615_v2  ;;  %v10038_v2 = vld [vmem:[#allocation2 + $0x2c0] sm:$0xff] }
 0xabb   : > { %17179 = vmatprep.subr.bf16.mxu0 %v23935_v23 }
 0xabd   : > { %15450 = vmatmul.mubr.f32.gmra.mrb[50].mxu0 %v21977_v37 }
 0xabe   : > { %15452 = vmatprep.mubr.f32.mxu0 %v22009_v33  ;;  %17181 = vmatpush3.bf16.msra.mxu0 %v23935_v23 }
 0xabf   : > { %17183 = vmatprep.subr.bf16.mxu0 %v23937_v19 }
 0xac1   : > { %15453 = vmatmul.mubr.f32.gmra.mrb[52].mxu0 %v22002_v18 }
 0xac2   : > { %15455 = vmatprep.mubr.f32.mxu0 %v22029_v50  ;;  %17185 = vmatpush3.bf16.msra.mxu0 %v23937_v19 }
 0xac3   : > { %17187 = vmatprep.subr.bf16.mxu0 %v23939_v13 }
 0xac5   : > { %15456 = vmatmul.mubr.f32.gmra.mrb[54].mxu0 %v22025_v39 }
 0xac6   : > { %15458 = vmatprep.mubr.f32.mxu0 %v22050_v11  ;;  %17189 = vmatpush3.bf16.msra.mxu0 %v23939_v13 }
 0xac7   : > { %17191 = vmatprep.subr.bf16.mxu0 %v21793_v57 }
 0xac9   : > { %15459 = vmatmul.mubr.f32.gmra.mrb[56].mxu0 %v22046_v1 }
 0xaca   : > { %15461 = vmatprep.mubr.f32.mxu0 %v22071_v54  ;;  %17193 = vmatpush3.bf16.msra.mxu0 %v21793_v57  ;;  %v10039_v57 = vld [vmem:[#allocation2 + $0x2c8] sm:$0xff] }
 0xacb   : > { %17195 = vmatprep.subr.bf16.mxu0 %v21797_v7 }
 0xacd   : > { %15462 = vmatmul.mubr.f32.gmra.mrb[58].mxu0 %v22067_v58 }
 0xace   : > { %15464 = vmatprep.mubr.f32.mxu0 %v22092_v6  ;;  %17197 = vmatpush3.bf16.msra.mxu0 %v21797_v7  ;;  %v10075_v7 = vand.u32 4294901760, %v10038_v2 }
 0xacf   : > { %17199 = vmatprep.subr.bf16.mxu0 %v21801_v16 }
 0xad0   : > { %v22411_v17 = vsub.f32 %v10038_v2, %v10075_v7 }
 0xad1   : > { %15465 = vmatmul.mubr.f32.gmra.mrb[60].mxu0 %v22088_v60 }
 0xad2   : > { %15467 = vmatprep.mubr.f32.mxu0 %v22112_v41  ;;  %17201 = vmatpush3.bf16.msra.mxu0 %v21801_v16  ;;  %v10078_v16 = vand.u32 4294901760, %v10039_v57  ;;  %23985 = vst [vmem:[#allocation41_spill] sm:$0xff] %v22411_v17  ;;  %v23423_v3 = vand.u32 4294901760, %v22411_v17 }
 0xad3   : > { %17203 = vmatprep.subr.bf16.mxu0 %v21817_v25 }
 0xad4   : > { %v22413_v61 = vsub.f32 %v10039_v57, %v10078_v16  ;;  %v10351_v38 = vsub.f32 %v22411_v17, %v23423_v3 }
 0xad5   : > { %15468 = vmatmul.mubr.f32.gmra.mrb[62].mxu0 %v22109_v48 }
 0xad6   : > { %17205 = vmatpush3.bf16.msra.mxu0 %v21817_v25  ;;  %15502 = vmatprep.mubr.f32.mxu0 %v21966_v31  ;;  %v22374_v25 = vpack.c.bf16 %v10078_v16, %v10075_v7  ;;  %v10042_v31 = vld [vmem:[#allocation2 + $0x2e0] sm:$0xff]  ;;  %23986 = vst [vmem:[#allocation43_spill] sm:$0xff] %v22413_v61  ;;  %v23422_v40 = vand.u32 4294901760, %v22413_v61  ;;  %v10352_v46 = vand.u32 4294901760, %v10351_v38  ;;  %v23997_v38 = vand.u32 4294901760, %v22188_v42 }
 0xad8   : > { %17223 = vmatprep.subr.bf16.mxu1 %v22374_v25  ;;  %v10358_v5 = vsub.f32 %v22413_v61, %v23422_v40 }
 0xad9   : > { %15503 = vmatmul.mubr.f32.vlgmr.msra.gmra.mrb[48].mxu0 %v21958_v28  ;;  %17225 = vmatpush3.bf16.msra.mxu1 %v22374_v25 }
 0xada   : > { %15505 = vmatprep.mubr.f32.mxu0 %v21981_v32  ;;  %v10043_v32 = vld [vmem:[#allocation2 + $0x2e8] sm:$0xff]  ;;  %v10359_v52 = vand.u32 4294901760, %v10358_v5  ;;  %v22506_v5 = vsub.f32 %v22188_v42, %v23997_v38  ;;  %v24000_v38 = vand.u32 4294901760, %v22211_v63 }
 0xadc   : > { %v22439_v49 = vpack.c.bf16 %v10359_v52, %v10352_v46  ;;  %v23998_v46 = vld [vmem:[#allocation25_spill] sm:$0xff] }
 0xadd   : > { %15506 = vmatmul.mubr.f32.gmra.mrb[50].mxu0 %v21977_v37  ;;  %v10040_v37 = vld [vmem:[#allocation2 + $0x2d0] sm:$0xff] }
 0xade   : > { %15508 = vmatprep.mubr.f32.mxu0 %v22009_v33  ;;  %v10090_v33 = vand.u32 4294901760, %v10043_v32 }
 0xae0   : > { %v22437_v43 = vsub.f32 %v10043_v32, %v10090_v33 }
 0xae1   : > { %15509 = vmatmul.mubr.f32.gmra.mrb[52].mxu0 %v22002_v18  ;;  %v10087_v18 = vand.u32 4294901760, %v10042_v31 }
 0xae2   : > { %15511 = vmatprep.mubr.f32.mxu0 %v22029_v50  ;;  %v10041_v50 = vld [vmem:[#allocation2 + $0x2d8] sm:$0xff]  ;;  %23990 = vst [vmem:[#allocation60_spill] sm:$0xff] %v22437_v43  ;;  %v23418_v53 = vand.u32 4294901760, %v22437_v43 }
 0xae3   : > { %v10084_v28 = vand.u32 4294901760, %v10041_v50  ;;  %v22435_v51 = vsub.f32 %v10042_v31, %v10087_v18 }
 0xae4   : > { %v10386_v47 = vsub.f32 %v22437_v43, %v23418_v53 }
 0xae5   : > { %15512 = vmatmul.mubr.f32.gmra.mrb[54].mxu0 %v22025_v39  ;;  %v22382_v39 = vpack.c.bf16 %v10090_v33, %v10087_v18  ;;  %v22422_v62 = vsub.f32 %v10041_v50, %v10084_v28  ;;  %23989 = vst [vmem:[#allocation57_spill] sm:$0xff] %v22435_v51  ;;  %v23419_v9 = vand.u32 4294901760, %v22435_v51  ;;  %v22473_v18 = vpack.c.bf16 %v22413_v61, %v22411_v17 }
 0xae6   : > { %15514 = vmatprep.mubr.f32.mxu0 %v22050_v11  ;;  %v10081_v11 = vand.u32 4294901760, %v10040_v37  ;;  %v10387_v2 = vand.u32 4294901760, %v10386_v47 }
 0xae7   : > { %23988 = vst [vmem:[#allocation52_spill] sm:$0xff] %v22422_v62  ;;  %v23420_v21 = vand.u32 4294901760, %v22422_v62  ;;  %v10379_v36 = vsub.f32 %v22435_v51, %v23419_v9 }
 0xae8   : > { %v22420_v59 = vsub.f32 %v10040_v37, %v10081_v11 }
 0xae9   : > { %15515 = vmatmul.mubr.f32.gmra.mrb[56].mxu0 %v22046_v1  ;;  %v23982_v1 = vand.u32 4294901760, %v22173_v10  ;;  %v10372_v35 = vsub.f32 %v22422_v62, %v23420_v21  ;;  %v10380_v12 = vand.u32 4294901760, %v10379_v36 }
 0xaea   : > { %15517 = vmatprep.mubr.f32.mxu0 %v22071_v54  ;;  %v22392_v54 = vsub.f32 %v22175_v44, %v23983_v55  ;;  %23987 = vst [vmem:[#allocation48_spill] sm:$0xff] %v22420_v59  ;;  %v23421_v15 = vand.u32 4294901760, %v22420_v59  ;;  %v22477_v33 = vpack.c.bf16 %v22422_v62, %v22420_v59 }
 0xaeb   : > { %v10373_v0 = vand.u32 4294901760, %v10372_v35  ;;  %v22457_v16 = vpack.c.bf16 %v10387_v2, %v10380_v12  ;;  %v23424_v35 = vand.u32 4294901760, %v22506_v5 }
 0xaec   : > { %23984 = vst [vmem:[#allocation37_spill] sm:$0xff] %v22392_v54  ;;  %v23432_v8 = vand.u32 4294901760, %v22392_v54  ;;  %v10365_v14 = vsub.f32 %v22420_v59, %v23421_v15 }
 0xaed   : > { %15518 = vmatmul.mubr.f32.gmra.mrb[58].mxu0 %v22067_v58  ;;  %v22387_v58 = vsub.f32 %v22173_v10, %v23982_v1  ;;  %v22481_v1 = vpack.c.bf16 %v22437_v43, %v22435_v51 }
 0xaee   : > { %15520 = vmatprep.mubr.f32.mxu0 %v22092_v6  ;;  %v22378_v6 = vpack.c.bf16 %v10084_v28, %v10081_v11  ;;  %v10302_v44 = vsub.f32 %v22392_v54, %v23432_v8  ;;  %v10366_v20 = vand.u32 4294901760, %v10365_v14 }
 0xaef   : > { %v23433_v34 = vand.u32 4294901760, %v22387_v58  ;;  %v22467_v28 = vpack.c.bf16 %v22392_v54, %v22387_v58 }
 0xaf0   : > { %17227 = vmatprep.subr.bf16.mxu1 %v22378_v6  ;;  %v10303_v13 = vand.u32 4294901760, %v10302_v44  ;;  %v22443_v22 = vpack.c.bf16 %v10373_v0, %v10366_v20 }
 0xaf1   : > { %15521 = vmatmul.mubr.f32.gmra.mrb[60].mxu0 %v22088_v60  ;;  %17229 = vmatpush3.bf16.msra.mxu1 %v22378_v6  ;;  %v10044_v60 = vld [vmem:[#allocation2 + $0x2f0] sm:$0xff]  ;;  %v10295_v10 = vsub.f32 %v22387_v58, %v23433_v34 }
 0xaf2   : > { %15523 = vmatprep.mubr.f32.mxu0 %v22112_v41  ;;  %17231 = vmatprep.subr.bf16.mxu1 %v22382_v39  ;;  %v10096_v41 = vand.u32 4294901760, %v10045_v29 }
 0xaf3   : > { %v10296_v23 = vand.u32 4294901760, %v10295_v10  ;;  %v23995_v10 = vand.u32 4294901760, %v22183_v56 }
 0xaf4   : > { %v22453_v4 = vsub.f32 %v10045_v29, %v10096_v41 }
 0xaf5   : > { %15524 = vmatmul.mubr.f32.gmra.mrb[62].mxu0 %v22109_v48  ;;  %v10093_v48 = vand.u32 4294901760, %v10044_v60  ;;  %17233 = vmatpush3.bf16.msra.mxu1 %v22382_v39  ;;  %v22408_v45 = vpack.c.bf16 %v10303_v13, %v10296_v23  ;;  %v22496_v44 = vsub.f32 %v22183_v56, %v23995_v10  ;;  %v23996_v23 = vand.u32 4294901760, %v22186_v30 }
 0xaf6   : > { %23992 = vst [vmem:[#allocation11_spill] sm:$0xff] %v22453_v4  ;;  %v23416_v7 = vand.u32 4294901760, %v22453_v4 }
 0xaf7   : > { %v22398_v19 = vpack.c.bf16 %v10096_v41, %v10093_v48  ;;  %v22451_v27 = vsub.f32 %v10044_v60, %v10093_v48  ;;  %v23993_v60 = vld [vmem:[#allocation20_spill] sm:$0xff]  ;;  %v23994_v48 = vand.u32 4294901760, %v22177_v26  ;;  %v22501_v13 = vsub.f32 %v22186_v30, %v23996_v23 }
 0xaf8   : > { %v10400_v50 = vsub.f32 %v22453_v4, %v23416_v7  ;;  %v8725_v29 = vsub.s32 4, %v23993_v60  ;;  %v23427_v14 = vand.u32 4294901760, %v22496_v44 }
 0xaf9   : > { %17235 = vmatprep.subr.bf16.mxu1 %v22398_v19  ;;  %23991 = vst [vmem:[#allocation64_spill] sm:$0xff] %v22451_v27  ;;  %v23417_v57 = vand.u32 4294901760, %v22451_v27  ;;  %v22485_v55 = vpack.c.bf16 %v22453_v4, %v22451_v27  ;;  %v22491_v41 = vsub.f32 %v22177_v26, %v23994_v48  ;;  %v23425_v56 = vand.u32 4294901760, %v22501_v13 }
 0xafa   : > { %17237 = vmatpush3.bf16.msra.mxu1 %v22398_v19  ;;  %v10401_v31 = vand.u32 4294901760, %v10400_v50  ;;  %v22509_v52 = vrot.slane %v23998_v46, %v8725_v29  ;;  %v10316_v47 = vsub.f32 %v22496_v44, %v23427_v14  ;;  %v22540_v46 = vsub.f32 %v22211_v63, %v24000_v38 }
 0xafb   : > { %17239 = vmatprep.subr.bf16.mxu1 %v22408_v45  ;;  %v10393_v37 = vsub.f32 %v22451_v27, %v23417_v57  ;;  %v23429_v26 = vand.u32 4294901760, %v22491_v41  ;;  %v10323_v2 = vsub.f32 %v22501_v13, %v23425_v56 }
 0xafd   : > { %v10394_v11 = vand.u32 4294901760, %v10393_v37  ;;  %v10309_v42 = vsub.f32 %v22491_v41, %v23429_v26  ;;  %v10330_v37 = vsub.f32 %v22506_v5, %v23424_v35 }
 0xaff   : > { %v22469_v32 = vpack.c.bf16 %v10401_v31, %v10394_v11  ;;  %v23999_v31 = vand.u32 4294901760, %v22209_v24  ;;  %v10331_v57 = vand.u32 4294901760, %v10330_v37 }
 0xb01   : > { %v22532_v29 = vsub.f32 %v22209_v24, %v23999_v31  ;;  %v10324_v31 = vand.u32 4294901760, %v10323_v2 }
 0xb03   : > { %v23428_v63 = vand.u32 4294901760, %v22532_v29  ;;  %v22567_v40 = vpack.c.bf16 %v10331_v57, %v10324_v31 }
 0xbac   : > { %v15504_v20 = vpop.f32.mrb[48].mxu0 }
 0xbad   : > { %v17462_v30 = vadd.f32 %v15504_v20, %v22509_v52  ;;  %v9919_v0 = vpop.f32.mrb[49].mxu0 }
 0xbae   : > { %v17463_v36 = vadd.f32 %v9919_v0, %v22509_v52  ;;  %v10310_v0 = vand.u32 4294901760, %v10309_v42 }
 0xbaf   : > { %v10014_v12 = vmax.f32 %v17462_v30, 0.0 }
 0xbb0   : > { %v10013_v50 = vmax.f32 %v17463_v36, 0.0  ;;  %v15507_v11 = vpop.f32.mrb[50].mxu0  ;;  %v10317_v36 = vand.u32 4294901760, %v10316_v47 }
 0xbb1   : > { %v22534_v48 = vand.u32 4294901760, %v10014_v12  ;;  %v17464_v10 = vadd.f32 %v15507_v11, %v22509_v52  ;;  %v9931_v23 = vpop.f32.mrb[51].mxu0 }
 0xbb2   : > { %v22542_v20 = vand.u32 4294901760, %v10013_v50  ;;  %v17465_v30 = vadd.f32 %v9931_v23, %v22509_v52 }
 0xbb3   : > { %v22546_v7 = vsub.f32 %v10014_v12, %v22534_v48  ;;  %v10016_v24 = vmax.f32 %v17464_v10, 0.0  ;;  %v23431_v12 = vand.u32 4294901760, %v22540_v46 }
 0xbb4   : > { %v22549_v11 = vsub.f32 %v10013_v50, %v22542_v20  ;;  %v10015_v53 = vmax.f32 %v17465_v30, 0.0  ;;  %v15510_v9 = vpop.f32.mrb[52].mxu0  ;;  %v17242_v50 = vpack.c.bf16 %v10317_v36, %v10310_v0  ;;  %v10337_v0 = vsub.f32 %v22532_v29, %v23428_v63 }
 0xbb5   : > { %v23426_v38 = vand.u32 4294901760, %v22546_v7  ;;  %v22553_v21 = vand.u32 4294901760, %v10016_v24  ;;  %v17466_v42 = vadd.f32 %v15510_v9, %v22509_v52  ;;  %v9943_v47 = vpop.f32.mrb[53].mxu0 }
 0xbb6   : > { %v22557_v23 = vand.u32 4294901760, %v10015_v53  ;;  %v17467_v2 = vadd.f32 %v9943_v47, %v22509_v52  ;;  %v23430_v37 = vand.u32 4294901760, %v22549_v11 }
 0xbb7   : > { %v10144_v10 = vsub.f32 %v22546_v7, %v23426_v38  ;;  %v22565_v30 = vsub.f32 %v10016_v24, %v22553_v21  ;;  %v10018_v15 = vmax.f32 %v17466_v42, 0.0 }
 0xbb8   : > { %v22570_v9 = vsub.f32 %v10015_v53, %v22557_v23  ;;  %v10017_v3 = vmax.f32 %v17467_v2, 0.0  ;;  %v15513_v35 = vpop.f32.mrb[54].mxu0  ;;  %v10134_v47 = vsub.f32 %v22549_v11, %v23430_v37  ;;  %v10344_v53 = vsub.f32 %v22540_v46, %v23431_v12 }
 0xbb9   : > { %v22578_v36 = vand.u32 4294901760, %v10018_v15  ;;  %v17468_v24 = vadd.f32 %v15513_v35, %v22509_v52  ;;  %v9955_v42 = vpop.f32.mrb[55].mxu0  ;;  %v23434_v57 = vand.u32 4294901760, %v22565_v30  ;;  %v10145_v14 = vand.u32 4294901760, %v10144_v10 }
 0xbba   : > { %v22585_v31 = vand.u32 4294901760, %v10017_v3  ;;  %v17469_v2 = vadd.f32 %v9955_v42, %v22509_v52  ;;  %v10135_v56 = vand.u32 4294901760, %v10134_v47  ;;  %v23435_v38 = vand.u32 4294901760, %v22570_v9 }
 0xbbb   : > { %v22590_v63 = vsub.f32 %v10018_v15, %v22578_v36  ;;  %v10020_v26 = vmax.f32 %v17468_v24, 0.0  ;;  %v10164_v35 = vsub.f32 %v22565_v30, %v23434_v57  ;;  %v10338_v42 = vand.u32 4294901760, %v10337_v0 }
 0xbbc   : > { %v22596_v37 = vsub.f32 %v10017_v3, %v22585_v31  ;;  %v10019_v12 = vmax.f32 %v17469_v2, 0.0  ;;  %v15516_v8 = vpop.f32.mrb[56].mxu0  ;;  %15558 = vmatprep.mubr.f32.mxu1 %v10135_v56  ;;  %v10154_v47 = vsub.f32 %v22570_v9, %v23435_v38  ;;  %v10345_v57 = vand.u32 4294901760, %v10344_v53 }
 0xbbd   : > { %v22601_v10 = vand.u32 4294901760, %v10020_v26  ;;  %v17470_v15 = vadd.f32 %v15516_v8, %v22509_v52  ;;  %v9967_v24 = vpop.f32.mrb[57].mxu0  ;;  %15559 = vmatmul.mubr.f32.vlgmr.msra.gmra.mrb[48].mxu1 %v10145_v14  ;;  %v23438_v34 = vand.u32 4294901760, %v22590_v63  ;;  %v10165_v4 = vand.u32 4294901760, %v10164_v35 }
 0xbbe   : > { %v22605_v60 = vand.u32 4294901760, %v10019_v12  ;;  %v17471_v3 = vadd.f32 %v9967_v24, %v22509_v52  ;;  %17241 = vmatpush3.bf16.msra.mxu1 %v22408_v45  ;;  %v10155_v56 = vand.u32 4294901760, %v10154_v47  ;;  %v23440_v2 = vand.u32 4294901760, %v22596_v37 }
 0xbbf   : > { %v22611_v0 = vsub.f32 %v10020_v26, %v22601_v10  ;;  %v10022_v38 = vmax.f32 %v17470_v15, 0.0  ;;  %17243 = vmatprep.subr.bf16.mxu1 %v17242_v50  ;;  %v10184_v8 = vsub.f32 %v22590_v63, %v23438_v34  ;;  %v17250_v27 = vpack.c.bf16 %v10345_v57, %v10338_v42 }
 0xbc0   : > { %v22617_v14 = vsub.f32 %v10019_v12, %v22605_v60  ;;  %v10021_v53 = vmax.f32 %v17471_v3, 0.0  ;;  %v15519_v24 = vpop.f32.mrb[58].mxu0  ;;  %15561 = vmatprep.mubr.f32.mxu1 %v10155_v56  ;;  %v10174_v45 = vsub.f32 %v22596_v37, %v23440_v2 }
 0xbc1   : > { %v22622_v47 = vand.u32 4294901760, %v10022_v38  ;;  %v17472_v26 = vadd.f32 %v15519_v24, %v22509_v52  ;;  %v9979_v35 = vpop.f32.mrb[59].mxu0  ;;  %15562 = vmatmul.mubr.f32.gmra.mrb[50].mxu1 %v10165_v4  ;;  %v23442_v15 = vand.u32 4294901760, %v22611_v0  ;;  %v10185_v51 = vand.u32 4294901760, %v10184_v8 }
 0xbc2   : > { %v22626_v34 = vand.u32 4294901760, %v10021_v53  ;;  %v17473_v12 = vadd.f32 %v9979_v35, %v22509_v52  ;;  %17245 = vmatpush3.bf16.msra.mxu1 %v17242_v50  ;;  %v10175_v3 = vand.u32 4294901760, %v10174_v45  ;;  %v23443_v56 = vand.u32 4294901760, %v22617_v14 }
 0xbc3   : > { %v22631_v43 = vsub.f32 %v10022_v38, %v22622_v47  ;;  %v10024_v2 = vmax.f32 %v17472_v26, 0.0  ;;  %17247 = vmatprep.subr.bf16.mxu1 %v22567_v40  ;;  %v10204_v4 = vsub.f32 %v22611_v0, %v23442_v15 }
 0xbc4   : > { %v22638_v57 = vsub.f32 %v10021_v53, %v22626_v34  ;;  %v10023_v42 = vmax.f32 %v17473_v12, 0.0  ;;  %v15522_v24 = vpop.f32.mrb[60].mxu0  ;;  %15564 = vmatprep.mubr.f32.mxu1 %v10175_v3  ;;  %v10194_v50 = vsub.f32 %v22617_v14, %v23443_v56 }
 0xbc5   : > { %v22643_v38 = vand.u32 4294901760, %v10024_v2  ;;  %v17474_v8 = vadd.f32 %v15522_v24, %v22509_v52  ;;  %v9991_v45 = vpop.f32.mrb[61].mxu0  ;;  %15565 = vmatmul.mubr.f32.gmra.mrb[52].mxu1 %v10185_v51  ;;  %v23447_v26 = vand.u32 4294901760, %v22631_v43  ;;  %v10205_v62 = vand.u32 4294901760, %v10204_v4 }
 0xbc6   : > { %v22647_v35 = vand.u32 4294901760, %v10023_v42  ;;  %v17475_v53 = vadd.f32 %v9991_v45, %v22509_v52  ;;  %17249 = vmatpush3.bf16.msra.mxu1 %v22567_v40  ;;  %v10195_v12 = vand.u32 4294901760, %v10194_v50  ;;  %v23448_v3 = vand.u32 4294901760, %v22638_v57 }
 0xbc7   : > { %v22653_v15 = vsub.f32 %v10024_v2, %v22643_v38  ;;  %v10026_v56 = vmax.f32 %v17474_v8, 0.0  ;;  %17251 = vmatprep.subr.bf16.mxu1 %v17250_v27  ;;  %v10224_v51 = vsub.f32 %v22631_v43, %v23447_v26 }
 0xbc8   : > { %v22659_v24 = vsub.f32 %v10023_v42, %v22647_v35  ;;  %v10025_v59 = vmax.f32 %v17475_v53, 0.0  ;;  %v15525_v45 = vpop.f32.mrb[62].mxu0  ;;  %15567 = vmatprep.mubr.f32.mxu1 %v10195_v12  ;;  %v10214_v40 = vsub.f32 %v22638_v57, %v23448_v3 }
 0xbc9   : > { %v22664_v50 = vand.u32 4294901760, %v10026_v56  ;;  %v17476_v2 = vadd.f32 %v15525_v45, %v22509_v52  ;;  %v10003_v4 = vpop.f32.mrb[63].mxu0  ;;  %15568 = vmatmul.mubr.f32.gmra.mrb[54].mxu1 %v10205_v62  ;;  %v10243_v8 = vand.u32 4294901760, %v22653_v15  ;;  %v10225_v17 = vand.u32 4294901760, %v10224_v51 }
 0xbca   : > { %v22668_v61 = vand.u32 4294901760, %v10025_v59  ;;  %v17477_v42 = vadd.f32 %v10003_v4, %v22509_v52  ;;  %17253 = vmatpush3.bf16.msra.mxu1 %v17250_v27  ;;  %v10215_v53 = vand.u32 4294901760, %v10214_v40  ;;  %v10233_v12 = vand.u32 4294901760, %v22659_v24 }
 0xbcb   : > { %v22673_v26 = vsub.f32 %v10026_v56, %v22664_v50  ;;  %v10028_v3 = vmax.f32 %v17476_v2, 0.0  ;;  %17255 = vmatprep.subr.bf16.mxu1 %v22439_v49  ;;  %v10244_v62 = vsub.f32 %v22653_v15, %v10243_v8 }
 0xbcc   : > { %v22680_v45 = vsub.f32 %v10025_v59, %v22668_v61  ;;  %v10027_v54 = vmax.f32 %v17477_v42, 0.0  ;;  %15570 = vmatprep.mubr.f32.mxu1 %v10215_v53  ;;  %v10234_v27 = vsub.f32 %v22659_v24, %v10233_v12 }
 0xbcd   : > { %v22685_v52 = vand.u32 4294901760, %v10028_v3  ;;  %15571 = vmatmul.mubr.f32.gmra.mrb[56].mxu1 %v10225_v17  ;;  %v10263_v56 = vand.u32 4294901760, %v22673_v26  ;;  %v10245_v4 = vand.u32 4294901760, %v10244_v62 }
 0xbce   : > { %v22688_v51 = vand.u32 4294901760, %v10027_v54  ;;  %17257 = vmatpush3.bf16.msra.mxu1 %v22439_v49  ;;  %v10235_v40 = vand.u32 4294901760, %v10234_v27  ;;  %v10253_v2 = vand.u32 4294901760, %v22680_v45 }
 0xbcf   : > { %v22693_v59 = vsub.f32 %v10028_v3, %v22685_v52  ;;  %17259 = vmatprep.subr.bf16.mxu1 %v22443_v22  ;;  %v10264_v42 = vsub.f32 %v22673_v26, %v10263_v56 }
 0xbd0   : > { %v22700_v17 = vsub.f32 %v10027_v54, %v22688_v51  ;;  %15573 = vmatprep.mubr.f32.mxu1 %v10235_v40  ;;  %v10254_v49 = vsub.f32 %v22680_v45, %v10253_v2 }
 0xbd1   : > { %15574 = vmatmul.mubr.f32.gmra.mrb[58].mxu1 %v10245_v4  ;;  %v10283_v53 = vand.u32 4294901760, %v22693_v59  ;;  %v10265_v27 = vand.u32 4294901760, %v10264_v42  ;;  %v17274_v42 = vpack.c.bf16 %v22496_v44, %v22491_v41 }
 0xbd2   : > { %17261 = vmatpush3.bf16.msra.mxu1 %v22443_v22  ;;  %v10255_v3 = vand.u32 4294901760, %v10254_v49  ;;  %v10273_v62 = vand.u32 4294901760, %v22700_v17  ;;  %v24006_v49 = vld [vmem:[#allocation37_spill] sm:$0xff] }
 0xbd3   : > { %17263 = vmatprep.subr.bf16.mxu1 %v22457_v16  ;;  %v10284_v54 = vsub.f32 %v22693_v59, %v10283_v53 }
 0xbd4   : > { %15576 = vmatprep.mubr.f32.mxu1 %v10255_v3  ;;  %v10274_v40 = vsub.f32 %v22700_v17, %v10273_v62  ;;  %v24007_v3 = vand.u32 4294901760, %v24006_v49  ;;  %v24019_v49 = vand.u32 4294901760, %v22590_v63 }
 0xbd5   : > { %15577 = vmatmul.mubr.f32.gmra.mrb[60].mxu1 %v10265_v27  ;;  %v10285_v22 = vand.u32 4294901760, %v10284_v54  ;;  %v24008_v54 = vand.u32 4294901760, %v22549_v11 }
 0xbd6   : > { %17265 = vmatpush3.bf16.msra.mxu1 %v22457_v16  ;;  %v10275_v4 = vand.u32 4294901760, %v10274_v40  ;;  %v17278_v16 = vpack.c.bf16 %v22506_v5, %v22501_v13  ;;  %v24009_v40 = vand.u32 4294901760, %v22491_v41  ;;  %v24016_v41 = vand.u32 4294901760, %v22596_v37 }
 0xbd7   : > { %17267 = vmatprep.subr.bf16.mxu1 %v22469_v32 }
 0xbd8   : > { %15579 = vmatprep.mubr.f32.mxu1 %v10275_v4  ;;  %v24010_v4 = vand.u32 4294901760, %v22496_v44  ;;  %v24018_v44 = vand.u32 4294901760, %v22540_v46 }
 0xbd9   : > { %15580 = vmatmul.mubr.f32.gmra.mrb[62].mxu1 %v10285_v22 }
 0xbda   : > { %17269 = vmatpush3.bf16.msra.mxu1 %v22469_v32  ;;  %15614 = vmatprep.mubr.f32.mxu1 %v22542_v20  ;;  %v17282_v32 = vpack.c.bf16 %v22540_v46, %v22532_v29  ;;  %v17338_v22 = vpack.c.bf16 %v24010_v4, %v24009_v40  ;;  %v24027_v46 = vld [vmem:[#allocation48_spill] sm:$0xff] }
 0xbdb   : > { %17271 = vmatprep.subr.bf16.mxu1 %v22467_v28  ;;  %v24029_v40 = vld [vmem:[#allocation52_spill] sm:$0xff] }
 0xbdd   : > { %15615 = vmatmul.mubr.f32.vlgmr.msra.gmra.mrb[48].mxu1 %v22534_v48 }
 0xbde   : > { %15617 = vmatprep.mubr.f32.mxu1 %v22557_v23  ;;  %17273 = vmatpush3.bf16.msra.mxu1 %v22467_v28  ;;  %v24001_v28 = vld [vmem:[#allocation5_spill] sm:$0xff] }
 0xbdf   : > { %17275 = vmatprep.subr.bf16.mxu1 %v17274_v42 }
 0xbe1   : > { %15618 = vmatmul.mubr.f32.gmra.mrb[50].mxu1 %v22553_v21 }
 0xbe2   : > { %15620 = vmatprep.mubr.f32.mxu1 %v22585_v31  ;;  %17277 = vmatpush3.bf16.msra.mxu1 %v17274_v42  ;;  %v24011_v42 = vand.u32 4294901760, %v22546_v7 }
 0xbe3   : > { %17279 = vmatprep.subr.bf16.mxu1 %v17278_v16 }
 0xbe5   : > { %15621 = vmatmul.mubr.f32.gmra.mrb[52].mxu1 %v22578_v36 }
 0xbe6   : > { %15623 = vmatprep.mubr.f32.mxu1 %v22605_v60  ;;  %17281 = vmatpush3.bf16.msra.mxu1 %v17278_v16  ;;  %v24013_v16 = vand.u32 4294901760, %v22501_v13  ;;  %v24020_v13 = vand.u32 4294901760, %v22617_v14 }
 0xbe7   : > { %17283 = vmatprep.subr.bf16.mxu1 %v17282_v32 }
 0xbe9   : > { %15624 = vmatmul.mubr.f32.gmra.mrb[54].mxu1 %v22601_v10 }
 0xbea   : > { %15626 = vmatprep.mubr.f32.mxu1 %v22626_v34  ;;  %17285 = vmatpush3.bf16.msra.mxu1 %v17282_v32  ;;  %v24014_v32 = vand.u32 4294901760, %v22506_v5  ;;  %v24021_v5 = vld [vmem:[#allocation41_spill] sm:$0xff] }
 0xbeb   : > { %17287 = vmatprep.subr.bf16.mxu1 %v22473_v18 }
 0xbed   : > { %15627 = vmatmul.mubr.f32.gmra.mrb[56].mxu1 %v22622_v47 }
 0xbee   : > { %15629 = vmatprep.mubr.f32.mxu1 %v22647_v35  ;;  %17289 = vmatpush3.bf16.msra.mxu1 %v22473_v18  ;;  %v24002_v18 = vld [vmem:[#allocation13_spill] sm:$0xff] }
 0xbef   : > { %17291 = vmatprep.subr.bf16.mxu1 %v22477_v33 }
 0xbf1   : > { %15630 = vmatmul.mubr.f32.gmra.mrb[58].mxu1 %v22643_v38 }
 0xbf2   : > { %15632 = vmatprep.mubr.f32.mxu1 %v22668_v61  ;;  %17293 = vmatpush3.bf16.msra.mxu1 %v22477_v33  ;;  %v24003_v33 = vld [vmem:[#allocation31_spill] sm:$0xff] }
 0xbf3   : > { %17295 = vmatprep.subr.bf16.mxu1 %v22481_v1 }
 0xbf5   : > { %15633 = vmatmul.mubr.f32.gmra.mrb[60].mxu1 %v22664_v50 }
 0xbf6   : > { %15635 = vmatprep.mubr.f32.mxu1 %v22688_v51  ;;  %17297 = vmatpush3.bf16.msra.mxu1 %v22481_v1  ;;  %v24004_v1 = vld [vmem:[#allocation34_spill] sm:$0xff] }
 0xbf7   : > { %17299 = vmatprep.subr.bf16.mxu1 %v22485_v55 }
 0xbf9   : > { %15636 = vmatmul.mubr.f32.gmra.mrb[62].mxu1 %v22685_v52 }
 0xbfa   : > { %17301 = vmatpush3.bf16.msra.mxu1 %v22485_v55  ;;  %15670 = vmatprep.mubr.f32.mxu1 %v22549_v11  ;;  %v24005_v55 = vand.u32 4294901760, %v22387_v58  ;;  %v24012_v58 = vand.u32 4294901760, %v22570_v9  ;;  %v17342_v11 = vpack.c.bf16 %v24014_v32, %v24013_v16 }
 0xbfb   : > { %17303 = vmatprep.subr.bf16.mxu1 %v24001_v28 }
 0xbfc   : > { %v17334_v27 = vpack.c.bf16 %v24007_v3, %v24005_v55  ;;  %v24015_v55 = vand.u32 4294901760, %v22565_v30  ;;  %v24023_v3 = vld [vmem:[#allocation43_spill] sm:$0xff] }
 0xbfd   : > { %15671 = vmatmul.mubr.f32.vlgmr.msra.gmra.mrb[48].mxu1 %v22546_v7  ;;  %v24017_v7 = vand.u32 4294901760, %v22532_v29  ;;  %v24026_v29 = vand.u32 4294901760, %v22638_v57 }
 0xbfe   : > { %15673 = vmatprep.mubr.f32.mxu1 %v22570_v9  ;;  %17305 = vmatpush3.bf16.msra.mxu1 %v24001_v28 }
 0xbff   : > { %17307 = vmatprep.subr.bf16.mxu1 %v24002_v18  ;;  %v17346_v9 = vpack.c.bf16 %v24018_v44, %v24017_v7 }
 0xc01   : > { %15674 = vmatmul.mubr.f32.gmra.mrb[50].mxu1 %v22565_v30  ;;  %v24022_v30 = vand.u32 4294901760, %v24021_v5 }
 0xc02   : > { %15676 = vmatprep.mubr.f32.mxu1 %v22596_v37  ;;  %17309 = vmatpush3.bf16.msra.mxu1 %v24002_v18  ;;  %v24024_v37 = vand.u32 4294901760, %v24023_v3 }
 0xc03   : > { %17311 = vmatprep.subr.bf16.mxu1 %v24003_v33 }
 0xc05   : > { %15677 = vmatmul.mubr.f32.gmra.mrb[52].mxu1 %v22590_v63  ;;  %v24028_v63 = vand.u32 4294901760, %v24027_v46 }
 0xc06   : > { %15679 = vmatprep.mubr.f32.mxu1 %v22617_v14  ;;  %17313 = vmatpush3.bf16.msra.mxu1 %v24003_v33  ;;  %v24030_v14 = vand.u32 4294901760, %v24029_v40 }
 0xc07   : > { %17315 = vmatprep.subr.bf16.mxu1 %v24004_v1 }
 0xc08   : > { %v17354_v4 = vpack.c.bf16 %v24030_v14, %v24028_v63 }
 0xc09   : > { %15680 = vmatmul.mubr.f32.gmra.mrb[54].mxu1 %v22611_v0 }
 0xc0a   : > { %15682 = vmatprep.mubr.f32.mxu1 %v22638_v57  ;;  %17317 = vmatpush3.bf16.msra.mxu1 %v24004_v1 }
 0xc0b   : > { %17319 = vmatprep.subr.bf16.mxu1 %v22374_v25 }
 0xc0d   : > { %15683 = vmatmul.mubr.f32.gmra.mrb[56].mxu1 %v22631_v43 }
 0xc0e   : > { %15685 = vmatprep.mubr.f32.mxu1 %v22659_v24  ;;  %17321 = vmatpush3.bf16.msra.mxu1 %v22374_v25 }
 0xc0f   : > { %17323 = vmatprep.subr.bf16.mxu1 %v22378_v6 }
 0xc11   : > { %15686 = vmatmul.mubr.f32.gmra.mrb[58].mxu1 %v22653_v15 }
 0xc12   : > { %15688 = vmatprep.mubr.f32.mxu1 %v22680_v45  ;;  %17325 = vmatpush3.bf16.msra.mxu1 %v22378_v6 }
 0xc13   : > { %17327 = vmatprep.subr.bf16.mxu1 %v22382_v39 }
 0xc15   : > { %15689 = vmatmul.mubr.f32.gmra.mrb[60].mxu1 %v22673_v26 }
 0xc16   : > { %15691 = vmatprep.mubr.f32.mxu1 %v22700_v17  ;;  %17329 = vmatpush3.bf16.msra.mxu1 %v22382_v39 }
 0xc17   : > { %17331 = vmatprep.subr.bf16.mxu1 %v22398_v19 }
 0xc19   : > { %15692 = vmatmul.mubr.f32.gmra.mrb[62].mxu1 %v22693_v59 }
 0xc1a   : > { %17333 = vmatpush3.bf16.msra.mxu1 %v22398_v19  ;;  %15726 = vmatprep.mubr.f32.mxu1 %v24008_v54  ;;  %v24025_v54 = vand.u32 4294901760, %v22611_v0  ;;  %v24032_v0 = vld [vmem:[#allocation57_spill] sm:$0xff] }
 0xc1b   : > { %17335 = vmatprep.subr.bf16.mxu1 %v17334_v27 }
 0xc1d   : > { %15727 = vmatmul.mubr.f32.vlgmr.msra.gmra.mrb[48].mxu1 %v24011_v42  ;;  %v24033_v42 = vand.u32 4294901760, %v24032_v0 }
 0xc1e   : > { %15729 = vmatprep.mubr.f32.mxu1 %v24012_v58  ;;  %17337 = vmatpush3.bf16.msra.mxu1 %v17334_v27  ;;  %v17350_v27 = vpack.c.bf16 %v24024_v37, %v24022_v30  ;;  %v24034_v58 = vld [vmem:[#allocation60_spill] sm:$0xff] }
 0xc1f   : > { %17339 = vmatprep.subr.bf16.mxu1 %v17338_v22  ;;  %v24035_v57 = vand.u32 4294901760, %v24034_v58 }
 0xc21   : > { %15730 = vmatmul.mubr.f32.gmra.mrb[50].mxu1 %v24015_v55  ;;  %v17358_v16 = vpack.c.bf16 %v24035_v57, %v24033_v42 }
 0xc22   : > { %15732 = vmatprep.mubr.f32.mxu1 %v24016_v41  ;;  %17341 = vmatpush3.bf16.msra.mxu1 %v17338_v22  ;;  %v24031_v22 = vand.u32 4294901760, %v22631_v43  ;;  %v24036_v43 = vld [vmem:[#allocation64_spill] sm:$0xff] }
 0xc23   : > { %17343 = vmatprep.subr.bf16.mxu1 %v17342_v11  ;;  %v24037_v32 = vand.u32 4294901760, %v24036_v43 }
 0xc25   : > { %15733 = vmatmul.mubr.f32.gmra.mrb[52].mxu1 %v24019_v49 }
 0xc26   : > { %15735 = vmatprep.mubr.f32.mxu1 %v24020_v13  ;;  %17345 = vmatpush3.bf16.msra.mxu1 %v17342_v11  ;;  %v24038_v11 = vld [vmem:[#allocation11_spill] sm:$0xff] }
 0xc27   : > { %17347 = vmatprep.subr.bf16.mxu1 %v17346_v9  ;;  %v24039_v24 = vand.u32 4294901760, %v24038_v11 }
 0xc29   : > { %15736 = vmatmul.mubr.f32.gmra.mrb[54].mxu1 %v24025_v54 }
 0xc2a   : > { %15738 = vmatprep.mubr.f32.mxu1 %v24026_v29  ;;  %17349 = vmatpush3.bf16.msra.mxu1 %v17346_v9 }
 0xc2b   : > { %17351 = vmatprep.subr.bf16.mxu1 %v17350_v27 }
 0xc2d   : > { %15739 = vmatmul.mubr.f32.gmra.mrb[56].mxu1 %v24031_v22 }
 0xc2e   : > { %15741 = vmatprep.mubr.f32.mxu1 %v10233_v12  ;;  %17353 = vmatpush3.bf16.msra.mxu1 %v17350_v27  ;;  %v17362_v12 = vpack.c.bf16 %v24039_v24, %v24037_v32 }
 0xc2f   : > { %17355 = vmatprep.subr.bf16.mxu1 %v17354_v4 }
 0xc31   : > { %15742 = vmatmul.mubr.f32.gmra.mrb[58].mxu1 %v10243_v8 }
 0xc32   : > { %15744 = vmatprep.mubr.f32.mxu1 %v10253_v2  ;;  %17357 = vmatpush3.bf16.msra.mxu1 %v17354_v4 }
 0xc33   : > { %17359 = vmatprep.subr.bf16.mxu1 %v17358_v16 }
 0xc35   : > { %15745 = vmatmul.mubr.f32.gmra.mrb[60].mxu1 %v10263_v56 }
 0xc36   : > { %15747 = vmatprep.mubr.f32.mxu1 %v10273_v62  ;;  %17361 = vmatpush3.bf16.msra.mxu1 %v17358_v16 }
 0xc37   : > { %17363 = vmatprep.subr.bf16.mxu1 %v17362_v12 }
 0xc39   : > { %15748 = vmatmul.mubr.f32.gmra.mrb[62].mxu1 %v10283_v53 }
 0xc3a   : > { %17365 = vmatpush3.bf16.msra.mxu1 %v17362_v12  ;;  %15782 = vmatprep.mubr.f32.mxu1 %v22542_v20 }
 0xc3b   : > { %17367 = vmatprep.subr.bf16.mxu1 %v24001_v28 }
 0xc3d   : > { %15783 = vmatmul.mubr.f32.vlgmr.msra.gmra.mrb[48].mxu1 %v22534_v48 }
 0xc3e   : > { %15785 = vmatprep.mubr.f32.mxu1 %v22557_v23  ;;  %17369 = vmatpush3.bf16.msra.mxu1 %v24001_v28 }
 0xc3f   : > { %17371 = vmatprep.subr.bf16.mxu1 %v24002_v18 }
 0xc41   : > { %15786 = vmatmul.mubr.f32.gmra.mrb[50].mxu1 %v22553_v21 }
 0xc42   : > { %15788 = vmatprep.mubr.f32.mxu1 %v22585_v31  ;;  %17373 = vmatpush3.bf16.msra.mxu1 %v24002_v18 }
 0xc43   : > { %17375 = vmatprep.subr.bf16.mxu1 %v24003_v33 }
 0xc45   : > { %15789 = vmatmul.mubr.f32.gmra.mrb[52].mxu1 %v22578_v36 }
 0xc46   : > { %15791 = vmatprep.mubr.f32.mxu1 %v22605_v60  ;;  %17377 = vmatpush3.bf16.msra.mxu1 %v24003_v33 }
 0xc47   : > { %17379 = vmatprep.subr.bf16.mxu1 %v24004_v1 }
 0xc49   : > { %15792 = vmatmul.mubr.f32.gmra.mrb[54].mxu1 %v22601_v10 }
 0xc4a   : > { %15794 = vmatprep.mubr.f32.mxu1 %v22626_v34  ;;  %17381 = vmatpush3.bf16.msra.mxu1 %v24004_v1 }
 0xc4b   : > { %17383 = vmatprep.subr.bf16.mxu1 %v22374_v25 }
 0xc4d   : > { %15795 = vmatmul.mubr.f32.gmra.mrb[56].mxu1 %v22622_v47 }
 0xc4e   : > { %15797 = vmatprep.mubr.f32.mxu1 %v22647_v35  ;;  %17385 = vmatpush3.bf16.msra.mxu1 %v22374_v25  ;;  %v24040_v25 = vld [vmem:[#allocation20_spill] sm:$0xff] }
 0xc4f   : > { %17387 = vmatprep.subr.bf16.mxu1 %v22378_v6 }
 0xc51   : > { %15798 = vmatmul.mubr.f32.gmra.mrb[58].mxu1 %v22643_v38 }
 0xc52   : > { %15800 = vmatprep.mubr.f32.mxu1 %v22668_v61  ;;  %17389 = vmatpush3.bf16.msra.mxu1 %v22378_v6  ;;  %v10048_v6 = vsub.s32 5, %v24040_v25 }
 0xc53   : > { %17391 = vmatprep.subr.bf16.mxu1 %v22382_v39 }
 0xc55   : > { %15801 = vmatmul.mubr.f32.gmra.mrb[60].mxu1 %v22664_v50 }
 0xc56   : > { %15803 = vmatprep.mubr.f32.mxu1 %v22688_v51  ;;  %17393 = vmatpush3.bf16.msra.mxu1 %v22382_v39  ;;  %v18227_v39 = vld [vmem:[%s23009_s5] sm:$0xff] }
 0xc57   : > { %17395 = vmatprep.subr.bf16.mxu1 %v22398_v19 }
 0xc59   : > { %15804 = vmatmul.mubr.f32.gmra.mrb[62].mxu1 %v22685_v52 }
 0xc5a   : > { %17397 = vmatpush3.bf16.msra.mxu1 %v22398_v19  ;;  %15838 = vmatprep.mubr.f32.mxu1 %v22542_v20 }
 0xc5d   : > { %15839 = vmatmul.mubr.f32.vlgmr.msra.gmra.mrb[48].mxu1 %v22534_v48 }
 0xc5e   : > { %15841 = vmatprep.mubr.f32.mxu1 %v22557_v23 }
 0xc61   : > { %15842 = vmatmul.mubr.f32.gmra.mrb[50].mxu1 %v22553_v21 }
 0xc62   : > { %15844 = vmatprep.mubr.f32.mxu1 %v22585_v31 }
 0xc65   : > { %15845 = vmatmul.mubr.f32.gmra.mrb[52].mxu1 %v22578_v36 }
 0xc66   : > { %15847 = vmatprep.mubr.f32.mxu1 %v22605_v60 }
 0xc69   : > { %15848 = vmatmul.mubr.f32.gmra.mrb[54].mxu1 %v22601_v10 }
 0xc6a   : > { %15850 = vmatprep.mubr.f32.mxu1 %v22626_v34  ;;  %v10049_v34 = vrot.slane %v18227_v39, %v10048_v6 }
 0xc6d   : > { %15851 = vmatmul.mubr.f32.gmra.mrb[56].mxu1 %v22622_v47 }
 0xc6e   : > { %15853 = vmatprep.mubr.f32.mxu1 %v22647_v35 }
 0xc71   : > { %15854 = vmatmul.mubr.f32.gmra.mrb[58].mxu1 %v22643_v38 }
 0xc72   : > { %15856 = vmatprep.mubr.f32.mxu1 %v22668_v61 }
 0xc75   : > { %15857 = vmatmul.mubr.f32.gmra.mrb[60].mxu1 %v22664_v50 }
 0xc76   : > { %15859 = vmatprep.mubr.f32.mxu1 %v22688_v51 }
 0xc79   : > { %15860 = vmatmul.mubr.f32.gmra.mrb[62].mxu1 %v22685_v52 }
 0xd30   : > { %v15840_v19 = vpop.f32.mrb[48].mxu1 }
 0xd31   : > { %v17478_v21 = vadd.f32 %v15840_v19, %v10049_v34  ;;  %v11242_v60 = vpop.f32.mrb[49].mxu1 }
 0xd32   : > { %v17479_v48 = vadd.f32 %v11242_v60, %v10049_v34 }
 0xd33   : > { %11338 = vmax.xlane.f32.xlu1 %v17478_v21 }
 0xd34   : > { %v15843_v20 = vpop.f32.mrb[50].mxu1  ;;  %11336 = vmax.xlane.f32.xlu0 %v17479_v48 }
 0xd35   : > { %v17480_v61 = vadd.f32 %v15843_v20, %v10049_v34  ;;  %v11254_v23 = vpop.f32.mrb[51].mxu1 }
 0xd36   : > { %v17481_v10 = vadd.f32 %v11254_v23, %v10049_v34 }
 0xd38   : > { %v15846_v36 = vpop.f32.mrb[52].mxu1  ;;  %11342 = vmax.xlane.f32.xlu0 %v17480_v61 }
 0xd39   : > { %v11266_v31 = vpop.f32.mrb[53].mxu1  ;;  %v17482_v26 = vadd.f32 %v15846_v36, %v10049_v34 }
 0xd3a   : > { %v17483_v47 = vadd.f32 %v11266_v31, %v10049_v34 }
 0xd3c   : > { %v15849_v15 = vpop.f32.mrb[54].mxu1  ;;  %11344 = vmax.xlane.f32.xlu1 %v17483_v47  ;;  %11340 = vmax.xlane.f32.xlu0 %v17481_v10 }
 0xd3d   : > { %v11278_v38 = vpop.f32.mrb[55].mxu1  ;;  %v17484_v45 = vadd.f32 %v15849_v15, %v10049_v34 }
 0xd3e   : > { %v17485_v35 = vadd.f32 %v11278_v38, %v10049_v34 }
 0xd40   : > { %v15852_v50 = vpop.f32.mrb[56].mxu1  ;;  %11348 = vmax.xlane.f32.xlu1 %v17485_v35  ;;  %11346 = vmax.xlane.f32.xlu0 %v17482_v26 }
 0xd41   : > { %v11290_v8 = vpop.f32.mrb[57].mxu1  ;;  %v17486_v2 = vadd.f32 %v15852_v50, %v10049_v34 }
 0xd42   : > { %v17487_v52 = vadd.f32 %v11290_v8, %v10049_v34 }
 0xd44   : > { %v15855_v56 = vpop.f32.mrb[58].mxu1  ;;  %11352 = vmax.xlane.f32.xlu1 %v17487_v52  ;;  %11350 = vmax.xlane.f32.xlu0 %v17484_v45 }
 0xd45   : > { %v11302_v51 = vpop.f32.mrb[59].mxu1  ;;  %v22898_v62 = vadd.f32 %v15855_v56, %v10049_v34 }
 0xd46   : > { %v17489_v59 = vadd.f32 %v11302_v51, %v10049_v34 }
 0xd48   : > { %v15858_v17 = vpop.f32.mrb[60].mxu1  ;;  %11356 = vmax.xlane.f32.xlu1 %v17489_v59  ;;  %11354 = vmax.xlane.f32.xlu0 %v17486_v2 }
 0xd49   : > { %v11314_v53 = vpop.f32.mrb[61].mxu1  ;;  %v22901_v1 = vadd.f32 %v15858_v17, %v10049_v34 }
 0xd4a   : > { %v17491_v28 = vadd.f32 %v11314_v53, %v10049_v34 }
 0xd4c   : > { %v15861_v18 = vpop.f32.mrb[62].mxu1  ;;  %11360 = vmax.xlane.f32.xlu1 %v17491_v28  ;;  %11358 = vmax.xlane.f32.xlu0 %v22898_v62 }
 0xd4d   : > { %v11326_v33 = vpop.f32.mrb[63].mxu1  ;;  %v22907_v41 = vadd.f32 %v15861_v18, %v10049_v34 }
 0xd4e   : > { %v22903_v55 = vadd.f32 %v11326_v33, %v10049_v34 }
 0xd50   : > { %11364 = vmax.xlane.f32.xlu1 %v22903_v55  ;;  %11362 = vmax.xlane.f32.xlu0 %v22901_v1 }
 0xd54   : > { %11366 = vmax.xlane.f32.xlu0 %v22907_v41 }
 0xdc0   : > { %v11339_v7 = vpop.xlane.xlu1 %11338 }
 0xdc1   : > { %v22910_v44 = vsub.f32 %v17478_v21, %v11339_v7  ;;  %v11337_v9 = vpop.xlane.xlu0 %11336 }
 0xdc2   : > { %v22912_v49 = vsub.f32 %v17479_v48, %v11337_v9 }
 0xdc3   : > { %v11386_v13 = vmul.f32 1.442695, %v22910_v44 }
 0xdc4   : > { %v11384_v5 = vmul.f32 1.442695, %v22912_v49 }
 0xdc5   : > { %18160 = vpow2.f32 %v11386_v13  ;;  %v11343_v30 = vpop.xlane.xlu0 %11342 }
 0xdc6   : > { %18162 = vpow2.f32 %v11384_v5  ;;  %v22916_v3 = vsub.f32 %v17480_v61, %v11343_v30 }
 0xdc8   : > { %v11390_v37 = vmul.f32 1.442695, %v22916_v3 }
 0xdc9   : > { %v11345_v27 = vpop.xlane.xlu1 %11344  ;;  %v11341_v54 = vpop.xlane.xlu0 %11340 }
 0xdca   : > { %18164 = vpow2.f32 %v11390_v37  ;;  %v22919_v29 = vsub.f32 %v17483_v47, %v11345_v27  ;;  %v22921_v46 = vsub.f32 %v17481_v10, %v11341_v54 }
 0xdcc   : > { %v11388_v63 = vmul.f32 1.442695, %v22921_v46  ;;  %v11392_v4 = vmul.f32 1.442695, %v22919_v29 }
 0xdcd   : > { %v11349_v40 = vpop.xlane.xlu1 %11348  ;;  %v11347_v14 = vpop.xlane.xlu0 %11346 }
 0xdce   : > { %v22925_v22 = vsub.f32 %v17485_v35, %v11349_v40  ;;  %v22927_v0 = vsub.f32 %v17482_v26, %v11347_v14  ;;  %18166 = vpow2.f32 %v11388_v63 }
 0xdcf   : > { %v18161_v42 = vpop.eup %18160  ;;  %18168 = vpow2.f32 %v11392_v4 }
 0xdd0   : > { %v18163_v58 = vpop.eup %18162  ;;  %v11394_v57 = vmul.f32 1.442695, %v22927_v0  ;;  %11418 = vadd.xlane.f32.xlu0 %v18161_v42  ;;  %v11396_v32 = vmul.f32 1.442695, %v22925_v22 }
 0xdd1   : > { %v11353_v16 = vpop.xlane.xlu1 %11352  ;;  %11416 = vadd.xlane.f32.xlu1 %v18163_v58  ;;  %v11351_v43 = vpop.xlane.xlu0 %11350 }
 0xdd2   : > { %v22931_v11 = vsub.f32 %v17487_v52, %v11353_v16  ;;  %v22933_v24 = vsub.f32 %v17484_v45, %v11351_v43  ;;  %18170 = vpow2.f32 %v11394_v57 }
 0xdd3   : > { %18172 = vpow2.f32 %v11396_v32 }
 0xdd4   : > { %v18165_v12 = vpop.eup %18164  ;;  %v11398_v25 = vmul.f32 1.442695, %v22933_v24  ;;  %v11400_v34 = vmul.f32 1.442695, %v22931_v11 }
 0xdd5   : > { %v11357_v6 = vpop.xlane.xlu1 %11356  ;;  %11422 = vadd.xlane.f32.xlu0 %v18165_v12  ;;  %v11355_v39 = vpop.xlane.xlu0 %11354 }
 0xdd6   : > { %v22937_v19 = vsub.f32 %v17489_v59, %v11357_v6  ;;  %v22939_v21 = vsub.f32 %v17486_v2, %v11355_v39  ;;  %18174 = vpow2.f32 %v11398_v25 }
 0xdd7   : > { %18176 = vpow2.f32 %v11400_v34 }
 0xdd8   : > { %v11402_v60 = vmul.f32 1.442695, %v22939_v21  ;;  %v18167_v48 = vpop.eup %18166  ;;  %v11404_v23 = vmul.f32 1.442695, %v22937_v19 }
 0xdd9   : > { %v11361_v20 = vpop.xlane.xlu1 %11360  ;;  %v11359_v61 = vpop.xlane.xlu0 %11358  ;;  %11420 = vadd.xlane.f32.xlu1 %v18167_v48 }
 0xdda   : > { %v22943_v36 = vsub.f32 %v17491_v28, %v11361_v20  ;;  %v22946_v31 = vsub.f32 %v22898_v62, %v11359_v61  ;;  %18178 = vpow2.f32 %v11402_v60  ;;  %v18169_v10 = vpop.eup %18168 }
 0xddb   : > { %18180 = vpow2.f32 %v11404_v23 }
 0xddc   : > { %v11406_v47 = vmul.f32 1.442695, %v22946_v31  ;;  %v18171_v15 = vpop.eup %18170  ;;  %v11408_v35 = vmul.f32 1.442695, %v22943_v36 }
 0xddd   : > { %v11365_v38 = vpop.xlane.xlu1 %11364  ;;  %v11363_v26 = vpop.xlane.xlu0 %11362  ;;  %11424 = vadd.xlane.f32.xlu1 %v18169_v10  ;;  %11426 = vadd.xlane.f32.xlu0 %v18171_v15 }
 0xdde   : > { %v22951_v50 = vsub.f32 %v22901_v1, %v11363_v26  ;;  %18182 = vpow2.f32 %v11406_v47  ;;  %v22954_v8 = vsub.f32 %v22903_v55, %v11365_v38  ;;  %v18173_v45 = vpop.eup %18172 }
 0xddf   : > { %18184 = vpow2.f32 %v11408_v35 }
 0xde0   : > { %v11410_v52 = vmul.f32 1.442695, %v22951_v50  ;;  %v18175_v56 = vpop.eup %18174  ;;  %v11412_v59 = vmul.f32 1.442695, %v22954_v8 }
 0xde1   : > { %v11367_v51 = vpop.xlane.xlu0 %11366  ;;  %11428 = vadd.xlane.f32.xlu1 %v18173_v45  ;;  %11430 = vadd.xlane.f32.xlu0 %v18175_v56  ;;  %v18177_v17 = vpop.eup %18176 }
 0xde2   : > { %v22958_v2 = vsub.f32 %v22907_v41, %v11367_v51  ;;  %18186 = vpow2.f32 %v11410_v52 }
 0xde4   : > { %v11414_v53 = vmul.f32 1.442695, %v22958_v2  ;;  %v18179_v62 = vpop.eup %18178 }
 0xde5   : > { %11432 = vadd.xlane.f32.xlu1 %v18177_v17  ;;  %11434 = vadd.xlane.f32.xlu0 %v18179_v62  ;;  %v18181_v28 = vpop.eup %18180 }
 0xde6   : > { %18188 = vpow2.f32 %v11414_v53 }
 0xde7   : > { %18190 = vpow2.f32 %v11412_v59 }
 0xde8   : > { %v18183_v18 = vpop.eup %18182 }
 0xde9   : > { %11436 = vadd.xlane.f32.xlu1 %v18181_v28  ;;  %11438 = vadd.xlane.f32.xlu0 %v18183_v18  ;;  %v18185_v33 = vpop.eup %18184 }
 0xdec   : > { %v18187_v1 = vpop.eup %18186 }
 0xded   : > { %11440 = vadd.xlane.f32.xlu1 %v18185_v33  ;;  %11442 = vadd.xlane.f32.xlu0 %v18187_v1 }
 0xdf0   : > { %v18189_v55 = vpop.eup %18188 }
 0xdf1   : > { %v18191_v41 = vpop.eup %18190  ;;  %11446 = vadd.xlane.f32.xlu0 %v18189_v55 }
 0xdf2   : > { %11444 = vadd.xlane.f32.xlu1 %v18191_v41 }
 0xe5d   : > { %v11419_v7 = vpop.xlane.xlu0 %11418 }
 0xe5e   : > { %18192 = vlog2.f32 %v11419_v7  ;;  %v11417_v9 = vpop.xlane.xlu1 %11416 }
 0xe5f   : > { %18194 = vlog2.f32 %v11417_v9 }
 0xe62   : > { %v11423_v13 = vpop.xlane.xlu0 %11422 }
 0xe63   : > { %18196 = vlog2.f32 %v11423_v13 }
 0xe66   : > { %v11421_v5 = vpop.xlane.xlu1 %11420 }
 0xe67   : > { %18198 = vlog2.f32 %v11421_v5 }
 0xe68   : > { %v18193_v30 = vpop.eup %18192 }
 0xe69   : > { %v18195_v37 = vpop.eup %18194  ;;  %v11451_v27 = vmul.f32 0.6931472, %v18193_v30 }
 0xe6a   : > { %v11449_v54 = vmul.f32 0.6931472, %v18195_v37  ;;  %v11425_v40 = vpop.xlane.xlu1 %11424  ;;  %v11427_v14 = vpop.xlane.xlu0 %11426 }
 0xe6b   : > { %v11481_v63 = vsub.f32 %v22910_v44, %v11451_v27  ;;  %18200 = vlog2.f32 %v11425_v40 }
 0xe6c   : > { %v11480_v4 = vsub.f32 %v22912_v49, %v11449_v54  ;;  %18202 = vlog2.f32 %v11427_v14 }
 0xe6d   : > { %v18197_v42 = vpop.eup %18196  ;;  %11497 = vst [vmem:[%s22967_s25 + $0x8] sm:$0xff] %v11481_v63 }
 0xe6e   : > { %11496 = vst [vmem:[%s22967_s25] sm:$0xff] %v11480_v4  ;;  %v11455_v58 = vmul.f32 0.6931472, %v18197_v42  ;;  %v11429_v57 = vpop.xlane.xlu1 %11428  ;;  %v11431_v16 = vpop.xlane.xlu0 %11430 }
 0xe6f   : > { %18204 = vlog2.f32 %v11429_v57 }
 0xe70   : > { %v11483_v43 = vsub.f32 %v22916_v3, %v11455_v58  ;;  %18206 = vlog2.f32 %v11431_v16 }
 0xe71   : > { %v18199_v32 = vpop.eup %18198 }
 0xe72   : > { %11499 = vst [vmem:[%s22967_s25 + $0x18] sm:$0xff] %v11483_v43  ;;  %v11453_v44 = vmul.f32 0.6931472, %v18199_v32  ;;  %v11433_v12 = vpop.xlane.xlu1 %11432  ;;  %v11435_v25 = vpop.xlane.xlu0 %11434 }
 0xe73   : > { %18208 = vlog2.f32 %v11433_v12 }
 0xe74   : > { %v11482_v49 = vsub.f32 %v22921_v46, %v11453_v44  ;;  %18210 = vlog2.f32 %v11435_v25 }
 0xe75   : > { %v18201_v6 = vpop.eup %18200 }
 0xe76   : > { %v18203_v39 = vpop.eup %18202  ;;  %11498 = vst [vmem:[%s22967_s25 + $0x10] sm:$0xff] %v11482_v49  ;;  %v11457_v34 = vmul.f32 0.6931472, %v18201_v6  ;;  %v11437_v60 = vpop.xlane.xlu1 %11436 }
 0xe77   : > { %v11439_v48 = vpop.xlane.xlu0 %11438  ;;  %v11459_v3 = vmul.f32 0.6931472, %v18203_v39  ;;  %18212 = vlog2.f32 %v11437_v60 }
 0xe78   : > { %v11484_v20 = vsub.f32 %v22919_v29, %v11457_v34  ;;  %18214 = vlog2.f32 %v11439_v48 }
 0xe79   : > { %v18205_v61 = vpop.eup %18204  ;;  %v11485_v23 = vsub.f32 %v22927_v0, %v11459_v3 }
 0xe7a   : > { %v18207_v10 = vpop.eup %18206  ;;  %11500 = vst [vmem:[%s22967_s25 + $0x20] sm:$0xff] %v11484_v20  ;;  %v11461_v46 = vmul.f32 0.6931472, %v18205_v61  ;;  %v11441_v47 = vpop.xlane.xlu1 %11440 }
 0xe7b   : > { %v11443_v15 = vpop.xlane.xlu0 %11442  ;;  %11501 = vst [vmem:[%s22967_s25 + $0x28] sm:$0xff] %v11485_v23  ;;  %v11463_v38 = vmul.f32 0.6931472, %v18207_v10  ;;  %18216 = vlog2.f32 %v11441_v47 }
 0xe7c   : > { %v11486_v26 = vsub.f32 %v22925_v22, %v11461_v46  ;;  %18218 = vlog2.f32 %v11443_v15 }
 0xe7d   : > { %v18209_v35 = vpop.eup %18208  ;;  %v11487_v29 = vsub.f32 %v22933_v24, %v11463_v38 }
 0xe7e   : > { %v18211_v45 = vpop.eup %18210  ;;  %11502 = vst [vmem:[%s22967_s25 + $0x30] sm:$0xff] %v11486_v26  ;;  %v11465_v0 = vmul.f32 0.6931472, %v18209_v35 }
 0xe7f   : > { %v11445_v52 = vpop.xlane.xlu1 %11444  ;;  %v11447_v56 = vpop.xlane.xlu0 %11446  ;;  %11503 = vst [vmem:[%s22967_s25 + $0x38] sm:$0xff] %v11487_v29  ;;  %v11467_v51 = vmul.f32 0.6931472, %v18211_v45 }
 0xe80   : > { %18220 = vlog2.f32 %v11445_v52  ;;  %v11488_v59 = vsub.f32 %v22931_v11, %v11465_v0 }
 0xe81   : > { %18222 = vlog2.f32 %v11447_v56  ;;  %v18213_v22 = vpop.eup %18212  ;;  %v11489_v17 = vsub.f32 %v22939_v21, %v11467_v51 }
 0xe82   : > { %v18215_v53 = vpop.eup %18214  ;;  %11504 = vst [vmem:[%s22967_s25 + $0x40] sm:$0xff] %v11488_v59  ;;  %v11469_v24 = vmul.f32 0.6931472, %v18213_v22 }
 0xe83   : > { %11505 = vst [vmem:[%s22967_s25 + $0x48] sm:$0xff] %v11489_v17  ;;  %v11471_v62 = vmul.f32 0.6931472, %v18215_v53 }
 0xe84   : > { %v11490_v28 = vsub.f32 %v22937_v19, %v11469_v24 }
 0xe85   : > { %v18217_v18 = vpop.eup %18216  ;;  %v11491_v33 = vsub.f32 %v22946_v31, %v11471_v62 }
 0xe86   : > { %v18219_v1 = vpop.eup %18218  ;;  %11506 = vst [vmem:[%s22967_s25 + $0x50] sm:$0xff] %v11490_v28  ;;  %v11473_v11 = vmul.f32 0.6931472, %v18217_v18 }
 0xe87   : > { %11507 = vst [vmem:[%s22967_s25 + $0x58] sm:$0xff] %v11491_v33  ;;  %v11475_v55 = vmul.f32 0.6931472, %v18219_v1 }
 0xe88   : > { %v11492_v21 = vsub.f32 %v22943_v36, %v11473_v11 }
 0xe89   : > { %v11493_v7 = vsub.f32 %v22951_v50, %v11475_v55 }
 0xe8a   : > { %v18221_v41 = vpop.eup %18220  ;;  %11508 = vst [vmem:[%s22967_s25 + $0x60] sm:$0xff] %v11492_v21 }
 0xe8b   : > { %v18223_v9 = vpop.eup %18222  ;;  %v11477_v13 = vmul.f32 0.6931472, %v18221_v41  ;;  %11509 = vst [vmem:[%s22967_s25 + $0x68] sm:$0xff] %v11493_v7 }
 0xe8c   : > { %v11479_v19 = vmul.f32 0.6931472, %v18223_v9 }
 0xe8d   : > { %v11494_v5 = vsub.f32 %v22954_v8, %v11477_v13 }
 0xe8e   : > { %v11495_v31 = vsub.f32 %v22958_v2, %v11479_v19 }
 0xe8f   : > { %11510 = vst [vmem:[%s22967_s25 + $0x70] sm:$0xff] %v11494_v5 }
 0xe90   : > { %11511 = vst [vmem:[%s22967_s25 + $0x78] sm:$0xff] %v11495_v31 }
 0xe91 PF: > { %s17_s21 = sadd.s32 1, %s18266_s21  }
 0xe92   : > { %p14_p5 = scmp.ge.s32.totalorder %s17_s21, 4  }
 0xe94   :  { %16 = sbr.rel (!%p14_p5) target bundleno = 1 (0x1), region = 93 }
 0xe9b   :  { %11534 = vsyncpa [#allocation3], 1 }
 0xe9c   :  { %11536 = vsyncpa [#allocation3 + $0x1], 1 }

</bundles_post_ra>
